<compile_context>
chip_gen: v5e
topology: v5e:2x2
jax: 0.10.0
libtpu: 0.0.40
codegen_flags: <defaults>
</compile_context>

<pallas_src>
import jax
import jax.numpy as jnp
from jax.experimental import pallas as pl
from jax.experimental.pallas import tpu as pltpu


# --------------------------------------------------------------------------
# Fused kernel: point MLP (bf16 MXU) + streamed global max + classification head
# --------------------------------------------------------------------------
def _pointnet_kernel(x_ref,
                     w1, w2, b2, w3, b3, w4, b4,
                     w5, b5, w6, b6, wfc, bfc,
                     out_ref, acc_ref):
    j = pl.program_id(1)                      # point-tile index (reduction axis)

    @pl.when(j == 0)
    def _():
        acc_ref[...] = jnp.full(acc_ref.shape, -jnp.inf, acc_ref.dtype)

    _, tile_n, _ = x_ref.shape
    nf = w4.shape[1]                          # 1024 global-feature channels

    x = x_ref[0]                              # (tile_n, c_pad) bf16

    # Layer 1: bias folded into the constant 1.0 input channel -> no bias add.
    h = jnp.dot(x, w1[...], preferred_element_type=jnp.float32)
    h = jnp.maximum(h, 0.0).astype(jnp.bfloat16)
    # Layer 2.
    h = jnp.dot(h, w2[...], preferred_element_type=jnp.float32) + b2[...]
    h = jnp.maximum(h, 0.0).astype(jnp.bfloat16)
    # Layer 3.
    h = jnp.dot(h, w3[...], preferred_element_type=jnp.float32) + b3[...]
    h = jnp.maximum(h, 0.0).astype(jnp.bfloat16)          # (tile_n, 128)

    # Layer 4 streamed in M-chunks, fused with the running max.  The bias add
    # and ReLU commute with max, so they are deferred to the finalize branch.
    # Running max keeps 8 live sublanes: the cross-sublane 8->1 reduce is paid
    # exactly once per batch element in the finalize branch.
    chunk = min(tile_n, 256)
    while chunk > 8 and (tile_n % chunk != 0 or chunk % 8 != 0):
        chunk -= 8
    n_chunks = tile_n // chunk
    for c in range(n_chunks):                 # short static loop
        h4 = jnp.dot(h[c * chunk:(c + 1) * chunk, :], w4[...],
                     preferred_element_type=jnp.float32)   # (chunk, nf) f32
        acc_ref[...] = jnp.maximum(
            acc_ref[...], h4.reshape(chunk // 8, 8, nf).max(axis=0))

    @pl.when(j == pl.num_programs(1) - 1)
    def _():
        pooled = acc_ref[...].max(axis=0, keepdims=True)    # (1, nf) 8->1 reduce
        feat = jnp.maximum(pooled + b4[...], 0.0)           # deferred bias+ReLU
        # TODO(synk): nn.Dropout(0.2) layers are identity in inference mode.
        g = jnp.dot(feat.astype(jnp.bfloat16), w5[...],
                    preferred_element_type=jnp.float32) + b5[...]
        g = jnp.maximum(g, 0.0).astype(jnp.bfloat16)
        g = jnp.dot(g, w6[...], preferred_element_type=jnp.float32) + b6[...]
        g = jnp.maximum(g, 0.0).astype(jnp.bfloat16)
        out_ref[0] = (jnp.dot(g, wfc[...],
                              preferred_element_type=jnp.float32) + bfc[...])


def _choose_tile_n(n, target=2048):
    # With layer 4 streamed, the per-tile VMEM footprint is small; a large
    # point tile amortizes the ~0.35 us per-grid-step overhead and still fits
    # comfortably inside v7x's 64 MiB VMEM.
    t = min(n, target)
    t -= t % 8
    while t > 8 and (n % t != 0):
        t -= 8
    return t


def pointnet_fused(x_bnc, params, *, tile_n=None):
    """x_bnc: (B, N, C_pad) bf16 points-last (1.0 bias channel included)."""
    B, N, c_pad = x_bnc.shape
    assert N % 8 == 0, "number of points must be a multiple of 8"
    if tile_n is None:
        tile_n = _choose_tile_n(N)
    assert N % tile_n == 0 and tile_n % 8 == 0
    num_classes = params["wfcT"].shape[1]
    nf = params["w4f"].shape[1]

    weight_args = (
        params["w1f"], params["w2f"], params["b2f"],
        params["w3f"], params["b3f"], params["w4f"], params["b4f"],
        params["w5f"], params["b5f"], params["w6f"], params["b6f"],
        params["wfcT"], params["bfc2"],
    )

    def const_spec(a):
        # Constant index_map -> Pallas elides re-DMA across grid steps.
        return pl.BlockSpec(a.shape, lambda b, j, nd=a.ndim: (0,) * nd)

    out = pl.pallas_call(
        _pointnet_kernel,
        out_shape=jax.ShapeDtypeStruct((B, 1, num_classes), jnp.float32),
        grid_spec=pltpu.PrefetchScalarGridSpec(
            num_scalar_prefetch=0,
            # batch axis "parallel" (uses both v7x TensorCores), point tiles
            # are the inner reduction axis.
            grid=(B, N // tile_n),
            in_specs=[pl.BlockSpec((1, tile_n, c_pad), lambda b, j: (b, j, 0))]
                     + [const_spec(a) for a in weight_args],
            out_specs=pl.BlockSpec((1, 1, num_classes), lambda b, j: (b, 0, 0)),
            scratch_shapes=[pltpu.VMEM((8, nf), jnp.float32)],
        ),
        compiler_params=pltpu.CompilerParams(
            dimension_semantics=("parallel", "arbitrary"),
            # Streamed layer 4 keeps the footprint small; 48 MiB gives slack
            # for large tile_n while staying under v7x's 64 MiB physical VMEM.
            vmem_limit_bytes=48 * 1024 * 1024),
    )(x_bnc, *weight_args)
    return out[:, 0, :]


# --------------------------------------------------------------------------
# Parameter construction and BN folding (plain-JAX glue)
# --------------------------------------------------------------------------
def fold_bn(w, gamma, beta, mean, var, eps=1e-5):
    """Fold inference-mode BatchNorm into a preceding no-bias matmul.

    w: (C_out, C_in) PyTorch-style weight.  Returns f32 (C_in, C_out) folded
    weight and f32 (1, C_out) bias so that  x @ Wf + bf == BN(x @ w.T).
    """
    scale = gamma / jnp.sqrt(var + eps)
    wf = (w * scale[:, None]).T
    bf = (beta - mean * scale)[None, :]
    return wf, bf


def make_params(key, in_channels, num_classes):
    keys = jax.random.split(key, 32)
    ki = iter(range(32))

    def lin_w(c_out, c_in):
        return 0.1 * jax.random.normal(keys[next(ki)], (c_out, c_in), jnp.float32)

    def bn(c):
        gamma = 1.0 + 0.1 * jax.random.normal(keys[next(ki)], (c,), jnp.float32)
        beta = 0.1 * jax.random.normal(keys[next(ki)], (c,), jnp.float32)
        mean = 0.1 * jax.random.normal(keys[next(ki)], (c,), jnp.float32)
        var = 1.0 + 0.5 * jax.random.uniform(keys[next(ki)], (c,), jnp.float32)
        return gamma, beta, mean, var

    p = {}
    p["w1"], p["bn1"] = lin_w(64, in_channels), bn(64)
    p["w2"], p["bn2"] = lin_w(64, 64), bn(64)
    p["w3"], p["bn3"] = lin_w(128, 64), bn(128)
    p["w4"], p["bn4"] = lin_w(1024, 128), bn(1024)
    p["w5"], p["bn5"] = lin_w(512, 1024), bn(512)
    p["w6"], p["bn6"] = lin_w(256, 512), bn(256)
    p["wfc"] = lin_w(num_classes, 256)
    p["bfc"] = 0.1 * jax.random.normal(keys[next(ki)], (num_classes,), jnp.float32)
    return p


def fold_all(p):
    folded = {}
    w1f, b1f = fold_bn(p["w1"], *p["bn1"])                 # (C_in, 64), (1, 64)
    c_in = w1f.shape[0]
    c_pad = -(-(c_in + 1) // 8) * 8                        # room for 1.0 channel
    w1a = jnp.zeros((c_pad, w1f.shape[1]), jnp.float32)
    w1a = w1a.at[:c_in, :].set(w1f)
    w1a = w1a.at[c_in, :].set(b1f[0])                      # bias rides 1.0 channel
    folded["w1f"] = w1a.astype(jnp.bfloat16)
    for idx, (wk, bk) in enumerate(
            [("w2", "bn2"), ("w3", "bn3"), ("w4", "bn4"),
             ("w5", "bn5"), ("w6", "bn6")], start=2):
        wf, bf = fold_bn(p[wk], *p[bk])
        folded[f"w{idx}f"] = wf.astype(jnp.bfloat16)
        folded[f"b{idx}f"] = bf.astype(jnp.float32)
    folded["wfcT"] = p["wfc"].T.astype(jnp.bfloat16)       # (256, num_classes)
    folded["bfc2"] = p["bfc"][None, :].astype(jnp.float32)  # (1, num_classes)
    return folded


def _prep_input(x_bcn, c_pad):
    # PyTorch NCW (B, C, N) -> (B, N, C); append a 1.0 bias channel and zero
    # padding up to c_pad so channels are tile-aligned.
    x = jnp.transpose(x_bcn, (0, 2, 1))
    B, N, c_in = x.shape
    aug = jnp.concatenate(
        [x,
         jnp.ones((B, N, 1), x.dtype),
         jnp.zeros((B, N, c_pad - c_in - 1), x.dtype)], axis=-1)
    return aug.astype(jnp.bfloat16)


@jax.jit
def pointnet_forward(x_bcn, folded):
    c_pad = folded["w1f"].shape[0]
    x_bnc = _prep_input(x_bcn, c_pad)
    return pointnet_fused(x_bnc, folded)


def reference_forward(x_bcn, folded):
    """Pure-JAX reference mirroring the kernel's bf16/f32 mixed precision."""
    c_pad = folded["w1f"].shape[0]
    x = _prep_input(x_bcn, c_pad)

    def layer(h, w, b=None):
        y = jnp.dot(h, w, preferred_element_type=jnp.float32)
        if b is not None:
            y = y + b
        return jnp.maximum(y, 0.0)

    h = layer(x, folded["w1f"]).astype(jnp.bfloat16)
    h = layer(h, folded["w2f"], folded["b2f"]).astype(jnp.bfloat16)
    h = layer(h, folded["w3f"], folded["b3f"]).astype(jnp.bfloat16)
    h = layer(h, folded["w4f"], folded["b4f"])              # f32 (B, N, 1024)
    feat = h.max(axis=1)                                    # AdaptiveMaxPool1d(1)
    g = layer(feat.astype(jnp.bfloat16),
              folded["w5f"], folded["b5f"]).astype(jnp.bfloat16)
    g = layer(g, folded["w6f"], folded["b6f"]).astype(jnp.bfloat16)
    return jnp.dot(g, folded["wfcT"],
                   preferred_element_type=jnp.float32) + folded["bfc2"]


if __name__ == "__main__":
    B, C_in, N, num_classes = 2, 3, 1024, 10     # N=1024 -> single point tile

    key = jax.random.PRNGKey(0)
    kx, kp = jax.random.split(key)
    x = jax.random.normal(kx, (B, C_in, N), jnp.float32)      # PyTorch NCW input

    params = make_params(kp, C_in, num_classes)
    folded = fold_all(params)

    out = pointnet_forward(x, folded)
    out = jax.block_until_ready(out)

    ref = reference_forward(x, folded)
    assert out.shape == (B, num_classes)
    assert jnp.allclose(out, ref, atol=1e-2, rtol=1e-2), "mismatch vs reference"

    print("KERNEL_OK")
</pallas_src>

<mosaic_0001>
module attributes {stable_mosaic.version = 11 : i64} {
  func.func @_pointnet_kernel(%arg0: i32, %arg1: i32, %arg2: memref<1x1024x8xbf16, #tpu.memory_space<vmem>>, %arg3: memref<8x64xbf16, #tpu.memory_space<vmem>>, %arg4: memref<64x64xbf16, #tpu.memory_space<vmem>>, %arg5: memref<1x64xf32, #tpu.memory_space<vmem>>, %arg6: memref<64x128xbf16, #tpu.memory_space<vmem>>, %arg7: memref<1x128xf32, #tpu.memory_space<vmem>>, %arg8: memref<128x1024xbf16, #tpu.memory_space<vmem>>, %arg9: memref<1x1024xf32, #tpu.memory_space<vmem>>, %arg10: memref<1024x512xbf16, #tpu.memory_space<vmem>>, %arg11: memref<1x512xf32, #tpu.memory_space<vmem>>, %arg12: memref<512x256xbf16, #tpu.memory_space<vmem>>, %arg13: memref<1x256xf32, #tpu.memory_space<vmem>>, %arg14: memref<256x10xbf16, #tpu.memory_space<vmem>>, %arg15: memref<1x10xf32, #tpu.memory_space<vmem>>, %arg16: memref<1x1x10xf32, #tpu.memory_space<vmem>>, %arg17: memref<8x1024xf32, #tpu.memory_space<vmem>>) attributes {dimension_semantics = [#tpu.dimension_semantics<parallel>, #tpu.dimension_semantics<arbitrary>], iteration_bounds = array<i64: 2, 1>, scalar_prefetch = 0 : i64, scratch_operands = 1 : i64, tpu.core_type = #tpu.core_type<tc>, window_params = [{transform_indices = @transform_0, window_bounds = array<i64: 1, 1024, 8>}, {pipeline_mode = #tpu.pipeline_mode<synchronous>, transform_indices = @transform_1, window_bounds = array<i64: 8, 64>}, {pipeline_mode = #tpu.pipeline_mode<synchronous>, transform_indices = @transform_2, window_bounds = array<i64: 64, 64>}, {pipeline_mode = #tpu.pipeline_mode<synchronous>, transform_indices = @transform_3, window_bounds = array<i64: 1, 64>}, {pipeline_mode = #tpu.pipeline_mode<synchronous>, transform_indices = @transform_4, window_bounds = array<i64: 64, 128>}, {pipeline_mode = #tpu.pipeline_mode<synchronous>, transform_indices = @transform_5, window_bounds = array<i64: 1, 128>}, {pipeline_mode = #tpu.pipeline_mode<synchronous>, transform_indices = @transform_6, window_bounds = array<i64: 128, 1024>}, {pipeline_mode = #tpu.pipeline_mode<synchronous>, transform_indices = @transform_7, window_bounds = array<i64: 1, 1024>}, {pipeline_mode = #tpu.pipeline_mode<synchronous>, transform_indices = @transform_8, window_bounds = array<i64: 1024, 512>}, {pipeline_mode = #tpu.pipeline_mode<synchronous>, transform_indices = @transform_9, window_bounds = array<i64: 1, 512>}, {pipeline_mode = #tpu.pipeline_mode<synchronous>, transform_indices = @transform_10, window_bounds = array<i64: 512, 256>}, {pipeline_mode = #tpu.pipeline_mode<synchronous>, transform_indices = @transform_11, window_bounds = array<i64: 1, 256>}, {pipeline_mode = #tpu.pipeline_mode<synchronous>, transform_indices = @transform_12, window_bounds = array<i64: 256, 10>}, {pipeline_mode = #tpu.pipeline_mode<synchronous>, transform_indices = @transform_13, window_bounds = array<i64: 1, 10>}, {transform_indices = @transform_14, window_bounds = array<i64: 1, 1, 10>}]} {
    %c0_i32 = arith.constant 0 : i32
    %0 = arith.cmpi eq, %arg1, %c0_i32 : i32
    %1 = arith.extui %0 : i1 to i32
    %c0_i32_0 = arith.constant 0 : i32
    %2 = arith.cmpi ne, %1, %c0_i32_0 : i32
    scf.if %2 {
      %cst_52 = arith.constant 0xFF800000 : f32
      %61 = vector.broadcast %cst_52 : f32 to vector<8x1024xf32>
      %c0_53 = arith.constant 0 : index
      %c0_54 = arith.constant 0 : index
      %62 = vector.load %arg17[%c0_53, %c0_54] : memref<8x1024xf32, #tpu.memory_space<vmem>>, vector<8x1024xf32>
      tpu.vector_store %arg17[%c0_53, %c0_54], %61 {strides = array<i32>} : memref<8x1024xf32, #tpu.memory_space<vmem>>, vector<8x1024xf32>,
    } else {
    }
    %c0 = arith.constant 0 : index
    %c0_1 = arith.constant 0 : index
    %c0_2 = arith.constant 0 : index
    %3 = vector.load %arg2[%c0, %c0_1, %c0_2] : memref<1x1024x8xbf16, #tpu.memory_space<vmem>>, vector<1x1024x8xbf16>
    %4 = vector.shape_cast %3 : vector<1x1024x8xbf16> to vector<1024x8xbf16>
    %c0_3 = arith.constant 0 : index
    %c0_4 = arith.constant 0 : index
    %5 = vector.load %arg3[%c0_3, %c0_4] : memref<8x64xbf16, #tpu.memory_space<vmem>>, vector<8x64xbf16>
    %cst = arith.constant dense<0.000000e+00> : vector<1024x64xf32>
    %6 = tpu.matmul %4, %5, %cst {dimension_numbers = #tpu.dot_dimension_numbers<[1], [0], [0], [1], [0, 0, 1, 1], [], []>} : vector<1024x8xbf16>, vector<8x64xbf16>, vector<1024x64xf32> -> vector<1024x64xf32>
    %cst_5 = arith.constant 0.000000e+00 : f32
    %7 = vector.broadcast %cst_5 : f32 to vector<1024x64xf32>
    %8 = arith.maximumf %6, %7 : vector<1024x64xf32>
    %9 = arith.truncf %8 : vector<1024x64xf32> to vector<1024x64xbf16>
    %c0_6 = arith.constant 0 : index
    %c0_7 = arith.constant 0 : index
    %10 = vector.load %arg4[%c0_6, %c0_7] : memref<64x64xbf16, #tpu.memory_space<vmem>>, vector<64x64xbf16>
    %cst_8 = arith.constant dense<0.000000e+00> : vector<1024x64xf32>
    %11 = tpu.matmul %9, %10, %cst_8 {dimension_numbers = #tpu.dot_dimension_numbers<[1], [0], [0], [1], [0, 0, 1, 1], [], []>} : vector<1024x64xbf16>, vector<64x64xbf16>, vector<1024x64xf32> -> vector<1024x64xf32>
    %c0_9 = arith.constant 0 : index
    %c0_10 = arith.constant 0 : index
    %12 = vector.load %arg5[%c0_9, %c0_10] : memref<1x64xf32, #tpu.memory_space<vmem>>, vector<1x64xf32>
    %13 = vector.broadcast %12 : vector<1x64xf32> to vector<1024x64xf32>
    %14 = arith.addf %11, %13 : vector<1024x64xf32>
    %cst_11 = arith.constant 0.000000e+00 : f32
    %15 = vector.broadcast %cst_11 : f32 to vector<1024x64xf32>
    %16 = arith.maximumf %14, %15 : vector<1024x64xf32>
    %17 = arith.truncf %16 : vector<1024x64xf32> to vector<1024x64xbf16>
    %c0_12 = arith.constant 0 : index
    %c0_13 = arith.constant 0 : index
    %18 = vector.load %arg6[%c0_12, %c0_13] : memref<64x128xbf16, #tpu.memory_space<vmem>>, vector<64x128xbf16>
    %cst_14 = arith.constant dense<0.000000e+00> : vector<1024x128xf32>
    %19 = tpu.matmul %17, %18, %cst_14 {dimension_numbers = #tpu.dot_dimension_numbers<[1], [0], [0], [1], [0, 0, 1, 1], [], []>} : vector<1024x64xbf16>, vector<64x128xbf16>, vector<1024x128xf32> -> vector<1024x128xf32>
    %c0_15 = arith.constant 0 : index
    %c0_16 = arith.constant 0 : index
    %20 = vector.load %arg7[%c0_15, %c0_16] : memref<1x128xf32, #tpu.memory_space<vmem>>, vector<1x128xf32>
    %21 = vector.broadcast %20 : vector<1x128xf32> to vector<1024x128xf32>
    %22 = arith.addf %19, %21 : vector<1024x128xf32>
    %cst_17 = arith.constant 0.000000e+00 : f32
    %23 = vector.broadcast %cst_17 : f32 to vector<1024x128xf32>
    %24 = arith.maximumf %22, %23 : vector<1024x128xf32>
    %25 = arith.truncf %24 : vector<1024x128xf32> to vector<1024x128xbf16>
    %26 = vector.extract_strided_slice %25 {offsets = [0, 0], sizes = [256, 128], strides = [1, 1]} : vector<1024x128xbf16> to vector<256x128xbf16>
    %c0_18 = arith.constant 0 : index
    %c0_19 = arith.constant 0 : index
    %27 = vector.load %arg8[%c0_18, %c0_19] : memref<128x1024xbf16, #tpu.memory_space<vmem>>, vector<128x1024xbf16>
    %cst_20 = arith.constant dense<0.000000e+00> : vector<256x1024xf32>
    %28 = tpu.matmul %26, %27, %cst_20 {dimension_numbers = #tpu.dot_dimension_numbers<[1], [0], [0], [1], [0, 0, 1, 1], [], []>} : vector<256x128xbf16>, vector<128x1024xbf16>, vector<256x1024xf32> -> vector<256x1024xf32>
    %c0_21 = arith.constant 0 : index
    %c0_22 = arith.constant 0 : index
    %29 = vector.load %arg17[%c0_21, %c0_22] : memref<8x1024xf32, #tpu.memory_space<vmem>>, vector<8x1024xf32>
    %30 = vector.shape_cast %28 : vector<256x1024xf32> to vector<32x8x1024xf32>
    %cst_23 = arith.constant dense<0xFF800000> : vector<8x1024xf32>
    %31 = vector.multi_reduction <maximumf>, %30, %cst_23 [0] : vector<32x8x1024xf32> to vector<8x1024xf32>
    %32 = arith.maximumf %29, %31 : vector<8x1024xf32>
    %c0_24 = arith.constant 0 : index
    %c0_25 = arith.constant 0 : index
    %33 = vector.load %arg17[%c0_24, %c0_25] : memref<8x1024xf32, #tpu.memory_space<vmem>>, vector<8x1024xf32>
    tpu.vector_store %arg17[%c0_24, %c0_25], %32 {strides = array<i32>} : memref<8x1024xf32, #tpu.memory_space<vmem>>, vector<8x1024xf32>,
    %34 = vector.extract_strided_slice %25 {offsets = [256, 0], sizes = [256, 128], strides = [1, 1]} : vector<1024x128xbf16> to vector<256x128xbf16>
    %c0_26 = arith.constant 0 : index
    %c0_27 = arith.constant 0 : index
    %35 = vector.load %arg8[%c0_26, %c0_27] : memref<128x1024xbf16, #tpu.memory_space<vmem>>, vector<128x1024xbf16>
    %cst_28 = arith.constant dense<0.000000e+00> : vector<256x1024xf32>
    %36 = tpu.matmul %34, %35, %cst_28 {dimension_numbers = #tpu.dot_dimension_numbers<[1], [0], [0], [1], [0, 0, 1, 1], [], []>} : vector<256x128xbf16>, vector<128x1024xbf16>, vector<256x1024xf32> -> vector<256x1024xf32>
    %c0_29 = arith.constant 0 : index
    %c0_30 = arith.constant 0 : index
    %37 = vector.load %arg17[%c0_29, %c0_30] : memref<8x1024xf32, #tpu.memory_space<vmem>>, vector<8x1024xf32>
    %38 = vector.shape_cast %36 : vector<256x1024xf32> to vector<32x8x1024xf32>
    %cst_31 = arith.constant dense<0xFF800000> : vector<8x1024xf32>
    %39 = vector.multi_reduction <maximumf>, %38, %cst_31 [0] : vector<32x8x1024xf32> to vector<8x1024xf32>
    %40 = arith.maximumf %37, %39 : vector<8x1024xf32>
    %c0_32 = arith.constant 0 : index
    %c0_33 = arith.constant 0 : index
    %41 = vector.load %arg17[%c0_32, %c0_33] : memref<8x1024xf32, #tpu.memory_space<vmem>>, vector<8x1024xf32>
    tpu.vector_store %arg17[%c0_32, %c0_33], %40 {strides = array<i32>} : memref<8x1024xf32, #tpu.memory_space<vmem>>, vector<8x1024xf32>,
    %42 = vector.extract_strided_slice %25 {offsets = [512, 0], sizes = [256, 128], strides = [1, 1]} : vector<1024x128xbf16> to vector<256x128xbf16>
    %c0_34 = arith.constant 0 : index
    %c0_35 = arith.constant 0 : index
    %43 = vector.load %arg8[%c0_34, %c0_35] : memref<128x1024xbf16, #tpu.memory_space<vmem>>, vector<128x1024xbf16>
    %cst_36 = arith.constant dense<0.000000e+00> : vector<256x1024xf32>
    %44 = tpu.matmul %42, %43, %cst_36 {dimension_numbers = #tpu.dot_dimension_numbers<[1], [0], [0], [1], [0, 0, 1, 1], [], []>} : vector<256x128xbf16>, vector<128x1024xbf16>, vector<256x1024xf32> -> vector<256x1024xf32>
    %c0_37 = arith.constant 0 : index
    %c0_38 = arith.constant 0 : index
    %45 = vector.load %arg17[%c0_37, %c0_38] : memref<8x1024xf32, #tpu.memory_space<vmem>>, vector<8x1024xf32>
    %46 = vector.shape_cast %44 : vector<256x1024xf32> to vector<32x8x1024xf32>
    %cst_39 = arith.constant dense<0xFF800000> : vector<8x1024xf32>
    %47 = vector.multi_reduction <maximumf>, %46, %cst_39 [0] : vector<32x8x1024xf32> to vector<8x1024xf32>
    %48 = arith.maximumf %45, %47 : vector<8x1024xf32>
    %c0_40 = arith.constant 0 : index
    %c0_41 = arith.constant 0 : index
    %49 = vector.load %arg17[%c0_40, %c0_41] : memref<8x1024xf32, #tpu.memory_space<vmem>>, vector<8x1024xf32>
    tpu.vector_store %arg17[%c0_40, %c0_41], %48 {strides = array<i32>} : memref<8x1024xf32, #tpu.memory_space<vmem>>, vector<8x1024xf32>,
    %50 = vector.extract_strided_slice %25 {offsets = [768, 0], sizes = [256, 128], strides = [1, 1]} : vector<1024x128xbf16> to vector<256x128xbf16>
    %c0_42 = arith.constant 0 : index
    %c0_43 = arith.constant 0 : index
    %51 = vector.load %arg8[%c0_42, %c0_43] : memref<128x1024xbf16, #tpu.memory_space<vmem>>, vector<128x1024xbf16>
    %cst_44 = arith.constant dense<0.000000e+00> : vector<256x1024xf32>
    %52 = tpu.matmul %50, %51, %cst_44 {dimension_numbers = #tpu.dot_dimension_numbers<[1], [0], [0], [1], [0, 0, 1, 1], [], []>} : vector<256x128xbf16>, vector<128x1024xbf16>, vector<256x1024xf32> -> vector<256x1024xf32>
    %c0_45 = arith.constant 0 : index
    %c0_46 = arith.constant 0 : index
    %53 = vector.load %arg17[%c0_45, %c0_46] : memref<8x1024xf32, #tpu.memory_space<vmem>>, vector<8x1024xf32>
    %54 = vector.shape_cast %52 : vector<256x1024xf32> to vector<32x8x1024xf32>
    %cst_47 = arith.constant dense<0xFF800000> : vector<8x1024xf32>
    %55 = vector.multi_reduction <maximumf>, %54, %cst_47 [0] : vector<32x8x1024xf32> to vector<8x1024xf32>
    %56 = arith.maximumf %53, %55 : vector<8x1024xf32>
    %c0_48 = arith.constant 0 : index
    %c0_49 = arith.constant 0 : index
    %57 = vector.load %arg17[%c0_48, %c0_49] : memref<8x1024xf32, #tpu.memory_space<vmem>>, vector<8x1024xf32>
    tpu.vector_store %arg17[%c0_48, %c0_49], %56 {strides = array<i32>} : memref<8x1024xf32, #tpu.memory_space<vmem>>, vector<8x1024xf32>,
    %c0_i32_50 = arith.constant 0 : i32
    %58 = arith.cmpi eq, %arg1, %c0_i32_50 : i32
    %59 = arith.extui %58 : i1 to i32
    %c0_i32_51 = arith.constant 0 : i32
    %60 = arith.cmpi ne, %59, %c0_i32_51 : i32
    scf.if %60 {
      %c0_52 = arith.constant 0 : index
      %c0_53 = arith.constant 0 : index
      %61 = vector.load %arg17[%c0_52, %c0_53] : memref<8x1024xf32, #tpu.memory_space<vmem>>, vector<8x1024xf32>
      %cst_54 = arith.constant dense<0xFF800000> : vector<1024xf32>
      %62 = vector.multi_reduction <maximumf>, %61, %cst_54 [0] : vector<8x1024xf32> to vector<1024xf32>
      %63 = vector.shape_cast %62 : vector<1024xf32> to vector<1x1024xf32>
      %c0_55 = arith.constant 0 : index
      %c0_56 = arith.constant 0 : index
      %64 = vector.load %arg9[%c0_55, %c0_56] : memref<1x1024xf32, #tpu.memory_space<vmem>>, vector<1x1024xf32>
      %65 = arith.addf %63, %64 : vector<1x1024xf32>
      %cst_57 = arith.constant 0.000000e+00 : f32
      %66 = vector.broadcast %cst_57 : f32 to vector<1x1024xf32>
      %67 = arith.maximumf %65, %66 : vector<1x1024xf32>
      %68 = arith.truncf %67 : vector<1x1024xf32> to vector<1x1024xbf16>
      %c0_58 = arith.constant 0 : index
      %c0_59 = arith.constant 0 : index
      %69 = vector.load %arg10[%c0_58, %c0_59] : memref<1024x512xbf16, #tpu.memory_space<vmem>>, vector<1024x512xbf16>
      %cst_60 = arith.constant dense<0.000000e+00> : vector<1x512xf32>
      %70 = tpu.matmul %68, %69, %cst_60 {dimension_numbers = #tpu.dot_dimension_numbers<[1], [0], [0], [1], [0, 0, 1, 1], [], []>} : vector<1x1024xbf16>, vector<1024x512xbf16>, vector<1x512xf32> -> vector<1x512xf32>
      %c0_61 = arith.constant 0 : index
      %c0_62 = arith.constant 0 : index
      %71 = vector.load %arg11[%c0_61, %c0_62] : memref<1x512xf32, #tpu.memory_space<vmem>>, vector<1x512xf32>
      %72 = arith.addf %70, %71 : vector<1x512xf32>
      %cst_63 = arith.constant 0.000000e+00 : f32
      %73 = vector.broadcast %cst_63 : f32 to vector<1x512xf32>
      %74 = arith.maximumf %72, %73 : vector<1x512xf32>
      %75 = arith.truncf %74 : vector<1x512xf32> to vector<1x512xbf16>
      %c0_64 = arith.constant 0 : index
      %c0_65 = arith.constant 0 : index
      %76 = vector.load %arg12[%c0_64, %c0_65] : memref<512x256xbf16, #tpu.memory_space<vmem>>, vector<512x256xbf16>
      %cst_66 = arith.constant dense<0.000000e+00> : vector<1x256xf32>
      %77 = tpu.matmul %75, %76, %cst_66 {dimension_numbers = #tpu.dot_dimension_numbers<[1], [0], [0], [1], [0, 0, 1, 1], [], []>} : vector<1x512xbf16>, vector<512x256xbf16>, vector<1x256xf32> -> vector<1x256xf32>
      %c0_67 = arith.constant 0 : index
      %c0_68 = arith.constant 0 : index
      %78 = vector.load %arg13[%c0_67, %c0_68] : memref<1x256xf32, #tpu.memory_space<vmem>>, vector<1x256xf32>
      %79 = arith.addf %77, %78 : vector<1x256xf32>
      %cst_69 = arith.constant 0.000000e+00 : f32
      %80 = vector.broadcast %cst_69 : f32 to vector<1x256xf32>
      %81 = arith.maximumf %79, %80 : vector<1x256xf32>
      %82 = arith.truncf %81 : vector<1x256xf32> to vector<1x256xbf16>
      %c0_70 = arith.constant 0 : index
      %c0_71 = arith.constant 0 : index
      %83 = vector.load %arg14[%c0_70, %c0_71] : memref<256x10xbf16, #tpu.memory_space<vmem>>, vector<256x10xbf16>
      %cst_72 = arith.constant dense<0.000000e+00> : vector<1x10xf32>
      %84 = tpu.matmul %82, %83, %cst_72 {dimension_numbers = #tpu.dot_dimension_numbers<[1], [0], [0], [1], [0, 0, 1, 1], [], []>} : vector<1x256xbf16>, vector<256x10xbf16>, vector<1x10xf32> -> vector<1x10xf32>
      %c0_73 = arith.constant 0 : index
      %c0_74 = arith.constant 0 : index
      %85 = vector.load %arg15[%c0_73, %c0_74] : memref<1x10xf32, #tpu.memory_space<vmem>>, vector<1x10xf32>
      %86 = arith.addf %84, %85 : vector<1x10xf32>
      %c0_75 = arith.constant 0 : index
      %c0_76 = arith.constant 0 : index
      %c0_77 = arith.constant 0 : index
      %87 = vector.load %arg16[%c0_75, %c0_76, %c0_77] : memref<1x1x10xf32, #tpu.memory_space<vmem>>, vector<1x1x10xf32>
      %88 = vector.shape_cast %87 : vector<1x1x10xf32> to vector<1x10xf32>
      %89 = vector.shape_cast %86 : vector<1x10xf32> to vector<1x1x10xf32>
      tpu.vector_store %arg16[%c0_75, %c0_76, %c0_77], %89 {strides = array<i32>} : memref<1x1x10xf32, #tpu.memory_space<vmem>>, vector<1x1x10xf32>,
    } else {
    }
    return
  }
  func.func @transform_0(%arg0: i32, %arg1: i32) -> (i32, i32, i32) {
    %c0_i32 = arith.constant 0 : i32
    %c0_i32_0 = arith.constant 0 : i32
    return %arg0, %arg1, %c0_i32 : i32, i32, i32
  }
  func.func @transform_1(%arg0: i32, %arg1: i32) -> (i32, i32) {
    %c0_i32 = arith.constant 0 : i32
    %c0_i32_0 = arith.constant 0 : i32
    %c0_i32_1 = arith.constant 0 : i32
    return %c0_i32, %c0_i32_0 : i32, i32
  }
  func.func @transform_2(%arg0: i32, %arg1: i32) -> (i32, i32) {
    %c0_i32 = arith.constant 0 : i32
    %c0_i32_0 = arith.constant 0 : i32
    %c0_i32_1 = arith.constant 0 : i32
    return %c0_i32, %c0_i32_0 : i32, i32
  }
  func.func @transform_3(%arg0: i32, %arg1: i32) -> (i32, i32) {
    %c0_i32 = arith.constant 0 : i32
    %c0_i32_0 = arith.constant 0 : i32
    %c0_i32_1 = arith.constant 0 : i32
    return %c0_i32, %c0_i32_0 : i32, i32
  }
  func.func @transform_4(%arg0: i32, %arg1: i32) -> (i32, i32) {
    %c0_i32 = arith.constant 0 : i32
    %c0_i32_0 = arith.constant 0 : i32
    %c0_i32_1 = arith.constant 0 : i32
    return %c0_i32, %c0_i32_0 : i32, i32
  }
  func.func @transform_5(%arg0: i32, %arg1: i32) -> (i32, i32) {
    %c0_i32 = arith.constant 0 : i32
    %c0_i32_0 = arith.constant 0 : i32
    %c0_i32_1 = arith.constant 0 : i32
    return %c0_i32, %c0_i32_0 : i32, i32
  }
  func.func @transform_6(%arg0: i32, %arg1: i32) -> (i32, i32) {
    %c0_i32 = arith.constant 0 : i32
    %c0_i32_0 = arith.constant 0 : i32
    %c0_i32_1 = arith.constant 0 : i32
    return %c0_i32, %c0_i32_0 : i32, i32
  }
  func.func @transform_7(%arg0: i32, %arg1: i32) -> (i32, i32) {
    %c0_i32 = arith.constant 0 : i32
    %c0_i32_0 = arith.constant 0 : i32
    %c0_i32_1 = arith.constant 0 : i32
    return %c0_i32, %c0_i32_0 : i32, i32
  }
  func.func @transform_8(%arg0: i32, %arg1: i32) -> (i32, i32) {
    %c0_i32 = arith.constant 0 : i32
    %c0_i32_0 = arith.constant 0 : i32
    %c0_i32_1 = arith.constant 0 : i32
    return %c0_i32, %c0_i32_0 : i32, i32
  }
  func.func @transform_9(%arg0: i32, %arg1: i32) -> (i32, i32) {
    %c0_i32 = arith.constant 0 : i32
    %c0_i32_0 = arith.constant 0 : i32
    %c0_i32_1 = arith.constant 0 : i32
    return %c0_i32, %c0_i32_0 : i32, i32
  }
  func.func @transform_10(%arg0: i32, %arg1: i32) -> (i32, i32) {
    %c0_i32 = arith.constant 0 : i32
    %c0_i32_0 = arith.constant 0 : i32
    %c0_i32_1 = arith.constant 0 : i32
    return %c0_i32, %c0_i32_0 : i32, i32
  }
  func.func @transform_11(%arg0: i32, %arg1: i32) -> (i32, i32) {
    %c0_i32 = arith.constant 0 : i32
    %c0_i32_0 = arith.constant 0 : i32
    %c0_i32_1 = arith.constant 0 : i32
    return %c0_i32, %c0_i32_0 : i32, i32
  }
  func.func @transform_12(%arg0: i32, %arg1: i32) -> (i32, i32) {
    %c0_i32 = arith.constant 0 : i32
    %c0_i32_0 = arith.constant 0 : i32
    %c0_i32_1 = arith.constant 0 : i32
    return %c0_i32, %c0_i32_0 : i32, i32
  }
  func.func @transform_13(%arg0: i32, %arg1: i32) -> (i32, i32) {
    %c0_i32 = arith.constant 0 : i32
    %c0_i32_0 = arith.constant 0 : i32
    %c0_i32_1 = arith.constant 0 : i32
    return %c0_i32, %c0_i32_0 : i32, i32
  }
  func.func @transform_14(%arg0: i32, %arg1: i32) -> (i32, i32, i32) {
    %c0_i32 = arith.constant 0 : i32
    %c0_i32_0 = arith.constant 0 : i32
    %c0_i32_1 = arith.constant 0 : i32
    return %arg0, %c0_i32, %c0_i32_0 : i32, i32, i32
  }
}

</mosaic_0001>

<bundles_post_ra>
// kernel: pointnet_forward.1
= control target key start
LH: loop header
LB: loop body
LE: loop exit
PB: predicated region body
PF: predicated region fallthrough
CT: control target
= control target key end

     0   :  { %s20875_s0 = inlined_call_operand.vmem [shape: bf16[2,1024,8], index: 0, kind: input, shape index: {}]   ;;  %s20876_s1 = inlined_call_operand.vmem [shape: bf16[8,64], index: 1, kind: input, shape index: {}]   ;;  %s20877_s2 = inlined_call_operand.vmem [shape: bf16[64,64], index: 2, kind: input, shape index: {}]   ;;  %s20878_s3 = inlined_call_operand.vmem [shape: f32[1,64], index: 3, kind: input, shape index: {}]   ;;  %s20879_s4 = inlined_call_operand.vmem [shape: bf16[64,128], index: 4, kind: input, shape index: {}]   ;;  %s20880_s5 = inlined_call_operand.vmem [shape: f32[1,128], index: 5, kind: input, shape index: {}]   ;;  %s20881_s6 = inlined_call_operand.vmem [shape: bf16[128,1024], index: 6, kind: input, shape index: {}]   ;;  %s20882_s7 = inlined_call_operand.vmem [shape: f32[1,1024], index: 7, kind: input, shape index: {}]   ;;  %s20883_s8 = inlined_call_operand.vmem [shape: bf16[1024,512], index: 8, kind: input, shape index: {}]   ;;  %s20884_s9 = inlined_call_operand.vmem [shape: f32[1,512], index: 9, kind: input, shape index: {}]   ;;  %s20885_s10 = inlined_call_operand.vmem [shape: bf16[512,256], index: 10, kind: input, shape index: {}]   ;;  %s20886_s11 = inlined_call_operand.vmem [shape: f32[1,256], index: 11, kind: input, shape index: {}]   ;;  %s20887_s12 = inlined_call_operand.vmem [shape: bf16[256,10], index: 12, kind: input, shape index: {}]   ;;  %s20888_s13 = inlined_call_operand.vmem [shape: f32[1,10], index: 13, kind: input, shape index: {}]   ;;  %s20889_s14 = inlined_call_operand.hbm [shape: f32[2,1,10], index: 14, kind: output, shape index: {}]  }
   0x1   :  { %20921 = sst [smem:[#allocation37_spill]] %s20875_s0 }
   0x2   :  { %20922 = sst [smem:[#allocation38_spill]] %s20876_s1 }
   0x3   :  { %20923 = sst [smem:[#allocation39_spill]] %s20877_s2 }
   0x4   :  { %19 = vsyncpa [#allocation4], 0 }
   0x5   :  { %21 = vsyncpa [#allocation4 + $0x1], 0  ;;  %s15644_s29 = smov 0   ;;  %s15646_s30 = smov 0  }
   0x6   :  { %s15648_s15 = smov 0   ;;  %s15650_s16 = smov 0  }
   0x7   :  { %s15652_s17 = smov 0   ;;  %s15654_s18 = smov 0  }
   0x8 LB: > { %20924 = sst [smem:[#allocation6_spill]] %s15563_s17  ;;  %s11900_s19 = sadd.s32 4294967295, %s15567_s18   ;;  %s15567_s18 = sphi %s15654_s18, %s27_s18   ;;  %s15563_s17 = sphi %s15652_s17, %s20996_s17   ;;  %s15559_s16 = sphi %s15650_s16, %s20995_s16   ;;  %s15555_s15 = sphi %s15648_s15, %s20999_s15   ;;  %s15551_s30 = sphi %s15646_s30, %s20998_s30   ;;  %s15547_s29 = sphi %s15644_s29, %s20997_s29  }
   0x9   : > { %s11901_s20 = sadd.s32 4294967294, %s15567_s18   ;;  %s39_s21 = sadd.s32 1, %s15563_s17 }
   0xa   : > { %s347_s22 = sadd.s32 1, %s15555_s15  ;;  %p41_p0 = scmp.ge.s32.totalorder %s39_s21, 2 }
   0xb   : > { %p357_p1 = scmp.ne.s32.totalorder %s15555_s15, %s15551_s30  ;;  %p358_p2 = scmp.eq.s32.totalorder %s11900_s19, 1 }
   0xc   : > { %p363_p3 = scmp.ne.s32.totalorder %s15551_s30, %s15547_s29  ;;  %s21001_s21 = smov (%p41_p0, %s39_s21), 0 }
   0xd   : > { %20925 = sst [smem:[#allocation7_spill]] %s21001_s21  ;;  %p15684_p4 = por %p358_p2, %p357_p1 }
   0xe   : > { %p364_p5 = scmp.eq.s32.totalorder %s11901_s20, 1  ;;  %s344_s24 = ssub.s32 %s15563_s17, %s21001_s21 }
   0xf   : > { %p11904_p6 = scmp.ge.s32.totalorder %s15567_s18, 1  ;;  %p345_p7 = scmp.eq.s32.totalorder %s344_s24, 0 }
  0x10   : > { %p15691_p8 = por %p364_p5, %p363_p3  ;;  %p434_p9 = scmp.lt.s32.totalorder %s15567_s18, 3 }
  0x11   : > { %s15697_s26 = scalar_select %p345_p7, %s15555_s15, %s347_s22  }
  0x12   : > { %p435_p10 = pnand %p11904_p6, %p434_p9 }
  0x14   : > { %438 = sbr.rel (%p435_p10) target bundleno = 4012 (0xfac), region = 76 }
  0x19   : > { %s20928_s1 = sld [smem:[#allocation38_spill]]  ;;  %vm1148_vm0 = vcmask 1043456   ;;  %p484_p11 = scmp.lt.s32.totalorder %s15559_s16, 1  ;;  %vm955_vm1 = vcmask 64512   ;;  %vm1709_vm2 = vcmask 523264   ;;  %v14829_v53 = vld [vmem:[%s20879_s4 + $0x18] sm:$0xff] }
  0x1a   : > { %s20929_s0 = sld [smem:[#allocation37_spill]]  ;;  %2655 = vmatpush.bf16.msra.mxu2 %v14829_v53  ;;  %v14828_v57 = vld [vmem:[%s20879_s4 + $0x10] sm:$0xff]  ;;  %v14827_v60 = vld [vmem:[%s20879_s4 + $0x8] sm:$0xff]  ;;  %v14826_v61 = vld [vmem:[%s20879_s4] sm:$0xff]  ;;  %vm11816_vm3 = vcmask 73728   ;;  %s15509_s24 = scalar_lea.hbm %s20889_s14, 2 }
  0x1b   : > { %s485_s19 = scalar_select %p484_p11, %s15559_s16, 1 }
  0x1c   : > { %s20930_s2 = sld [smem:[#allocation39_spill]] }
  0x1d   : > { %s14757_s20 = sshll.u32 %s485_s19, 9 }
  0x1e   : > { %2656 = vmatpush.bf16.msra.mxu2 %v14828_v57 }
  0x1f   : > { %v634_v0 = vld [vmem:[%s20928_s1] sm:$0xf] }
  0x20   : > { %v1150_v1 = vsel %vm1148_vm0, %v634_v0, 0  ;;  %s15707_s17 = scalar_lea.vmem %s20929_s0, %s14757_s20  ;;  %s11827_s20 = scalar_lea.hbm %s20889_s14, %s15559_s16 }
  0x21   : > { %1159 = vmatpush.bf16.msra.mxu0 %v1150_v1  ;;  %v14758_v2 = vld [vmem:[%s15707_s17] sm:$0xff]  ;;  %v14759_v3 = vld [vmem:[%s15707_s17 + $0x8] sm:$0xff]  ;;  %v14760_v4 = vld [vmem:[%s15707_s17 + $0x10] sm:$0xff]  ;;  %s11831_s21 = sshll.u32 %s11827_s20, 4  ;;  %s11832_s21 = int_to_ptr.hbm [resolvable:$true] %s11831_s21 }
  0x22   : > { %v14761_v5 = vld [vmem:[%s15707_s17 + $0x18] sm:$0xff]  ;;  %v14762_v6 = vld [vmem:[%s15707_s17 + $0x20] sm:$0xff]  ;;  %v14763_v7 = vld [vmem:[%s15707_s17 + $0x28] sm:$0xff]  ;;  %2657 = vmatpush.bf16.msra.mxu2 %v14827_v60  ;;  %s15503_s27 = sshra.s32 %s11832_s21, 4  ;;  %s15504_s27 = int_to_ptr.hbm [resolvable:$true] %s15503_s27 }
  0x23   : > { %v14825_v8 = vld [vmem:[%s20930_s2 + $0x18] sm:$0xff]  ;;  %v14764_v9 = vld [vmem:[%s15707_s17 + $0x30] sm:$0xff]  ;;  %v14823_v11 = vld [vmem:[%s20930_s2 + $0x8] sm:$0xff]  ;;  %s15505_s28 = scalar_lea.hbm %s15504_s27, 1  ;;  %p15510_p1 = scmp.lt.s32.totalorder %s15504_s27, %s20889_s14 }
  0x24   : > { %12163 = vmatmul.msk.bf16.vlgmr.msra.gmra.mxu0 %vm955_vm1, %v14758_v2  ;;  %1906 = vmatpush.bf16.msra.mxu1 %v14825_v8  ;;  %v14824_v10 = vld [vmem:[%s20930_s2 + $0x10] sm:$0xff]  ;;  %v14822_v12 = vld [vmem:[%s20930_s2] sm:$0xff]  ;;  %v14765_v13 = vld [vmem:[%s15707_s17 + $0x38] sm:$0xff]  ;;  %p15506_p12 = scmp.ne.s32.totalorder %s15504_s27, %s15505_s28  ;;  %p15511_p2 = scmp.lt.s32.totalorder %s15509_s24, %s15505_s28 }
  0x25   : > { %v14766_v14 = vld [vmem:[%s15707_s17 + $0x40] sm:$0xff]  ;;  %v14767_v20 = vld [vmem:[%s15707_s17 + $0x48] sm:$0xff]  ;;  %v14768_v26 = vld [vmem:[%s15707_s17 + $0x50] sm:$0xff] }
  0x26   : > { %v14769_v32 = vld [vmem:[%s15707_s17 + $0x58] sm:$0xff]  ;;  %v14770_v38 = vld [vmem:[%s15707_s17 + $0x60] sm:$0xff]  ;;  %v14771_v44 = vld [vmem:[%s15707_s17 + $0x68] sm:$0xff]  ;;  %2658 = vmatpush.bf16.msra.mxu2 %v14826_v61  ;;  %p15507_p13 = pnand %p15506_p12, %p15684_p4  ;;  %p15512_p3 = por %p15511_p2, %p15510_p1 }
  0x27   : > { %v14772_v50 = vld [vmem:[%s15707_s17 + $0x70] sm:$0xff]  ;;  %v14773_v58 = vld [vmem:[%s15707_s17 + $0x78] sm:$0xff]  ;;  %v14774_v2 = vld [vmem:[%s15707_s17 + $0x80] sm:$0xff] }
  0x28   : > { %1907 = vmatpush.bf16.msra.mxu1 %v14824_v10  ;;  %v14775_v10 = vld [vmem:[%s15707_s17 + $0x88] sm:$0xff]  ;;  %p15508_p0 = pneg %p15507_p13 }
  0x2a   : > { %p15513_p5 = pnand %p15512_p3, %p15508_p0 }
  0x2c   : > { %1908 = vmatpush.bf16.msra.mxu1 %v14823_v11 }
  0x30   : > { %1909 = vmatpush.bf16.msra.mxu1 %v14822_v12 }
  0x34   : > { %12164 = vmatmul.msk.bf16.gmra.mxu0 %vm955_vm1, %v14759_v3 }
  0x44   : > { %12165 = vmatmul.msk.bf16.gmra.mxu0 %vm955_vm1, %v14760_v4 }
  0x54   : > { %12166 = vmatmul.msk.bf16.gmra.mxu0 %vm955_vm1, %v14761_v5 }
  0x64   : > { %12167 = vmatmul.msk.bf16.gmra.mxu0 %vm955_vm1, %v14762_v6 }
  0x74   : > { %12168 = vmatmul.msk.bf16.gmra.mxu0 %vm955_vm1, %v14763_v7 }
  0x84   : > { %12169 = vmatmul.msk.bf16.gmra.mxu0 %vm955_vm1, %v14764_v9  ;;  %v15778_v9 = vld [vmem:[%s20878_s3] ss:$0 sm:$0xff] }
  0x94   : > { %12170 = vmatmul.msk.bf16.gmra.mxu0 %vm955_vm1, %v14765_v13 }
  0xa1   : > { %v1161_v15 = vpop.f32.mrf.mxu0 }
  0xa2   : > { %v1481_v17 = vmax.f32 %v1161_v15, 0.0 }
  0xa4   : > { %12171 = vmatmul.msk.bf16.gmra.mxu0 %vm955_vm1, %v14766_v14 }
  0xa9   : > { %v1163_v16 = vpop.f32.mrf.mxu0 }
  0xaa   : > { %v1482_v18 = vmax.f32 %v1163_v16, 0.0 }
  0xac   : > { %v1609_v19 = vpack.c.bf16 %v1482_v18, %v1481_v17 }
  0xae   : > { %12243 = vmatmul.msk.bf16.vlgmr.msra.gmra.mxu1 %vm1709_vm2, %v1609_v19 }
  0xb1   : > { %v1166_v21 = vpop.f32.mrf.mxu0 }
  0xb2   : > { %v1483_v23 = vmax.f32 %v1166_v21, 0.0 }
  0xb4   : > { %12172 = vmatmul.msk.bf16.gmra.mxu0 %vm955_vm1, %v14767_v20 }
  0xb9   : > { %v1168_v22 = vpop.f32.mrf.mxu0 }
  0xba   : > { %v1484_v24 = vmax.f32 %v1168_v22, 0.0 }
  0xbc   : > { %v1610_v25 = vpack.c.bf16 %v1484_v24, %v1483_v23  ;;  %v14776_v23 = vld [vmem:[%s15707_s17 + $0x90] sm:$0xff] }
  0xbe   : > { %12244 = vmatmul.msk.bf16.gmra.mxu1 %vm1709_vm2, %v1610_v25 }
  0xc1   : > { %v1171_v27 = vpop.f32.mrf.mxu0 }
  0xc2   : > { %v1485_v29 = vmax.f32 %v1171_v27, 0.0 }
  0xc4   : > { %12173 = vmatmul.msk.bf16.gmra.mxu0 %vm955_vm1, %v14768_v26 }
  0xc9   : > { %v1173_v28 = vpop.f32.mrf.mxu0 }
  0xca   : > { %v1486_v30 = vmax.f32 %v1173_v28, 0.0 }
  0xcc   : > { %v1611_v31 = vpack.c.bf16 %v1486_v30, %v1485_v29 }
  0xce   : > { %12245 = vmatmul.msk.bf16.gmra.mxu1 %vm1709_vm2, %v1611_v31 }
  0xd1   : > { %v1176_v33 = vpop.f32.mrf.mxu0 }
  0xd2   : > { %v1487_v35 = vmax.f32 %v1176_v33, 0.0 }
  0xd4   : > { %12174 = vmatmul.msk.bf16.gmra.mxu0 %vm955_vm1, %v14769_v32 }
  0xd9   : > { %v1178_v34 = vpop.f32.mrf.mxu0 }
  0xda   : > { %v1488_v36 = vmax.f32 %v1178_v34, 0.0 }
  0xdc   : > { %v1612_v37 = vpack.c.bf16 %v1488_v36, %v1487_v35  ;;  %v14777_v36 = vld [vmem:[%s15707_s17 + $0x98] sm:$0xff] }
  0xde   : > { %12246 = vmatmul.msk.bf16.gmra.mxu1 %vm1709_vm2, %v1612_v37 }
  0xe1   : > { %v1181_v39 = vpop.f32.mrf.mxu0 }
  0xe2   : > { %v1489_v41 = vmax.f32 %v1181_v39, 0.0 }
  0xe4   : > { %12175 = vmatmul.msk.bf16.gmra.mxu0 %vm955_vm1, %v14770_v38 }
  0xe9   : > { %v1183_v40 = vpop.f32.mrf.mxu0 }
  0xea   : > { %v1490_v42 = vmax.f32 %v1183_v40, 0.0 }
  0xec   : > { %v1613_v43 = vpack.c.bf16 %v1490_v42, %v1489_v41 }
  0xee   : > { %12247 = vmatmul.msk.bf16.gmra.mxu1 %vm1709_vm2, %v1613_v43 }
  0xf1   : > { %v1186_v45 = vpop.f32.mrf.mxu0 }
  0xf2   : > { %v1491_v47 = vmax.f32 %v1186_v45, 0.0 }
  0xf4   : > { %12176 = vmatmul.msk.bf16.gmra.mxu0 %vm955_vm1, %v14771_v44 }
  0xf9   : > { %v1188_v46 = vpop.f32.mrf.mxu0 }
  0xfa   : > { %v1492_v48 = vmax.f32 %v1188_v46, 0.0 }
  0xfc   : > { %v1614_v49 = vpack.c.bf16 %v1492_v48, %v1491_v47 }
  0xfe   : > { %12248 = vmatmul.msk.bf16.gmra.mxu1 %vm1709_vm2, %v1614_v49  ;;  %v14778_v49 = vld [vmem:[%s15707_s17 + $0xa0] sm:$0xff] }
 0x101   : > { %v1191_v51 = vpop.f32.mrf.mxu0 }
 0x102   : > { %v1493_v54 = vmax.f32 %v1191_v51, 0.0 }
 0x104   : > { %12177 = vmatmul.msk.bf16.gmra.mxu0 %vm955_vm1, %v14772_v50 }
 0x109   : > { %v1193_v52 = vpop.f32.mrf.mxu0 }
 0x10a   : > { %v1494_v55 = vmax.f32 %v1193_v52, 0.0 }
 0x10c   : > { %v1615_v56 = vpack.c.bf16 %v1494_v55, %v1493_v54 }
 0x10e   : > { %12249 = vmatmul.msk.bf16.gmra.mxu1 %vm1709_vm2, %v1615_v56 }
 0x111   : > { %v1196_v59 = vpop.f32.mrf.mxu0 }
 0x112   : > { %v1495_v63 = vmax.f32 %v1196_v59, 0.0 }
 0x114   : > { %12178 = vmatmul.msk.bf16.gmra.mxu0 %vm955_vm1, %v14773_v58 }
 0x119   : > { %v1198_v62 = vpop.f32.mrf.mxu0 }
 0x11a   : > { %v1496_v0 = vmax.f32 %v1198_v62, 0.0  ;;  %v14779_v62 = vld [vmem:[%s15707_s17 + $0xa8] sm:$0xff] }
 0x11c   : > { %v1616_v1 = vpack.c.bf16 %v1496_v0, %v1495_v63 }
 0x11e   : > { %12250 = vmatmul.msk.bf16.gmra.mxu1 %vm1709_vm2, %v1616_v1 }
 0x121   : > { %v1201_v3 = vpop.f32.mrf.mxu0 }
 0x122   : > { %v1497_v5 = vmax.f32 %v1201_v3, 0.0 }
 0x124   : > { %12179 = vmatmul.msk.bf16.gmra.mxu0 %vm955_vm1, %v14774_v2 }
 0x129   : > { %v1203_v4 = vpop.f32.mrf.mxu0 }
 0x12a   : > { %v1498_v6 = vmax.f32 %v1203_v4, 0.0 }
 0x12b   : > { %v1911_v7 = vpop.f32.mrf.mxu1 }
 0x12c   : > { %v1617_v8 = vpack.c.bf16 %v1498_v6, %v1497_v5  ;;  %v1912_v12 = vadd.f32 %v15778_v9, %v1911_v7 }
 0x12e   : > { %12251 = vmatmul.msk.bf16.gmra.mxu1 %vm1709_vm2, %v1617_v8  ;;  %v2231_v15 = vmax.f32 %v1912_v12, 0.0  ;;  %v14780_v12 = vld [vmem:[%s15707_s17 + $0xb0] sm:$0xff] }
 0x131   : > { %v1206_v11 = vpop.f32.mrf.mxu0 }
 0x132   : > { %v1499_v19 = vmax.f32 %v1206_v11, 0.0 }
 0x133   : > { %v1913_v13 = vpop.f32.mrf.mxu1 }
 0x134   : > { %v1914_v14 = vadd.f32 %v15778_v9, %v1913_v13  ;;  %12180 = vmatmul.msk.bf16.gmra.mxu0 %vm955_vm1, %v14775_v10 }
 0x136   : > { %v2232_v16 = vmax.f32 %v1914_v14, 0.0 }
 0x138   : > { %v2359_v17 = vpack.c.bf16 %v2232_v16, %v2231_v15 }
 0x139   : > { %v1208_v18 = vpop.f32.mrf.mxu0 }
 0x13a   : > { %v1500_v20 = vmax.f32 %v1208_v18, 0.0  ;;  %12323 = vmatmul.msk.bf16.vlgmr.msra.gmra.mxu2 %vm1709_vm2, %v2359_v17 }
 0x13b   : > { %v1916_v21 = vpop.f32.mrf.mxu1 }
 0x13c   : > { %v1618_v22 = vpack.c.bf16 %v1500_v20, %v1499_v19  ;;  %v1917_v25 = vadd.f32 %v15778_v9, %v1916_v21 }
 0x13e   : > { %12252 = vmatmul.msk.bf16.gmra.mxu1 %vm1709_vm2, %v1618_v22  ;;  %v2233_v28 = vmax.f32 %v1917_v25, 0.0  ;;  %v12613_v25 = vld [vmem:[%s20881_s6 + $0x1c0] sm:$0xf] }
 0x141   : > { %v1211_v24 = vpop.f32.mrf.mxu0 }
 0x142   : > { %v1501_v32 = vmax.f32 %v1211_v24, 0.0 }
 0x143   : > { %v1918_v26 = vpop.f32.mrf.mxu1 }
 0x144   : > { %v1919_v27 = vadd.f32 %v15778_v9, %v1918_v26  ;;  %12181 = vmatmul.msk.bf16.gmra.mxu0 %vm955_vm1, %v14776_v23  ;;  %v14890_v26 = vld [vmem:[%s20881_s6 + $0x1dc] sm:$0xf0] }
 0x146   : > { %v2234_v29 = vmax.f32 %v1919_v27, 0.0  ;;  %v12614_v27 = vor.u32 %v14890_v26, %v12613_v25  ;;  %v15885_v25 = vld [vmem:[%s20880_s5] ss:$0 sm:$0xff] }
 0x148   : > { %v2360_v30 = vpack.c.bf16 %v2234_v29, %v2233_v28  ;;  %v14781_v28 = vld [vmem:[%s15707_s17 + $0xb8] sm:$0xff]  ;;  %3716 = vmatpush.bf16.msra.mxu3 %v12614_v27 }
 0x149   : > { %v1213_v31 = vpop.f32.mrf.mxu0 }
 0x14a   : > { %v1502_v33 = vmax.f32 %v1213_v31, 0.0  ;;  %12324 = vmatmul.msk.bf16.gmra.mxu2 %vm1709_vm2, %v2360_v30  ;;  %v12581_v31 = vld [vmem:[%s20881_s6 + $0x180] sm:$0xf] }
 0x14b   : > { %v1921_v34 = vpop.f32.mrf.mxu1 }
 0x14c   : > { %v1619_v35 = vpack.c.bf16 %v1502_v33, %v1501_v32  ;;  %v1922_v38 = vadd.f32 %v15778_v9, %v1921_v34  ;;  %v14882_v32 = vld [vmem:[%s20881_s6 + $0x19c] sm:$0xf0] }
 0x14d   : > { %v12582_v34 = vor.u32 %v14882_v32, %v12581_v31 }
 0x14e   : > { %12253 = vmatmul.msk.bf16.gmra.mxu1 %vm1709_vm2, %v1619_v35  ;;  %v2235_v41 = vmax.f32 %v1922_v38, 0.0  ;;  %v12549_v38 = vld [vmem:[%s20881_s6 + $0x140] sm:$0xf] }
 0x14f   : > { %3717 = vmatpush.bf16.msra.mxu3 %v12582_v34 }
 0x151   : > { %v1216_v37 = vpop.f32.mrf.mxu0 }
 0x152   : > { %v1503_v45 = vmax.f32 %v1216_v37, 0.0 }
 0x153   : > { %v1923_v39 = vpop.f32.mrf.mxu1 }
 0x154   : > { %v1924_v40 = vadd.f32 %v15778_v9, %v1923_v39  ;;  %12182 = vmatmul.msk.bf16.gmra.mxu0 %vm955_vm1, %v14777_v36  ;;  %v14874_v39 = vld [vmem:[%s20881_s6 + $0x15c] sm:$0xf0] }
 0x156   : > { %v2236_v42 = vmax.f32 %v1924_v40, 0.0  ;;  %v12550_v40 = vor.u32 %v14874_v39, %v12549_v38 }
 0x158   : > { %v2361_v43 = vpack.c.bf16 %v2236_v42, %v2235_v41  ;;  %3718 = vmatpush.bf16.msra.mxu3 %v12550_v40 }
 0x159   : > { %v1218_v44 = vpop.f32.mrf.mxu0 }
 0x15a   : > { %v1504_v46 = vmax.f32 %v1218_v44, 0.0  ;;  %12325 = vmatmul.msk.bf16.gmra.mxu2 %vm1709_vm2, %v2361_v43 }
 0x15b   : > { %v1926_v47 = vpop.f32.mrf.mxu1 }
 0x15c   : > { %v1620_v48 = vpack.c.bf16 %v1504_v46, %v1503_v45  ;;  %v1927_v51 = vadd.f32 %v15778_v9, %v1926_v47  ;;  %v12517_v45 = vld [vmem:[%s20881_s6 + $0x100] sm:$0xf] }
 0x15d   : > { %v14866_v46 = vld [vmem:[%s20881_s6 + $0x11c] sm:$0xf0] }
 0x15e   : > { %12254 = vmatmul.msk.bf16.gmra.mxu1 %vm1709_vm2, %v1620_v48  ;;  %v2237_v54 = vmax.f32 %v1927_v51, 0.0  ;;  %v12518_v48 = vor.u32 %v14866_v46, %v12517_v45  ;;  %v14858_v51 = vld [vmem:[%s20881_s6 + $0xdc] sm:$0xf0] }
 0x160   : > { %3719 = vmatpush.bf16.msra.mxu3 %v12518_v48 }
 0x161   : > { %v1221_v50 = vpop.f32.mrf.mxu0 }
 0x162   : > { %v1505_v58 = vmax.f32 %v1221_v50, 0.0  ;;  %v12485_v50 = vld [vmem:[%s20881_s6 + $0xc0] sm:$0xf] }
 0x163   : > { %v1928_v52 = vpop.f32.mrf.mxu1 }
 0x164   : > { %v1929_v53 = vadd.f32 %v15778_v9, %v1928_v52  ;;  %12183 = vmatmul.msk.bf16.gmra.mxu0 %vm955_vm1, %v14778_v49  ;;  %v12486_v52 = vor.u32 %v14858_v51, %v12485_v50 }
 0x166   : > { %v2238_v55 = vmax.f32 %v1929_v53, 0.0  ;;  %v14782_v53 = vld [vmem:[%s15707_s17 + $0xc0] sm:$0xff]  ;;  %3720 = vmatpush.bf16.msra.mxu3 %v12486_v52  ;;  %v14785_v52 = vld [vmem:[%s15707_s17 + $0xd8] sm:$0xff] }
 0x168   : > { %v2362_v56 = vpack.c.bf16 %v2238_v55, %v2237_v54 }
 0x169   : > { %v1223_v57 = vpop.f32.mrf.mxu0 }
 0x16a   : > { %v1506_v59 = vmax.f32 %v1223_v57, 0.0  ;;  %12326 = vmatmul.msk.bf16.gmra.mxu2 %vm1709_vm2, %v2362_v56  ;;  %v12453_v56 = vld [vmem:[%s20881_s6 + $0x80] sm:$0xf] }
 0x16b   : > { %v1931_v60 = vpop.f32.mrf.mxu1  ;;  %v14850_v57 = vld [vmem:[%s20881_s6 + $0x9c] sm:$0xf0] }
 0x16c   : > { %v1621_v61 = vpack.c.bf16 %v1506_v59, %v1505_v58  ;;  %v1932_v0 = vadd.f32 %v15778_v9, %v1931_v60  ;;  %v12454_v59 = vor.u32 %v14850_v57, %v12453_v56 }
 0x16e   : > { %12255 = vmatmul.msk.bf16.gmra.mxu1 %vm1709_vm2, %v1621_v61  ;;  %v2239_v3 = vmax.f32 %v1932_v0, 0.0  ;;  %3721 = vmatpush.bf16.msra.mxu3 %v12454_v59  ;;  %v14842_v0 = vld [vmem:[%s20881_s6 + $0x5c] sm:$0xf0] }
 0x171   : > { %v1226_v63 = vpop.f32.mrf.mxu0 }
 0x172   : > { %v1507_v7 = vmax.f32 %v1226_v63, 0.0  ;;  %v12421_v63 = vld [vmem:[%s20881_s6 + $0x40] sm:$0xf] }
 0x173   : > { %v1933_v1 = vpop.f32.mrf.mxu1 }
 0x174   : > { %v1934_v2 = vadd.f32 %v15778_v9, %v1933_v1  ;;  %12184 = vmatmul.msk.bf16.gmra.mxu0 %vm955_vm1, %v14779_v62  ;;  %v12422_v1 = vor.u32 %v14842_v0, %v12421_v63 }
 0x176   : > { %v2240_v4 = vmax.f32 %v1934_v2, 0.0  ;;  %3722 = vmatpush.bf16.msra.mxu3 %v12422_v1 }
 0x178   : > { %v2363_v5 = vpack.c.bf16 %v2240_v4, %v2239_v3 }
 0x179   : > { %v1228_v6 = vpop.f32.mrf.mxu0 }
 0x17a   : > { %v1508_v8 = vmax.f32 %v1228_v6, 0.0  ;;  %12327 = vmatmul.msk.bf16.gmra.mxu2 %vm1709_vm2, %v2363_v5  ;;  %v12389_v6 = vld [vmem:[%s20881_s6] sm:$0xf] }
 0x17b   : > { %v1936_v10 = vpop.f32.mrf.mxu1 }
 0x17c   : > { %v1622_v11 = vpack.c.bf16 %v1508_v8, %v1507_v7  ;;  %v1937_v14 = vadd.f32 %v15778_v9, %v1936_v10  ;;  %v14834_v7 = vld [vmem:[%s20881_s6 + $0x1c] sm:$0xf0] }
 0x17d   : > { %v12390_v10 = vor.u32 %v14834_v7, %v12389_v6 }
 0x17e   : > { %12256 = vmatmul.msk.bf16.gmra.mxu1 %vm1709_vm2, %v1622_v11  ;;  %v2241_v17 = vmax.f32 %v1937_v14, 0.0 }
 0x17f   : > { %3723 = vmatpush.bf16.msra.mxu3 %v12390_v10 }
 0x181   : > { %v1231_v13 = vpop.f32.mrf.mxu0 }
 0x182   : > { %v1509_v21 = vmax.f32 %v1231_v13, 0.0 }
 0x183   : > { %v1938_v15 = vpop.f32.mrf.mxu1 }
 0x184   : > { %v1939_v16 = vadd.f32 %v15778_v9, %v1938_v15  ;;  %12185 = vmatmul.msk.bf16.gmra.mxu0 %vm955_vm1, %v14780_v12  ;;  %v14783_v12 = vld [vmem:[%s15707_s17 + $0xc8] sm:$0xff] }
 0x186   : > { %v2242_v18 = vmax.f32 %v1939_v16, 0.0 }
 0x188   : > { %v2364_v19 = vpack.c.bf16 %v2242_v18, %v2241_v17 }
 0x189   : > { %v1233_v20 = vpop.f32.mrf.mxu0 }
 0x18a   : > { %v1510_v22 = vmax.f32 %v1233_v20, 0.0  ;;  %12328 = vmatmul.msk.bf16.gmra.mxu2 %vm1709_vm2, %v2364_v19 }
 0x18b   : > { %v1941_v23 = vpop.f32.mrf.mxu1 }
 0x18c   : > { %v1623_v24 = vpack.c.bf16 %v1510_v22, %v1509_v21  ;;  %v1942_v30 = vadd.f32 %v15778_v9, %v1941_v23 }
 0x18e   : > { %12257 = vmatmul.msk.bf16.gmra.mxu1 %vm1709_vm2, %v1623_v24  ;;  %v2243_v36 = vmax.f32 %v1942_v30, 0.0 }
 0x191   : > { %v1236_v29 = vpop.f32.mrf.mxu0 }
 0x192   : > { %v1511_v43 = vmax.f32 %v1236_v29, 0.0 }
 0x193   : > { %v1943_v33 = vpop.f32.mrf.mxu1 }
 0x194   : > { %v1944_v35 = vadd.f32 %v15778_v9, %v1943_v33  ;;  %12186 = vmatmul.msk.bf16.gmra.mxu0 %vm955_vm1, %v14781_v28  ;;  %v14784_v28 = vld [vmem:[%s15707_s17 + $0xd0] sm:$0xff] }
 0x196   : > { %v2244_v37 = vmax.f32 %v1944_v35, 0.0 }
 0x198   : > { %v2365_v41 = vpack.c.bf16 %v2244_v37, %v2243_v36 }
 0x199   : > { %v1238_v42 = vpop.f32.mrf.mxu0 }
 0x19a   : > { %v1512_v44 = vmax.f32 %v1238_v42, 0.0  ;;  %12329 = vmatmul.msk.bf16.gmra.mxu2 %vm1709_vm2, %v2365_v41 }
 0x19b   : > { %v1946_v47 = vpop.f32.mrf.mxu1 }
 0x19c   : > { %v1624_v49 = vpack.c.bf16 %v1512_v44, %v1511_v43  ;;  %v1947_v55 = vadd.f32 %v15778_v9, %v1946_v47 }
 0x19e   : > { %12258 = vmatmul.msk.bf16.gmra.mxu1 %vm1709_vm2, %v1624_v49  ;;  %v2245_v61 = vmax.f32 %v1947_v55, 0.0 }
 0x1a1   : > { %v1241_v54 = vpop.f32.mrf.mxu0 }
 0x1a2   : > { %v1513_v2 = vmax.f32 %v1241_v54, 0.0 }
 0x1a3   : > { %v1948_v58 = vpop.f32.mrf.mxu1 }
 0x1a4   : > { %v1949_v60 = vadd.f32 %v15778_v9, %v1948_v58  ;;  %12187 = vmatmul.msk.bf16.gmra.mxu0 %vm955_vm1, %v14782_v53 }
 0x1a6   : > { %v2246_v62 = vmax.f32 %v1949_v60, 0.0 }
 0x1a8   : > { %v2366_v3 = vpack.c.bf16 %v2246_v62, %v2245_v61 }
 0x1a9   : > { %v1243_v4 = vpop.f32.mrf.mxu0 }
 0x1aa   : > { %v1514_v5 = vmax.f32 %v1243_v4, 0.0  ;;  %12330 = vmatmul.msk.bf16.gmra.mxu2 %vm1709_vm2, %v2366_v3 }
 0x1ab   : > { %v1951_v8 = vpop.f32.mrf.mxu1 }
 0x1ac   : > { %v1625_v11 = vpack.c.bf16 %v1514_v5, %v1513_v2  ;;  %v1952_v14 = vadd.f32 %v15778_v9, %v1951_v8 }
 0x1ae   : > { %12259 = vmatmul.msk.bf16.gmra.mxu1 %vm1709_vm2, %v1625_v11  ;;  %v2247_v17 = vmax.f32 %v1952_v14, 0.0 }
 0x1b1   : > { %v1246_v13 = vpop.f32.mrf.mxu0 }
 0x1b2   : > { %v1515_v19 = vmax.f32 %v1246_v13, 0.0  ;;  %v14786_v13 = vld [vmem:[%s15707_s17 + $0xe0] sm:$0xff] }
 0x1b3   : > { %v1953_v15 = vpop.f32.mrf.mxu1 }
 0x1b4   : > { %v1954_v16 = vadd.f32 %v15778_v9, %v1953_v15  ;;  %12188 = vmatmul.msk.bf16.gmra.mxu0 %vm955_vm1, %v14783_v12 }
 0x1b6   : > { %v2248_v18 = vmax.f32 %v1954_v16, 0.0 }
 0x1b8   : > { %v2367_v20 = vpack.c.bf16 %v2248_v18, %v2247_v17 }
 0x1b9   : > { %v1248_v21 = vpop.f32.mrf.mxu0 }
 0x1ba   : > { %v1516_v22 = vmax.f32 %v1248_v21, 0.0  ;;  %12331 = vmatmul.msk.bf16.gmra.mxu2 %vm1709_vm2, %v2367_v20  ;;  %v14893_v20 = vld [vmem:[%s20881_s6 + $0x1f4] sm:$0xf0] }
 0x1bb   : > { %v1956_v23 = vpop.f32.mrf.mxu1 }
 0x1bc   : > { %v1626_v24 = vpack.c.bf16 %v1516_v22, %v1515_v19  ;;  %v1957_v30 = vadd.f32 %v15778_v9, %v1956_v23  ;;  %v12637_v19 = vld [vmem:[%s20881_s6 + $0x1d8] sm:$0xf] }
 0x1bd   : > { %v2660_v26 = vpop.f32.mrf.mxu2  ;;  %v12638_v22 = vor.u32 %v14893_v20, %v12637_v19 }
 0x1be   : > { %12260 = vmatmul.msk.bf16.gmra.mxu1 %vm1709_vm2, %v1626_v24  ;;  %v2661_v27 = vadd.f32 %v15885_v25, %v2660_v26  ;;  %v2249_v35 = vmax.f32 %v1957_v30, 0.0 }
 0x1bf   : > { %4250 = vmatpush.bf16.msrb.mxu2 %v12638_v22 }
 0x1c0   : > { %v2980_v32 = vmax.f32 %v2661_v27, 0.0 }
 0x1c1   : > { %v1251_v29 = vpop.f32.mrf.mxu0 }
 0x1c2   : > { %v3108_v38 = vpack.c.bf16 %v2980_v32, %v2980_v32  ;;  %v1517_v39 = vmax.f32 %v1251_v29, 0.0  ;;  %v12615_v32 = vld [vmem:[%s20881_s6 + $0x1e0] sm:$0xf0] }
 0x1c3   : > { %v1958_v31 = vpop.f32.mrf.mxu1 }
 0x1c4   : > { %v1959_v33 = vadd.f32 %v15778_v9, %v1958_v31  ;;  %12189 = vmatmul.msk.bf16.gmra.mxu0 %vm955_vm1, %v14784_v28  ;;  %v3332_v46 = vunpack.c.l.b16 %v3108_v38  ;;  %v14886_v31 = vld [vmem:[%s20881_s6 + $0x1c4] sm:$0xf] }
 0x1c5   : > { %v2662_v34 = vpop.f32.mrf.mxu2 }
 0x1c6   : > { %v2250_v36 = vmax.f32 %v1959_v33, 0.0  ;;  %v2663_v37 = vadd.f32 %v15885_v25, %v2662_v34  ;;  %v12618_v34 = vor.u32 %v14886_v31, %v12615_v32 }
 0x1c8   : > { %v2981_v40 = vmax.f32 %v2663_v37, 0.0  ;;  %v2368_v41 = vpack.c.bf16 %v2250_v36, %v2249_v35  ;;  %3805 = vmatpush.bf16.msrb.mxu3 %v12618_v34 }
 0x1c9   : > { %v1253_v42 = vpop.f32.mrf.mxu0 }
 0x1ca   : > { %v3109_v43 = vpack.c.bf16 %v2981_v40, %v2981_v40  ;;  %v1518_v44 = vmax.f32 %v1253_v42, 0.0  ;;  %12332 = vmatmul.msk.bf16.gmra.mxu2 %vm1709_vm2, %v2368_v41 }
 0x1cb   : > { %v1961_v45 = vpop.f32.mrf.mxu1 }
 0x1cc   : > { %v3333_v47 = vunpack.c.l.b16 %v3109_v43  ;;  %v1627_v48 = vpack.c.bf16 %v1518_v44, %v1517_v39  ;;  %v1962_v54 = vadd.f32 %v15778_v9, %v1961_v45  ;;  %v12629_v43 = vld [vmem:[%s20881_s6 + $0x1d0] sm:$0xf] }
 0x1cd   : > { %v2665_v49 = vpop.f32.mrf.mxu2  ;;  %v14892_v44 = vld [vmem:[%s20881_s6 + $0x1ec] sm:$0xf0] }
 0x1ce   : > { %v15895_v50 = vpack.c.b16 %v3333_v47, %v3332_v46  ;;  %12261 = vmatmul.msk.bf16.gmra.mxu1 %vm1709_vm2, %v1627_v48  ;;  %v2666_v51 = vadd.f32 %v15885_v25, %v2665_v49  ;;  %v2251_v59 = vmax.f32 %v1962_v54, 0.0  ;;  %v12630_v45 = vor.u32 %v14892_v44, %v12629_v43  ;;  %v14888_v46 = vld [vmem:[%s20881_s6 + $0x1d4] sm:$0xf]  ;;  %v14787_v49 = vld [vmem:[%s15707_s17 + $0xe8] sm:$0xff] }
 0x1cf   : > { %v12631_v47 = vld [vmem:[%s20881_s6 + $0x1f0] sm:$0xf0] }
 0x1d0   : > { %3724 = vmatmul.bf16.vlgmr.msra.gmra.mxu3 %v15895_v50  ;;  %v2982_v56 = vmax.f32 %v2666_v51, 0.0  ;;  %v12634_v51 = vor.u32 %v14888_v46, %v12631_v47  ;;  %4072 = vmatpush.bf16.msrb.mxu0 %v12630_v45 }
 0x1d1   : > { %v1256_v53 = vpop.f32.mrf.mxu0 }
 0x1d2   : > { %v3110_v62 = vpack.c.bf16 %v2982_v56, %v2982_v56  ;;  %v1519_v63 = vmax.f32 %v1256_v53, 0.0  ;;  %4161 = vmatpush.bf16.msrb.mxu1 %v12634_v51 }
 0x1d3   : > { %v1963_v55 = vpop.f32.mrf.mxu1 }
 0x1d4   : > { %v1964_v57 = vadd.f32 %v15778_v9, %v1963_v55  ;;  %12190 = vmatmul.msk.bf16.gmra.mxu0 %vm955_vm1, %v14785_v52  ;;  %v3334_v6 = vunpack.c.l.b16 %v3110_v62 }
 0x1d5   : > { %v2667_v58 = vpop.f32.mrf.mxu2 }
 0x1d6   : > { %v2252_v60 = vmax.f32 %v1964_v57, 0.0  ;;  %v2668_v61 = vadd.f32 %v15885_v25, %v2667_v58 }
 0x1d8   : > { %v2983_v0 = vmax.f32 %v2668_v61, 0.0  ;;  %v2369_v1 = vpack.c.bf16 %v2252_v60, %v2251_v59 }
 0x1d9   : > { %v1258_v2 = vpop.f32.mrf.mxu0 }
 0x1da   : > { %v3111_v3 = vpack.c.bf16 %v2983_v0, %v2983_v0  ;;  %v1520_v4 = vmax.f32 %v1258_v2, 0.0  ;;  %12333 = vmatmul.msk.bf16.gmra.mxu2 %vm1709_vm2, %v2369_v1 }
 0x1db   : > { %v1966_v5 = vpop.f32.mrf.mxu1 }
 0x1dc   : > { %v3335_v7 = vunpack.c.l.b16 %v3111_v3  ;;  %v1628_v8 = vpack.c.bf16 %v1520_v4, %v1519_v63  ;;  %v1967_v15 = vadd.f32 %v15778_v9, %v1966_v5 }
 0x1dd   : > { %v2670_v10 = vpop.f32.mrf.mxu2 }
 0x1de   : > { %v15906_v11 = vpack.c.b16 %v3335_v7, %v3334_v6  ;;  %12262 = vmatmul.msk.bf16.gmra.mxu1 %vm1709_vm2, %v1628_v8  ;;  %v2671_v12 = vadd.f32 %v15885_v25, %v2670_v10  ;;  %v2253_v23 = vmax.f32 %v1967_v15, 0.0 }
 0x1e0   : > { %3729 = vmatmul.bf16.gmra.mxu3 %v15906_v11  ;;  %v2984_v17 = vmax.f32 %v2671_v12, 0.0 }
 0x1e1   : > { %v1261_v14 = vpop.f32.mrf.mxu0 }
 0x1e2   : > { %v3112_v27 = vpack.c.bf16 %v2984_v17, %v2984_v17  ;;  %v1521_v28 = vmax.f32 %v1261_v14, 0.0 }
 0x1e3   : > { %v1968_v16 = vpop.f32.mrf.mxu1 }
 0x1e4   : > { %v1969_v18 = vadd.f32 %v15778_v9, %v1968_v16  ;;  %12191 = vmatmul.msk.bf16.gmra.mxu0 %vm955_vm1, %v14786_v13  ;;  %v3336_v38 = vunpack.c.l.b16 %v3112_v27  ;;  %v14788_v13 = vld [vmem:[%s15707_s17 + $0xf0] sm:$0xff] }
 0x1e5   : > { %v2672_v21 = vpop.f32.mrf.mxu2 }
 0x1e6   : > { %v2254_v24 = vmax.f32 %v1969_v18, 0.0  ;;  %v2673_v26 = vadd.f32 %v15885_v25, %v2672_v21 }
 0x1e8   : > { %v2985_v29 = vmax.f32 %v2673_v26, 0.0  ;;  %v2370_v30 = vpack.c.bf16 %v2254_v24, %v2253_v23 }
 0x1e9   : > { %v1263_v33 = vpop.f32.mrf.mxu0 }
 0x1ea   : > { %v3113_v35 = vpack.c.bf16 %v2985_v29, %v2985_v29  ;;  %v1522_v36 = vmax.f32 %v1263_v33, 0.0  ;;  %12334 = vmatmul.msk.bf16.gmra.mxu2 %vm1709_vm2, %v2370_v30  ;;  %v12583_v29 = vld [vmem:[%s20881_s6 + $0x1a0] sm:$0xf0] }
 0x1eb   : > { %v1971_v37 = vpop.f32.mrf.mxu1 }
 0x1ec   : > { %v3337_v39 = vunpack.c.l.b16 %v3113_v35  ;;  %v1629_v40 = vpack.c.bf16 %v1522_v36, %v1521_v28  ;;  %v1972_v53 = vadd.f32 %v15778_v9, %v1971_v37  ;;  %v14878_v28 = vld [vmem:[%s20881_s6 + $0x184] sm:$0xf] }
 0x1ed   : > { %v2675_v41 = vpop.f32.mrf.mxu2  ;;  %v12586_v31 = vor.u32 %v14878_v28, %v12583_v29 }
 0x1ee   : > { %v15929_v42 = vpack.c.b16 %v3337_v39, %v3336_v38  ;;  %12263 = vmatmul.msk.bf16.gmra.mxu1 %vm1709_vm2, %v1629_v40  ;;  %v2676_v48 = vadd.f32 %v15885_v25, %v2675_v41  ;;  %v2255_v58 = vmax.f32 %v1972_v53, 0.0  ;;  %v14789_v41 = vld [vmem:[%s15707_s17 + $0xf8] sm:$0xff] }
 0x1ef   : > { %3806 = vmatpush.bf16.msrb.mxu3 %v12586_v31 }
 0x1f0   : > { %3734 = vmatmul.bf16.gmra.mxu3 %v15929_v42  ;;  %v2986_v55 = vmax.f32 %v2676_v48, 0.0 }
 0x1f1   : > { %v1266_v52 = vpop.f32.mrf.mxu0 }
 0x1f2   : > { %v3114_v61 = vpack.c.bf16 %v2986_v55, %v2986_v55  ;;  %v1523_v62 = vmax.f32 %v1266_v52, 0.0 }
 0x1f3   : > { %v1973_v54 = vpop.f32.mrf.mxu1 }
 0x1f4   : > { %v1974_v56 = vadd.f32 %v15778_v9, %v1973_v54  ;;  %12192 = vmatmul.msk.bf16.gmra.mxu0 %vm955_vm1, %v14787_v49  ;;  %v3338_v5 = vunpack.c.l.b16 %v3114_v61 }
 0x1f5   : > { %v2677_v57 = vpop.f32.mrf.mxu2 }
 0x1f6   : > { %v2256_v59 = vmax.f32 %v1974_v56, 0.0  ;;  %v2678_v60 = vadd.f32 %v15885_v25, %v2677_v57 }
 0x1f8   : > { %v2371_v63 = vpack.c.bf16 %v2256_v59, %v2255_v58  ;;  %v2987_v0 = vmax.f32 %v2678_v60, 0.0 }
 0x1f9   : > { %v1268_v1 = vpop.f32.mrf.mxu0 }
 0x1fa   : > { %v3115_v2 = vpack.c.bf16 %v2987_v0, %v2987_v0  ;;  %v1524_v3 = vmax.f32 %v1268_v1, 0.0  ;;  %12335 = vmatmul.msk.bf16.gmra.mxu2 %vm1709_vm2, %v2371_v63 }
 0x1fb   : > { %v1976_v4 = vpop.f32.mrf.mxu1 }
 0x1fc   : > { %v3339_v6 = vunpack.c.l.b16 %v3115_v2  ;;  %v1630_v7 = vpack.c.bf16 %v1524_v3, %v1523_v62  ;;  %v1977_v15 = vadd.f32 %v15778_v9, %v1976_v4  ;;  %v14790_v3 = vld [vmem:[%s15707_s17 + $0x100] sm:$0xff] }
 0x1fd   : > { %v2680_v8 = vpop.f32.mrf.mxu2 }
 0x1fe   : > { %v15952_v10 = vpack.c.b16 %v3339_v6, %v3338_v5  ;;  %12264 = vmatmul.msk.bf16.gmra.mxu1 %vm1709_vm2, %v1630_v7  ;;  %v2681_v12 = vadd.f32 %v15885_v25, %v2680_v8  ;;  %v2257_v20 = vmax.f32 %v1977_v15, 0.0 }
 0x200   : > { %3739 = vmatmul.bf16.gmra.mxu3 %v15952_v10  ;;  %v2988_v17 = vmax.f32 %v2681_v12, 0.0 }
 0x201   : > { %v1271_v14 = vpop.f32.mrf.mxu0 }
 0x202   : > { %v3116_v23 = vpack.c.bf16 %v2988_v17, %v2988_v17  ;;  %v1525_v24 = vmax.f32 %v1271_v14, 0.0 }
 0x203   : > { %v1978_v16 = vpop.f32.mrf.mxu1 }
 0x204   : > { %v1979_v18 = vadd.f32 %v15778_v9, %v1978_v16  ;;  %12193 = vmatmul.msk.bf16.gmra.mxu0 %vm955_vm1, %v14788_v13  ;;  %v3340_v35 = vunpack.c.l.b16 %v3116_v23 }
 0x205   : > { %v2682_v19 = vpop.f32.mrf.mxu2 }
 0x206   : > { %v2258_v21 = vmax.f32 %v1979_v18, 0.0  ;;  %v2683_v22 = vadd.f32 %v15885_v25, %v2682_v19 }
 0x208   : > { %v2372_v26 = vpack.c.bf16 %v2258_v21, %v2257_v20  ;;  %v2989_v27 = vmax.f32 %v2683_v22, 0.0  ;;  %v14870_v20 = vld [vmem:[%s20881_s6 + $0x144] sm:$0xf] }
 0x209   : > { %v1273_v30 = vpop.f32.mrf.mxu0  ;;  %v12551_v21 = vld [vmem:[%s20881_s6 + $0x160] sm:$0xf0] }
 0x20a   : > { %v3117_v32 = vpack.c.bf16 %v2989_v27, %v2989_v27  ;;  %v1526_v33 = vmax.f32 %v1273_v30, 0.0  ;;  %12336 = vmatmul.msk.bf16.gmra.mxu2 %vm1709_vm2, %v2372_v26  ;;  %v12554_v23 = vor.u32 %v14870_v20, %v12551_v21 }
 0x20b   : > { %v1981_v34 = vpop.f32.mrf.mxu1 }
 0x20c   : > { %v3341_v36 = vunpack.c.l.b16 %v3117_v32  ;;  %v1631_v37 = vpack.c.bf16 %v1526_v33, %v1525_v24  ;;  %v1982_v44 = vadd.f32 %v15778_v9, %v1981_v34  ;;  %3807 = vmatpush.bf16.msrb.mxu3 %v12554_v23 }
 0x20d   : > { %v2685_v38 = vpop.f32.mrf.mxu2 }
 0x20e   : > { %v15969_v39 = vpack.c.b16 %v3341_v36, %v3340_v35  ;;  %12265 = vmatmul.msk.bf16.gmra.mxu1 %vm1709_vm2, %v1631_v37  ;;  %v2686_v40 = vadd.f32 %v15885_v25, %v2685_v38  ;;  %v2259_v49 = vmax.f32 %v1982_v44, 0.0  ;;  %v14791_v35 = vld [vmem:[%s15707_s17 + $0x108] sm:$0xff] }
 0x210   : > { %3744 = vmatmul.bf16.gmra.mxu3 %v15969_v39  ;;  %v2990_v46 = vmax.f32 %v2686_v40, 0.0 }
 0x211   : > { %v1276_v43 = vpop.f32.mrf.mxu0 }
 0x212   : > { %v3118_v53 = vpack.c.bf16 %v2990_v46, %v2990_v46  ;;  %v1527_v54 = vmax.f32 %v1276_v43, 0.0 }
 0x213   : > { %v1983_v45 = vpop.f32.mrf.mxu1 }
 0x214   : > { %v1984_v47 = vadd.f32 %v15778_v9, %v1983_v45  ;;  %12194 = vmatmul.msk.bf16.gmra.mxu0 %vm955_vm1, %v14789_v41  ;;  %v3342_v61 = vunpack.c.l.b16 %v3118_v53 }
 0x215   : > { %v2687_v48 = vpop.f32.mrf.mxu2 }
 0x216   : > { %v2260_v51 = vmax.f32 %v1984_v47, 0.0  ;;  %v2688_v52 = vadd.f32 %v15885_v25, %v2687_v48 }
 0x218   : > { %v2373_v55 = vpack.c.bf16 %v2260_v51, %v2259_v49  ;;  %v2991_v56 = vmax.f32 %v2688_v52, 0.0 }
 0x219   : > { %v1278_v57 = vpop.f32.mrf.mxu0 }
 0x21a   : > { %v3119_v58 = vpack.c.bf16 %v2991_v56, %v2991_v56  ;;  %v1528_v59 = vmax.f32 %v1278_v57, 0.0  ;;  %12337 = vmatmul.msk.bf16.gmra.mxu2 %vm1709_vm2, %v2373_v55 }
 0x21b   : > { %v1986_v60 = vpop.f32.mrf.mxu1 }
 0x21c   : > { %v3343_v62 = vunpack.c.l.b16 %v3119_v58  ;;  %v1632_v63 = vpack.c.bf16 %v1528_v59, %v1527_v54  ;;  %v1987_v5 = vadd.f32 %v15778_v9, %v1986_v60 }
 0x21d   : > { %v2690_v0 = vpop.f32.mrf.mxu2 }
 0x21e   : > { %v15980_v1 = vpack.c.b16 %v3343_v62, %v3342_v61  ;;  %12266 = vmatmul.msk.bf16.gmra.mxu1 %vm1709_vm2, %v1632_v63  ;;  %v2691_v2 = vadd.f32 %v15885_v25, %v2690_v0  ;;  %v2261_v13 = vmax.f32 %v1987_v5, 0.0  ;;  %v14792_v62 = vld [vmem:[%s15707_s17 + $0x110] sm:$0xff] }
 0x220   : > { %3749 = vmatmul.bf16.gmra.mxu3 %v15980_v1  ;;  %v2992_v7 = vmax.f32 %v2691_v2, 0.0 }
 0x221   : > { %v1281_v4 = vpop.f32.mrf.mxu0 }
 0x222   : > { %v3120_v16 = vpack.c.bf16 %v2992_v7, %v2992_v7  ;;  %v1529_v17 = vmax.f32 %v1281_v4, 0.0 }
 0x223   : > { %v1988_v6 = vpop.f32.mrf.mxu1 }
 0x224   : > { %v1989_v8 = vadd.f32 %v15778_v9, %v1988_v6  ;;  %12195 = vmatmul.msk.bf16.gmra.mxu0 %vm955_vm1, %v14790_v3  ;;  %v3344_v28 = vunpack.c.l.b16 %v3120_v16  ;;  %v12519_v16 = vld [vmem:[%s20881_s6 + $0x120] sm:$0xf0] }
 0x225   : > { %v2692_v12 = vpop.f32.mrf.mxu2 }
 0x226   : > { %v2262_v14 = vmax.f32 %v1989_v8, 0.0  ;;  %v2693_v15 = vadd.f32 %v15885_v25, %v2692_v12 }
 0x228   : > { %v2374_v18 = vpack.c.bf16 %v2262_v14, %v2261_v13  ;;  %v2993_v19 = vmax.f32 %v2693_v15, 0.0  ;;  %v14862_v15 = vld [vmem:[%s20881_s6 + $0x104] sm:$0xf] }
 0x229   : > { %v1283_v22 = vpop.f32.mrf.mxu0 }
 0x22a   : > { %v3121_v24 = vpack.c.bf16 %v2993_v19, %v2993_v19  ;;  %v1530_v26 = vmax.f32 %v1283_v22, 0.0  ;;  %12338 = vmatmul.msk.bf16.gmra.mxu2 %vm1709_vm2, %v2374_v18  ;;  %v12522_v18 = vor.u32 %v14862_v15, %v12519_v16 }
 0x22b   : > { %v1991_v27 = vpop.f32.mrf.mxu1 }
 0x22c   : > { %v3345_v29 = vunpack.c.l.b16 %v3121_v24  ;;  %v1633_v30 = vpack.c.bf16 %v1530_v26, %v1529_v17  ;;  %v1992_v33 = vadd.f32 %v15778_v9, %v1991_v27  ;;  %3808 = vmatpush.bf16.msrb.mxu3 %v12522_v18 }
 0x22d   : > { %v2695_v31 = vpop.f32.mrf.mxu2 }
 0x22e   : > { %v15997_v32 = vpack.c.b16 %v3345_v29, %v3344_v28  ;;  %12267 = vmatmul.msk.bf16.gmra.mxu1 %vm1709_vm2, %v1633_v30  ;;  %v2696_v34 = vadd.f32 %v15885_v25, %v2695_v31  ;;  %v2263_v38 = vmax.f32 %v1992_v33, 0.0  ;;  %v14793_v30 = vld [vmem:[%s15707_s17 + $0x118] sm:$0xff] }
 0x230   : > { %3754 = vmatmul.bf16.gmra.mxu3 %v15997_v32  ;;  %v2994_v40 = vmax.f32 %v2696_v34, 0.0 }
 0x231   : > { %v1286_v36 = vpop.f32.mrf.mxu0 }
 0x232   : > { %v3122_v46 = vpack.c.bf16 %v2994_v40, %v2994_v40  ;;  %v1531_v47 = vmax.f32 %v1286_v36, 0.0 }
 0x233   : > { %v1993_v37 = vpop.f32.mrf.mxu1 }
 0x234   : > { %v1994_v41 = vadd.f32 %v15778_v9, %v1993_v37  ;;  %12196 = vmatmul.msk.bf16.gmra.mxu0 %vm955_vm1, %v14791_v35  ;;  %v3346_v55 = vunpack.c.l.b16 %v3122_v46 }
 0x235   : > { %v2697_v43 = vpop.f32.mrf.mxu2 }
 0x236   : > { %v2264_v44 = vmax.f32 %v1994_v41, 0.0  ;;  %v2698_v45 = vadd.f32 %v15885_v25, %v2697_v43 }
 0x238   : > { %v2375_v48 = vpack.c.bf16 %v2264_v44, %v2263_v38  ;;  %v2995_v49 = vmax.f32 %v2698_v45, 0.0 }
 0x239   : > { %v1288_v51 = vpop.f32.mrf.mxu0 }
 0x23a   : > { %v3123_v52 = vpack.c.bf16 %v2995_v49, %v2995_v49  ;;  %v1532_v53 = vmax.f32 %v1288_v51, 0.0  ;;  %12339 = vmatmul.msk.bf16.gmra.mxu2 %vm1709_vm2, %v2375_v48 }
 0x23b   : > { %v1996_v54 = vpop.f32.mrf.mxu1 }
 0x23c   : > { %v3347_v56 = vunpack.c.l.b16 %v3123_v52  ;;  %v1634_v57 = vpack.c.bf16 %v1532_v53, %v1531_v47  ;;  %v1997_v60 = vadd.f32 %v15778_v9, %v1996_v54 }
 0x23d   : > { %v2700_v58 = vpop.f32.mrf.mxu2 }
 0x23e   : > { %v16008_v59 = vpack.c.b16 %v3347_v56, %v3346_v55  ;;  %12268 = vmatmul.msk.bf16.gmra.mxu1 %vm1709_vm2, %v1634_v57  ;;  %v2701_v61 = vadd.f32 %v15885_v25, %v2700_v58  ;;  %v2265_v2 = vmax.f32 %v1997_v60, 0.0 }
 0x240   : > { %3759 = vmatmul.bf16.gmra.mxu3 %v16008_v59  ;;  %v2996_v3 = vmax.f32 %v2701_v61, 0.0 }
 0x241   : > { %v1291_v63 = vpop.f32.mrf.mxu0 }
 0x242   : > { %v3124_v8 = vpack.c.bf16 %v2996_v3, %v2996_v3  ;;  %v1533_v12 = vmax.f32 %v1291_v63, 0.0 }
 0x243   : > { %v1998_v0 = vpop.f32.mrf.mxu1 }
 0x244   : > { %v1999_v4 = vadd.f32 %v15778_v9, %v1998_v0  ;;  %12197 = vmatmul.msk.bf16.gmra.mxu0 %vm955_vm1, %v14792_v62  ;;  %v3348_v22 = vunpack.c.l.b16 %v3124_v8  ;;  %v14794_v62 = vld [vmem:[%s15707_s17 + $0x120] sm:$0xff]  ;;  %v14885_v8 = vld [vmem:[%s20881_s6 + $0x1b4] sm:$0xf0] }
 0x245   : > { %v2702_v5 = vpop.f32.mrf.mxu2 }
 0x246   : > { %v2266_v6 = vmax.f32 %v1999_v4, 0.0  ;;  %v2703_v7 = vadd.f32 %v15885_v25, %v2702_v5 }
 0x248   : > { %v2376_v13 = vpack.c.bf16 %v2266_v6, %v2265_v2  ;;  %v2997_v14 = vmax.f32 %v2703_v7, 0.0  ;;  %v12605_v7 = vld [vmem:[%s20881_s6 + $0x198] sm:$0xf] }
 0x249   : > { %v1293_v17 = vpop.f32.mrf.mxu0 }
 0x24a   : > { %v3125_v19 = vpack.c.bf16 %v2997_v14, %v2997_v14  ;;  %v1534_v20 = vmax.f32 %v1293_v17, 0.0  ;;  %12340 = vmatmul.msk.bf16.gmra.mxu2 %vm1709_vm2, %v2376_v13  ;;  %v12606_v13 = vor.u32 %v14885_v8, %v12605_v7 }
 0x24b   : > { %v2001_v21 = vpop.f32.mrf.mxu1 }
 0x24c   : > { %v3349_v23 = vunpack.c.l.b16 %v3125_v19  ;;  %v1635_v24 = vpack.c.bf16 %v1534_v20, %v1533_v12  ;;  %v2002_v28 = vadd.f32 %v15778_v9, %v2001_v21  ;;  %4251 = vmatpush.bf16.msrb.mxu2 %v12606_v13  ;;  %v14854_v19 = vld [vmem:[%s20881_s6 + $0xc4] sm:$0xf] }
 0x24d   : > { %v2705_v26 = vpop.f32.mrf.mxu2  ;;  %v12487_v20 = vld [vmem:[%s20881_s6 + $0xe0] sm:$0xf0] }
 0x24e   : > { %v16025_v27 = vpack.c.b16 %v3349_v23, %v3348_v22  ;;  %12269 = vmatmul.msk.bf16.gmra.mxu1 %vm1709_vm2, %v1635_v24  ;;  %v2706_v29 = vadd.f32 %v15885_v25, %v2705_v26  ;;  %v2267_v35 = vmax.f32 %v2002_v28, 0.0  ;;  %v12490_v22 = vor.u32 %v14854_v19, %v12487_v20 }
 0x250   : > { %3764 = vmatmul.bf16.gmra.mxu3 %v16025_v27  ;;  %v2998_v36 = vmax.f32 %v2706_v29, 0.0 }
 0x251   : > { %v1296_v31 = vpop.f32.mrf.mxu0  ;;  %3809 = vmatpush.bf16.msrb.mxu3 %v12490_v22 }
 0x252   : > { %v3126_v43 = vpack.c.bf16 %v2998_v36, %v2998_v36  ;;  %v1535_v44 = vmax.f32 %v1296_v31, 0.0  ;;  %v12597_v36 = vld [vmem:[%s20881_s6 + $0x190] sm:$0xf] }
 0x253   : > { %v2003_v33 = vpop.f32.mrf.mxu1  ;;  %v3725_v34 = vpop.f32.mrf.mxu3 }
 0x254   : > { %v2004_v37 = vadd.f32 %v15778_v9, %v2003_v33  ;;  %12198 = vmatmul.msk.bf16.gmra.mxu0 %vm955_vm1, %v14793_v30  ;;  %v3350_v53 = vunpack.c.l.b16 %v3126_v43  ;;  %v16077_v43 = vld [vmem:[%s20878_s3] ss:$0 sm:$0xff] }
 0x255   : > { %v2707_v38 = vpop.f32.mrf.mxu2 }
 0x256   : > { %v2268_v40 = vmax.f32 %v2004_v37, 0.0  ;;  %v2708_v41 = vadd.f32 %v15885_v25, %v2707_v38  ;;  %v14884_v37 = vld [vmem:[%s20881_s6 + $0x1ac] sm:$0xf0] }
 0x257   : > { %v12598_v38 = vor.u32 %v14884_v37, %v12597_v36  ;;  %v14846_v36 = vld [vmem:[%s20881_s6 + $0x84] sm:$0xf] }
 0x258   : > { %v2377_v45 = vpack.c.bf16 %v2268_v40, %v2267_v35  ;;  %v2999_v46 = vmax.f32 %v2708_v41, 0.0  ;;  %v14880_v40 = vld [vmem:[%s20881_s6 + $0x194] sm:$0xf]  ;;  %v12455_v37 = vld [vmem:[%s20881_s6 + $0xa0] sm:$0xf0] }
 0x259   : > { %v1298_v47 = vpop.f32.mrf.mxu0  ;;  %v12599_v41 = vld [vmem:[%s20881_s6 + $0x1b0] sm:$0xf0]  ;;  %4073 = vmatpush.bf16.msrb.mxu0 %v12598_v38 }
 0x25a   : > { %v3127_v48 = vpack.c.bf16 %v2999_v46, %v2999_v46  ;;  %v1536_v49 = vmax.f32 %v1298_v47, 0.0  ;;  %12341 = vmatmul.msk.bf16.gmra.mxu2 %vm1709_vm2, %v2377_v45  ;;  %v14795_v46 = vld [vmem:[%s15707_s17 + $0x128] sm:$0xff]  ;;  %v12602_v47 = vor.u32 %v14880_v40, %v12599_v41  ;;  %v12458_v40 = vor.u32 %v14846_v36, %v12455_v37 }
 0x25b   : > { %v2006_v51 = vpop.f32.mrf.mxu1  ;;  %v3727_v52 = vpop.f32.mrf.mxu3 }
 0x25c   : > { %v3351_v54 = vunpack.c.l.b16 %v3127_v48  ;;  %v1636_v55 = vpack.c.bf16 %v1536_v49, %v1535_v44  ;;  %v4436_v56 = vmax.f32 %v3725_v34, %v3727_v52  ;;  %v2007_v60 = vadd.f32 %v15778_v9, %v2006_v51  ;;  %4162 = vmatpush.bf16.msrb.mxu1 %v12602_v47  ;;  %3810 = vmatpush.bf16.msrb.mxu3 %v12458_v40 }
 0x25d   : > { %v2710_v57 = vpop.f32.mrf.mxu2 }
 0x25e   : > { %v16036_v58 = vpack.c.b16 %v3351_v54, %v3350_v53  ;;  %12270 = vmatmul.msk.bf16.gmra.mxu1 %vm1709_vm2, %v1636_v55  ;;  %v2711_v61 = vadd.f32 %v15885_v25, %v2710_v57  ;;  %v2269_v3 = vmax.f32 %v2007_v60, 0.0 }
 0x260   : > { %3769 = vmatmul.bf16.gmra.mxu3 %v16036_v58  ;;  %v3000_v4 = vmax.f32 %v2711_v61, 0.0 }
 0x261   : > { %v1301_v63 = vpop.f32.mrf.mxu0 }
 0x262   : > { %v3128_v16 = vpack.c.bf16 %v3000_v4, %v3000_v4  ;;  %v1537_v17 = vmax.f32 %v1301_v63, 0.0 }
 0x263   : > { %v2008_v0 = vpop.f32.mrf.mxu1  ;;  %v3730_v2 = vpop.f32.mrf.mxu3 }
 0x264   : > { %v2009_v5 = vadd.f32 %v15778_v9, %v2008_v0  ;;  %v4437_v6 = vmax.f32 %v4436_v56, %v3730_v2  ;;  %12199 = vmatmul.msk.bf16.gmra.mxu0 %vm955_vm1, %v14794_v62  ;;  %v3352_v29 = vunpack.c.l.b16 %v3128_v16 }
 0x265   : > { %v2712_v12 = vpop.f32.mrf.mxu2 }
 0x266   : > { %v2270_v14 = vmax.f32 %v2009_v5, 0.0  ;;  %v2713_v15 = vadd.f32 %v15885_v25, %v2712_v12 }
 0x268   : > { %v2378_v9 = vpack.c.bf16 %v2270_v14, %v2269_v3  ;;  %v3001_v18 = vmax.f32 %v2713_v15, 0.0 }
 0x269   : > { %v1303_v21 = vpop.f32.mrf.mxu0 }
 0x26a   : > { %v3129_v23 = vpack.c.bf16 %v3001_v18, %v3001_v18  ;;  %v1538_v24 = vmax.f32 %v1303_v21, 0.0  ;;  %12342 = vmatmul.msk.bf16.gmra.mxu2 %vm1709_vm2, %v2378_v9  ;;  %v14796_v9 = vld [vmem:[%s15707_s17 + $0x130] sm:$0xff] }
 0x26b   : > { %v2011_v26 = vpop.f32.mrf.mxu1  ;;  %v3732_v28 = vpop.f32.mrf.mxu3 }
 0x26c   : > { %v3353_v30 = vunpack.c.l.b16 %v3129_v23  ;;  %v1637_v31 = vpack.c.bf16 %v1538_v24, %v1537_v17  ;;  %v4438_v33 = vmax.f32 %v4437_v6, %v3732_v28  ;;  %v2012_v44 = vadd.f32 %v16077_v43, %v2011_v26 }
 0x26d   : > { %v2715_v34 = vpop.f32.mrf.mxu2 }
 0x26e   : > { %v16059_v35 = vpack.c.b16 %v3353_v30, %v3352_v29  ;;  %12271 = vmatmul.msk.bf16.gmra.mxu1 %vm1709_vm2, %v1637_v31  ;;  %v2716_v45 = vadd.f32 %v15885_v25, %v2715_v34  ;;  %v2271_v52 = vmax.f32 %v2012_v44, 0.0 }
 0x270   : > { %3774 = vmatmul.bf16.gmra.mxu3 %v16059_v35  ;;  %v3002_v53 = vmax.f32 %v2716_v45, 0.0 }
 0x271   : > { %v1306_v48 = vpop.f32.mrf.mxu0 }
 0x272   : > { %v3130_v61 = vpack.c.bf16 %v3002_v53, %v3002_v53  ;;  %v1539_v62 = vmax.f32 %v1306_v48, 0.0 }
 0x273   : > { %v2013_v49 = vpop.f32.mrf.mxu1  ;;  %v3735_v51 = vpop.f32.mrf.mxu3 }
 0x274   : > { %v2014_v54 = vadd.f32 %v16077_v43, %v2013_v49  ;;  %v4439_v55 = vmax.f32 %v4438_v33, %v3735_v51  ;;  %12200 = vmatmul.msk.bf16.gmra.mxu0 %vm955_vm1, %v14795_v46  ;;  %v3354_v7 = vunpack.c.l.b16 %v3130_v61 }
 0x275   : > { %v2717_v56 = vpop.f32.mrf.mxu2 }
 0x276   : > { %v2272_v57 = vmax.f32 %v2014_v54, 0.0  ;;  %v2718_v60 = vadd.f32 %v15885_v25, %v2717_v56  ;;  %v14797_v56 = vld [vmem:[%s15707_s17 + $0x138] sm:$0xff] }
 0x278   : > { %v2379_v63 = vpack.c.bf16 %v2272_v57, %v2271_v52  ;;  %v3003_v0 = vmax.f32 %v2718_v60, 0.0 }
 0x279   : > { %v1308_v2 = vpop.f32.mrf.mxu0 }
 0x27a   : > { %v3131_v3 = vpack.c.bf16 %v3003_v0, %v3003_v0  ;;  %v1540_v4 = vmax.f32 %v1308_v2, 0.0  ;;  %12343 = vmatmul.msk.bf16.gmra.mxu2 %vm1709_vm2, %v2379_v63 }
 0x27b   : > { %v2016_v5 = vpop.f32.mrf.mxu1  ;;  %v3737_v6 = vpop.f32.mrf.mxu3 }
 0x27c   : > { %v3355_v8 = vunpack.c.l.b16 %v3131_v3  ;;  %v1638_v12 = vpack.c.bf16 %v1540_v4, %v1539_v62  ;;  %v4440_v13 = vmax.f32 %v4439_v55, %v3737_v6  ;;  %v2017_v16 = vadd.f32 %v16077_v43, %v2016_v5 }
 0x27d   : > { %v2720_v14 = vpop.f32.mrf.mxu2 }
 0x27e   : > { %v16087_v15 = vpack.c.b16 %v3355_v8, %v3354_v7  ;;  %12272 = vmatmul.msk.bf16.gmra.mxu1 %vm1709_vm2, %v1638_v12  ;;  %v2721_v17 = vadd.f32 %v15885_v25, %v2720_v14  ;;  %v2273_v21 = vmax.f32 %v2017_v16, 0.0 }
 0x280   : > { %3779 = vmatmul.bf16.gmra.mxu3 %v16087_v15  ;;  %v3004_v22 = vmax.f32 %v2721_v17, 0.0 }
 0x281   : > { %v1311_v18 = vpop.f32.mrf.mxu0 }
 0x282   : > { %v3132_v30 = vpack.c.bf16 %v3004_v22, %v3004_v22  ;;  %v1541_v31 = vmax.f32 %v1311_v18, 0.0 }
 0x283   : > { %v2018_v19 = vpop.f32.mrf.mxu1  ;;  %v3740_v20 = vpop.f32.mrf.mxu3 }
 0x284   : > { %v2019_v23 = vadd.f32 %v16077_v43, %v2018_v19  ;;  %v4441_v24 = vmax.f32 %v4440_v13, %v3740_v20  ;;  %12201 = vmatmul.msk.bf16.gmra.mxu0 %vm955_vm1, %v14796_v9  ;;  %v3356_v47 = vunpack.c.l.b16 %v3132_v30 }
 0x285   : > { %v2722_v26 = vpop.f32.mrf.mxu2 }
 0x286   : > { %v2274_v28 = vmax.f32 %v2019_v23, 0.0  ;;  %v2723_v29 = vadd.f32 %v15885_v25, %v2722_v26 }
 0x288   : > { %v2380_v33 = vpack.c.bf16 %v2274_v28, %v2273_v21  ;;  %v3005_v34 = vmax.f32 %v2723_v29, 0.0  ;;  %v14798_v28 = vld [vmem:[%s15707_s17 + $0x140] sm:$0xff] }
 0x289   : > { %v1313_v38 = vpop.f32.mrf.mxu0 }
 0x28a   : > { %v3133_v41 = vpack.c.bf16 %v3005_v34, %v3005_v34  ;;  %v1542_v44 = vmax.f32 %v1313_v38, 0.0  ;;  %12344 = vmatmul.msk.bf16.gmra.mxu2 %vm1709_vm2, %v2380_v33 }
 0x28b   : > { %v2021_v45 = vpop.f32.mrf.mxu1  ;;  %v3742_v46 = vpop.f32.mrf.mxu3 }
 0x28c   : > { %v3357_v48 = vunpack.c.l.b16 %v3133_v41  ;;  %v1639_v49 = vpack.c.bf16 %v1542_v44, %v1541_v31  ;;  %v4442_v51 = vmax.f32 %v4441_v24, %v3742_v46  ;;  %v2022_v54 = vadd.f32 %v16077_v43, %v2021_v45  ;;  %v14838_v44 = vld [vmem:[%s20881_s6 + $0x44] sm:$0xf] }
 0x28d   : > { %v2725_v52 = vpop.f32.mrf.mxu2  ;;  %v12423_v45 = vld [vmem:[%s20881_s6 + $0x60] sm:$0xf0] }
 0x28e   : > { %v16104_v53 = vpack.c.b16 %v3357_v48, %v3356_v47  ;;  %12273 = vmatmul.msk.bf16.gmra.mxu1 %vm1709_vm2, %v1639_v49  ;;  %v2726_v55 = vadd.f32 %v15885_v25, %v2725_v52  ;;  %v2275_v62 = vmax.f32 %v2022_v54, 0.0  ;;  %v12426_v46 = vor.u32 %v14838_v44, %v12423_v45 }
 0x290   : > { %3784 = vmatmul.bf16.gmra.mxu3 %v16104_v53  ;;  %v3006_v63 = vmax.f32 %v2726_v55, 0.0 }
 0x291   : > { %v1316_v57 = vpop.f32.mrf.mxu0  ;;  %3811 = vmatpush.bf16.msrb.mxu3 %v12426_v46 }
 0x292   : > { %v3134_v6 = vpack.c.bf16 %v3006_v63, %v3006_v63  ;;  %v1543_v7 = vmax.f32 %v1316_v57, 0.0  ;;  %v12391_v57 = vld [vmem:[%s20881_s6 + $0x20] sm:$0xf0] }
 0x293   : > { %v2023_v60 = vpop.f32.mrf.mxu1  ;;  %v3745_v61 = vpop.f32.mrf.mxu3 }
 0x294   : > { %v2024_v0 = vadd.f32 %v16077_v43, %v2023_v60  ;;  %v4443_v2 = vmax.f32 %v4442_v51, %v3745_v61  ;;  %12202 = vmatmul.msk.bf16.gmra.mxu0 %vm955_vm1, %v14797_v56  ;;  %v3358_v18 = vunpack.c.l.b16 %v3134_v6  ;;  %v14830_v56 = vld [vmem:[%s20881_s6 + $0x4] sm:$0xf] }
 0x295   : > { %v2727_v3 = vpop.f32.mrf.mxu2 }
 0x296   : > { %v2276_v4 = vmax.f32 %v2024_v0, 0.0  ;;  %v2728_v5 = vadd.f32 %v15885_v25, %v2727_v3 }
 0x298   : > { %v2381_v8 = vpack.c.bf16 %v2276_v4, %v2275_v62  ;;  %v3007_v12 = vmax.f32 %v2728_v5, 0.0  ;;  %v12394_v62 = vor.u32 %v14830_v56, %v12391_v57 }
 0x299   : > { %v1318_v13 = vpop.f32.mrf.mxu0 }
 0x29a   : > { %v3135_v14 = vpack.c.bf16 %v3007_v12, %v3007_v12  ;;  %v1544_v16 = vmax.f32 %v1318_v13, 0.0  ;;  %12345 = vmatmul.msk.bf16.gmra.mxu2 %vm1709_vm2, %v2381_v8  ;;  %3812 = vmatpush.bf16.msrb.mxu3 %v12394_v62  ;;  %v14799_v8 = vld [vmem:[%s15707_s17 + $0x148] sm:$0xff] }
 0x29b   : > { %v2026_v17 = vpop.f32.mrf.mxu1  ;;  %v3747_v9 = vpop.f32.mrf.mxu3 }
 0x29c   : > { %v3359_v19 = vunpack.c.l.b16 %v3135_v14  ;;  %v1640_v20 = vpack.c.bf16 %v1544_v16, %v1543_v7  ;;  %v4444_v21 = vmax.f32 %v4443_v2, %v3747_v9  ;;  %v2027_v24 = vadd.f32 %v16077_v43, %v2026_v17 }
 0x29d   : > { %v2730_v22 = vpop.f32.mrf.mxu2 }
 0x29e   : > { %v16115_v23 = vpack.c.b16 %v3359_v19, %v3358_v18  ;;  %12274 = vmatmul.msk.bf16.gmra.mxu1 %vm1709_vm2, %v1640_v20  ;;  %v2731_v26 = vadd.f32 %v15885_v25, %v2730_v22  ;;  %v2277_v33 = vmax.f32 %v2027_v24, 0.0 }
 0x2a0   : > { %3789 = vmatmul.bf16.gmra.mxu3 %v16115_v23  ;;  %v3008_v34 = vmax.f32 %v2731_v26, 0.0 }
 0x2a1   : > { %v1321_v29 = vpop.f32.mrf.mxu0 }
 0x2a2   : > { %v3136_v47 = vpack.c.bf16 %v3008_v34, %v3008_v34  ;;  %v1545_v48 = vmax.f32 %v1321_v29, 0.0 }
 0x2a3   : > { %v2028_v30 = vpop.f32.mrf.mxu1  ;;  %v3750_v31 = vpop.f32.mrf.mxu3 }
 0x2a4   : > { %v2029_v36 = vadd.f32 %v16077_v43, %v2028_v30  ;;  %v4445_v37 = vmax.f32 %v4444_v21, %v3750_v31  ;;  %12203 = vmatmul.msk.bf16.gmra.mxu0 %vm955_vm1, %v14798_v28  ;;  %v3360_v63 = vunpack.c.l.b16 %v3136_v47  ;;  %v16150_v21 = vld [vmem:[%s20880_s5] ss:$0 sm:$0xff]  ;;  %v14800_v47 = vld [vmem:[%s15707_s17 + $0x150] sm:$0xff] }
 0x2a5   : > { %v2732_v38 = vpop.f32.mrf.mxu2 }
 0x2a6   : > { %v2278_v40 = vmax.f32 %v2029_v36, 0.0  ;;  %v2733_v41 = vadd.f32 %v15885_v25, %v2732_v38 }
 0x2a8   : > { %v2382_v49 = vpack.c.bf16 %v2278_v40, %v2277_v33  ;;  %v3009_v51 = vmax.f32 %v2733_v41, 0.0 }
 0x2a9   : > { %v1323_v52 = vpop.f32.mrf.mxu0 }
 0x2aa   : > { %v3137_v54 = vpack.c.bf16 %v3009_v51, %v3009_v51  ;;  %v1546_v55 = vmax.f32 %v1323_v52, 0.0  ;;  %12346 = vmatmul.msk.bf16.gmra.mxu2 %vm1709_vm2, %v2382_v49 }
 0x2ab   : > { %v2031_v60 = vpop.f32.mrf.mxu1  ;;  %v3752_v61 = vpop.f32.mrf.mxu3 }
 0x2ac   : > { %v3361_v0 = vunpack.c.l.b16 %v3137_v54  ;;  %v1641_v2 = vpack.c.bf16 %v1546_v55, %v1545_v48  ;;  %v4446_v3 = vmax.f32 %v4445_v37, %v3752_v61  ;;  %v2032_v6 = vadd.f32 %v16077_v43, %v2031_v60 }
 0x2ad   : > { %v2735_v4 = vpop.f32.mrf.mxu2 }
 0x2ae   : > { %v16138_v5 = vpack.c.b16 %v3361_v0, %v3360_v63  ;;  %12275 = vmatmul.msk.bf16.gmra.mxu1 %vm1709_vm2, %v1641_v2  ;;  %v2736_v7 = vadd.f32 %v15885_v25, %v2735_v4  ;;  %v2279_v16 = vmax.f32 %v2032_v6, 0.0 }
 0x2b0   : > { %3794 = vmatmul.bf16.gmra.mxu3 %v16138_v5  ;;  %v3010_v17 = vmax.f32 %v2736_v7, 0.0 }
 0x2b1   : > { %v1326_v12 = vpop.f32.mrf.mxu0 }
 0x2b2   : > { %v3138_v22 = vpack.c.bf16 %v3010_v17, %v3010_v17  ;;  %v1547_v24 = vmax.f32 %v1326_v12, 0.0 }
 0x2b3   : > { %v2033_v13 = vpop.f32.mrf.mxu1  ;;  %v3755_v14 = vpop.f32.mrf.mxu3 }
 0x2b4   : > { %v2034_v9 = vadd.f32 %v16077_v43, %v2033_v13  ;;  %v4447_v18 = vmax.f32 %v4446_v3, %v3755_v14  ;;  %12204 = vmatmul.msk.bf16.gmra.mxu0 %vm955_vm1, %v14799_v8  ;;  %v3362_v36 = vunpack.c.l.b16 %v3138_v22 }
 0x2b5   : > { %v2737_v19 = vpop.f32.mrf.mxu2 }
 0x2b6   : > { %v2280_v20 = vmax.f32 %v2034_v9, 0.0  ;;  %v2738_v25 = vadd.f32 %v16150_v21, %v2737_v19 }
 0x2b8   : > { %v2383_v26 = vpack.c.bf16 %v2280_v20, %v2279_v16  ;;  %v3011_v28 = vmax.f32 %v2738_v25, 0.0  ;;  %v14801_v20 = vld [vmem:[%s15707_s17 + $0x158] sm:$0xff] }
 0x2b9   : > { %v1328_v29 = vpop.f32.mrf.mxu0 }
 0x2ba   : > { %v3139_v30 = vpack.c.bf16 %v3011_v28, %v3011_v28  ;;  %v1548_v31 = vmax.f32 %v1328_v29, 0.0  ;;  %12347 = vmatmul.msk.bf16.gmra.mxu2 %vm1709_vm2, %v2383_v26 }
 0x2bb   : > { %v2036_v33 = vpop.f32.mrf.mxu1  ;;  %v3757_v34 = vpop.f32.mrf.mxu3 }
 0x2bc   : > { %v3363_v37 = vunpack.c.l.b16 %v3139_v30  ;;  %v1642_v38 = vpack.c.bf16 %v1548_v31, %v1547_v24  ;;  %v4448_v40 = vmax.f32 %v4447_v18, %v3757_v34  ;;  %v2037_v46 = vadd.f32 %v16077_v43, %v2036_v33 }
 0x2bd   : > { %v2740_v41 = vpop.f32.mrf.mxu2 }
 0x2be   : > { %v16154_v44 = vpack.c.b16 %v3363_v37, %v3362_v36  ;;  %v2741_v45 = vadd.f32 %v16150_v21, %v2740_v41  ;;  %12276 = vmatmul.msk.bf16.gmra.mxu1 %vm1709_vm2, %v1642_v38  ;;  %v2281_v54 = vmax.f32 %v2037_v46, 0.0 }
 0x2c0   : > { %3799 = vmatmul.bf16.gmra.mxu3 %v16154_v44  ;;  %v3012_v49 = vmax.f32 %v2741_v45, 0.0 }
 0x2c1   : > { %v1331_v48 = vpop.f32.mrf.mxu0 }
 0x2c2   : > { %v3140_v60 = vpack.c.bf16 %v3012_v49, %v3012_v49  ;;  %v1549_v63 = vmax.f32 %v1331_v48, 0.0 }
 0x2c3   : > { %v2038_v51 = vpop.f32.mrf.mxu1  ;;  %v3760_v52 = vpop.f32.mrf.mxu3 }
 0x2c4   : > { %v2039_v55 = vadd.f32 %v16077_v43, %v2038_v51  ;;  %v4449_v56 = vmax.f32 %v4448_v40, %v3760_v52  ;;  %12205 = vmatmul.msk.bf16.gmra.mxu0 %vm955_vm1, %v14800_v47  ;;  %v4796_v4 = vunpack.c.l.b16 %v3140_v60 }
 0x2c5   : > { %v2742_v57 = vpop.f32.mrf.mxu2 }
 0x2c6   : > { %v2282_v61 = vmax.f32 %v2039_v55, 0.0  ;;  %v2743_v62 = vadd.f32 %v16150_v21, %v2742_v57 }
 0x2c8   : > { %v2384_v0 = vpack.c.bf16 %v2282_v61, %v2281_v54  ;;  %v3013_v2 = vmax.f32 %v2743_v62, 0.0  ;;  %v14802_v61 = vld [vmem:[%s15707_s17 + $0x160] sm:$0xff] }
 0x2c9   : > { %v1333_v3 = vpop.f32.mrf.mxu0 }
 0x2ca   : > { %v3141_v6 = vpack.c.bf16 %v3013_v2, %v3013_v2  ;;  %v1550_v7 = vmax.f32 %v1333_v3, 0.0  ;;  %12348 = vmatmul.msk.bf16.gmra.mxu2 %vm1709_vm2, %v2384_v0 }
 0x2cb   : > { %v2041_v8 = vpop.f32.mrf.mxu1  ;;  %v3762_v12 = vpop.f32.mrf.mxu3 }
 0x2cc   : > { %v4797_v13 = vunpack.c.l.b16 %v3141_v6  ;;  %v1643_v14 = vpack.c.bf16 %v1550_v7, %v1549_v63  ;;  %v4450_v16 = vmax.f32 %v4449_v56, %v3762_v12  ;;  %v2042_v19 = vadd.f32 %v16077_v43, %v2041_v8  ;;  %v12573_v7 = vld [vmem:[%s20881_s6 + $0x158] sm:$0xf] }
 0x2cd   : > { %v2745_v17 = vpop.f32.mrf.mxu2  ;;  %v14877_v8 = vld [vmem:[%s20881_s6 + $0x174] sm:$0xf0] }
 0x2ce   : > { %v16165_v9 = vpack.c.b16 %v4797_v13, %v4796_v4  ;;  %v2746_v18 = vadd.f32 %v16150_v21, %v2745_v17  ;;  %12277 = vmatmul.msk.bf16.gmra.mxu1 %vm1709_vm2, %v1643_v14  ;;  %v2283_v28 = vmax.f32 %v2042_v19, 0.0  ;;  %v12574_v13 = vor.u32 %v14877_v8, %v12573_v7 }
 0x2d0   : > { %3813 = vmatmul.bf16.vlgmr.msrb.gmra.mxu3 %v15895_v50  ;;  %v3014_v22 = vmax.f32 %v2746_v18, 0.0  ;;  %4252 = vmatpush.bf16.msrb.mxu2 %v12574_v13 }
 0x2d1   : > { %v1336_v25 = vpop.f32.mrf.mxu0 }
 0x2d2   : > { %v3142_v33 = vpack.c.bf16 %v3014_v22, %v3014_v22  ;;  %v1551_v37 = vmax.f32 %v1336_v25, 0.0  ;;  %v12621_v25 = vld [vmem:[%s20881_s6 + $0x1c8] sm:$0xf] }
 0x2d3   : > { %v2043_v24 = vpop.f32.mrf.mxu1  ;;  %v3765_v26 = vpop.f32.mrf.mxu3  ;;  %v14891_v22 = vld [vmem:[%s20881_s6 + $0x1e4] sm:$0xf0] }
 0x2d4   : > { %v2044_v29 = vadd.f32 %v16077_v43, %v2043_v24  ;;  %v4451_v30 = vmax.f32 %v4450_v16, %v3765_v26  ;;  %12206 = vmatmul.msk.bf16.gmra.mxu0 %vm955_vm1, %v14801_v20  ;;  %v4798_v45 = vunpack.c.l.b16 %v3142_v33  ;;  %v12622_v26 = vor.u32 %v14891_v22, %v12621_v25 }
 0x2d5   : > { %v2747_v31 = vpop.f32.mrf.mxu2 }
 0x2d6   : > { %v2284_v34 = vmax.f32 %v2044_v29, 0.0  ;;  %v2748_v36 = vadd.f32 %v16150_v21, %v2747_v31  ;;  %3894 = vmatpush.bf16.msra.mxu3 %v12622_v26 }
 0x2d8   : > { %v2385_v38 = vpack.c.bf16 %v2284_v34, %v2283_v28  ;;  %v3015_v40 = vmax.f32 %v2748_v36, 0.0 }
 0x2d9   : > { %v1338_v41 = vpop.f32.mrf.mxu0 }
 0x2da   : > { %v3143_v46 = vpack.c.bf16 %v3015_v40, %v3015_v40  ;;  %v1552_v47 = vmax.f32 %v1338_v41, 0.0  ;;  %12349 = vmatmul.msk.bf16.gmra.mxu2 %vm1709_vm2, %v2385_v38 }
 0x2db   : > { %v2046_v48 = vpop.f32.mrf.mxu1  ;;  %v3767_v49 = vpop.f32.mrf.mxu3 }
 0x2dc   : > { %v4799_v51 = vunpack.c.l.b16 %v3143_v46  ;;  %v1644_v52 = vpack.c.bf16 %v1552_v47, %v1551_v37  ;;  %v4452_v54 = vmax.f32 %v4451_v30, %v3767_v49  ;;  %v2047_v60 = vadd.f32 %v16077_v43, %v2046_v48  ;;  %v14876_v46 = vld [vmem:[%s20881_s6 + $0x16c] sm:$0xf0]  ;;  %v14872_v48 = vld [vmem:[%s20881_s6 + $0x154] sm:$0xf] }
 0x2dd   : > { %v2750_v55 = vpop.f32.mrf.mxu2  ;;  %v12567_v49 = vld [vmem:[%s20881_s6 + $0x170] sm:$0xf0] }
 0x2de   : > { %v16176_v56 = vpack.c.b16 %v4799_v51, %v4798_v45  ;;  %v2751_v57 = vadd.f32 %v16150_v21, %v2750_v55  ;;  %12278 = vmatmul.msk.bf16.gmra.mxu1 %vm1709_vm2, %v1644_v52  ;;  %v2285_v3 = vmax.f32 %v2047_v60, 0.0  ;;  %v12565_v45 = vld [vmem:[%s20881_s6 + $0x150] sm:$0xf]  ;;  %v14803_v52 = vld [vmem:[%s15707_s17 + $0x168] sm:$0xff] }
 0x2df   : > { %v12566_v47 = vor.u32 %v14876_v46, %v12565_v45 }
 0x2e0   : > { %3818 = vmatmul.bf16.gmra.mxu3 %v15906_v11  ;;  %v3016_v63 = vmax.f32 %v2751_v57, 0.0 }
 0x2e1   : > { %v1341_v62 = vpop.f32.mrf.mxu0  ;;  %4074 = vmatpush.bf16.msrb.mxu0 %v12566_v47 }
 0x2e2   : > { %v3144_v14 = vpack.c.bf16 %v3016_v63, %v3016_v63  ;;  %v1553_v18 = vmax.f32 %v1341_v62, 0.0 }
 0x2e3   : > { %v2048_v0 = vpop.f32.mrf.mxu1  ;;  %v3770_v2 = vpop.f32.mrf.mxu3 }
 0x2e4   : > { %v2049_v4 = vadd.f32 %v16077_v43, %v2048_v0  ;;  %v4453_v6 = vmax.f32 %v4452_v54, %v3770_v2  ;;  %12207 = vmatmul.msk.bf16.gmra.mxu0 %vm955_vm1, %v14802_v61  ;;  %v4800_v28 = vunpack.c.l.b16 %v3144_v14  ;;  %v12570_v54 = vor.u32 %v14872_v48, %v12567_v49 }
 0x2e5   : > { %v2752_v12 = vpop.f32.mrf.mxu2 }
 0x2e6   : > { %v2286_v16 = vmax.f32 %v2049_v4, 0.0  ;;  %v2753_v17 = vadd.f32 %v16150_v21, %v2752_v12  ;;  %4163 = vmatpush.bf16.msrb.mxu1 %v12570_v54  ;;  %v12589_v54 = vld [vmem:[%s20881_s6 + $0x188] sm:$0xf] }
 0x2e8   : > { %v2386_v19 = vpack.c.bf16 %v2286_v16, %v2285_v3  ;;  %v3017_v20 = vmax.f32 %v2753_v17, 0.0 }
 0x2e9   : > { %v1343_v24 = vpop.f32.mrf.mxu0 }
 0x2ea   : > { %v3145_v29 = vpack.c.bf16 %v3017_v20, %v3017_v20  ;;  %v1554_v30 = vmax.f32 %v1343_v24, 0.0  ;;  %12350 = vmatmul.msk.bf16.gmra.mxu2 %vm1709_vm2, %v2386_v19 }
 0x2eb   : > { %v2051_v31 = vpop.f32.mrf.mxu1  ;;  %v3772_v33 = vpop.f32.mrf.mxu3 }
 0x2ec   : > { %v4801_v34 = vunpack.c.l.b16 %v3145_v29  ;;  %v1645_v36 = vpack.c.bf16 %v1554_v30, %v1553_v18  ;;  %v4454_v37 = vmax.f32 %v4453_v6, %v3772_v33  ;;  %v2052_v51 = vadd.f32 %v16077_v43, %v2051_v31  ;;  %v14804_v30 = vld [vmem:[%s15707_s17 + $0x170] sm:$0xff] }
 0x2ed   : > { %v2755_v38 = vpop.f32.mrf.mxu2 }
 0x2ee   : > { %v16199_v40 = vpack.c.b16 %v4801_v34, %v4800_v28  ;;  %v2756_v41 = vadd.f32 %v16150_v21, %v2755_v38  ;;  %12279 = vmatmul.msk.bf16.gmra.mxu1 %vm1709_vm2, %v1645_v36  ;;  %v2287_v62 = vmax.f32 %v2052_v51, 0.0 }
 0x2f0   : > { %3823 = vmatmul.bf16.gmra.mxu3 %v15929_v42  ;;  %v3018_v57 = vmax.f32 %v2756_v41, 0.0 }
 0x2f1   : > { %v1346_v55 = vpop.f32.mrf.mxu0 }
 0x2f2   : > { %v3146_v3 = vpack.c.bf16 %v3018_v57, %v3018_v57  ;;  %v1555_v7 = vmax.f32 %v1346_v55, 0.0  ;;  %v14883_v55 = vld [vmem:[%s20881_s6 + $0x1a4] sm:$0xf0] }
 0x2f3   : > { %v2053_v60 = vpop.f32.mrf.mxu1  ;;  %v3775_v61 = vpop.f32.mrf.mxu3 }
 0x2f4   : > { %v2054_v63 = vadd.f32 %v16077_v43, %v2053_v60  ;;  %v4455_v0 = vmax.f32 %v4454_v37, %v3775_v61  ;;  %12208 = vmatmul.msk.bf16.gmra.mxu0 %vm955_vm1, %v14803_v52  ;;  %v4802_v14 = vunpack.c.l.b16 %v3146_v3  ;;  %v12590_v60 = vor.u32 %v14883_v55, %v12589_v54 }
 0x2f5   : > { %v2757_v2 = vpop.f32.mrf.mxu2 }
 0x2f6   : > { %v2288_v4 = vmax.f32 %v2054_v63, 0.0  ;;  %v2758_v6 = vadd.f32 %v16150_v21, %v2757_v2  ;;  %3895 = vmatpush.bf16.msra.mxu3 %v12590_v60 }
 0x2f8   : > { %v2387_v8 = vpack.c.bf16 %v2288_v4, %v2287_v62  ;;  %v3019_v12 = vmax.f32 %v2758_v6, 0.0 }
 0x2f9   : > { %v1348_v13 = vpop.f32.mrf.mxu0 }
 0x2fa   : > { %v3147_v16 = vpack.c.bf16 %v3019_v12, %v3019_v12  ;;  %v1556_v17 = vmax.f32 %v1348_v13, 0.0  ;;  %12351 = vmatmul.msk.bf16.gmra.mxu2 %vm1709_vm2, %v2387_v8 }
 0x2fb   : > { %v2056_v18 = vpop.f32.mrf.mxu1  ;;  %v3777_v19 = vpop.f32.mrf.mxu3 }
 0x2fc   : > { %v4803_v20 = vunpack.c.l.b16 %v3147_v16  ;;  %v1646_v25 = vpack.c.bf16 %v1556_v17, %v1555_v7  ;;  %v4456_v22 = vmax.f32 %v4455_v0, %v3777_v19  ;;  %v2057_v29 = vadd.f32 %v16077_v43, %v2056_v18 }
 0x2fd   : > { %v2760_v24 = vpop.f32.mrf.mxu2 }
 0x2fe   : > { %v16222_v26 = vpack.c.b16 %v4803_v20, %v4802_v14  ;;  %v2761_v28 = vadd.f32 %v16150_v21, %v2760_v24  ;;  %12280 = vmatmul.msk.bf16.gmra.mxu1 %vm1709_vm2, %v1646_v25  ;;  %v2289_v37 = vmax.f32 %v2057_v29, 0.0  ;;  %v14805_v14 = vld [vmem:[%s15707_s17 + $0x178] sm:$0xff] }
 0x300   : > { %3828 = vmatmul.bf16.gmra.mxu3 %v15952_v10  ;;  %v3020_v33 = vmax.f32 %v2761_v28, 0.0 }
 0x301   : > { %v1351_v31 = vpop.f32.mrf.mxu0 }
 0x302   : > { %v3148_v46 = vpack.c.bf16 %v3020_v33, %v3020_v33  ;;  %v1557_v49 = vmax.f32 %v1351_v31, 0.0 }
 0x303   : > { %v2058_v34 = vpop.f32.mrf.mxu1  ;;  %v3780_v36 = vpop.f32.mrf.mxu3 }
 0x304   : > { %v2059_v38 = vadd.f32 %v16077_v43, %v2058_v34  ;;  %v4457_v41 = vmax.f32 %v4456_v22, %v3780_v36  ;;  %12209 = vmatmul.msk.bf16.gmra.mxu0 %vm955_vm1, %v14804_v30  ;;  %v4804_v61 = vunpack.c.l.b16 %v3148_v46 }
 0x305   : > { %v2762_v45 = vpop.f32.mrf.mxu2 }
 0x306   : > { %v2290_v47 = vmax.f32 %v2059_v38, 0.0  ;;  %v2763_v48 = vadd.f32 %v16150_v21, %v2762_v45 }
 0x308   : > { %v2388_v51 = vpack.c.bf16 %v2290_v47, %v2289_v37  ;;  %v3021_v52 = vmax.f32 %v2763_v48, 0.0 }
 0x309   : > { %v1353_v57 = vpop.f32.mrf.mxu0 }
 0x30a   : > { %v3149_v62 = vpack.c.bf16 %v3021_v52, %v3021_v52  ;;  %v1558_v63 = vmax.f32 %v1353_v57, 0.0  ;;  %12352 = vmatmul.msk.bf16.gmra.mxu2 %vm1709_vm2, %v2388_v51  ;;  %v14806_v57 = vld [vmem:[%s15707_s17 + $0x180] sm:$0xff] }
 0x30b   : > { %v2061_v0 = vpop.f32.mrf.mxu1  ;;  %v3782_v2 = vpop.f32.mrf.mxu3 }
 0x30c   : > { %v4805_v3 = vunpack.c.l.b16 %v3149_v62  ;;  %v1647_v4 = vpack.c.bf16 %v1558_v63, %v1557_v49  ;;  %v4458_v6 = vmax.f32 %v4457_v41, %v3782_v2  ;;  %v2062_v13 = vadd.f32 %v16077_v43, %v2061_v0 }
 0x30d   : > { %v2765_v7 = vpop.f32.mrf.mxu2 }
 0x30e   : > { %v16239_v8 = vpack.c.b16 %v4805_v3, %v4804_v61  ;;  %v2766_v12 = vadd.f32 %v16150_v21, %v2765_v7  ;;  %12281 = vmatmul.msk.bf16.gmra.mxu1 %vm1709_vm2, %v1647_v4  ;;  %v2291_v20 = vmax.f32 %v2062_v13, 0.0 }
 0x310   : > { %3833 = vmatmul.bf16.gmra.mxu3 %v15969_v39  ;;  %v3022_v17 = vmax.f32 %v2766_v12, 0.0 }
 0x311   : > { %v1356_v16 = vpop.f32.mrf.mxu0 }
 0x312   : > { %v3150_v28 = vpack.c.bf16 %v3022_v17, %v3022_v17  ;;  %v1559_v31 = vmax.f32 %v1356_v16, 0.0  ;;  %v12557_v17 = vld [vmem:[%s20881_s6 + $0x148] sm:$0xf] }
 0x313   : > { %v2063_v18 = vpop.f32.mrf.mxu1  ;;  %v3785_v19 = vpop.f32.mrf.mxu3 }
 0x314   : > { %v2064_v25 = vadd.f32 %v16077_v43, %v2063_v18  ;;  %v4459_v22 = vmax.f32 %v4458_v6, %v3785_v19  ;;  %12210 = vmatmul.msk.bf16.gmra.mxu0 %vm955_vm1, %v14805_v14  ;;  %v4806_v37 = vunpack.c.l.b16 %v3150_v28  ;;  %v14875_v18 = vld [vmem:[%s20881_s6 + $0x164] sm:$0xf0] }
 0x315   : > { %v2767_v24 = vpop.f32.mrf.mxu2 }
 0x316   : > { %v2292_v29 = vmax.f32 %v2064_v25, 0.0  ;;  %v2768_v30 = vadd.f32 %v16150_v21, %v2767_v24 }
 0x318   : > { %v2389_v33 = vpack.c.bf16 %v2292_v29, %v2291_v20  ;;  %v3023_v34 = vmax.f32 %v2768_v30, 0.0  ;;  %v12558_v20 = vor.u32 %v14875_v18, %v12557_v17 }
 0x319   : > { %v1358_v36 = vpop.f32.mrf.mxu0 }
 0x31a   : > { %v3151_v38 = vpack.c.bf16 %v3023_v34, %v3023_v34  ;;  %v1560_v41 = vmax.f32 %v1358_v36, 0.0  ;;  %12353 = vmatmul.msk.bf16.gmra.mxu2 %vm1709_vm2, %v2389_v33  ;;  %3896 = vmatpush.bf16.msra.mxu3 %v12558_v20 }
 0x31b   : > { %v2066_v45 = vpop.f32.mrf.mxu1  ;;  %v3787_v46 = vpop.f32.mrf.mxu3 }
 0x31c   : > { %v4807_v47 = vunpack.c.l.b16 %v3151_v38  ;;  %v1648_v48 = vpack.c.bf16 %v1560_v41, %v1559_v31  ;;  %v4460_v49 = vmax.f32 %v4459_v22, %v3787_v46  ;;  %v2067_v55 = vadd.f32 %v16077_v43, %v2066_v45  ;;  %v14807_v41 = vld [vmem:[%s15707_s17 + $0x188] sm:$0xff] }
 0x31d   : > { %v2770_v51 = vpop.f32.mrf.mxu2 }
 0x31e   : > { %v16250_v52 = vpack.c.b16 %v4807_v47, %v4806_v37  ;;  %v2771_v54 = vadd.f32 %v16150_v21, %v2770_v51  ;;  %12282 = vmatmul.msk.bf16.gmra.mxu1 %vm1709_vm2, %v1648_v48  ;;  %v2293_v0 = vmax.f32 %v2067_v55, 0.0 }
 0x320   : > { %3838 = vmatmul.bf16.gmra.mxu3 %v15980_v1  ;;  %v3024_v61 = vmax.f32 %v2771_v54, 0.0 }
 0x321   : > { %v1361_v60 = vpop.f32.mrf.mxu0 }
 0x322   : > { %v3152_v6 = vpack.c.bf16 %v3024_v61, %v3024_v61  ;;  %v1561_v13 = vmax.f32 %v1361_v60, 0.0 }
 0x323   : > { %v2068_v62 = vpop.f32.mrf.mxu1  ;;  %v3790_v63 = vpop.f32.mrf.mxu3 }
 0x324   : > { %v2069_v2 = vadd.f32 %v16077_v43, %v2068_v62  ;;  %v4461_v3 = vmax.f32 %v4460_v49, %v3790_v63  ;;  %12211 = vmatmul.msk.bf16.gmra.mxu0 %vm955_vm1, %v14806_v57  ;;  %v4808_v25 = vunpack.c.l.b16 %v3152_v6 }
 0x325   : > { %v2772_v4 = vpop.f32.mrf.mxu2 }
 0x326   : > { %v2294_v7 = vmax.f32 %v2069_v2, 0.0  ;;  %v2773_v12 = vadd.f32 %v16150_v21, %v2772_v4 }
 0x328   : > { %v2390_v14 = vpack.c.bf16 %v2294_v7, %v2293_v0  ;;  %v3025_v16 = vmax.f32 %v2773_v12, 0.0 }
 0x329   : > { %v1363_v19 = vpop.f32.mrf.mxu0 }
 0x32a   : > { %v3153_v22 = vpack.c.bf16 %v3025_v16, %v3025_v16  ;;  %v1562_v24 = vmax.f32 %v1363_v19, 0.0  ;;  %12354 = vmatmul.msk.bf16.gmra.mxu2 %vm1709_vm2, %v2390_v14 }
 0x32b   : > { %v2071_v28 = vpop.f32.mrf.mxu1  ;;  %v3792_v29 = vpop.f32.mrf.mxu3 }
 0x32c   : > { %v4809_v30 = vunpack.c.l.b16 %v3153_v22  ;;  %v1649_v31 = vpack.c.bf16 %v1562_v24, %v1561_v13  ;;  %v4462_v33 = vmax.f32 %v4461_v3, %v3792_v29  ;;  %v2072_v38 = vadd.f32 %v16077_v43, %v2071_v28 }
 0x32d   : > { %v2775_v34 = vpop.f32.mrf.mxu2 }
 0x32e   : > { %v16267_v36 = vpack.c.b16 %v4809_v30, %v4808_v25  ;;  %v2776_v37 = vadd.f32 %v16150_v21, %v2775_v34  ;;  %12283 = vmatmul.msk.bf16.gmra.mxu1 %vm1709_vm2, %v1649_v31  ;;  %v2295_v49 = vmax.f32 %v2072_v38, 0.0  ;;  %v14808_v25 = vld [vmem:[%s15707_s17 + $0x190] sm:$0xff] }
 0x330   : > { %3843 = vmatmul.bf16.gmra.mxu3 %v15997_v32  ;;  %v3026_v46 = vmax.f32 %v2776_v37, 0.0 }
 0x331   : > { %v1366_v45 = vpop.f32.mrf.mxu0 }
 0x332   : > { %v3154_v57 = vpack.c.bf16 %v3026_v46, %v3026_v46  ;;  %v1563_v62 = vmax.f32 %v1366_v45, 0.0 }
 0x333   : > { %v2073_v47 = vpop.f32.mrf.mxu1  ;;  %v3795_v48 = vpop.f32.mrf.mxu3 }
 0x334   : > { %v2074_v51 = vadd.f32 %v16077_v43, %v2073_v47  ;;  %v4463_v54 = vmax.f32 %v4462_v33, %v3795_v48  ;;  %12212 = vmatmul.msk.bf16.gmra.mxu0 %vm955_vm1, %v14807_v41  ;;  %v4810_v3 = vunpack.c.l.b16 %v3154_v57  ;;  %v12525_v48 = vld [vmem:[%s20881_s6 + $0x108] sm:$0xf] }
 0x335   : > { %v2777_v55 = vpop.f32.mrf.mxu2 }
 0x336   : > { %v2296_v60 = vmax.f32 %v2074_v51, 0.0  ;;  %v2778_v61 = vadd.f32 %v16150_v21, %v2777_v55 }
 0x338   : > { %v2391_v63 = vpack.c.bf16 %v2296_v60, %v2295_v49  ;;  %v3027_v0 = vmax.f32 %v2778_v61, 0.0  ;;  %v14867_v49 = vld [vmem:[%s20881_s6 + $0x124] sm:$0xf0] }
 0x339   : > { %v1368_v2 = vpop.f32.mrf.mxu0 }
 0x33a   : > { %v3155_v4 = vpack.c.bf16 %v3027_v0, %v3027_v0  ;;  %v1564_v6 = vmax.f32 %v1368_v2, 0.0  ;;  %12355 = vmatmul.msk.bf16.gmra.mxu2 %vm1709_vm2, %v2391_v63 }
 0x33b   : > { %v2076_v7 = vpop.f32.mrf.mxu1  ;;  %v3797_v12 = vpop.f32.mrf.mxu3 }
 0x33c   : > { %v4811_v13 = vunpack.c.l.b16 %v3155_v4  ;;  %v1650_v14 = vpack.c.bf16 %v1564_v6, %v1563_v62  ;;  %v4464_v16 = vmax.f32 %v4463_v54, %v3797_v12  ;;  %v2077_v20 = vadd.f32 %v16077_v43, %v2076_v7  ;;  %v14809_v12 = vld [vmem:[%s15707_s17 + $0x198] sm:$0xff] }
 0x33d   : > { %v2780_v17 = vpop.f32.mrf.mxu2  ;;  %v12526_v54 = vor.u32 %v14867_v49, %v12525_v48 }
 0x33e   : > { %v16278_v18 = vpack.c.b16 %v4811_v13, %v4810_v3  ;;  %v2781_v19 = vadd.f32 %v16150_v21, %v2780_v17  ;;  %12284 = vmatmul.msk.bf16.gmra.mxu1 %vm1709_vm2, %v1650_v14  ;;  %v2297_v30 = vmax.f32 %v2077_v20, 0.0 }
 0x33f   : > { %3897 = vmatpush.bf16.msra.mxu3 %v12526_v54 }
 0x340   : > { %3848 = vmatmul.bf16.gmra.mxu3 %v16008_v59  ;;  %v3028_v24 = vmax.f32 %v2781_v19, 0.0 }
 0x341   : > { %v1371_v22 = vpop.f32.mrf.mxu0 }
 0x342   : > { %v3156_v37 = vpack.c.bf16 %v3028_v24, %v3028_v24  ;;  %v1565_v45 = vmax.f32 %v1371_v22, 0.0 }
 0x343   : > { %v2078_v28 = vpop.f32.mrf.mxu1  ;;  %v3800_v29 = vpop.f32.mrf.mxu3 }
 0x344   : > { %v2079_v31 = vadd.f32 %v16077_v43, %v2078_v28  ;;  %v16286_v33 = vmax.f32 %v4464_v16, %v3800_v29  ;;  %12213 = vmatmul.msk.bf16.gmra.mxu0 %vm955_vm1, %v14808_v25  ;;  %v4812_v55 = vunpack.c.l.b16 %v3156_v37 }
 0x345   : > { %v2782_v34 = vpop.f32.mrf.mxu2 }
 0x346   : > { %v2298_v38 = vmax.f32 %v2079_v31, 0.0  ;;  %v2783_v41 = vadd.f32 %v16150_v21, %v2782_v34 }
 0x348   : > { %v2392_v46 = vpack.c.bf16 %v2298_v38, %v2297_v30  ;;  %v3029_v47 = vmax.f32 %v2783_v41, 0.0 }
 0x349   : > { %v1373_v51 = vpop.f32.mrf.mxu0 }
 0x34a   : > { %v3157_v57 = vpack.c.bf16 %v3029_v47, %v3029_v47  ;;  %v1566_v60 = vmax.f32 %v1373_v51, 0.0  ;;  %12356 = vmatmul.msk.bf16.gmra.mxu2 %vm1709_vm2, %v2392_v46 }
 0x34b   : > { %v2081_v61 = vpop.f32.mrf.mxu1  ;;  %v16297_v62 = vpop.f32.mrf.mxu3 }
 0x34c   : > { %v4813_v63 = vunpack.c.l.b16 %v3157_v57  ;;  %v1651_v0 = vpack.c.bf16 %v1566_v60, %v1565_v45  ;;  %v2082_v7 = vadd.f32 %v16077_v43, %v2081_v61  ;;  %v14810_v60 = vld [vmem:[%s15707_s17 + $0x1a0] sm:$0xff] }
 0x34d   : > { %v2785_v3 = vpop.f32.mrf.mxu2 }
 0x34e   : > { %v16301_v4 = vpack.c.b16 %v4813_v63, %v4812_v55  ;;  %v2786_v6 = vadd.f32 %v16150_v21, %v2785_v3  ;;  %12285 = vmatmul.msk.bf16.gmra.mxu1 %vm1709_vm2, %v1651_v0  ;;  %v2299_v19 = vmax.f32 %v2082_v7, 0.0  ;;  %v16319_v55 = vld [vmem:[%s20878_s3] ss:$0 sm:$0xff] }
 0x350   : > { %3853 = vmatmul.bf16.gmra.mxu3 %v16025_v27  ;;  %v3030_v14 = vmax.f32 %v2786_v6, 0.0 }
 0x351   : > { %v1376_v13 = vpop.f32.mrf.mxu0 }
 0x352   : > { %v3158_v22 = vpack.c.bf16 %v3030_v14, %v3030_v14  ;;  %v1567_v29 = vmax.f32 %v1376_v13, 0.0  ;;  %v12541_v13 = vld [vmem:[%s20881_s6 + $0x118] sm:$0xf] }
 0x353   : > { %v2083_v16 = vpop.f32.mrf.mxu1  ;;  %v3814_v17 = vpop.f32.mrf.mxu3  ;;  %v14869_v14 = vld [vmem:[%s20881_s6 + $0x134] sm:$0xf0] }
 0x354   : > { %v2084_v20 = vadd.f32 %v16077_v43, %v2083_v16  ;;  %12214 = vmatmul.msk.bf16.gmra.mxu0 %vm955_vm1, %v14809_v12  ;;  %v4814_v37 = vunpack.c.l.b16 %v3158_v22 }
 0x355   : > { %v2787_v25 = vpop.f32.mrf.mxu2 }
 0x356   : > { %v2300_v24 = vmax.f32 %v2084_v20, 0.0  ;;  %v2788_v28 = vadd.f32 %v16150_v21, %v2787_v25 }
 0x358   : > { %v2393_v30 = vpack.c.bf16 %v2300_v24, %v2299_v19  ;;  %v3031_v31 = vmax.f32 %v2788_v28, 0.0 }
 0x359   : > { %v1378_v34 = vpop.f32.mrf.mxu0 }
 0x35a   : > { %v3159_v38 = vpack.c.bf16 %v3031_v31, %v3031_v31  ;;  %v1568_v41 = vmax.f32 %v1378_v34, 0.0  ;;  %12357 = vmatmul.msk.bf16.gmra.mxu2 %vm1709_vm2, %v2393_v30  ;;  %v14859_v30 = vld [vmem:[%s20881_s6 + $0xe4] sm:$0xf0] }
 0x35b   : > { %v2086_v45 = vpop.f32.mrf.mxu1  ;;  %v3816_v46 = vpop.f32.mrf.mxu3 }
 0x35c   : > { %v4815_v43 = vunpack.c.l.b16 %v3159_v38  ;;  %v1652_v47 = vpack.c.bf16 %v1568_v41, %v1567_v29  ;;  %v4467_v48 = vmax.f32 %v3814_v17, %v3816_v46  ;;  %v2087_v57 = vadd.f32 %v16319_v55, %v2086_v45  ;;  %v12493_v29 = vld [vmem:[%s20881_s6 + $0xc8] sm:$0xf] }
 0x35d   : > { %v2790_v49 = vpop.f32.mrf.mxu2  ;;  %v12542_v17 = vor.u32 %v14869_v14, %v12541_v13  ;;  %v12494_v34 = vor.u32 %v14859_v30, %v12493_v29 }
 0x35e   : > { %v16312_v51 = vpack.c.b16 %v4815_v43, %v4814_v37  ;;  %v2791_v54 = vadd.f32 %v16150_v21, %v2790_v49  ;;  %12286 = vmatmul.msk.bf16.gmra.mxu1 %vm1709_vm2, %v1652_v47  ;;  %v2301_v6 = vmax.f32 %v2087_v57, 0.0 }
 0x35f   : > { %4253 = vmatpush.bf16.msrb.mxu2 %v12542_v17  ;;  %3898 = vmatpush.bf16.msra.mxu3 %v12494_v34 }
 0x360   : > { %3858 = vmatmul.bf16.gmra.mxu3 %v16036_v58  ;;  %v3032_v63 = vmax.f32 %v2791_v54, 0.0 }
 0x361   : > { %v1381_v61 = vpop.f32.mrf.mxu0 }
 0x362   : > { %v3160_v19 = vpack.c.bf16 %v3032_v63, %v3032_v63  ;;  %v1569_v22 = vmax.f32 %v1381_v61, 0.0  ;;  %v14868_v61 = vld [vmem:[%s20881_s6 + $0x12c] sm:$0xf0] }
 0x363   : > { %v2088_v0 = vpop.f32.mrf.mxu1  ;;  %v3819_v3 = vpop.f32.mrf.mxu3 }
 0x364   : > { %v2089_v7 = vadd.f32 %v16319_v55, %v2088_v0  ;;  %v4468_v12 = vmax.f32 %v4467_v48, %v3819_v3  ;;  %12215 = vmatmul.msk.bf16.gmra.mxu0 %vm955_vm1, %v14810_v60  ;;  %v4816_v37 = vunpack.c.l.b16 %v3160_v19  ;;  %v12533_v60 = vld [vmem:[%s20881_s6 + $0x110] sm:$0xf]  ;;  %v14864_v0 = vld [vmem:[%s20881_s6 + $0x114] sm:$0xf] }
 0x365   : > { %v2792_v16 = vpop.f32.mrf.mxu2  ;;  %v12534_v63 = vor.u32 %v14868_v61, %v12533_v60  ;;  %v12535_v3 = vld [vmem:[%s20881_s6 + $0x130] sm:$0xf0] }
 0x366   : > { %v2302_v20 = vmax.f32 %v2089_v7, 0.0  ;;  %v2793_v25 = vadd.f32 %v16150_v21, %v2792_v16  ;;  %v14811_v7 = vld [vmem:[%s15707_s17 + $0x1a8] sm:$0xff] }
 0x367   : > { %4075 = vmatpush.bf16.msrb.mxu0 %v12534_v63 }
 0x368   : > { %v2394_v24 = vpack.c.bf16 %v2302_v20, %v2301_v6  ;;  %v3033_v28 = vmax.f32 %v2793_v25, 0.0 }
 0x369   : > { %v1383_v31 = vpop.f32.mrf.mxu0 }
 0x36a   : > { %v3161_v38 = vpack.c.bf16 %v3033_v28, %v3033_v28  ;;  %v1570_v41 = vmax.f32 %v1383_v31, 0.0  ;;  %12358 = vmatmul.msk.bf16.gmra.mxu2 %vm1709_vm2, %v2394_v24 }
 0x36b   : > { %v2091_v45 = vpop.f32.mrf.mxu1  ;;  %v3821_v46 = vpop.f32.mrf.mxu3 }
 0x36c   : > { %v4817_v43 = vunpack.c.l.b16 %v3161_v38  ;;  %v1653_v47 = vpack.c.bf16 %v1570_v41, %v1569_v22  ;;  %v4469_v48 = vmax.f32 %v4468_v12, %v3821_v46  ;;  %v2092_v6 = vadd.f32 %v16319_v55, %v2091_v45 }
 0x36d   : > { %v2795_v49 = vpop.f32.mrf.mxu2  ;;  %v12538_v12 = vor.u32 %v14864_v0, %v12535_v3  ;;  %v14812_v0 = vld [vmem:[%s15707_s17 + $0x1b0] sm:$0xff] }
 0x36e   : > { %v16340_v54 = vpack.c.b16 %v4817_v43, %v4816_v37  ;;  %v2796_v57 = vadd.f32 %v16150_v21, %v2795_v49  ;;  %12287 = vmatmul.msk.bf16.gmra.mxu1 %vm1709_vm2, %v1653_v47  ;;  %v2303_v19 = vmax.f32 %v2092_v6, 0.0 }
 0x36f   : > { %4164 = vmatpush.bf16.msrb.mxu1 %v12538_v12 }
 0x370   : > { %3863 = vmatmul.bf16.gmra.mxu3 %v16059_v35  ;;  %v3034_v14 = vmax.f32 %v2796_v57, 0.0 }
 0x371   : > { %v1386_v13 = vpop.f32.mrf.mxu0 }
 0x372   : > { %v3162_v24 = vpack.c.bf16 %v3034_v14, %v3034_v14  ;;  %v1571_v30 = vmax.f32 %v1386_v13, 0.0 }
 0x373   : > { %v2093_v16 = vpop.f32.mrf.mxu1  ;;  %v3824_v17 = vpop.f32.mrf.mxu3 }
 0x374   : > { %v2094_v20 = vadd.f32 %v16319_v55, %v2093_v16  ;;  %v4470_v25 = vmax.f32 %v4469_v48, %v3824_v17  ;;  %12216 = vmatmul.msk.bf16.gmra.mxu0 %vm955_vm1, %v14811_v7  ;;  %v4818_v38 = vunpack.c.l.b16 %v3162_v24 }
 0x375   : > { %v2797_v22 = vpop.f32.mrf.mxu2 }
 0x376   : > { %v2304_v28 = vmax.f32 %v2094_v20, 0.0  ;;  %v2798_v29 = vadd.f32 %v16150_v21, %v2797_v22 }
 0x378   : > { %v2395_v31 = vpack.c.bf16 %v2304_v28, %v2303_v19  ;;  %v3035_v34 = vmax.f32 %v2798_v29, 0.0  ;;  %v12461_v29 = vld [vmem:[%s20881_s6 + $0x88] sm:$0xf] }
 0x379   : > { %v1388_v37 = vpop.f32.mrf.mxu0 }
 0x37a   : > { %v3163_v41 = vpack.c.bf16 %v3035_v34, %v3035_v34  ;;  %v1572_v45 = vmax.f32 %v1388_v37, 0.0  ;;  %12359 = vmatmul.msk.bf16.gmra.mxu2 %vm1709_vm2, %v2395_v31 }
 0x37b   : > { %v2096_v46 = vpop.f32.mrf.mxu1  ;;  %v3826_v43 = vpop.f32.mrf.mxu3 }
 0x37c   : > { %v4819_v47 = vunpack.c.l.b16 %v3163_v41  ;;  %v1654_v48 = vpack.c.bf16 %v1572_v45, %v1571_v30  ;;  %v4471_v49 = vmax.f32 %v4470_v25, %v3826_v43  ;;  %v2097_v63 = vadd.f32 %v16319_v55, %v2096_v46  ;;  %v14851_v30 = vld [vmem:[%s20881_s6 + $0xa4] sm:$0xf0] }
 0x37d   : > { %v2800_v57 = vpop.f32.mrf.mxu2  ;;  %v12462_v34 = vor.u32 %v14851_v30, %v12461_v29 }
 0x37e   : > { %v16363_v60 = vpack.c.b16 %v4819_v47, %v4818_v38  ;;  %v2801_v61 = vadd.f32 %v16150_v21, %v2800_v57  ;;  %12288 = vmatmul.msk.bf16.gmra.mxu1 %vm1709_vm2, %v1654_v48  ;;  %v2305_v13 = vmax.f32 %v2097_v63, 0.0 }
 0x37f   : > { %3899 = vmatpush.bf16.msra.mxu3 %v12462_v34 }
 0x380   : > { %3868 = vmatmul.bf16.gmra.mxu3 %v16087_v15  ;;  %v3036_v6 = vmax.f32 %v2801_v61, 0.0 }
 0x381   : > { %v1391_v3 = vpop.f32.mrf.mxu0 }
 0x382   : > { %v3164_v19 = vpack.c.bf16 %v3036_v6, %v3036_v6  ;;  %v1573_v22 = vmax.f32 %v1391_v3, 0.0 }
 0x383   : > { %v2098_v7 = vpop.f32.mrf.mxu1  ;;  %v3829_v12 = vpop.f32.mrf.mxu3 }
 0x384   : > { %v2099_v14 = vadd.f32 %v16319_v55, %v2098_v7  ;;  %v4472_v16 = vmax.f32 %v4471_v49, %v3829_v12  ;;  %12217 = vmatmul.msk.bf16.gmra.mxu0 %vm955_vm1, %v14812_v0  ;;  %v4820_v37 = vunpack.c.l.b16 %v3164_v19  ;;  %v14813_v0 = vld [vmem:[%s15707_s17 + $0x1b8] sm:$0xff] }
 0x385   : > { %v2802_v17 = vpop.f32.mrf.mxu2 }
 0x386   : > { %v2306_v20 = vmax.f32 %v2099_v14, 0.0  ;;  %v2803_v25 = vadd.f32 %v16150_v21, %v2802_v17 }
 0x388   : > { %v2396_v24 = vpack.c.bf16 %v2306_v20, %v2305_v13  ;;  %v3037_v28 = vmax.f32 %v2803_v25, 0.0 }
 0x389   : > { %v1393_v31 = vpop.f32.mrf.mxu0 }
 0x38a   : > { %v3165_v38 = vpack.c.bf16 %v3037_v28, %v3037_v28  ;;  %v1574_v41 = vmax.f32 %v1393_v31, 0.0  ;;  %12360 = vmatmul.msk.bf16.gmra.mxu2 %vm1709_vm2, %v2396_v24 }
 0x38b   : > { %v2101_v45 = vpop.f32.mrf.mxu1  ;;  %v3831_v46 = vpop.f32.mrf.mxu3 }
 0x38c   : > { %v4821_v43 = vunpack.c.l.b16 %v3165_v38  ;;  %v1655_v47 = vpack.c.bf16 %v1574_v41, %v1573_v22  ;;  %v4473_v48 = vmax.f32 %v4472_v16, %v3831_v46  ;;  %v2102_v63 = vadd.f32 %v16319_v55, %v2101_v45 }
 0x38d   : > { %v2805_v49 = vpop.f32.mrf.mxu2 }
 0x38e   : > { %v16380_v57 = vpack.c.b16 %v4821_v43, %v4820_v37  ;;  %v2806_v61 = vadd.f32 %v16150_v21, %v2805_v49  ;;  %12289 = vmatmul.msk.bf16.gmra.mxu1 %vm1709_vm2, %v1655_v47  ;;  %v2307_v13 = vmax.f32 %v2102_v63, 0.0 }
 0x390   : > { %3873 = vmatmul.bf16.gmra.mxu3 %v16104_v53  ;;  %v3038_v6 = vmax.f32 %v2806_v61, 0.0  ;;  %v14814_v61 = vld [vmem:[%s15707_s17 + $0x1c0] sm:$0xff] }
 0x391   : > { %v1396_v3 = vpop.f32.mrf.mxu0 }
 0x392   : > { %v3166_v19 = vpack.c.bf16 %v3038_v6, %v3038_v6  ;;  %v1575_v22 = vmax.f32 %v1396_v3, 0.0 }
 0x393   : > { %v2103_v7 = vpop.f32.mrf.mxu1  ;;  %v3834_v12 = vpop.f32.mrf.mxu3 }
 0x394   : > { %v2104_v14 = vadd.f32 %v16319_v55, %v2103_v7  ;;  %v4474_v16 = vmax.f32 %v4473_v48, %v3834_v12  ;;  %12218 = vmatmul.msk.bf16.gmra.mxu0 %vm955_vm1, %v14813_v0  ;;  %v4822_v30 = vunpack.c.l.b16 %v3166_v19 }
 0x395   : > { %v2807_v17 = vpop.f32.mrf.mxu2 }
 0x396   : > { %v2308_v20 = vmax.f32 %v2104_v14, 0.0  ;;  %v2808_v25 = vadd.f32 %v16150_v21, %v2807_v17  ;;  %v16396_v21 = vld [vmem:[%s20880_s5] ss:$0 sm:$0xff] }
 0x398   : > { %v2397_v24 = vpack.c.bf16 %v2308_v20, %v2307_v13  ;;  %v3039_v28 = vmax.f32 %v2808_v25, 0.0  ;;  %v12429_v20 = vld [vmem:[%s20881_s6 + $0x48] sm:$0xf] }
 0x399   : > { %v1398_v29 = vpop.f32.mrf.mxu0  ;;  %v14843_v25 = vld [vmem:[%s20881_s6 + $0x64] sm:$0xf0] }
 0x39a   : > { %v3167_v31 = vpack.c.bf16 %v3039_v28, %v3039_v28  ;;  %v1576_v34 = vmax.f32 %v1398_v29, 0.0  ;;  %12361 = vmatmul.msk.bf16.gmra.mxu2 %vm1709_vm2, %v2397_v24 }
 0x39b   : > { %v2106_v37 = vpop.f32.mrf.mxu1  ;;  %v3836_v38 = vpop.f32.mrf.mxu3 }
 0x39c   : > { %v4823_v41 = vunpack.c.l.b16 %v3167_v31  ;;  %v1656_v45 = vpack.c.bf16 %v1576_v34, %v1575_v22  ;;  %v4475_v46 = vmax.f32 %v4474_v16, %v3836_v38  ;;  %v2107_v49 = vadd.f32 %v16319_v55, %v2106_v37  ;;  %v12397_v38 = vld [vmem:[%s20881_s6 + $0x8] sm:$0xf] }
 0x39d   : > { %v2810_v43 = vpop.f32.mrf.mxu2  ;;  %v12430_v22 = vor.u32 %v14843_v25, %v12429_v20 }
 0x39e   : > { %v16391_v47 = vpack.c.b16 %v4823_v41, %v4822_v30  ;;  %v2811_v48 = vadd.f32 %v16396_v21, %v2810_v43  ;;  %12290 = vmatmul.msk.bf16.gmra.mxu1 %vm1709_vm2, %v1656_v45  ;;  %v2309_v7 = vmax.f32 %v2107_v49, 0.0  ;;  %v14835_v41 = vld [vmem:[%s20881_s6 + $0x24] sm:$0xf0] }
 0x39f   : > { %3900 = vmatpush.bf16.msra.mxu3 %v12430_v22  ;;  %v12398_v43 = vor.u32 %v14835_v41, %v12397_v38 }
 0x3a0   : > { %3878 = vmatmul.bf16.gmra.mxu3 %v16115_v23  ;;  %v3040_v0 = vmax.f32 %v2811_v48, 0.0 }
 0x3a1   : > { %v1401_v63 = vpop.f32.mrf.mxu0 }
 0x3a2   : > { %v3168_v16 = vpack.c.bf16 %v3040_v0, %v3040_v0  ;;  %v1577_v24 = vmax.f32 %v1401_v63, 0.0 }
 0x3a3   : > { %v2108_v3 = vpop.f32.mrf.mxu1  ;;  %v3839_v6 = vpop.f32.mrf.mxu3  ;;  %3901 = vmatpush.bf16.msra.mxu3 %v12398_v43 }
 0x3a4   : > { %v2109_v12 = vadd.f32 %v16319_v55, %v2108_v3  ;;  %v4476_v13 = vmax.f32 %v4475_v46, %v3839_v6  ;;  %12219 = vmatmul.msk.bf16.gmra.mxu0 %vm955_vm1, %v14814_v61  ;;  %v4824_v31 = vunpack.c.l.b16 %v3168_v16 }
 0x3a5   : > { %v2812_v14 = vpop.f32.mrf.mxu2 }
 0x3a6   : > { %v2310_v17 = vmax.f32 %v2109_v12, 0.0  ;;  %v2813_v19 = vadd.f32 %v16396_v21, %v2812_v14 }
 0x3a8   : > { %v2398_v28 = vpack.c.bf16 %v2310_v17, %v2309_v7  ;;  %v3041_v29 = vmax.f32 %v2813_v19, 0.0  ;;  %v14815_v7 = vld [vmem:[%s15707_s17 + $0x1c8] sm:$0xff] }
 0x3a9   : > { %v1403_v30 = vpop.f32.mrf.mxu0 }
 0x3aa   : > { %v3169_v34 = vpack.c.bf16 %v3041_v29, %v3041_v29  ;;  %v1578_v37 = vmax.f32 %v1403_v30, 0.0  ;;  %12362 = vmatmul.msk.bf16.gmra.mxu2 %vm1709_vm2, %v2398_v28 }
 0x3ab   : > { %v2111_v45 = vpop.f32.mrf.mxu1  ;;  %v3841_v46 = vpop.f32.mrf.mxu3 }
 0x3ac   : > { %v4825_v48 = vunpack.c.l.b16 %v3169_v34  ;;  %v1657_v49 = vpack.c.bf16 %v1578_v37, %v1577_v24  ;;  %v4477_v61 = vmax.f32 %v4476_v13, %v3841_v46  ;;  %v2112_v6 = vadd.f32 %v16319_v55, %v2111_v45 }
 0x3ad   : > { %v2815_v63 = vpop.f32.mrf.mxu2 }
 0x3ae   : > { %v16419_v0 = vpack.c.b16 %v4825_v48, %v4824_v31  ;;  %v2816_v3 = vadd.f32 %v16396_v21, %v2815_v63  ;;  %12291 = vmatmul.msk.bf16.gmra.mxu1 %vm1709_vm2, %v1657_v49  ;;  %v2311_v19 = vmax.f32 %v2112_v6, 0.0 }
 0x3b0   : > { %3883 = vmatmul.bf16.gmra.mxu3 %v16138_v5  ;;  %v3042_v14 = vmax.f32 %v2816_v3, 0.0 }
 0x3b1   : > { %v1406_v12 = vpop.f32.mrf.mxu0 }
 0x3b2   : > { %v3170_v22 = vpack.c.bf16 %v3042_v14, %v3042_v14  ;;  %v1579_v29 = vmax.f32 %v1406_v12, 0.0 }
 0x3b3   : > { %v2113_v16 = vpop.f32.mrf.mxu1  ;;  %v3844_v17 = vpop.f32.mrf.mxu3 }
 0x3b4   : > { %v2114_v13 = vadd.f32 %v16319_v55, %v2113_v16  ;;  %v4478_v20 = vmax.f32 %v4477_v61, %v3844_v17  ;;  %12220 = vmatmul.msk.bf16.gmra.mxu0 %vm955_vm1, %v14815_v7  ;;  %v4826_v37 = vunpack.c.l.b16 %v3170_v22  ;;  %v14816_v7 = vld [vmem:[%s15707_s17 + $0x1d0] sm:$0xff] }
 0x3b5   : > { %v2817_v25 = vpop.f32.mrf.mxu2 }
 0x3b6   : > { %v2312_v24 = vmax.f32 %v2114_v13, 0.0  ;;  %v2818_v28 = vadd.f32 %v16396_v21, %v2817_v25 }
 0x3b8   : > { %v2399_v30 = vpack.c.bf16 %v2312_v24, %v2311_v19  ;;  %v3043_v31 = vmax.f32 %v2818_v28, 0.0 }
 0x3b9   : > { %v1408_v34 = vpop.f32.mrf.mxu0 }
 0x3ba   : > { %v3171_v38 = vpack.c.bf16 %v3043_v31, %v3043_v31  ;;  %v1580_v41 = vmax.f32 %v1408_v34, 0.0  ;;  %12363 = vmatmul.msk.bf16.gmra.mxu2 %vm1709_vm2, %v2399_v30 }
 0x3bb   : > { %v2116_v45 = vpop.f32.mrf.mxu1  ;;  %v3846_v46 = vpop.f32.mrf.mxu3 }
 0x3bc   : > { %v4827_v43 = vunpack.c.l.b16 %v3171_v38  ;;  %v1658_v48 = vpack.c.bf16 %v1580_v41, %v1579_v29  ;;  %v4479_v49 = vmax.f32 %v4478_v20, %v3846_v46  ;;  %v2117_v6 = vadd.f32 %v16319_v55, %v2116_v45 }
 0x3bd   : > { %v2820_v61 = vpop.f32.mrf.mxu2 }
 0x3be   : > { %v16430_v63 = vpack.c.b16 %v4827_v43, %v4826_v37  ;;  %v2821_v3 = vadd.f32 %v16396_v21, %v2820_v61  ;;  %12292 = vmatmul.msk.bf16.gmra.mxu1 %vm1709_vm2, %v1658_v48  ;;  %v2313_v19 = vmax.f32 %v2117_v6, 0.0 }
 0x3c0   : > { %3888 = vmatmul.bf16.gmra.mxu3 %v16154_v44  ;;  %v3044_v14 = vmax.f32 %v2821_v3, 0.0 }
 0x3c1   : > { %v1411_v12 = vpop.f32.mrf.mxu0 }
 0x3c2   : > { %v3172_v22 = vpack.c.bf16 %v3044_v14, %v3044_v14  ;;  %v1581_v29 = vmax.f32 %v1411_v12, 0.0  ;;  %v14817_v12 = vld [vmem:[%s15707_s17 + $0x1d8] sm:$0xff] }
 0x3c3   : > { %v2118_v16 = vpop.f32.mrf.mxu1  ;;  %v3849_v17 = vpop.f32.mrf.mxu3 }
 0x3c4   : > { %v2119_v13 = vadd.f32 %v16319_v55, %v2118_v16  ;;  %v4480_v20 = vmax.f32 %v4479_v49, %v3849_v17  ;;  %12221 = vmatmul.msk.bf16.gmra.mxu0 %vm955_vm1, %v14816_v7  ;;  %v6260_v37 = vunpack.c.l.b16 %v3172_v22 }
 0x3c5   : > { %v2822_v25 = vpop.f32.mrf.mxu2 }
 0x3c6   : > { %v2314_v24 = vmax.f32 %v2119_v13, 0.0  ;;  %v2823_v28 = vadd.f32 %v16396_v21, %v2822_v25 }
 0x3c8   : > { %v2400_v30 = vpack.c.bf16 %v2314_v24, %v2313_v19  ;;  %v3045_v31 = vmax.f32 %v2823_v28, 0.0 }
 0x3c9   : > { %v1413_v34 = vpop.f32.mrf.mxu0 }
 0x3ca   : > { %v3173_v38 = vpack.c.bf16 %v3045_v31, %v3045_v31  ;;  %v1582_v41 = vmax.f32 %v1413_v34, 0.0  ;;  %12364 = vmatmul.msk.bf16.gmra.mxu2 %vm1709_vm2, %v2400_v30 }
 0x3cb   : > { %v2121_v45 = vpop.f32.mrf.mxu1  ;;  %v3851_v46 = vpop.f32.mrf.mxu3 }
 0x3cc   : > { %v6261_v43 = vunpack.c.l.b16 %v3173_v38  ;;  %v1659_v48 = vpack.c.bf16 %v1582_v41, %v1581_v29  ;;  %v4481_v49 = vmax.f32 %v4480_v20, %v3851_v46  ;;  %v2122_v7 = vadd.f32 %v16319_v55, %v2121_v45 }
 0x3cd   : > { %v2825_v61 = vpop.f32.mrf.mxu2 }
 0x3ce   : > { %v16441_v3 = vpack.c.b16 %v6261_v43, %v6260_v37  ;;  %v2826_v6 = vadd.f32 %v16396_v21, %v2825_v61  ;;  %12293 = vmatmul.msk.bf16.gmra.mxu1 %vm1709_vm2, %v1659_v48  ;;  %v2315_v13 = vmax.f32 %v2122_v7, 0.0 }
 0x3d0   : > { %3902 = vmatmul.bf16.vlgmr.msra.gmra.mxu3 %v15895_v50  ;;  %v3046_v16 = vmax.f32 %v2826_v6, 0.0 }
 0x3d1   : > { %v1416_v14 = vpop.f32.mrf.mxu0 }
 0x3d2   : > { %v3174_v24 = vpack.c.bf16 %v3046_v16, %v3046_v16  ;;  %v1583_v30 = vmax.f32 %v1416_v14, 0.0  ;;  %v14818_v16 = vld [vmem:[%s15707_s17 + $0x1e0] sm:$0xff] }
 0x3d3   : > { %v2123_v17 = vpop.f32.mrf.mxu1  ;;  %v3854_v19 = vpop.f32.mrf.mxu3 }
 0x3d4   : > { %v2124_v25 = vadd.f32 %v16319_v55, %v2123_v17  ;;  %v4482_v20 = vmax.f32 %v4481_v49, %v3854_v19  ;;  %12222 = vmatmul.msk.bf16.gmra.mxu0 %vm955_vm1, %v14817_v12  ;;  %v6262_v38 = vunpack.c.l.b16 %v3174_v24 }
 0x3d5   : > { %v2827_v22 = vpop.f32.mrf.mxu2 }
 0x3d6   : > { %v2316_v28 = vmax.f32 %v2124_v25, 0.0  ;;  %v2828_v29 = vadd.f32 %v16396_v21, %v2827_v22 }
 0x3d8   : > { %v2401_v31 = vpack.c.bf16 %v2316_v28, %v2315_v13  ;;  %v3047_v34 = vmax.f32 %v2828_v29, 0.0  ;;  %v12509_v28 = vld [vmem:[%s20881_s6 + $0xd8] sm:$0xf] }
 0x3d9   : > { %v1418_v37 = vpop.f32.mrf.mxu0  ;;  %v14861_v29 = vld [vmem:[%s20881_s6 + $0xf4] sm:$0xf0] }
 0x3da   : > { %v3175_v41 = vpack.c.bf16 %v3047_v34, %v3047_v34  ;;  %v1584_v45 = vmax.f32 %v1418_v37, 0.0  ;;  %12365 = vmatmul.msk.bf16.gmra.mxu2 %vm1709_vm2, %v2401_v31  ;;  %v12510_v31 = vor.u32 %v14861_v29, %v12509_v28  ;;  %v12501_v29 = vld [vmem:[%s20881_s6 + $0xd0] sm:$0xf] }
 0x3db   : > { %v2126_v46 = vpop.f32.mrf.mxu1  ;;  %v3856_v43 = vpop.f32.mrf.mxu3 }
 0x3dc   : > { %v6263_v48 = vunpack.c.l.b16 %v3175_v41  ;;  %v1660_v49 = vpack.c.bf16 %v1584_v45, %v1583_v30  ;;  %v4483_v61 = vmax.f32 %v4482_v20, %v3856_v43  ;;  %v2127_v14 = vadd.f32 %v16319_v55, %v2126_v46  ;;  %4254 = vmatpush.bf16.msrb.mxu2 %v12510_v31  ;;  %v14887_v43 = vld [vmem:[%s20881_s6 + $0x1cc] sm:$0xf] }
 0x3dd   : > { %v2830_v6 = vpop.f32.mrf.mxu2 }
 0x3de   : > { %v16452_v7 = vpack.c.b16 %v6263_v48, %v6262_v38  ;;  %v2831_v12 = vadd.f32 %v16396_v21, %v2830_v6  ;;  %12294 = vmatmul.msk.bf16.gmra.mxu1 %vm1709_vm2, %v1660_v49  ;;  %v2317_v22 = vmax.f32 %v2127_v14, 0.0  ;;  %v12623_v48 = vld [vmem:[%s20881_s6 + $0x1e8] sm:$0xf0] }
 0x3e0   : > { %3907 = vmatmul.bf16.gmra.mxu3 %v15906_v11  ;;  %v3048_v19 = vmax.f32 %v2831_v12, 0.0 }
 0x3e1   : > { %v1421_v17 = vpop.f32.mrf.mxu0 }
 0x3e2   : > { %v3176_v34 = vpack.c.bf16 %v3048_v19, %v3048_v19  ;;  %v1585_v41 = vmax.f32 %v1421_v17, 0.0 }
 0x3e3   : > { %v2128_v13 = vpop.f32.mrf.mxu1  ;;  %v3859_v25 = vpop.f32.mrf.mxu3 }
 0x3e4   : > { %v2129_v24 = vadd.f32 %v16319_v55, %v2128_v13  ;;  %v4484_v20 = vmax.f32 %v4483_v61, %v3859_v25  ;;  %12223 = vmatmul.msk.bf16.gmra.mxu0 %vm955_vm1, %v14818_v16  ;;  %v12626_v61 = vor.u32 %v14887_v43, %v12623_v48  ;;  %v6264_v6 = vunpack.c.l.b16 %v3176_v34  ;;  %v12503_v34 = vld [vmem:[%s20881_s6 + $0xf0] sm:$0xf0] }
 0x3e5   : > { %v2832_v30 = vpop.f32.mrf.mxu2 }
 0x3e6   : > { %v2318_v37 = vmax.f32 %v2129_v24, 0.0  ;;  %v2833_v38 = vadd.f32 %v16396_v21, %v2832_v30  ;;  %3983 = vmatpush.bf16.msrb.mxu3 %v12626_v61  ;;  %v14860_v30 = vld [vmem:[%s20881_s6 + $0xec] sm:$0xf0] }
 0x3e7   : > { %v12502_v31 = vor.u32 %v14860_v30, %v12501_v29 }
 0x3e8   : > { %v2402_v45 = vpack.c.bf16 %v2318_v37, %v2317_v22  ;;  %v3049_v46 = vmax.f32 %v2833_v38, 0.0  ;;  %v14819_v38 = vld [vmem:[%s15707_s17 + $0x1e8] sm:$0xff] }
 0x3e9   : > { %v1423_v49 = vpop.f32.mrf.mxu0  ;;  %4076 = vmatpush.bf16.msrb.mxu0 %v12502_v31 }
 0x3ea   : > { %v3177_v12 = vpack.c.bf16 %v3049_v46, %v3049_v46  ;;  %v1586_v14 = vmax.f32 %v1423_v49, 0.0  ;;  %12366 = vmatmul.msk.bf16.gmra.mxu2 %vm1709_vm2, %v2402_v45 }
 0x3eb   : > { %v2131_v16 = vpop.f32.mrf.mxu1  ;;  %v3861_v19 = vpop.f32.mrf.mxu3 }
 0x3ec   : > { %v6265_v17 = vunpack.c.l.b16 %v3177_v12  ;;  %v1661_v13 = vpack.c.bf16 %v1586_v14, %v1585_v41  ;;  %v4485_v25 = vmax.f32 %v4484_v20, %v3861_v19  ;;  %v14856_v20 = vld [vmem:[%s20881_s6 + $0xd4] sm:$0xf]  ;;  %v2132_v37 = vadd.f32 %v16319_v55, %v2131_v16 }
 0x3ed   : > { %v2835_v22 = vpop.f32.mrf.mxu2  ;;  %v12506_v41 = vor.u32 %v14856_v20, %v12503_v34 }
 0x3ee   : > { %v16475_v24 = vpack.c.b16 %v6265_v17, %v6264_v6  ;;  %v2836_v28 = vadd.f32 %v16396_v21, %v2835_v22  ;;  %12295 = vmatmul.msk.bf16.gmra.mxu1 %vm1709_vm2, %v1661_v13  ;;  %v2319_v49 = vmax.f32 %v2132_v37, 0.0  ;;  %v12469_v17 = vld [vmem:[%s20881_s6 + $0x90] sm:$0xf] }
 0x3ef   : > { %4165 = vmatpush.bf16.msrb.mxu1 %v12506_v41  ;;  %v14852_v13 = vld [vmem:[%s20881_s6 + $0xac] sm:$0xf0] }
 0x3f0   : > { %20931 = vst [vmem:[#allocation8_spill] sm:$0xff] %v16475_v24  ;;  %3912 = vmatmul.bf16.gmra.mxu3 %v15929_v42  ;;  %v3050_v46 = vmax.f32 %v2836_v28, 0.0  ;;  %v12470_v22 = vor.u32 %v14852_v13, %v12469_v17  ;;  %v12437_v37 = vld [vmem:[%s20881_s6 + $0x50] sm:$0xf] }
 0x3f1   : > { %v1426_v45 = vpop.f32.mrf.mxu0 }
 0x3f2   : > { %v3178_v14 = vpack.c.bf16 %v3050_v46, %v3050_v46  ;;  %v1587_v28 = vmax.f32 %v1426_v45, 0.0  ;;  %4077 = vmatpush.bf16.msrb.mxu0 %v12470_v22 }
 0x3f3   : > { %v2133_v43 = vpop.f32.mrf.mxu1  ;;  %v3864_v48 = vpop.f32.mrf.mxu3 }
 0x3f4   : > { %v2134_v61 = vadd.f32 %v16319_v55, %v2133_v43  ;;  %v4486_v6 = vmax.f32 %v4485_v25, %v3864_v48  ;;  %12224 = vmatmul.msk.bf16.gmra.mxu0 %vm955_vm1, %v14819_v38  ;;  %v6266_v31 = vunpack.c.l.b16 %v3178_v14  ;;  %v14844_v38 = vld [vmem:[%s20881_s6 + $0x6c] sm:$0xf0] }
 0x3f5   : > { %v2837_v12 = vpop.f32.mrf.mxu2  ;;  %v12438_v46 = vor.u32 %v14844_v38, %v12437_v37 }
 0x3f6   : > { %v2320_v19 = vmax.f32 %v2134_v61, 0.0  ;;  %v2838_v16 = vadd.f32 %v16396_v21, %v2837_v12 }
 0x3f7   : > { %4078 = vmatpush.bf16.msrb.mxu0 %v12438_v46 }
 0x3f8   : > { %v2403_v29 = vpack.c.bf16 %v2320_v19, %v2319_v49  ;;  %v3051_v30 = vmax.f32 %v2838_v16, 0.0  ;;  %v12405_v19 = vld [vmem:[%s20881_s6 + $0x10] sm:$0xf] }
 0x3f9   : > { %v1428_v25 = vpop.f32.mrf.mxu0  ;;  %v14836_v16 = vld [vmem:[%s20881_s6 + $0x2c] sm:$0xf0] }
 0x3fa   : > { %v3179_v20 = vpack.c.bf16 %v3051_v30, %v3051_v30  ;;  %v1588_v34 = vmax.f32 %v1428_v25, 0.0  ;;  %12367 = vmatmul.msk.bf16.gmra.mxu2 %vm1709_vm2, %v2403_v29  ;;  %v12406_v17 = vor.u32 %v14836_v16, %v12405_v19 }
 0x3fb   : > { %v2136_v41 = vpop.f32.mrf.mxu1  ;;  %v3866_v45 = vpop.f32.mrf.mxu3 }
 0x3fc   : > { %v6267_v43 = vunpack.c.l.b16 %v3179_v20  ;;  %v1662_v48 = vpack.c.bf16 %v1588_v34, %v1587_v28  ;;  %v4487_v49 = vmax.f32 %v4486_v6, %v3866_v45  ;;  %v2137_v13 = vadd.f32 %v16319_v55, %v2136_v41  ;;  %v14820_v6 = vld [vmem:[%s15707_s17 + $0x1f0] sm:$0xff]  ;;  %4079 = vmatpush.bf16.msrb.mxu0 %v12406_v17 }
 0x3fd   : > { %v2840_v61 = vpop.f32.mrf.mxu2 }
 0x3fe   : > { %v16510_v12 = vpack.c.b16 %v6267_v43, %v6266_v31  ;;  %v2841_v14 = vadd.f32 %v16396_v21, %v2840_v61  ;;  %12296 = vmatmul.msk.bf16.gmra.mxu1 %vm1709_vm2, %v1662_v48  ;;  %v2321_v25 = vmax.f32 %v2137_v13, 0.0  ;;  %v14879_v48 = vld [vmem:[%s20881_s6 + $0x18c] sm:$0xf] }
 0x3ff   : > { %v12591_v61 = vld [vmem:[%s20881_s6 + $0x1a8] sm:$0xf0] }
 0x400   : > { %20932 = vst [vmem:[#allocation9_spill] sm:$0xff] %v16510_v12  ;;  %3917 = vmatmul.bf16.gmra.mxu3 %v15952_v10  ;;  %v3052_v28 = vmax.f32 %v2841_v14, 0.0 }
 0x401   : > { %v1431_v22 = vpop.f32.mrf.mxu0 }
 0x402   : > { %v3180_v37 = vpack.c.bf16 %v3052_v28, %v3052_v28  ;;  %v1589_v41 = vmax.f32 %v1431_v22, 0.0 }
 0x403   : > { %v2138_v29 = vpop.f32.mrf.mxu1  ;;  %v3869_v30 = vpop.f32.mrf.mxu3 }
 0x404   : > { %v2139_v31 = vadd.f32 %v16319_v55, %v2138_v29  ;;  %v4488_v20 = vmax.f32 %v4487_v49, %v3869_v30  ;;  %12225 = vmatmul.msk.bf16.gmra.mxu0 %vm955_vm1, %v14820_v6  ;;  %v12594_v49 = vor.u32 %v14879_v48, %v12591_v61  ;;  %v6268_v19 = vunpack.c.l.b16 %v3180_v37  ;;  %v14821_v37 = vld [vmem:[%s15707_s17 + $0x1f8] sm:$0xff]  ;;  %s481_s17 = sand.u32 1, %s15551_s30  }
 0x405   : > { %v2842_v34 = vpop.f32.mrf.mxu2  ;;  %s482_s2 = scalar_lea.vmem [#allocation3], %s481_s17  ;;  %s11819_s22 = scalar_lea.sflag [#allocation4], %s481_s17 }
 0x406   : > { %v2322_v38 = vmax.f32 %v2139_v31, 0.0  ;;  %v2843_v45 = vadd.f32 %v16396_v21, %v2842_v34  ;;  %3984 = vmatpush.bf16.msrb.mxu3 %v12594_v49  ;;  %s11829_s0 = sshll.u32 %s482_s2, 4  ;;  %s11830_s0 = int_to_ptr.vmem [resolvable:$true] %s11829_s0 }
 0x408   : > { %v2404_v46 = vpack.c.bf16 %v2322_v38, %v2321_v25  ;;  %v3053_v43 = vmax.f32 %v2843_v45, 0.0 }
 0x409   : > { %v1433_v14 = vpop.f32.mrf.mxu0 }
 0x40a   : > { %v3181_v16 = vpack.c.bf16 %v3053_v43, %v3053_v43  ;;  %v1590_v17 = vmax.f32 %v1433_v14, 0.0  ;;  %12368 = vmatmul.msk.bf16.gmra.mxu2 %vm1709_vm2, %v2404_v46 }
 0x40b   : > { %v2141_v13 = vpop.f32.mrf.mxu1  ;;  %v3871_v6 = vpop.f32.mrf.mxu3 }
 0x40c   : > { %v6269_v22 = vunpack.c.l.b16 %v3181_v16  ;;  %v1663_v28 = vpack.c.bf16 %v1590_v17, %v1589_v41  ;;  %v4489_v29 = vmax.f32 %v4488_v20, %v3871_v6  ;;  %v2142_v34 = vadd.f32 %v16319_v55, %v2141_v13 }
 0x40d   : > { %v2845_v30 = vpop.f32.mrf.mxu2 }
 0x40e   : > { %v16533_v25 = vpack.c.b16 %v6269_v22, %v6268_v19  ;;  %v2846_v31 = vadd.f32 %v16396_v21, %v2845_v30  ;;  %12297 = vmatmul.msk.bf16.gmra.mxu1 %vm1709_vm2, %v1663_v28  ;;  %v2323_v48 = vmax.f32 %v2142_v34, 0.0 }
 0x410   : > { %20933 = vst [vmem:[#allocation10_spill] sm:$0xff] %v16533_v25  ;;  %3922 = vmatmul.bf16.gmra.mxu3 %v15969_v39  ;;  %v3054_v45 = vmax.f32 %v2846_v31, 0.0 }
 0x411   : > { %v1436_v38 = vpop.f32.mrf.mxu0 }
 0x412   : > { %v3182_v14 = vpack.c.bf16 %v3054_v45, %v3054_v45  ;;  %v1591_v16 = vmax.f32 %v1436_v38, 0.0 }
 0x413   : > { %v2143_v46 = vpop.f32.mrf.mxu1  ;;  %v3874_v43 = vpop.f32.mrf.mxu3 }
 0x414   : > { %v2144_v41 = vadd.f32 %v16319_v55, %v2143_v46  ;;  %v4490_v20 = vmax.f32 %v4489_v29, %v3874_v43  ;;  %12226 = vmatmul.msk.bf16.gmra.mxu0 %vm955_vm1, %v14821_v37  ;;  %v6270_v22 = vunpack.c.l.b16 %v3182_v14 }
 0x415   : > { %v2847_v61 = vpop.f32.mrf.mxu2 }
 0x416   : > { %v2324_v49 = vmax.f32 %v2144_v41, 0.0  ;;  %v2848_v19 = vadd.f32 %v16396_v21, %v2847_v61 }
 0x418   : > { %v2405_v17 = vpack.c.bf16 %v2324_v49, %v2323_v48  ;;  %v3055_v13 = vmax.f32 %v2848_v19, 0.0 }
 0x419   : > { %v1438_v6 = vpop.f32.mrf.mxu0 }
 0x41a   : > { %v3183_v28 = vpack.c.bf16 %v3055_v13, %v3055_v13  ;;  %v1592_v30 = vmax.f32 %v1438_v6, 0.0  ;;  %12369 = vmatmul.msk.bf16.gmra.mxu2 %vm1709_vm2, %v2405_v17 }
 0x41b   : > { %v2146_v31 = vpop.f32.mrf.mxu1  ;;  %v3876_v34 = vpop.f32.mrf.mxu3 }
 0x41c   : > { %v6271_v46 = vunpack.c.l.b16 %v3183_v28  ;;  %v1664_v29 = vpack.c.bf16 %v1592_v30, %v1591_v16  ;;  %v4491_v43 = vmax.f32 %v4490_v20, %v3876_v34  ;;  %v2147_v38 = vadd.f32 %v16319_v55, %v2146_v31  ;;  %v14871_v31 = vld [vmem:[%s20881_s6 + $0x14c] sm:$0xf] }
 0x41d   : > { %v2850_v37 = vpop.f32.mrf.mxu2  ;;  %v12559_v34 = vld [vmem:[%s20881_s6 + $0x168] sm:$0xf0] }
 0x41e   : > { %v16544_v2 = vpack.c.b16 %v6271_v46, %v6270_v22  ;;  %v2851_v45 = vadd.f32 %v16396_v21, %v2850_v37  ;;  %12298 = vmatmul.msk.bf16.gmra.mxu1 %vm1709_vm2, %v1664_v29  ;;  %v2325_v49 = vmax.f32 %v2147_v38, 0.0  ;;  %v12562_v29 = vor.u32 %v14871_v31, %v12559_v34 }
 0x420   : > { %20934 = vst [vmem:[#allocation11_spill] sm:$0xff] %v16544_v2  ;;  %3927 = vmatmul.bf16.gmra.mxu3 %v15980_v1  ;;  %v3056_v41 = vmax.f32 %v2851_v45, 0.0 }
 0x421   : > { %v1441_v48 = vpop.f32.mrf.mxu0  ;;  %3985 = vmatpush.bf16.msrb.mxu3 %v12562_v29 }
 0x422   : > { %v3184_v17 = vpack.c.bf16 %v3056_v41, %v3056_v41  ;;  %v1593_v22 = vmax.f32 %v1441_v48, 0.0 }
 0x423   : > { %v2148_v61 = vpop.f32.mrf.mxu1  ;;  %v3879_v14 = vpop.f32.mrf.mxu3 }
 0x424   : > { %v2149_v19 = vadd.f32 %v16319_v55, %v2148_v61  ;;  %v4492_v16 = vmax.f32 %v4491_v43, %v3879_v14  ;;  %4080 = vmatmul.bf16.vlgmr.msrb.gmra.mxu0 %v15895_v50  ;;  %v6272_v43 = vunpack.c.l.b16 %v3184_v17 }
 0x425   : > { %v2852_v20 = vpop.f32.mrf.mxu2 }
 0x426   : > { %v2326_v13 = vmax.f32 %v2149_v19, 0.0  ;;  %v2853_v6 = vadd.f32 %v16396_v21, %v2852_v20 }
 0x428   : > { %v2406_v28 = vpack.c.bf16 %v2326_v13, %v2325_v49  ;;  %v3057_v30 = vmax.f32 %v2853_v6, 0.0 }
 0x429   : > { %v1443_v46 = vpop.f32.mrf.mxu0 }
 0x42a   : > { %v3185_v37 = vpack.c.bf16 %v3057_v30, %v3057_v30  ;;  %v1594_v45 = vmax.f32 %v1443_v46, 0.0  ;;  %12370 = vmatmul.msk.bf16.gmra.mxu2 %vm1709_vm2, %v2406_v28 }
 0x42b   : > { %v2151_v38 = vpop.f32.mrf.mxu1  ;;  %v3881_v41 = vpop.f32.mrf.mxu3 }
 0x42c   : > { %v6273_v48 = vunpack.c.l.b16 %v3185_v37  ;;  %v1665_v61 = vpack.c.bf16 %v1594_v45, %v1593_v22  ;;  %v4493_v14 = vmax.f32 %v4492_v16, %v3881_v41  ;;  %v2152_v13 = vadd.f32 %v16319_v55, %v2151_v38 }
 0x42d   : > { %v2855_v49 = vpop.f32.mrf.mxu2 }
 0x42e   : > { %v16560_v19 = vpack.c.b16 %v6273_v48, %v6272_v43  ;;  %v2856_v20 = vadd.f32 %v16396_v21, %v2855_v49  ;;  %12299 = vmatmul.msk.bf16.gmra.mxu1 %vm1709_vm2, %v1665_v61  ;;  %v2327_v31 = vmax.f32 %v2152_v13, 0.0 }
 0x430   : > { %20935 = vst [vmem:[#allocation12_spill] sm:$0xff] %v16560_v19  ;;  %3932 = vmatmul.bf16.gmra.mxu3 %v15997_v32  ;;  %v3058_v6 = vmax.f32 %v2856_v20, 0.0 }
 0x431   : > { %v1446_v17 = vpop.f32.mrf.mxu0 }
 0x432   : > { %v3186_v46 = vpack.c.bf16 %v3058_v6, %v3058_v6  ;;  %v1595_v37 = vmax.f32 %v1446_v17, 0.0 }
 0x433   : > { %v2153_v28 = vpop.f32.mrf.mxu1  ;;  %v3884_v30 = vpop.f32.mrf.mxu3 }
 0x434   : > { %v2154_v34 = vadd.f32 %v16319_v55, %v2153_v28  ;;  %v4494_v22 = vmax.f32 %v4493_v14, %v3884_v30  ;;  %4085 = vmatmul.bf16.gmra.mxu0 %v15906_v11  ;;  %v6274_v48 = vunpack.c.l.b16 %v3186_v46 }
 0x435   : > { %v2857_v16 = vpop.f32.mrf.mxu2 }
 0x436   : > { %v2328_v29 = vmax.f32 %v2154_v34, 0.0  ;;  %v2858_v43 = vadd.f32 %v16396_v21, %v2857_v16 }
 0x438   : > { %v2407_v45 = vpack.c.bf16 %v2328_v29, %v2327_v31  ;;  %v3059_v38 = vmax.f32 %v2858_v43, 0.0 }
 0x439   : > { %v1448_v41 = vpop.f32.mrf.mxu0 }
 0x43a   : > { %v3187_v61 = vpack.c.bf16 %v3059_v38, %v3059_v38  ;;  %v1596_v49 = vmax.f32 %v1448_v41, 0.0  ;;  %12371 = vmatmul.msk.bf16.gmra.mxu2 %vm1709_vm2, %v2407_v45 }
 0x43b   : > { %v2156_v20 = vpop.f32.mrf.mxu1  ;;  %v3886_v13 = vpop.f32.mrf.mxu3 }
 0x43c   : > { %v6275_v28 = vunpack.c.l.b16 %v3187_v61  ;;  %v1666_v14 = vpack.c.bf16 %v1596_v49, %v1595_v37  ;;  %v4495_v30 = vmax.f32 %v4494_v22, %v3886_v13  ;;  %v2157_v17 = vadd.f32 %v16319_v55, %v2156_v20  ;;  %v16579_v22 = vld [vmem:[%s20878_s3] ss:$0 sm:$0xff]  ;;  %v14863_v49 = vld [vmem:[%s20881_s6 + $0x10c] sm:$0xf] }
 0x43d   : > { %v2860_v19 = vpop.f32.mrf.mxu2  ;;  %v12527_v20 = vld [vmem:[%s20881_s6 + $0x128] sm:$0xf0] }
 0x43e   : > { %v16570_v2 = vpack.c.b16 %v6275_v28, %v6274_v48  ;;  %v2861_v6 = vadd.f32 %v16396_v21, %v2860_v19  ;;  %12300 = vmatmul.msk.bf16.gmra.mxu1 %vm1709_vm2, %v1666_v14  ;;  %v2329_v29 = vmax.f32 %v2157_v17, 0.0  ;;  %v12530_v28 = vor.u32 %v14863_v49, %v12527_v20 }
 0x440   : > { %20936 = vst [vmem:[#allocation13_spill] sm:$0xff] %v16570_v2  ;;  %3937 = vmatmul.bf16.gmra.mxu3 %v16008_v59  ;;  %v3060_v34 = vmax.f32 %v2861_v6, 0.0 }
 0x441   : > { %v1451_v31 = vpop.f32.mrf.mxu0  ;;  %3986 = vmatpush.bf16.msrb.mxu3 %v12530_v28 }
 0x442   : > { %v3188_v55 = vpack.c.bf16 %v3060_v34, %v3060_v34  ;;  %v1597_v41 = vmax.f32 %v1451_v31, 0.0 }
 0x443   : > { %v2158_v16 = vpop.f32.mrf.mxu1  ;;  %v3889_v46 = vpop.f32.mrf.mxu3 }
 0x444   : > { %v2159_v43 = vadd.f32 %v16579_v22, %v2158_v16  ;;  %v16582_v37 = vmax.f32 %v4495_v30, %v3889_v46  ;;  %4090 = vmatmul.bf16.gmra.mxu0 %v15929_v42  ;;  %v6276_v14 = vunpack.c.l.b16 %v3188_v55 }
 0x445   : > { %v2862_v19 = vpop.f32.mrf.mxu2 }
 0x446   : > { %v2330_v45 = vmax.f32 %v2159_v43, 0.0  ;;  %v2863_v38 = vadd.f32 %v16396_v21, %v2862_v19 }
 0x448   : > { %v2408_v48 = vpack.c.bf16 %v2330_v45, %v2329_v29  ;;  %v3061_v61 = vmax.f32 %v2863_v38, 0.0 }
 0x449   : > { %v1453_v13 = vpop.f32.mrf.mxu0 }
 0x44a   : > { %v3189_v30 = vpack.c.bf16 %v3061_v61, %v3061_v61  ;;  %v1598_v6 = vmax.f32 %v1453_v13, 0.0  ;;  %12372 = vmatmul.msk.bf16.gmra.mxu2 %vm1709_vm2, %v2408_v48 }
 0x44b   : > { %v2161_v17 = vpop.f32.mrf.mxu1  ;;  %v16593_v34 = vpop.f32.mrf.mxu3 }
 0x44c   : > { %v6277_v31 = vunpack.c.l.b16 %v3189_v30  ;;  %v1667_v16 = vpack.c.bf16 %v1598_v6, %v1597_v41  ;;  %v2162_v55 = vadd.f32 %v16579_v22, %v2161_v17 }
 0x44d   : > { %v2865_v29 = vpop.f32.mrf.mxu2 }
 0x44e   : > { %v16597_v43 = vpack.c.b16 %v6277_v31, %v6276_v14  ;;  %v2866_v19 = vadd.f32 %v16396_v21, %v2865_v29  ;;  %12301 = vmatmul.msk.bf16.gmra.mxu1 %vm1709_vm2, %v1667_v16  ;;  %v2331_v49 = vmax.f32 %v2162_v55, 0.0 }
 0x450   : > { %20937 = vst [vmem:[#allocation14_spill] sm:$0xff] %v16597_v43  ;;  %3942 = vmatmul.bf16.gmra.mxu3 %v16025_v27  ;;  %v3062_v38 = vmax.f32 %v2866_v19, 0.0 }
 0x451   : > { %v1456_v45 = vpop.f32.mrf.mxu0 }
 0x452   : > { %v3190_v13 = vpack.c.bf16 %v3062_v38, %v3062_v38  ;;  %v1599_v30 = vmax.f32 %v1456_v45, 0.0 }
 0x453   : > { %v2163_v48 = vpop.f32.mrf.mxu1  ;;  %v3903_v61 = vpop.f32.mrf.mxu3 }
 0x454   : > { %v2164_v41 = vadd.f32 %v16579_v22, %v2163_v48  ;;  %4095 = vmatmul.bf16.gmra.mxu0 %v15952_v10  ;;  %v6278_v16 = vunpack.c.l.b16 %v3190_v13 }
 0x455   : > { %v2867_v20 = vpop.f32.mrf.mxu2 }
 0x456   : > { %v2332_v28 = vmax.f32 %v2164_v41, 0.0  ;;  %v2868_v14 = vadd.f32 %v16396_v21, %v2867_v20 }
 0x458   : > { %v2409_v6 = vpack.c.bf16 %v2332_v28, %v2331_v49  ;;  %v3063_v31 = vmax.f32 %v2868_v14, 0.0 }
 0x459   : > { %v1458_v17 = vpop.f32.mrf.mxu0 }
 0x45a   : > { %v3191_v29 = vpack.c.bf16 %v3063_v31, %v3063_v31  ;;  %v1600_v46 = vmax.f32 %v1458_v17, 0.0  ;;  %12373 = vmatmul.msk.bf16.gmra.mxu2 %vm1709_vm2, %v2409_v6 }
 0x45b   : > { %v2166_v19 = vpop.f32.mrf.mxu1  ;;  %v3905_v55 = vpop.f32.mrf.mxu3 }
 0x45c   : > { %v6279_v43 = vunpack.c.l.b16 %v3191_v29  ;;  %v1668_v48 = vpack.c.bf16 %v1600_v46, %v1599_v30  ;;  %v4498_v2 = vmax.f32 %v3903_v61, %v3905_v55  ;;  %v2167_v45 = vadd.f32 %v16579_v22, %v2166_v19  ;;  %v14855_v19 = vld [vmem:[%s20881_s6 + $0xcc] sm:$0xf] }
 0x45d   : > { %v2870_v25 = vpop.f32.mrf.mxu2  ;;  %v12495_v55 = vld [vmem:[%s20881_s6 + $0xe8] sm:$0xf0] }
 0x45e   : > { %v16607_v12 = vpack.c.b16 %v6279_v43, %v6278_v16  ;;  %v2871_v38 = vadd.f32 %v16396_v21, %v2870_v25  ;;  %12302 = vmatmul.msk.bf16.gmra.mxu1 %vm1709_vm2, %v1668_v48  ;;  %v2333_v28 = vmax.f32 %v2167_v45, 0.0  ;;  %v12477_v25 = vld [vmem:[%s20881_s6 + $0x98] sm:$0xf] }
 0x45f   : > { %v14853_v43 = vld [vmem:[%s20881_s6 + $0xb4] sm:$0xf0] }
 0x460   : > { %20938 = vst [vmem:[#allocation15_spill] sm:$0xff] %v16607_v12  ;;  %3947 = vmatmul.bf16.gmra.mxu3 %v16036_v58  ;;  %v3064_v41 = vmax.f32 %v2871_v38, 0.0  ;;  %v12478_v30 = vor.u32 %v14853_v43, %v12477_v25  ;;  %v12498_v38 = vor.u32 %v14855_v19, %v12495_v55 }
 0x461   : > { %v1461_v49 = vpop.f32.mrf.mxu0 }
 0x462   : > { %v3192_v6 = vpack.c.bf16 %v3064_v41, %v3064_v41  ;;  %4255 = vmatpush.bf16.msrb.mxu2 %v12478_v30  ;;  %v1601_v16 = vmax.f32 %v1461_v49, 0.0  ;;  %3987 = vmatpush.bf16.msrb.mxu3 %v12498_v38 }
 0x463   : > { %v2168_v20 = vpop.f32.mrf.mxu1  ;;  %v3908_v13 = vpop.f32.mrf.mxu3 }
 0x464   : > { %v2169_v14 = vadd.f32 %v16579_v22, %v2168_v20  ;;  %v4499_v46 = vmax.f32 %v4498_v2, %v3908_v13  ;;  %4100 = vmatmul.bf16.gmra.mxu0 %v15969_v39  ;;  %v6280_v45 = vunpack.c.l.b16 %v3192_v6  ;;  %v14848_v6 = vld [vmem:[%s20881_s6 + $0x94] sm:$0xf] }
 0x465   : > { %v2872_v61 = vpop.f32.mrf.mxu2 }
 0x466   : > { %v2334_v31 = vmax.f32 %v2169_v14, 0.0  ;;  %v2873_v17 = vadd.f32 %v16396_v21, %v2872_v61 }
 0x468   : > { %v2410_v29 = vpack.c.bf16 %v2334_v31, %v2333_v28  ;;  %v3065_v2 = vmax.f32 %v2873_v17, 0.0  ;;  %v12471_v31 = vld [vmem:[%s20881_s6 + $0xb0] sm:$0xf0] }
 0x469   : > { %v1463_v48 = vpop.f32.mrf.mxu0  ;;  %v12474_v17 = vor.u32 %v14848_v6, %v12471_v31 }
 0x46a   : > { %v3193_v20 = vpack.c.bf16 %v3065_v2, %v3065_v2  ;;  %v1602_v41 = vmax.f32 %v1463_v48, 0.0  ;;  %12374 = vmatmul.msk.bf16.gmra.mxu2 %vm1709_vm2, %v2410_v29 }
 0x46b   : > { %v2171_v13 = vpop.f32.mrf.mxu1  ;;  %v3910_v14 = vpop.f32.mrf.mxu3  ;;  %4166 = vmatpush.bf16.msrb.mxu1 %v12474_v17 }
 0x46c   : > { %v6281_v49 = vunpack.c.l.b16 %v3193_v20  ;;  %v1669_v28 = vpack.c.bf16 %v1602_v41, %v1601_v16  ;;  %v4500_v25 = vmax.f32 %v4499_v46, %v3910_v14  ;;  %v2172_v29 = vadd.f32 %v16579_v22, %v2171_v13 }
 0x46d   : > { %v2875_v43 = vpop.f32.mrf.mxu2 }
 0x46e   : > { %v16629_v61 = vpack.c.b16 %v6281_v49, %v6280_v45  ;;  %v2876_v30 = vadd.f32 %v16396_v21, %v2875_v43  ;;  %12303 = vmatmul.msk.bf16.gmra.mxu1 %vm1709_vm2, %v1669_v28  ;;  %v2335_v55 = vmax.f32 %v2172_v29, 0.0 }
 0x470   : > { %20939 = vst [vmem:[#allocation16_spill] sm:$0xff] %v16629_v61  ;;  %3952 = vmatmul.bf16.gmra.mxu3 %v16059_v35  ;;  %v3066_v16 = vmax.f32 %v2876_v30, 0.0 }
 0x471   : > { %v1466_v46 = vpop.f32.mrf.mxu0 }
 0x472   : > { %v3194_v20 = vpack.c.bf16 %v3066_v16, %v3066_v16  ;;  %v1603_v49 = vmax.f32 %v1466_v46, 0.0 }
 0x473   : > { %v2173_v2 = vpop.f32.mrf.mxu1  ;;  %v3913_v19 = vpop.f32.mrf.mxu3 }
 0x474   : > { %v2174_v48 = vadd.f32 %v16579_v22, %v2173_v2  ;;  %v4501_v38 = vmax.f32 %v4500_v25, %v3913_v19  ;;  %4105 = vmatmul.bf16.gmra.mxu0 %v15980_v1  ;;  %v6282_v6 = vunpack.c.l.b16 %v3194_v20 }
 0x475   : > { %v2877_v45 = vpop.f32.mrf.mxu2 }
 0x476   : > { %v2336_v41 = vmax.f32 %v2174_v48, 0.0  ;;  %v2878_v14 = vadd.f32 %v16396_v21, %v2877_v45 }
 0x478   : > { %v2411_v13 = vpack.c.bf16 %v2336_v41, %v2335_v55  ;;  %v3067_v28 = vmax.f32 %v2878_v14, 0.0 }
 0x479   : > { %v1468_v43 = vpop.f32.mrf.mxu0 }
 0x47a   : > { %v3195_v31 = vpack.c.bf16 %v3067_v28, %v3067_v28  ;;  %v1604_v30 = vmax.f32 %v1468_v43, 0.0  ;;  %12375 = vmatmul.msk.bf16.gmra.mxu2 %vm1709_vm2, %v2411_v13 }
 0x47b   : > { %v2176_v17 = vpop.f32.mrf.mxu1  ;;  %v3915_v29 = vpop.f32.mrf.mxu3 }
 0x47c   : > { %v6283_v2 = vunpack.c.l.b16 %v3195_v31  ;;  %v1670_v25 = vpack.c.bf16 %v1604_v30, %v1603_v49  ;;  %v4502_v19 = vmax.f32 %v4501_v38, %v3915_v29  ;;  %v2177_v46 = vadd.f32 %v16579_v22, %v2176_v17 }
 0x47d   : > { %v2880_v61 = vpop.f32.mrf.mxu2 }
 0x47e   : > { %v16645_v12 = vpack.c.b16 %v6283_v2, %v6282_v6  ;;  %v2881_v16 = vadd.f32 %v16396_v21, %v2880_v61  ;;  %12304 = vmatmul.msk.bf16.gmra.mxu1 %vm1709_vm2, %v1670_v25  ;;  %v2337_v41 = vmax.f32 %v2177_v46, 0.0  ;;  %v14840_v21 = vld [vmem:[%s20881_s6 + $0x54] sm:$0xf]  ;;  %v16662_v6 = vld [vmem:[%s20880_s5] ss:$0 sm:$0xff] }
 0x47f   : > { %v12439_v61 = vld [vmem:[%s20881_s6 + $0x70] sm:$0xf0]  ;;  %v14847_v2 = vld [vmem:[%s20881_s6 + $0x8c] sm:$0xf] }
 0x480   : > { %20940 = vst [vmem:[#allocation17_spill] sm:$0xff] %v16645_v12  ;;  %3957 = vmatmul.bf16.gmra.mxu3 %v16087_v15  ;;  %v3068_v48 = vmax.f32 %v2881_v16, 0.0  ;;  %v12442_v13 = vor.u32 %v14840_v21, %v12439_v61  ;;  %v12463_v25 = vld [vmem:[%s20881_s6 + $0xa8] sm:$0xf0]  ;;  %v14832_v46 = vld [vmem:[%s20881_s6 + $0x14] sm:$0xf] }
 0x481   : > { %v1471_v55 = vpop.f32.mrf.mxu0  ;;  %v12466_v16 = vor.u32 %v14847_v2, %v12463_v25 }
 0x482   : > { %v3196_v28 = vpack.c.bf16 %v3068_v48, %v3068_v48  ;;  %4167 = vmatpush.bf16.msrb.mxu1 %v12442_v13  ;;  %v1605_v30 = vmax.f32 %v1471_v55, 0.0  ;;  %v12407_v55 = vld [vmem:[%s20881_s6 + $0x30] sm:$0xf0] }
 0x483   : > { %v2178_v45 = vpop.f32.mrf.mxu1  ;;  %v3918_v20 = vpop.f32.mrf.mxu3  ;;  %3988 = vmatpush.bf16.msrb.mxu3 %v12466_v16 }
 0x484   : > { %v2179_v14 = vadd.f32 %v16579_v22, %v2178_v45  ;;  %v4503_v49 = vmax.f32 %v4502_v19, %v3918_v20  ;;  %4110 = vmatmul.bf16.gmra.mxu0 %v15997_v32  ;;  %v6284_v48 = vunpack.c.l.b16 %v3196_v28 }
 0x485   : > { %v2882_v38 = vpop.f32.mrf.mxu2 }
 0x486   : > { %v2338_v43 = vmax.f32 %v2179_v14, 0.0  ;;  %v2883_v31 = vadd.f32 %v16662_v6, %v2882_v38 }
 0x488   : > { %v2412_v17 = vpack.c.bf16 %v2338_v43, %v2337_v41  ;;  %v3069_v29 = vmax.f32 %v2883_v31, 0.0  ;;  %v12410_v41 = vor.u32 %v14832_v46, %v12407_v55 }
 0x489   : > { %v1473_v19 = vpop.f32.mrf.mxu0 }
 0x48a   : > { %v3197_v45 = vpack.c.bf16 %v3069_v29, %v3069_v29  ;;  %v1606_v20 = vmax.f32 %v1473_v19, 0.0  ;;  %12376 = vmatmul.msk.bf16.gmra.mxu2 %vm1709_vm2, %v2412_v17  ;;  %4168 = vmatpush.bf16.msrb.mxu1 %v12410_v41 }
 0x48b   : > { %v2181_v14 = vpop.f32.mrf.mxu1  ;;  %v3920_v21 = vpop.f32.mrf.mxu3 }
 0x48c   : > { %v6285_v61 = vunpack.c.l.b16 %v3197_v45  ;;  %v1671_v38 = vpack.c.bf16 %v1606_v20, %v1605_v30  ;;  %v4504_v13 = vmax.f32 %v4503_v49, %v3920_v21  ;;  %v2182_v28 = vadd.f32 %v16579_v22, %v2181_v14 }
 0x48d   : > { %v2885_v43 = vpop.f32.mrf.mxu2 }
 0x48e   : > { %v16678_v31 = vpack.c.b16 %v6285_v61, %v6284_v48  ;;  %v2886_v2 = vadd.f32 %v16662_v6, %v2885_v43  ;;  %12305 = vmatmul.msk.bf16.gmra.mxu1 %vm1709_vm2, %v1671_v38  ;;  %v2339_v16 = vmax.f32 %v2182_v28, 0.0 }
 0x490   : > { %20941 = vst [vmem:[#allocation18_spill] sm:$0xff] %v16678_v31  ;;  %3962 = vmatmul.bf16.gmra.mxu3 %v16104_v53  ;;  %v3070_v29 = vmax.f32 %v2886_v2, 0.0 }
 0x491   : > { %v1476_v17 = vpop.f32.mrf.mxu0 }
 0x492   : > { %v3198_v55 = vpack.c.bf16 %v3070_v29, %v3070_v29  ;;  %v1607_v20 = vmax.f32 %v1476_v17, 0.0 }
 0x493   : > { %v2183_v25 = vpop.f32.mrf.mxu1  ;;  %v3923_v19 = vpop.f32.mrf.mxu3 }
 0x494   : > { %v2184_v30 = vadd.f32 %v16579_v22, %v2183_v25  ;;  %v4505_v49 = vmax.f32 %v4504_v13, %v3923_v19  ;;  %4115 = vmatmul.bf16.gmra.mxu0 %v16008_v59  ;;  %v6286_v61 = vunpack.c.l.b16 %v3198_v55 }
 0x495   : > { %v2887_v46 = vpop.f32.mrf.mxu2 }
 0x496   : > { %v2340_v48 = vmax.f32 %v2184_v30, 0.0  ;;  %v2888_v45 = vadd.f32 %v16662_v6, %v2887_v46 }
 0x498   : > { %v2413_v41 = vpack.c.bf16 %v2340_v48, %v2339_v16  ;;  %v3071_v14 = vmax.f32 %v2888_v45, 0.0 }
 0x499   : > { %v1478_v21 = vpop.f32.mrf.mxu0 }
 0x49a   : > { %v3199_v38 = vpack.c.bf16 %v3071_v14, %v3071_v14  ;;  %v1608_v43 = vmax.f32 %v1478_v21, 0.0  ;;  %12377 = vmatmul.msk.bf16.gmra.mxu2 %vm1709_vm2, %v2413_v41  ;;  %v14839_v21 = vld [vmem:[%s20881_s6 + $0x4c] sm:$0xf] }
 0x49b   : > { %v2186_v2 = vpop.f32.mrf.mxu1  ;;  %v3925_v28 = vpop.f32.mrf.mxu3 }
 0x49c   : > { %v6287_v25 = vunpack.c.l.b16 %v3199_v38  ;;  %v1672_v13 = vpack.c.bf16 %v1608_v43, %v1607_v20  ;;  %v4506_v19 = vmax.f32 %v4505_v49, %v3925_v28  ;;  %v2187_v17 = vadd.f32 %v16579_v22, %v2186_v2 }
 0x49d   : > { %v2890_v31 = vpop.f32.mrf.mxu2 }
 0x49e   : > { %v16688_v12 = vpack.c.b16 %v6287_v25, %v6286_v61  ;;  %v2891_v29 = vadd.f32 %v16662_v6, %v2890_v31  ;;  %12306 = vmatmul.msk.bf16.gmra.mxu1 %vm1709_vm2, %v1672_v13  ;;  %v2341_v48 = vmax.f32 %v2187_v17, 0.0  ;;  %v12431_v61 = vld [vmem:[%s20881_s6 + $0x68] sm:$0xf0] }
 0x49f   : > { %v12434_v38 = vor.u32 %v14839_v21, %v12431_v61  ;;  %v12399_v17 = vld [vmem:[%s20881_s6 + $0x28] sm:$0xf0] }
 0x4a0   : > { %20942 = vst [vmem:[#allocation19_spill] sm:$0xff] %v16688_v12  ;;  %3967 = vmatmul.bf16.gmra.mxu3 %v16115_v23  ;;  %v3072_v30 = vmax.f32 %v2891_v29, 0.0  ;;  %v14831_v29 = vld [vmem:[%s20881_s6 + $0xc] sm:$0xf] }
 0x4a1   : > { %v4081_v16 = vpop.f32.mrf.mxu0  ;;  %3989 = vmatpush.bf16.msrb.mxu3 %v12434_v38 }
 0x4a2   : > { %v3200_v41 = vpack.c.bf16 %v3072_v30, %v3072_v30 }
 0x4a3   : > { %v2188_v46 = vpop.f32.mrf.mxu1  ;;  %v3928_v55 = vpop.f32.mrf.mxu3 }
 0x4a4   : > { %v2189_v45 = vadd.f32 %v16579_v22, %v2188_v46  ;;  %v4507_v20 = vmax.f32 %v4506_v19, %v3928_v55  ;;  %4120 = vmatmul.bf16.gmra.mxu0 %v16025_v27  ;;  %v6288_v25 = vunpack.c.l.b16 %v3200_v41  ;;  %v12402_v55 = vor.u32 %v14831_v29, %v12399_v17 }
 0x4a5   : > { %v2892_v49 = vpop.f32.mrf.mxu2 }
 0x4a6   : > { %v2342_v14 = vmax.f32 %v2189_v45, 0.0  ;;  %v2893_v31 = vadd.f32 %v16662_v6, %v2892_v49  ;;  %3990 = vmatpush.bf16.msrb.mxu3 %v12402_v55 }
 0x4a8   : > { %v2414_v43 = vpack.c.bf16 %v2342_v14, %v2341_v48  ;;  %v3073_v2 = vmax.f32 %v2893_v31, 0.0 }
 0x4a9   : > { %v4083_v28 = vpop.f32.mrf.mxu0 }
 0x4aa   : > { %v3201_v13 = vpack.c.bf16 %v3073_v2, %v3073_v2  ;;  %v4560_v19 = vmax.f32 %v4081_v16, %v4083_v28  ;;  %12378 = vmatmul.msk.bf16.gmra.mxu2 %vm1709_vm2, %v2414_v43 }
 0x4ab   : > { %v2191_v30 = vpop.f32.mrf.mxu1  ;;  %v3930_v46 = vpop.f32.mrf.mxu3 }
 0x4ac   : > { %v6289_v48 = vunpack.c.l.b16 %v3201_v13  ;;  %v4508_v45 = vmax.f32 %v4507_v20, %v3930_v46  ;;  %v2192_v14 = vadd.f32 %v16579_v22, %v2191_v30 }
 0x4ad   : > { %v2895_v49 = vpop.f32.mrf.mxu2 }
 0x4ae   : > { %v16710_v41 = vpack.c.b16 %v6289_v48, %v6288_v25  ;;  %v2896_v16 = vadd.f32 %v16662_v6, %v2895_v49  ;;  %4169 = vmatmul.bf16.vlgmr.msrb.gmra.mxu1 %v15895_v50  ;;  %v2343_v2 = vmax.f32 %v2192_v14, 0.0 }
 0x4b0   : > { %20943 = vst [vmem:[#allocation20_spill] sm:$0xff] %v16710_v41  ;;  %3972 = vmatmul.bf16.gmra.mxu3 %v16138_v5  ;;  %v3074_v21 = vmax.f32 %v2896_v16, 0.0 }
 0x4b1   : > { %v4086_v31 = vpop.f32.mrf.mxu0 }
 0x4b2   : > { %v4561_v61 = vmax.f32 %v4560_v19, %v4086_v31  ;;  %v3202_v13 = vpack.c.bf16 %v3074_v21, %v3074_v21 }
 0x4b3   : > { %v2193_v38 = vpop.f32.mrf.mxu1  ;;  %v3933_v43 = vpop.f32.mrf.mxu3 }
 0x4b4   : > { %v2194_v20 = vadd.f32 %v16579_v22, %v2193_v38  ;;  %v4509_v28 = vmax.f32 %v4508_v45, %v3933_v43  ;;  %4125 = vmatmul.bf16.gmra.mxu0 %v16036_v58  ;;  %v6290_v48 = vunpack.c.l.b16 %v3202_v13 }
 0x4b5   : > { %v2897_v25 = vpop.f32.mrf.mxu2 }
 0x4b6   : > { %v2344_v29 = vmax.f32 %v2194_v20, 0.0  ;;  %v2898_v17 = vadd.f32 %v16662_v6, %v2897_v25 }
 0x4b8   : > { %v2415_v46 = vpack.c.bf16 %v2344_v29, %v2343_v2  ;;  %v3075_v30 = vmax.f32 %v2898_v17, 0.0 }
 0x4b9   : > { %v4088_v55 = vpop.f32.mrf.mxu0 }
 0x4ba   : > { %v3203_v49 = vpack.c.bf16 %v3075_v30, %v3075_v30  ;;  %v4562_v16 = vmax.f32 %v4561_v61, %v4088_v55  ;;  %12379 = vmatmul.msk.bf16.gmra.mxu2 %vm1709_vm2, %v2415_v46 }
 0x4bb   : > { %v2196_v19 = vpop.f32.mrf.mxu1  ;;  %v3935_v14 = vpop.f32.mrf.mxu3 }
 0x4bc   : > { %v6291_v31 = vunpack.c.l.b16 %v3203_v49  ;;  %v4510_v38 = vmax.f32 %v4509_v28, %v3935_v14  ;;  %v2197_v2 = vadd.f32 %v16579_v22, %v2196_v19 }
 0x4bd   : > { %v2900_v45 = vpop.f32.mrf.mxu2 }
 0x4be   : > { %v16720_v43 = vpack.c.b16 %v6291_v31, %v6290_v48  ;;  %v2901_v21 = vadd.f32 %v16662_v6, %v2900_v45  ;;  %4174 = vmatmul.bf16.gmra.mxu1 %v15906_v11  ;;  %v2345_v17 = vmax.f32 %v2197_v2, 0.0 }
 0x4c0   : > { %20944 = vst [vmem:[#allocation21_spill] sm:$0xff] %v16720_v43  ;;  %3977 = vmatmul.bf16.gmra.mxu3 %v16154_v44  ;;  %v3076_v25 = vmax.f32 %v2901_v21, 0.0 }
 0x4c1   : > { %v4091_v20 = vpop.f32.mrf.mxu0 }
 0x4c2   : > { %v4563_v61 = vmax.f32 %v4562_v16, %v4091_v20  ;;  %v3204_v55 = vpack.c.bf16 %v3076_v25, %v3076_v25 }
 0x4c3   : > { %v2198_v13 = vpop.f32.mrf.mxu1  ;;  %v3938_v29 = vpop.f32.mrf.mxu3 }
 0x4c4   : > { %v2199_v46 = vadd.f32 %v16579_v22, %v2198_v13  ;;  %v4511_v28 = vmax.f32 %v4510_v38, %v3938_v29  ;;  %4130 = vmatmul.bf16.gmra.mxu0 %v16059_v35  ;;  %v7724_v45 = vunpack.c.l.b16 %v3204_v55 }
 0x4c5   : > { %v2902_v30 = vpop.f32.mrf.mxu2 }
 0x4c6   : > { %v2346_v48 = vmax.f32 %v2199_v46, 0.0  ;;  %v2903_v49 = vadd.f32 %v16662_v6, %v2902_v30 }
 0x4c8   : > { %v2416_v14 = vpack.c.bf16 %v2346_v48, %v2345_v17  ;;  %v3077_v19 = vmax.f32 %v2903_v49, 0.0 }
 0x4c9   : > { %v4093_v31 = vpop.f32.mrf.mxu0 }
 0x4ca   : > { %v3205_v43 = vpack.c.bf16 %v3077_v19, %v3077_v19  ;;  %v4564_v21 = vmax.f32 %v4563_v61, %v4093_v31  ;;  %12380 = vmatmul.msk.bf16.gmra.mxu2 %vm1709_vm2, %v2416_v14 }
 0x4cb   : > { %v2201_v16 = vpop.f32.mrf.mxu1  ;;  %v3940_v2 = vpop.f32.mrf.mxu3 }
 0x4cc   : > { %v7725_v20 = vunpack.c.l.b16 %v3205_v43  ;;  %v4512_v13 = vmax.f32 %v4511_v28, %v3940_v2  ;;  %v2202_v17 = vadd.f32 %v16579_v22, %v2201_v16 }
 0x4cd   : > { %v2905_v38 = vpop.f32.mrf.mxu2 }
 0x4ce   : > { %v16730_v29 = vpack.c.b16 %v7725_v20, %v7724_v45  ;;  %v2906_v25 = vadd.f32 %v16662_v6, %v2905_v38  ;;  %4179 = vmatmul.bf16.gmra.mxu1 %v15929_v42  ;;  %v2347_v49 = vmax.f32 %v2202_v17, 0.0 }
 0x4d0   : > { %20945 = vst [vmem:[#allocation22_spill] sm:$0xff] %v16730_v29  ;;  %3991 = vmatmul.bf16.vlgmr.msrb.gmra.mxu3 %v15895_v50  ;;  %v3078_v30 = vmax.f32 %v2906_v25, 0.0 }
 0x4d1   : > { %v4096_v46 = vpop.f32.mrf.mxu0 }
 0x4d2   : > { %v4565_v61 = vmax.f32 %v4564_v21, %v4096_v46  ;;  %v3206_v19 = vpack.c.bf16 %v3078_v30, %v3078_v30 }
 0x4d3   : > { %v2203_v55 = vpop.f32.mrf.mxu1  ;;  %v3943_v48 = vpop.f32.mrf.mxu3 }
 0x4d4   : > { %v2204_v43 = vadd.f32 %v16579_v22, %v2203_v55  ;;  %v4513_v28 = vmax.f32 %v4512_v13, %v3943_v48  ;;  %4135 = vmatmul.bf16.gmra.mxu0 %v16087_v15  ;;  %v7726_v38 = vunpack.c.l.b16 %v3206_v19  ;;  %v12869_v19 = vld [vmem:[%s20881_s6 + $0x1c0] sm:$0xf] }
 0x4d5   : > { %v2907_v14 = vpop.f32.mrf.mxu2 }
 0x4d6   : > { %v2348_v31 = vmax.f32 %v2204_v43, 0.0  ;;  %v2908_v45 = vadd.f32 %v16662_v6, %v2907_v14 }
 0x4d8   : > { %v2417_v2 = vpack.c.bf16 %v2348_v31, %v2347_v49  ;;  %v3079_v16 = vmax.f32 %v2908_v45, 0.0 }
 0x4d9   : > { %v4098_v20 = vpop.f32.mrf.mxu0 }
 0x4da   : > { %v3207_v29 = vpack.c.bf16 %v3079_v16, %v3079_v16  ;;  %v4566_v25 = vmax.f32 %v4565_v61, %v4098_v20  ;;  %12381 = vmatmul.msk.bf16.gmra.mxu2 %vm1709_vm2, %v2417_v2 }
 0x4db   : > { %v2206_v21 = vpop.f32.mrf.mxu1  ;;  %v3945_v17 = vpop.f32.mrf.mxu3 }
 0x4dc   : > { %v7727_v46 = vunpack.c.l.b16 %v3207_v29  ;;  %v4514_v55 = vmax.f32 %v4513_v28, %v3945_v17  ;;  %v2207_v49 = vadd.f32 %v16579_v22, %v2206_v21  ;;  %v14954_v29 = vld [vmem:[%s20881_s6 + $0x1dc] sm:$0xf0] }
 0x4dd   : > { %v2910_v13 = vpop.f32.mrf.mxu2  ;;  %v12870_v45 = vor.u32 %v14954_v29, %v12869_v19 }
 0x4de   : > { %v16740_v48 = vpack.c.b16 %v7727_v46, %v7726_v38  ;;  %v2911_v30 = vadd.f32 %v16662_v6, %v2910_v13  ;;  %4184 = vmatmul.bf16.gmra.mxu1 %v15952_v10  ;;  %v2349_v2 = vmax.f32 %v2207_v49, 0.0  ;;  %v12445_v38 = vld [vmem:[%s20881_s6 + $0x58] sm:$0xf]  ;;  %v14946_v49 = vld [vmem:[%s20881_s6 + $0x19c] sm:$0xf0] }
 0x4df   : > { %5180 = vmatpush.bf16.msra.mxu0 %v12870_v45 }
 0x4e0   : > { %20946 = vst [vmem:[#allocation23_spill] sm:$0xff] %v16740_v48  ;;  %3996 = vmatmul.bf16.gmra.mxu3 %v15906_v11  ;;  %v3080_v14 = vmax.f32 %v2911_v30, 0.0 }
 0x4e1   : > { %v4101_v43 = vpop.f32.mrf.mxu0 }
 0x4e2   : > { %v4567_v61 = vmax.f32 %v4566_v25, %v4101_v43  ;;  %v14845_v25 = vld [vmem:[%s20881_s6 + $0x74] sm:$0xf0]  ;;  %v3208_v46 = vpack.c.bf16 %v3080_v14, %v3080_v14  ;;  %v12639_v14 = vld [vmem:[%s20881_s6 + $0x1f8] sm:$0xf0] }
 0x4e3   : > { %v2208_v28 = vpop.f32.mrf.mxu1  ;;  %v3948_v31 = vpop.f32.mrf.mxu3  ;;  %v12446_v17 = vor.u32 %v14845_v25, %v12445_v38 }
 0x4e4   : > { %v2209_v16 = vadd.f32 %v16579_v22, %v2208_v28  ;;  %v4515_v20 = vmax.f32 %v4514_v55, %v3948_v31  ;;  %4140 = vmatmul.bf16.gmra.mxu0 %v16104_v53  ;;  %v12837_v55 = vld [vmem:[%s20881_s6 + $0x180] sm:$0xf]  ;;  %v14889_v28 = vld [vmem:[%s20881_s6 + $0x1dc] sm:$0xf] }
 0x4e5   : > { %v2912_v21 = vpop.f32.mrf.mxu2  ;;  %4256 = vmatpush.bf16.msrb.mxu2 %v12446_v17  ;;  %v12838_v43 = vor.u32 %v14946_v49, %v12837_v55  ;;  %v12642_v45 = vor.u32 %v14889_v28, %v12639_v14 }
 0x4e6   : > { %v2350_v13 = vmax.f32 %v2209_v16, 0.0  ;;  %v2913_v30 = vadd.f32 %v16662_v6, %v2912_v21  ;;  %v7728_v16 = vunpack.c.l.b16 %v3208_v46  ;;  %v14938_v21 = vld [vmem:[%s20881_s6 + $0x15c] sm:$0xf0] }
 0x4e7   : > { %5181 = vmatpush.bf16.msra.mxu0 %v12838_v43  ;;  %4339 = vmatpush.bf16.msra.mxu3 %v12642_v45 }
 0x4e8   : > { %v2418_v19 = vpack.c.bf16 %v2350_v13, %v2349_v2  ;;  %v3081_v29 = vmax.f32 %v2913_v30, 0.0  ;;  %v12805_v2 = vld [vmem:[%s20881_s6 + $0x140] sm:$0xf] }
 0x4e9   : > { %v4103_v31 = vpop.f32.mrf.mxu0  ;;  %v12806_v30 = vor.u32 %v14938_v21, %v12805_v2 }
 0x4ea   : > { %v3209_v38 = vpack.c.bf16 %v3081_v29, %v3081_v29  ;;  %v4568_v25 = vmax.f32 %v4567_v61, %v4103_v31  ;;  %12382 = vmatmul.msk.bf16.gmra.mxu2 %vm1709_vm2, %v2418_v19  ;;  %v12773_v19 = vld [vmem:[%s20881_s6 + $0x100] sm:$0xf] }
 0x4eb   : > { %v2211_v17 = vpop.f32.mrf.mxu1  ;;  %v3950_v13 = vpop.f32.mrf.mxu3  ;;  %5182 = vmatpush.bf16.msra.mxu0 %v12806_v30  ;;  %v14930_v29 = vld [vmem:[%s20881_s6 + $0x11c] sm:$0xf0] }
 0x4ec   : > { %v7729_v55 = vunpack.c.l.b16 %v3209_v38  ;;  %v4516_v49 = vmax.f32 %v4515_v20, %v3950_v13  ;;  %v12774_v28 = vor.u32 %v14930_v29, %v12773_v19  ;;  %v2212_v14 = vadd.f32 %v16579_v22, %v2211_v17  ;;  %v14922_v38 = vld [vmem:[%s20881_s6 + $0xdc] sm:$0xf0] }
 0x4ed   : > { %v2915_v43 = vpop.f32.mrf.mxu2  ;;  %v12709_v29 = vld [vmem:[%s20881_s6 + $0x80] sm:$0xf] }
 0x4ee   : > { %v16780_v46 = vpack.c.b16 %v7729_v55, %v7728_v16  ;;  %v2916_v61 = vadd.f32 %v16662_v6, %v2915_v43  ;;  %4189 = vmatmul.bf16.gmra.mxu1 %v15969_v39  ;;  %v12741_v16 = vld [vmem:[%s20881_s6 + $0xc0] sm:$0xf]  ;;  %v2351_v30 = vmax.f32 %v2212_v14, 0.0 }
 0x4ef   : > { %5183 = vmatpush.bf16.msra.mxu0 %v12774_v28  ;;  %v12742_v13 = vor.u32 %v14922_v38, %v12741_v16  ;;  %v14914_v28 = vld [vmem:[%s20881_s6 + $0x9c] sm:$0xf0] }
 0x4f0   : > { %20947 = vst [vmem:[#allocation24_spill] sm:$0xff] %v16780_v46  ;;  %4001 = vmatmul.bf16.gmra.mxu3 %v15929_v42  ;;  %v3082_v31 = vmax.f32 %v2916_v61, 0.0  ;;  %v12710_v14 = vor.u32 %v14914_v28, %v12709_v29  ;;  %v12645_v28 = vld [vmem:[%s20881_s6] sm:$0xf] }
 0x4f1   : > { %v4106_v20 = vpop.f32.mrf.mxu0 }
 0x4f2   : > { %v4569_v45 = vmax.f32 %v4568_v25, %v4106_v20  ;;  %v3210_v25 = vpack.c.bf16 %v3082_v31, %v3082_v31  ;;  %v12677_v31 = vld [vmem:[%s20881_s6 + $0x40] sm:$0xf] }
 0x4f3   : > { %v2213_v2 = vpop.f32.mrf.mxu1  ;;  %v3953_v21 = vpop.f32.mrf.mxu3  ;;  %5184 = vmatpush.bf16.msra.mxu0 %v12742_v13  ;;  %v14906_v13 = vld [vmem:[%s20881_s6 + $0x5c] sm:$0xf0] }
 0x4f4   : > { %v2214_v17 = vadd.f32 %v16579_v22, %v2213_v2  ;;  %v4517_v55 = vmax.f32 %v4516_v49, %v3953_v21  ;;  %4145 = vmatmul.bf16.gmra.mxu0 %v16115_v23  ;;  %v7730_v38 = vunpack.c.l.b16 %v3210_v25  ;;  %v12678_v29 = vor.u32 %v14906_v13, %v12677_v31 }
 0x4f5   : > { %v2917_v43 = vpop.f32.mrf.mxu2 }
 0x4f6   : > { %v2352_v61 = vmax.f32 %v2214_v17, 0.0  ;;  %v2918_v19 = vadd.f32 %v16662_v6, %v2917_v43 }
 0x4f7   : > { %5185 = vmatpush.bf16.msra.mxu0 %v12710_v14  ;;  %v14898_v14 = vld [vmem:[%s20881_s6 + $0x1c] sm:$0xf0] }
 0x4f8   : > { %v2419_v20 = vpack.c.bf16 %v2352_v61, %v2351_v30  ;;  %v3083_v16 = vmax.f32 %v2918_v19, 0.0 }
 0x4f9   : > { %v4108_v49 = vpop.f32.mrf.mxu0 }
 0x4fa   : > { %v3211_v2 = vpack.c.bf16 %v3083_v16, %v3083_v16  ;;  %v4570_v21 = vmax.f32 %v4569_v45, %v4108_v49  ;;  %12383 = vmatmul.msk.bf16.gmra.mxu2 %vm1709_vm2, %v2419_v20  ;;  %v12646_v20 = vor.u32 %v14898_v14, %v12645_v28 }
 0x4fb   : > { %v2216_v17 = vpop.f32.mrf.mxu1  ;;  %v3955_v43 = vpop.f32.mrf.mxu3  ;;  %5186 = vmatpush.bf16.msra.mxu0 %v12678_v29 }
 0x4fc   : > { %v7731_v30 = vunpack.c.l.b16 %v3211_v2  ;;  %v4518_v61 = vmax.f32 %v4517_v55, %v3955_v43  ;;  %v2217_v16 = vadd.f32 %v16579_v22, %v2216_v17 }
 0x4fd   : > { %v2920_v19 = vpop.f32.mrf.mxu2 }
 0x4fe   : > { %v16814_v25 = vpack.c.b16 %v7731_v30, %v7730_v38  ;;  %v2921_v45 = vadd.f32 %v16662_v6, %v2920_v19  ;;  %4194 = vmatmul.bf16.gmra.mxu1 %v15980_v1  ;;  %v2353_v13 = vmax.f32 %v2217_v16, 0.0 }
 0x4ff   : > { %5187 = vmatpush.bf16.msra.mxu0 %v12646_v20 }
 0x500   : > { %20948 = vst [vmem:[#allocation25_spill] sm:$0xff] %v16814_v25  ;;  %4006 = vmatmul.bf16.gmra.mxu3 %v15952_v10  ;;  %v3084_v49 = vmax.f32 %v2921_v45, 0.0  ;;  %v14881_v45 = vld [vmem:[%s20881_s6 + $0x19c] sm:$0xf] }
 0x501   : > { %v4111_v55 = vpop.f32.mrf.mxu0 }
 0x502   : > { %v4571_v38 = vmax.f32 %v4570_v21, %v4111_v55  ;;  %v3212_v19 = vpack.c.bf16 %v3084_v49, %v3084_v49  ;;  %v12607_v21 = vld [vmem:[%s20881_s6 + $0x1b8] sm:$0xf0] }
 0x503   : > { %v2218_v2 = vpop.f32.mrf.mxu1  ;;  %v3958_v31 = vpop.f32.mrf.mxu3  ;;  %v12610_v16 = vor.u32 %v14881_v45, %v12607_v21 }
 0x504   : > { %v2219_v43 = vadd.f32 %v16579_v22, %v2218_v2  ;;  %v4519_v29 = vmax.f32 %v4518_v61, %v3958_v31  ;;  %4150 = vmatmul.bf16.gmra.mxu0 %v16138_v5  ;;  %v7732_v61 = vunpack.c.l.b16 %v3212_v19 }
 0x505   : > { %v2922_v30 = vpop.f32.mrf.mxu2  ;;  %4340 = vmatpush.bf16.msra.mxu3 %v12610_v16  ;;  %v12413_v16 = vld [vmem:[%s20881_s6 + $0x18] sm:$0xf] }
 0x506   : > { %v2354_v25 = vmax.f32 %v2219_v43, 0.0  ;;  %v2923_v28 = vadd.f32 %v16662_v6, %v2922_v30 }
 0x508   : > { %v2420_v17 = vpack.c.bf16 %v2354_v25, %v2353_v13  ;;  %v3085_v14 = vmax.f32 %v2923_v28, 0.0 }
 0x509   : > { %v4113_v20 = vpop.f32.mrf.mxu0 }
 0x50a   : > { %v3213_v55 = vpack.c.bf16 %v3085_v14, %v3085_v14  ;;  %v4572_v2 = vmax.f32 %v4571_v38, %v4113_v20  ;;  %12384 = vmatmul.msk.bf16.gmra.mxu2 %vm1709_vm2, %v2420_v17 }
 0x50b   : > { %v2221_v49 = vpop.f32.mrf.mxu1  ;;  %v3960_v31 = vpop.f32.mrf.mxu3 }
 0x50c   : > { %v7733_v25 = vunpack.c.l.b16 %v3213_v55  ;;  %v4520_v13 = vmax.f32 %v4519_v29, %v3960_v31  ;;  %v2222_v46 = vadd.f32 %v16579_v22, %v2221_v49 }
 0x50d   : > { %v2925_v43 = vpop.f32.mrf.mxu2 }
 0x50e   : > { %v16836_v30 = vpack.c.b16 %v7733_v25, %v7732_v61  ;;  %v2926_v28 = vadd.f32 %v16662_v6, %v2925_v43  ;;  %4199 = vmatmul.bf16.gmra.mxu1 %v15997_v32  ;;  %v2355_v21 = vmax.f32 %v2222_v46, 0.0  ;;  %v14837_v61 = vld [vmem:[%s20881_s6 + $0x34] sm:$0xf0] }
 0x50f   : > { %v12414_v49 = vor.u32 %v14837_v61, %v12413_v16 }
 0x510   : > { %20949 = vst [vmem:[#allocation26_spill] sm:$0xff] %v16836_v30  ;;  %4011 = vmatmul.bf16.gmra.mxu3 %v15969_v39  ;;  %v3086_v38 = vmax.f32 %v2926_v28, 0.0 }
 0x511   : > { %v4116_v19 = vpop.f32.mrf.mxu0  ;;  %4257 = vmatpush.bf16.msrb.mxu2 %v12414_v49 }
 0x512   : > { %v4573_v14 = vmax.f32 %v4572_v2, %v4116_v19  ;;  %v3214_v31 = vpack.c.bf16 %v3086_v38, %v3086_v38 }
 0x513   : > { %v2223_v17 = vpop.f32.mrf.mxu1  ;;  %v3963_v45 = vpop.f32.mrf.mxu3 }
 0x514   : > { %v2224_v20 = vadd.f32 %v16579_v22, %v2223_v17  ;;  %v4521_v29 = vmax.f32 %v4520_v13, %v3963_v45  ;;  %4155 = vmatmul.bf16.gmra.mxu0 %v16154_v44  ;;  %v7734_v28 = vunpack.c.l.b16 %v3214_v31 }
 0x515   : > { %v2927_v55 = vpop.f32.mrf.mxu2 }
 0x516   : > { %v2356_v2 = vmax.f32 %v2224_v20, 0.0  ;;  %v2928_v25 = vadd.f32 %v16662_v6, %v2927_v55 }
 0x518   : > { %v2421_v46 = vpack.c.bf16 %v2356_v2, %v2355_v21  ;;  %v3087_v43 = vmax.f32 %v2928_v25, 0.0 }
 0x519   : > { %v4118_v13 = vpop.f32.mrf.mxu0 }
 0x51a   : > { %v3215_v19 = vpack.c.bf16 %v3087_v43, %v3087_v43  ;;  %v4574_v17 = vmax.f32 %v4573_v14, %v4118_v13  ;;  %12385 = vmatmul.msk.bf16.gmra.mxu2 %vm1709_vm2, %v2421_v46 }
 0x51b   : > { %v2226_v45 = vpop.f32.mrf.mxu1  ;;  %v3965_v30 = vpop.f32.mrf.mxu3 }
 0x51c   : > { %v7735_v48 = vunpack.c.l.b16 %v3215_v19  ;;  %v4522_v41 = vmax.f32 %v4521_v29, %v3965_v30  ;;  %v2227_v21 = vadd.f32 %v16579_v22, %v2226_v45 }
 0x51d   : > { %v2930_v12 = vpop.f32.mrf.mxu2 }
 0x51e   : > { %v16852_v24 = vpack.c.b16 %v7735_v48, %v7734_v28  ;;  %v2931_v38 = vadd.f32 %v16662_v6, %v2930_v12  ;;  %4204 = vmatmul.bf16.gmra.mxu1 %v16008_v59  ;;  %v2357_v49 = vmax.f32 %v2227_v21, 0.0  ;;  %v14873_v12 = vld [vmem:[%s20881_s6 + $0x15c] sm:$0xf] }
 0x51f   : > { %v12575_v48 = vld [vmem:[%s20881_s6 + $0x178] sm:$0xf0] }
 0x520   : > { %20950 = vst [vmem:[#allocation27_spill] sm:$0xff] %v16852_v24  ;;  %4016 = vmatmul.bf16.gmra.mxu3 %v15980_v1  ;;  %v3088_v16 = vmax.f32 %v2931_v38, 0.0  ;;  %v12578_v2 = vor.u32 %v14873_v12, %v12575_v48 }
 0x521   : > { %v4121_v20 = vpop.f32.mrf.mxu0 }
 0x522   : > { %v4575_v14 = vmax.f32 %v4574_v17, %v4121_v20  ;;  %v3216_v25 = vpack.c.bf16 %v3088_v16, %v3088_v16  ;;  %4341 = vmatpush.bf16.msra.mxu3 %v12578_v2 }
 0x523   : > { %v2228_v61 = vpop.f32.mrf.mxu1  ;;  %v3968_v55 = vpop.f32.mrf.mxu3 }
 0x524   : > { %v2229_v31 = vadd.f32 %v16579_v22, %v2228_v61  ;;  %v4523_v30 = vmax.f32 %v4522_v41, %v3968_v55  ;;  %5188 = vmatmul.bf16.vlgmr.msra.gmra.mxu0 %v16165_v9  ;;  %v7736_v28 = vunpack.c.l.b16 %v3216_v25 }
 0x525   : > { %v2932_v29 = vpop.f32.mrf.mxu2 }
 0x526   : > { %v2358_v46 = vmax.f32 %v2229_v31, 0.0  ;;  %v2933_v43 = vadd.f32 %v16662_v6, %v2932_v29 }
 0x528   : > { %v2422_v13 = vpack.c.bf16 %v2358_v46, %v2357_v49  ;;  %v3089_v22 = vmax.f32 %v2933_v43, 0.0 }
 0x529   : > { %v4123_v41 = vpop.f32.mrf.mxu0 }
 0x52a   : > { %v3217_v19 = vpack.c.bf16 %v3089_v22, %v3089_v22  ;;  %v4576_v17 = vmax.f32 %v4575_v14, %v4123_v41  ;;  %12386 = vmatmul.msk.bf16.gmra.mxu2 %vm1709_vm2, %v2422_v13 }
 0x52b   : > { %v3970_v45 = vpop.f32.mrf.mxu3  ;;  %v4170_v38 = vpop.f32.mrf.mxu1 }
 0x52c   : > { %v7737_v21 = vunpack.c.l.b16 %v3217_v19  ;;  %v4524_v20 = vmax.f32 %v4523_v30, %v3970_v45 }
 0x52d   : > { %v2935_v61 = vpop.f32.mrf.mxu2 }
 0x52e   : > { %v16868_v55 = vpack.c.b16 %v7737_v21, %v7736_v28  ;;  %v2936_v16 = vadd.f32 %v16662_v6, %v2935_v61  ;;  %4209 = vmatmul.bf16.gmra.mxu1 %v16025_v27 }
 0x530   : > { %20951 = vst [vmem:[#allocation28_spill] sm:$0xff] %v16868_v55  ;;  %4021 = vmatmul.bf16.gmra.mxu3 %v15997_v32  ;;  %v3090_v31 = vmax.f32 %v2936_v16, 0.0 }
 0x531   : > { %v4126_v49 = vpop.f32.mrf.mxu0 }
 0x532   : > { %v4577_v12 = vmax.f32 %v4576_v17, %v4126_v49  ;;  %v3218_v30 = vpack.c.bf16 %v3090_v31, %v3090_v31 }
 0x533   : > { %v3973_v48 = vpop.f32.mrf.mxu3  ;;  %v4172_v14 = vpop.f32.mrf.mxu1 }
 0x534   : > { %v4525_v29 = vmax.f32 %v4524_v20, %v3973_v48  ;;  %v4591_v2 = vmax.f32 %v4170_v38, %v4172_v14  ;;  %5193 = vmatmul.bf16.gmra.mxu0 %v16176_v56  ;;  %v7738_v22 = vunpack.c.l.b16 %v3218_v30 }
 0x535   : > { %v2937_v25 = vpop.f32.mrf.mxu2 }
 0x536   : > { %v2938_v46 = vadd.f32 %v16662_v6, %v2937_v25 }
 0x538   : > { %v3091_v43 = vmax.f32 %v2938_v46, 0.0 }
 0x539   : > { %v4128_v13 = vpop.f32.mrf.mxu0 }
 0x53a   : > { %v3219_v41 = vpack.c.bf16 %v3091_v43, %v3091_v43  ;;  %v4578_v28 = vmax.f32 %v4577_v12, %v4128_v13  ;;  %4258 = vmatmul.bf16.vlgmr.msrb.gmra.mxu2 %v15895_v50 }
 0x53b   : > { %v3975_v19 = vpop.f32.mrf.mxu3  ;;  %v4175_v45 = vpop.f32.mrf.mxu1 }
 0x53c   : > { %v7739_v17 = vunpack.c.l.b16 %v3219_v41  ;;  %v4526_v21 = vmax.f32 %v4525_v29, %v3975_v19  ;;  %v4592_v61 = vmax.f32 %v4591_v2, %v4175_v45  ;;  %v14865_v29 = vld [vmem:[%s20881_s6 + $0x11c] sm:$0xf] }
 0x53d   : > { %v2940_v20 = vpop.f32.mrf.mxu2  ;;  %v12543_v2 = vld [vmem:[%s20881_s6 + $0x138] sm:$0xf0] }
 0x53e   : > { %v16876_v38 = vpack.c.b16 %v7739_v17, %v7738_v22  ;;  %v2941_v16 = vadd.f32 %v16662_v6, %v2940_v20  ;;  %4214 = vmatmul.bf16.gmra.mxu1 %v16036_v58  ;;  %v12546_v43 = vor.u32 %v14865_v29, %v12543_v2 }
 0x540   : > { %20952 = vst [vmem:[#allocation29_spill] sm:$0xff] %v16876_v38  ;;  %4026 = vmatmul.bf16.gmra.mxu3 %v16008_v59  ;;  %v3092_v31 = vmax.f32 %v2941_v16, 0.0 }
 0x541   : > { %v4131_v49 = vpop.f32.mrf.mxu0  ;;  %4342 = vmatpush.bf16.msra.mxu3 %v12546_v43 }
 0x542   : > { %v4579_v48 = vmax.f32 %v4578_v28, %v4131_v49  ;;  %v3220_v13 = vpack.c.bf16 %v3092_v31, %v3092_v31 }
 0x543   : > { %v3978_v12 = vpop.f32.mrf.mxu3  ;;  %v4177_v14 = vpop.f32.mrf.mxu1 }
 0x544   : > { %v16881_v25 = vmax.f32 %v4526_v21, %v3978_v12  ;;  %v4593_v30 = vmax.f32 %v4592_v61, %v4177_v14  ;;  %5198 = vmatmul.bf16.gmra.mxu0 %v16199_v40  ;;  %v7740_v19 = vunpack.c.l.b16 %v3220_v13 }
 0x545   : > { %v2942_v46 = vpop.f32.mrf.mxu2 }
 0x546   : > { %v2943_v22 = vadd.f32 %v16662_v6, %v2942_v46 }
 0x548   : > { %v3093_v41 = vmax.f32 %v2943_v22, 0.0 }
 0x549   : > { %v4133_v28 = vpop.f32.mrf.mxu0 }
 0x54a   : > { %v3221_v45 = vpack.c.bf16 %v3093_v41, %v3093_v41  ;;  %v4580_v17 = vmax.f32 %v4579_v48, %v4133_v28  ;;  %4263 = vmatmul.bf16.gmra.mxu2 %v15906_v11 }
 0x54b   : > { %v16892_v21 = vpop.f32.mrf.mxu3  ;;  %v4180_v61 = vpop.f32.mrf.mxu1 }
 0x54c   : > { %20953 = vst [vmem:[#allocation30_spill] sm:$0xff] %v16892_v21  ;;  %v7741_v20 = vunpack.c.l.b16 %v3221_v45  ;;  %v4594_v49 = vmax.f32 %v4593_v30, %v4180_v61 }
 0x54d   : > { %v2945_v12 = vpop.f32.mrf.mxu2 }
 0x54e   : > { %v16896_v31 = vpack.c.b16 %v7741_v20, %v7740_v19  ;;  %v2946_v14 = vadd.f32 %v16662_v6, %v2945_v12  ;;  %4219 = vmatmul.bf16.gmra.mxu1 %v16059_v35 }
 0x550   : > { %20954 = vst [vmem:[#allocation31_spill] sm:$0xff] %v16896_v31  ;;  %4031 = vmatmul.bf16.gmra.mxu3 %v16025_v27  ;;  %v3094_v29 = vmax.f32 %v2946_v14, 0.0 }
 0x551   : > { %v4136_v48 = vpop.f32.mrf.mxu0 }
 0x552   : > { %v4581_v2 = vmax.f32 %v4580_v17, %v4136_v48  ;;  %v3222_v41 = vpack.c.bf16 %v3094_v29, %v3094_v29 }
 0x553   : > { %v3992_v46 = vpop.f32.mrf.mxu3  ;;  %v4182_v43 = vpop.f32.mrf.mxu1 }
 0x554   : > { %v4595_v13 = vmax.f32 %v4594_v49, %v4182_v43  ;;  %5203 = vmatmul.bf16.gmra.mxu0 %v16222_v26  ;;  %v7742_v45 = vunpack.c.l.b16 %v3222_v41 }
 0x555   : > { %v2947_v22 = vpop.f32.mrf.mxu2 }
 0x556   : > { %v2948_v30 = vadd.f32 %v16662_v6, %v2947_v22 }
 0x558   : > { %v3095_v28 = vmax.f32 %v2948_v30, 0.0 }
 0x559   : > { %v4138_v19 = vpop.f32.mrf.mxu0 }
 0x55a   : > { %v3223_v61 = vpack.c.bf16 %v3095_v28, %v3095_v28  ;;  %v4582_v20 = vmax.f32 %v4581_v2, %v4138_v19  ;;  %4268 = vmatmul.bf16.gmra.mxu2 %v15929_v42 }
 0x55b   : > { %v3994_v12 = vpop.f32.mrf.mxu3  ;;  %v4185_v16 = vpop.f32.mrf.mxu1 }
 0x55c   : > { %v7743_v14 = vunpack.c.l.b16 %v3223_v61  ;;  %v4529_v17 = vmax.f32 %v3992_v46, %v3994_v12  ;;  %v4596_v48 = vmax.f32 %v4595_v13, %v4185_v16  ;;  %v14857_v16 = vld [vmem:[%s20881_s6 + $0xdc] sm:$0xf] }
 0x55d   : > { %v2950_v31 = vpop.f32.mrf.mxu2 }
 0x55e   : > { %v16904_v49 = vpack.c.b16 %v7743_v14, %v7742_v45  ;;  %v2951_v43 = vadd.f32 %v16662_v6, %v2950_v31  ;;  %4224 = vmatmul.bf16.gmra.mxu1 %v16087_v15  ;;  %v12511_v31 = vld [vmem:[%s20881_s6 + $0xf8] sm:$0xf0] }
 0x55f   : > { %v12514_v13 = vor.u32 %v14857_v16, %v12511_v31  ;;  %v14950_v16 = vld [vmem:[%s20881_s6 + $0x1c4] sm:$0xf] }
 0x560   : > { %20955 = vst [vmem:[#allocation32_spill] sm:$0xff] %v16904_v49  ;;  %4036 = vmatmul.bf16.gmra.mxu3 %v16036_v58  ;;  %v3096_v22 = vmax.f32 %v2951_v43, 0.0 }
 0x561   : > { %v4141_v29 = vpop.f32.mrf.mxu0  ;;  %4343 = vmatpush.bf16.msra.mxu3 %v12514_v13 }
 0x562   : > { %v4583_v41 = vmax.f32 %v4582_v20, %v4141_v29  ;;  %v3224_v45 = vpack.c.bf16 %v3096_v22, %v3096_v22  ;;  %v12871_v22 = vld [vmem:[%s20881_s6 + $0x1e0] sm:$0xf0] }
 0x563   : > { %v3997_v2 = vpop.f32.mrf.mxu3  ;;  %v4187_v30 = vpop.f32.mrf.mxu1 }
 0x564   : > { %v4530_v28 = vmax.f32 %v4529_v17, %v3997_v2  ;;  %v4597_v19 = vmax.f32 %v4596_v48, %v4187_v30  ;;  %5208 = vmatmul.bf16.gmra.mxu0 %v16239_v8  ;;  %v7744_v14 = vunpack.c.l.b16 %v3224_v45 }
 0x565   : > { %v2952_v46 = vpop.f32.mrf.mxu2 }
 0x566   : > { %v2953_v61 = vadd.f32 %v16662_v6, %v2952_v46  ;;  %v12874_v46 = vor.u32 %v14950_v16, %v12871_v22 }
 0x568   : > { %v3097_v20 = vmax.f32 %v2953_v61, 0.0  ;;  %5269 = vmatpush.bf16.msra.mxu1 %v12874_v46  ;;  %v14926_v46 = vld [vmem:[%s20881_s6 + $0x104] sm:$0xf] }
 0x569   : > { %v4143_v12 = vpop.f32.mrf.mxu0 }
 0x56a   : > { %v3225_v17 = vpack.c.bf16 %v3097_v20, %v3097_v20  ;;  %v4584_v48 = vmax.f32 %v4583_v41, %v4143_v12  ;;  %4273 = vmatmul.bf16.gmra.mxu2 %v15952_v10 }
 0x56b   : > { %v3999_v43 = vpop.f32.mrf.mxu3  ;;  %v4190_v29 = vpop.f32.mrf.mxu1 }
 0x56c   : > { %v7745_v2 = vunpack.c.l.b16 %v3225_v17  ;;  %v4531_v30 = vmax.f32 %v4530_v28, %v3999_v43  ;;  %v4598_v49 = vmax.f32 %v4597_v19, %v4190_v29  ;;  %v14942_v28 = vld [vmem:[%s20881_s6 + $0x184] sm:$0xf] }
 0x56d   : > { %v2955_v31 = vpop.f32.mrf.mxu2  ;;  %v12839_v19 = vld [vmem:[%s20881_s6 + $0x1a0] sm:$0xf0] }
 0x56e   : > { %v16924_v13 = vpack.c.b16 %v7745_v2, %v7744_v14  ;;  %v2956_v41 = vadd.f32 %v16662_v6, %v2955_v31  ;;  %4229 = vmatmul.bf16.gmra.mxu1 %v16104_v53  ;;  %v12842_v61 = vor.u32 %v14942_v28, %v12839_v19  ;;  %v14934_v29 = vld [vmem:[%s20881_s6 + $0x144] sm:$0xf] }
 0x56f   : > { %v12807_v2 = vld [vmem:[%s20881_s6 + $0x160] sm:$0xf0] }
 0x570   : > { %20956 = vst [vmem:[#allocation33_spill] sm:$0xff] %v16924_v13  ;;  %4041 = vmatmul.bf16.gmra.mxu3 %v16059_v35  ;;  %v3098_v20 = vmax.f32 %v2956_v41, 0.0  ;;  %5270 = vmatpush.bf16.msra.mxu1 %v12842_v61  ;;  %v12810_v22 = vor.u32 %v14934_v29, %v12807_v2  ;;  %v12775_v41 = vld [vmem:[%s20881_s6 + $0x120] sm:$0xf0] }
 0x571   : > { %v4146_v45 = vpop.f32.mrf.mxu0  ;;  %v12778_v19 = vor.u32 %v14926_v46, %v12775_v41 }
 0x572   : > { %v4585_v12 = vmax.f32 %v4584_v48, %v4146_v45  ;;  %v3226_v31 = vpack.c.bf16 %v3098_v20, %v3098_v20  ;;  %v16945_v48 = vld [vmem:[%s20880_s5] ss:$0 sm:$0xff] }
 0x573   : > { %v4002_v14 = vpop.f32.mrf.mxu3  ;;  %v4192_v17 = vpop.f32.mrf.mxu1 }
 0x574   : > { %v4532_v6 = vmax.f32 %v4531_v30, %v4002_v14  ;;  %v4599_v43 = vmax.f32 %v4598_v49, %v4192_v17  ;;  %5213 = vmatmul.bf16.gmra.mxu0 %v16250_v52  ;;  %5271 = vmatpush.bf16.msra.mxu1 %v12810_v22  ;;  %v7746_v45 = vunpack.c.l.b16 %v3226_v31  ;;  %v14918_v22 = vld [vmem:[%s20881_s6 + $0xc4] sm:$0xf] }
 0x575   : > { %v2957_v16 = vpop.f32.mrf.mxu2 }
 0x576   : > { %v2958_v49 = vadd.f32 %v16945_v48, %v2957_v16 }
 0x578   : > { %v3099_v30 = vmax.f32 %v2958_v49, 0.0  ;;  %5272 = vmatpush.bf16.msra.mxu1 %v12778_v19  ;;  %v12743_v49 = vld [vmem:[%s20881_s6 + $0xe0] sm:$0xf0] }
 0x579   : > { %v4148_v28 = vpop.f32.mrf.mxu0  ;;  %v12746_v31 = vor.u32 %v14918_v22, %v12743_v49  ;;  %v14849_v22 = vld [vmem:[%s20881_s6 + $0x9c] sm:$0xf] }
 0x57a   : > { %v3227_v61 = vpack.c.bf16 %v3099_v30, %v3099_v30  ;;  %v4586_v20 = vmax.f32 %v4585_v12, %v4148_v28  ;;  %4278 = vmatmul.bf16.gmra.mxu2 %v15969_v39  ;;  %v12479_v49 = vld [vmem:[%s20881_s6 + $0xb8] sm:$0xf0] }
 0x57b   : > { %v4004_v14 = vpop.f32.mrf.mxu3  ;;  %v4195_v17 = vpop.f32.mrf.mxu1 }
 0x57c   : > { %v7747_v29 = vunpack.c.l.b16 %v3227_v61  ;;  %v4533_v2 = vmax.f32 %v4532_v6, %v4004_v14  ;;  %v4600_v16 = vmax.f32 %v4599_v43, %v4195_v17  ;;  %5273 = vmatpush.bf16.msra.mxu1 %v12746_v31  ;;  %v14910_v6 = vld [vmem:[%s20881_s6 + $0x84] sm:$0xf]  ;;  %v12482_v31 = vor.u32 %v14849_v22, %v12479_v49 }
 0x57d   : > { %v2960_v46 = vpop.f32.mrf.mxu2  ;;  %v12711_v43 = vld [vmem:[%s20881_s6 + $0xa0] sm:$0xf0] }
 0x57e   : > { %v16961_v30 = vpack.c.b16 %v7747_v29, %v7746_v45  ;;  %v2961_v12 = vadd.f32 %v16945_v48, %v2960_v46  ;;  %4234 = vmatmul.bf16.gmra.mxu1 %v16115_v23  ;;  %v12714_v28 = vor.u32 %v14910_v6, %v12711_v43  ;;  %v14902_v46 = vld [vmem:[%s20881_s6 + $0x44] sm:$0xf]  ;;  %4344 = vmatpush.bf16.msra.mxu3 %v12482_v31 }
 0x580   : > { %20957 = vst [vmem:[#allocation34_spill] sm:$0xff] %v16961_v30  ;;  %4046 = vmatmul.bf16.gmra.mxu3 %v16087_v15  ;;  %v3100_v19 = vmax.f32 %v2961_v12, 0.0  ;;  %5274 = vmatpush.bf16.msra.mxu1 %v12714_v28  ;;  %v12647_v28 = vld [vmem:[%s20881_s6 + $0x20] sm:$0xf0] }
 0x581   : > { %v4151_v41 = vpop.f32.mrf.mxu0 }
 0x582   : > { %v4587_v45 = vmax.f32 %v4586_v20, %v4151_v41  ;;  %v14894_v41 = vld [vmem:[%s20881_s6 + $0x4] sm:$0xf] }
 0x583   : > { %v4007_v61 = vpop.f32.mrf.mxu3  ;;  %v4197_v14 = vpop.f32.mrf.mxu1 }
 0x584   : > { %v4534_v17 = vmax.f32 %v4533_v2, %v4007_v61  ;;  %v4601_v29 = vmax.f32 %v4600_v16, %v4197_v14  ;;  %5218 = vmatmul.bf16.gmra.mxu0 %v16267_v36  ;;  %v12679_v2 = vld [vmem:[%s20881_s6 + $0x60] sm:$0xf0]  ;;  %v3228_v16 = vpack.c.bf16 %v3100_v19, %v3100_v19  ;;  %v12650_v14 = vor.u32 %v14894_v41, %v12647_v28 }
 0x585   : > { %v2962_v20 = vpop.f32.mrf.mxu2  ;;  %v12682_v6 = vor.u32 %v14902_v46, %v12679_v2 }
 0x586   : > { %v2963_v12 = vadd.f32 %v16945_v48, %v2962_v20  ;;  %v7748_v22 = vunpack.c.l.b16 %v3228_v16 }
 0x587   : > { %5275 = vmatpush.bf16.msra.mxu1 %v12682_v6 }
 0x588   : > { %v3101_v43 = vmax.f32 %v2963_v12, 0.0 }
 0x589   : > { %v4153_v61 = vpop.f32.mrf.mxu0 }
 0x58a   : > { %v3229_v49 = vpack.c.bf16 %v3101_v43, %v3101_v43  ;;  %v4588_v30 = vmax.f32 %v4587_v45, %v4153_v61  ;;  %4283 = vmatmul.bf16.gmra.mxu2 %v15980_v1 }
 0x58b   : > { %v4009_v19 = vpop.f32.mrf.mxu3  ;;  %v4200_v46 = vpop.f32.mrf.mxu1  ;;  %5276 = vmatpush.bf16.msra.mxu1 %v12650_v14 }
 0x58c   : > { %v7749_v20 = vunpack.c.l.b16 %v3229_v49  ;;  %v4535_v31 = vmax.f32 %v4534_v17, %v4009_v19  ;;  %v4602_v2 = vmax.f32 %v4601_v29, %v4200_v46 }
 0x58d   : > { %v2965_v12 = vpop.f32.mrf.mxu2 }
 0x58e   : > { %v16993_v6 = vpack.c.b16 %v7749_v20, %v7748_v22  ;;  %v2966_v13 = vadd.f32 %v16945_v48, %v2965_v12  ;;  %4239 = vmatmul.bf16.gmra.mxu1 %v16138_v5 }
 0x590   : > { %20958 = vst [vmem:[#allocation35_spill] sm:$0xff] %v16993_v6  ;;  %4051 = vmatmul.bf16.gmra.mxu3 %v16104_v53  ;;  %v3102_v43 = vmax.f32 %v2966_v13, 0.0 }
 0x591   : > { %v4156_v16 = vpop.f32.mrf.mxu0 }
 0x592   : > { %v16998_v45 = vmax.f32 %v4588_v30, %v4156_v16  ;;  %v3230_v29 = vpack.c.bf16 %v3102_v43, %v3102_v43 }
 0x593   : > { %v4012_v41 = vpop.f32.mrf.mxu3  ;;  %v4202_v28 = vpop.f32.mrf.mxu1 }
 0x594   : > { %v4536_v61 = vmax.f32 %v4535_v31, %v4012_v41  ;;  %v4603_v49 = vmax.f32 %v4602_v2, %v4202_v28  ;;  %5223 = vmatmul.bf16.gmra.mxu0 %v16278_v18  ;;  %v7750_v46 = vunpack.c.l.b16 %v3230_v29 }
 0x595   : > { %v2967_v17 = vpop.f32.mrf.mxu2 }
 0x596   : > { %v2968_v14 = vadd.f32 %v16945_v48, %v2967_v17 }
 0x598   : > { %v3103_v22 = vmax.f32 %v2968_v14, 0.0 }
 0x599   : > { %v17002_v19 = vpop.f32.mrf.mxu0 }
 0x59a   : > { %v3231_v20 = vpack.c.bf16 %v3103_v22, %v3103_v22  ;;  %4288 = vmatmul.bf16.gmra.mxu2 %v15997_v32 }
 0x59b   : > { %v4014_v30 = vpop.f32.mrf.mxu3  ;;  %v4205_v12 = vpop.f32.mrf.mxu1 }
 0x59c   : > { %v7751_v31 = vunpack.c.l.b16 %v3231_v20  ;;  %v4537_v2 = vmax.f32 %v4536_v61, %v4014_v30  ;;  %v4604_v16 = vmax.f32 %v4603_v49, %v4205_v12  ;;  %v14841_v61 = vld [vmem:[%s20881_s6 + $0x5c] sm:$0xf] }
 0x59d   : > { %v2970_v41 = vpop.f32.mrf.mxu2  ;;  %v12447_v49 = vld [vmem:[%s20881_s6 + $0x78] sm:$0xf0] }
 0x59e   : > { %v17007_v28 = vpack.c.b16 %v7751_v31, %v7750_v46  ;;  %v2971_v43 = vadd.f32 %v16945_v48, %v2970_v41  ;;  %4244 = vmatmul.bf16.gmra.mxu1 %v16154_v44  ;;  %v12450_v20 = vor.u32 %v14841_v61, %v12447_v49 }
 0x5a0   : > { %20959 = vst [vmem:[#allocation36_spill] sm:$0xff] %v17007_v28  ;;  %4056 = vmatmul.bf16.gmra.mxu3 %v16115_v23  ;;  %v3104_v29 = vmax.f32 %v2971_v43, 0.0 }
 0x5a1   : > { %v5189_v17 = vpop.f32.mrf.mxu0  ;;  %4345 = vmatpush.bf16.msra.mxu3 %v12450_v20 }
 0x5a2   : > { %v3232_v30 = vpack.c.bf16 %v3104_v29, %v3104_v29 }
 0x5a3   : > { %v4017_v14 = vpop.f32.mrf.mxu3  ;;  %v4207_v22 = vpop.f32.mrf.mxu1 }
 0x5a4   : > { %v4538_v13 = vmax.f32 %v4537_v2, %v4017_v14  ;;  %v4605_v6 = vmax.f32 %v4604_v16, %v4207_v22  ;;  %5228 = vmatmul.bf16.gmra.mxu0 %v16301_v4  ;;  %v7752_v2 = vunpack.c.l.b16 %v3232_v30  ;;  %v14833_v14 = vld [vmem:[%s20881_s6 + $0x1c] sm:$0xf] }
 0x5a5   : > { %v2972_v46 = vpop.f32.mrf.mxu2  ;;  %v12415_v22 = vld [vmem:[%s20881_s6 + $0x38] sm:$0xf0] }
 0x5a6   : > { %v2973_v12 = vadd.f32 %v16945_v48, %v2972_v46  ;;  %v12418_v49 = vor.u32 %v14833_v14, %v12415_v22 }
 0x5a8   : > { %v3105_v31 = vmax.f32 %v2973_v12, 0.0  ;;  %4346 = vmatpush.bf16.msra.mxu3 %v12418_v49 }
 0x5a9   : > { %v5191_v41 = vpop.f32.mrf.mxu0 }
 0x5aa   : > { %v3233_v16 = vpack.c.bf16 %v3105_v31, %v3105_v31  ;;  %v5900_v43 = vmax.f32 %v5189_v17, %v5191_v41  ;;  %4293 = vmatmul.bf16.gmra.mxu2 %v16008_v59 }
 0x5ab   : > { %v4019_v61 = vpop.f32.mrf.mxu3  ;;  %v4210_v29 = vpop.f32.mrf.mxu1 }
 0x5ac   : > { %v7753_v46 = vunpack.c.l.b16 %v3233_v16  ;;  %v4539_v20 = vmax.f32 %v4538_v13, %v4019_v61  ;;  %v4606_v12 = vmax.f32 %v4605_v6, %v4210_v29 }
 0x5ad   : > { %v2975_v28 = vpop.f32.mrf.mxu2 }
 0x5ae   : > { %v17027_v30 = vpack.c.b16 %v7753_v46, %v7752_v2  ;;  %v2976_v17 = vadd.f32 %v16945_v48, %v2975_v28  ;;  %5277 = vmatmul.bf16.vlgmr.msra.gmra.mxu1 %v16165_v9 }
 0x5b0   : > { %4061 = vmatmul.bf16.gmra.mxu3 %v16138_v5  ;;  %v3106_v41 = vmax.f32 %v2976_v17, 0.0 }
 0x5b1   : > { %v5194_v31 = vpop.f32.mrf.mxu0 }
 0x5b2   : > { %v5901_v38 = vmax.f32 %v5900_v43, %v5194_v31  ;;  %v3234_v13 = vpack.c.bf16 %v3106_v41, %v3106_v41 }
 0x5b3   : > { %v4022_v55 = vpop.f32.mrf.mxu3  ;;  %v4212_v24 = vpop.f32.mrf.mxu1 }
 0x5b4   : > { %v4540_v21 = vmax.f32 %v4539_v20, %v4022_v55  ;;  %v4607_v14 = vmax.f32 %v4606_v12, %v4212_v24  ;;  %5233 = vmatmul.bf16.gmra.mxu0 %v16312_v51  ;;  %v7754_v28 = vunpack.c.l.b16 %v3234_v13 }
 0x5b5   : > { %v2977_v6 = vpop.f32.mrf.mxu2 }
 0x5b6   : > { %v2978_v2 = vadd.f32 %v16945_v48, %v2977_v6 }
 0x5b8   : > { %v3107_v16 = vmax.f32 %v2978_v2, 0.0 }
 0x5b9   : > { %v5196_v22 = vpop.f32.mrf.mxu0 }
 0x5ba   : > { %v3235_v61 = vpack.c.bf16 %v3107_v16, %v3107_v16  ;;  %v5902_v29 = vmax.f32 %v5901_v38, %v5196_v22  ;;  %4298 = vmatmul.bf16.gmra.mxu2 %v16025_v27 }
 0x5bb   : > { %v4024_v49 = vpop.f32.mrf.mxu3  ;;  %v4215_v46 = vpop.f32.mrf.mxu1 }
 0x5bc   : > { %v7755_v43 = vunpack.c.l.b16 %v3235_v61  ;;  %v4541_v17 = vmax.f32 %v4540_v21, %v4024_v49  ;;  %v4608_v31 = vmax.f32 %v4607_v14, %v4215_v46 }
 0x5bd   : > { %v4259_v55 = vpop.f32.mrf.mxu2 }
 0x5be   : > { %v17035_v24 = vpack.c.b16 %v7755_v43, %v7754_v28  ;;  %5282 = vmatmul.bf16.gmra.mxu1 %v16176_v56 }
 0x5c0   : > { %4066 = vmatmul.bf16.gmra.mxu3 %v16154_v44 }
 0x5c1   : > { %v5199_v48 = vpop.f32.mrf.mxu0 }
 0x5c2   : > { %v5903_v20 = vmax.f32 %v5902_v29, %v5199_v48 }
 0x5c3   : > { %v4027_v12 = vpop.f32.mrf.mxu3  ;;  %v4217_v41 = vpop.f32.mrf.mxu1 }
 0x5c4   : > { %v4542_v6 = vmax.f32 %v4541_v17, %v4027_v12  ;;  %v4609_v38 = vmax.f32 %v4608_v31, %v4217_v41  ;;  %5238 = vmatmul.bf16.gmra.mxu0 %v16340_v54 }
 0x5c5   : > { %v4261_v13 = vpop.f32.mrf.mxu2 }
 0x5c6   : > { %v4622_v2 = vmax.f32 %v4259_v55, %v4261_v13 }
 0x5c9   : > { %v5201_v16 = vpop.f32.mrf.mxu0 }
 0x5ca   : > { %v5904_v21 = vmax.f32 %v5903_v20, %v5201_v16  ;;  %4303 = vmatmul.bf16.gmra.mxu2 %v16036_v58 }
 0x5cb   : > { %v4029_v14 = vpop.f32.mrf.mxu3  ;;  %v4220_v22 = vpop.f32.mrf.mxu1 }
 0x5cc   : > { %v4543_v28 = vmax.f32 %v4542_v6, %v4029_v14  ;;  %v4610_v61 = vmax.f32 %v4609_v38, %v4220_v22 }
 0x5cd   : > { %v4264_v49 = vpop.f32.mrf.mxu2 }
 0x5ce   : > { %v4623_v46 = vmax.f32 %v4622_v2, %v4264_v49  ;;  %5287 = vmatmul.bf16.gmra.mxu1 %v16199_v40  ;;  %v12885_v49 = vld [vmem:[%s20881_s6 + $0x1d0] sm:$0xf] }
 0x5d0   : > { %4347 = vmatmul.bf16.vlgmr.msra.gmra.mxu3 %v15895_v50 }
 0x5d1   : > { %v5204_v29 = vpop.f32.mrf.mxu0 }
 0x5d2   : > { %v5905_v43 = vmax.f32 %v5904_v21, %v5204_v29 }
 0x5d3   : > { %v4032_v17 = vpop.f32.mrf.mxu3  ;;  %v4222_v31 = vpop.f32.mrf.mxu1 }
 0x5d4   : > { %v4544_v48 = vmax.f32 %v4543_v28, %v4032_v17  ;;  %v4611_v55 = vmax.f32 %v4610_v61, %v4222_v31  ;;  %5243 = vmatmul.bf16.gmra.mxu0 %v16363_v60  ;;  %v12877_v28 = vld [vmem:[%s20881_s6 + $0x1c8] sm:$0xf] }
 0x5d5   : > { %v4266_v20 = vpop.f32.mrf.mxu2  ;;  %v14955_v61 = vld [vmem:[%s20881_s6 + $0x1e4] sm:$0xf0] }
 0x5d6   : > { %v4624_v12 = vmax.f32 %v4623_v46, %v4266_v20 }
 0x5d9   : > { %v5206_v41 = vpop.f32.mrf.mxu0 }
 0x5da   : > { %v5906_v13 = vmax.f32 %v5905_v43, %v5206_v41  ;;  %4308 = vmatmul.bf16.gmra.mxu2 %v16059_v35  ;;  %v12878_v43 = vor.u32 %v14955_v61, %v12877_v28 }
 0x5db   : > { %v4034_v6 = vpop.f32.mrf.mxu3  ;;  %v4225_v38 = vpop.f32.mrf.mxu1 }
 0x5dc   : > { %v4545_v2 = vmax.f32 %v4544_v48, %v4034_v6  ;;  %v4612_v16 = vmax.f32 %v4611_v55, %v4225_v38  ;;  %v14951_v48 = vld [vmem:[%s20881_s6 + $0x1cc] sm:$0xf]  ;;  %5358 = vmatpush.bf16.msra.mxu2 %v12878_v43  ;;  %v12853_v6 = vld [vmem:[%s20881_s6 + $0x190] sm:$0xf] }
 0x5dd   : > { %v4269_v14 = vpop.f32.mrf.mxu2  ;;  %v12879_v55 = vld [vmem:[%s20881_s6 + $0x1e8] sm:$0xf0]  ;;  %v14948_v38 = vld [vmem:[%s20881_s6 + $0x1ac] sm:$0xf0] }
 0x5de   : > { %v4625_v50 = vmax.f32 %v4624_v12, %v4269_v14  ;;  %5292 = vmatmul.bf16.gmra.mxu1 %v16222_v26  ;;  %v12882_v41 = vor.u32 %v14951_v48, %v12879_v55  ;;  %v14932_v48 = vld [vmem:[%s20881_s6 + $0x12c] sm:$0xf0] }
 0x5e0   : > { %4352 = vmatmul.bf16.gmra.mxu3 %v15906_v11  ;;  %v14956_v11 = vld [vmem:[%s20881_s6 + $0x1ec] sm:$0xf0] }
 0x5e1   : > { %v5209_v21 = vpop.f32.mrf.mxu0  ;;  %v12886_v20 = vor.u32 %v14956_v11, %v12885_v49  ;;  %5447 = vmatpush.bf16.msrb.mxu3 %v12882_v41 }
 0x5e2   : > { %v5907_v22 = vmax.f32 %v5906_v13, %v5209_v21  ;;  %v14940_v21 = vld [vmem:[%s20881_s6 + $0x16c] sm:$0xf0] }
 0x5e3   : > { %v4037_v46 = vpop.f32.mrf.mxu3  ;;  %v4227_v29 = vpop.f32.mrf.mxu1  ;;  %5536 = vmatpush.bf16.msrb.mxu0 %v12886_v20 }
 0x5e4   : > { %v4546_v17 = vmax.f32 %v4545_v2, %v4037_v46  ;;  %v4613_v31 = vmax.f32 %v4612_v16, %v4227_v29  ;;  %5248 = vmatmul.bf16.gmra.mxu0 %v16380_v57  ;;  %v12854_v2 = vor.u32 %v14948_v38, %v12853_v6 }
 0x5e5   : > { %v4271_v12 = vpop.f32.mrf.mxu2 }
 0x5e6   : > { %v4626_v13 = vmax.f32 %v4625_v50, %v4271_v12  ;;  %v12821_v50 = vld [vmem:[%s20881_s6 + $0x150] sm:$0xf] }
 0x5e7   : > { %5537 = vmatpush.bf16.msrb.mxu0 %v12854_v2  ;;  %v12822_v49 = vor.u32 %v14940_v21, %v12821_v50  ;;  %v14916_v50 = vld [vmem:[%s20881_s6 + $0xac] sm:$0xf0] }
 0x5e9   : > { %v5211_v16 = vpop.f32.mrf.mxu0 }
 0x5ea   : > { %v5908_v14 = vmax.f32 %v5907_v22, %v5211_v16  ;;  %4313 = vmatmul.bf16.gmra.mxu2 %v16087_v15  ;;  %v12789_v22 = vld [vmem:[%s20881_s6 + $0x110] sm:$0xf] }
 0x5eb   : > { %v4039_v28 = vpop.f32.mrf.mxu3  ;;  %v4230_v61 = vpop.f32.mrf.mxu1  ;;  %5538 = vmatpush.bf16.msrb.mxu0 %v12822_v49  ;;  %v12790_v55 = vor.u32 %v14932_v48, %v12789_v22  ;;  %v12693_v49 = vld [vmem:[%s20881_s6 + $0x50] sm:$0xf] }
 0x5ec   : > { %v4547_v46 = vmax.f32 %v4546_v17, %v4039_v28  ;;  %v4614_v29 = vmax.f32 %v4613_v31, %v4230_v61  ;;  %v12757_v17 = vld [vmem:[%s20881_s6 + $0xd0] sm:$0xf] }
 0x5ed   : > { %v4274_v43 = vpop.f32.mrf.mxu2  ;;  %v14924_v31 = vld [vmem:[%s20881_s6 + $0xec] sm:$0xf0] }
 0x5ee   : > { %v4627_v11 = vmax.f32 %v4626_v13, %v4274_v43  ;;  %5297 = vmatmul.bf16.gmra.mxu1 %v16239_v8  ;;  %v12758_v6 = vor.u32 %v14924_v31, %v12757_v17 }
 0x5ef   : > { %5539 = vmatpush.bf16.msrb.mxu0 %v12790_v55  ;;  %v12845_v55 = vld [vmem:[%s20881_s6 + $0x188] sm:$0xf] }
 0x5f0   : > { %4357 = vmatmul.bf16.gmra.mxu3 %v15929_v42 }
 0x5f1   : > { %v5214_v20 = vpop.f32.mrf.mxu0 }
 0x5f2   : > { %v5909_v12 = vmax.f32 %v5908_v14, %v5214_v20  ;;  %v12725_v14 = vld [vmem:[%s20881_s6 + $0x90] sm:$0xf]  ;;  %v14947_v20 = vld [vmem:[%s20881_s6 + $0x1a4] sm:$0xf0] }
 0x5f3   : > { %v4042_v41 = vpop.f32.mrf.mxu3  ;;  %v4232_v13 = vpop.f32.mrf.mxu1  ;;  %5540 = vmatpush.bf16.msrb.mxu0 %v12758_v6  ;;  %v12726_v21 = vor.u32 %v14916_v50, %v12725_v14  ;;  %v12846_v17 = vor.u32 %v14947_v20, %v12845_v55  ;;  %v12749_v55 = vld [vmem:[%s20881_s6 + $0xc8] sm:$0xf] }
 0x5f4   : > { %v4548_v38 = vmax.f32 %v4547_v46, %v4042_v41  ;;  %v4615_v2 = vmax.f32 %v4614_v29, %v4232_v13  ;;  %5253 = vmatmul.bf16.gmra.mxu0 %v16391_v47  ;;  %v14908_v46 = vld [vmem:[%s20881_s6 + $0x6c] sm:$0xf0]  ;;  %v14923_v20 = vld [vmem:[%s20881_s6 + $0xe4] sm:$0xf0] }
 0x5f5   : > { %v4276_v16 = vpop.f32.mrf.mxu2  ;;  %v12661_v41 = vld [vmem:[%s20881_s6 + $0x10] sm:$0xf]  ;;  %5359 = vmatpush.bf16.msra.mxu2 %v12846_v17  ;;  %v12750_v17 = vor.u32 %v14923_v20, %v12749_v55 }
 0x5f6   : > { %v4628_v42 = vmax.f32 %v4627_v11, %v4276_v16  ;;  %v12694_v11 = vor.u32 %v14908_v46, %v12693_v49  ;;  %v14900_v13 = vld [vmem:[%s20881_s6 + $0x2c] sm:$0xf0]  ;;  %v12847_v46 = vld [vmem:[%s20881_s6 + $0x1a8] sm:$0xf0] }
 0x5f7   : > { %5541 = vmatpush.bf16.msrb.mxu0 %v12726_v21  ;;  %v12662_v6 = vor.u32 %v14900_v13, %v12661_v41 }
 0x5f9   : > { %v5216_v28 = vpop.f32.mrf.mxu0 }
 0x5fa   : > { %v5910_v61 = vmax.f32 %v5909_v12, %v5216_v28  ;;  %4318 = vmatmul.bf16.gmra.mxu2 %v16104_v53 }
 0x5fb   : > { %v4044_v29 = vpop.f32.mrf.mxu3  ;;  %v4235_v43 = vpop.f32.mrf.mxu1  ;;  %5542 = vmatpush.bf16.msrb.mxu0 %v12694_v11  ;;  %v14931_v11 = vld [vmem:[%s20881_s6 + $0x124] sm:$0xf0] }
 0x5fc   : > { %v4549_v22 = vmax.f32 %v4548_v38, %v4044_v29  ;;  %v4616_v48 = vmax.f32 %v4615_v2, %v4235_v43  ;;  %v12813_v38 = vld [vmem:[%s20881_s6 + $0x148] sm:$0xf] }
 0x5fd   : > { %v4279_v12 = vpop.f32.mrf.mxu2  ;;  %v14939_v2 = vld [vmem:[%s20881_s6 + $0x164] sm:$0xf0] }
 0x5fe   : > { %v4629_v31 = vmax.f32 %v4628_v42, %v4279_v12  ;;  %5302 = vmatmul.bf16.gmra.mxu1 %v16250_v52  ;;  %v12814_v42 = vor.u32 %v14939_v2, %v12813_v38  ;;  %v12717_v2 = vld [vmem:[%s20881_s6 + $0x88] sm:$0xf] }
 0x5ff   : > { %5543 = vmatpush.bf16.msrb.mxu0 %v12662_v6 }
 0x600   : > { %4362 = vmatmul.bf16.gmra.mxu3 %v15952_v10  ;;  %5360 = vmatpush.bf16.msra.mxu2 %v12814_v42  ;;  %v14943_v10 = vld [vmem:[%s20881_s6 + $0x18c] sm:$0xf] }
 0x601   : > { %v5219_v16 = vpop.f32.mrf.mxu0  ;;  %v12850_v43 = vor.u32 %v14943_v10, %v12847_v46 }
 0x602   : > { %v5911_v14 = vmax.f32 %v5910_v61, %v5219_v16  ;;  %v12781_v61 = vld [vmem:[%s20881_s6 + $0x108] sm:$0xf] }
 0x603   : > { %v4047_v50 = vpop.f32.mrf.mxu3  ;;  %v4237_v21 = vpop.f32.mrf.mxu1  ;;  %5448 = vmatpush.bf16.msrb.mxu3 %v12850_v43  ;;  %v14915_v16 = vld [vmem:[%s20881_s6 + $0xa4] sm:$0xf0] }
 0x604   : > { %v4550_v28 = vmax.f32 %v4549_v22, %v4047_v50  ;;  %v4617_v49 = vmax.f32 %v4616_v48, %v4237_v21  ;;  %5258 = vmatmul.bf16.gmra.mxu0 %v16419_v0  ;;  %v12782_v48 = vor.u32 %v14931_v11, %v12781_v61  ;;  %v12718_v50 = vor.u32 %v14915_v16, %v12717_v2 }
 0x605   : > { %v4281_v29 = vpop.f32.mrf.mxu2 }
 0x606   : > { %v4630_v22 = vmax.f32 %v4629_v31, %v4281_v29  ;;  %5361 = vmatpush.bf16.msra.mxu2 %v12782_v48 }
 0x609   : > { %v5221_v12 = vpop.f32.mrf.mxu0 }
 0x60a   : > { %v5912_v41 = vmax.f32 %v5911_v14, %v5221_v12  ;;  %4323 = vmatmul.bf16.gmra.mxu2 %v16115_v23  ;;  %v12685_v14 = vld [vmem:[%s20881_s6 + $0x48] sm:$0xf] }
 0x60b   : > { %v4049_v13 = vpop.f32.mrf.mxu3  ;;  %v4240_v6 = vpop.f32.mrf.mxu1  ;;  %5362 = vmatpush.bf16.msra.mxu2 %v12750_v17 }
 0x60c   : > { %v4551_v38 = vmax.f32 %v4550_v28, %v4049_v13  ;;  %v4618_v31 = vmax.f32 %v4617_v49, %v4240_v6  ;;  %v14907_v28 = vld [vmem:[%s20881_s6 + $0x64] sm:$0xf0] }
 0x60d   : > { %v4284_v42 = vpop.f32.mrf.mxu2  ;;  %v12686_v10 = vor.u32 %v14907_v28, %v12685_v14 }
 0x60e   : > { %v4631_v21 = vmax.f32 %v4630_v22, %v4284_v42  ;;  %5307 = vmatmul.bf16.gmra.mxu1 %v16267_v36  ;;  %v14899_v22 = vld [vmem:[%s20881_s6 + $0x24] sm:$0xf0] }
 0x60f   : > { %5363 = vmatpush.bf16.msra.mxu2 %v12718_v50 }
 0x610   : > { %4367 = vmatmul.bf16.gmra.mxu3 %v15969_v39  ;;  %v12653_v39 = vld [vmem:[%s20881_s6 + $0x8] sm:$0xf] }
 0x611   : > { %v5224_v49 = vpop.f32.mrf.mxu0  ;;  %v12654_v55 = vor.u32 %v14899_v22, %v12653_v39 }
 0x612   : > { %v5913_v46 = vmax.f32 %v5912_v41, %v5224_v49  ;;  %v14935_v49 = vld [vmem:[%s20881_s6 + $0x14c] sm:$0xf] }
 0x613   : > { %v4052_v61 = vpop.f32.mrf.mxu3  ;;  %v4242_v29 = vpop.f32.mrf.mxu1  ;;  %5364 = vmatpush.bf16.msra.mxu2 %v12686_v10  ;;  %v12815_v10 = vld [vmem:[%s20881_s6 + $0x168] sm:$0xf0] }
 0x614   : > { %v4552_v43 = vmax.f32 %v4551_v38, %v4052_v61  ;;  %v4619_v11 = vmax.f32 %v4618_v31, %v4242_v29  ;;  %5263 = vmatmul.bf16.gmra.mxu0 %v16430_v63 }
 0x615   : > { %v4286_v48 = vpop.f32.mrf.mxu2 }
 0x616   : > { %v4632_v20 = vmax.f32 %v4631_v21, %v4286_v48 }
 0x617   : > { %5365 = vmatpush.bf16.msra.mxu2 %v12654_v55 }
 0x619   : > { %v5226_v12 = vpop.f32.mrf.mxu0 }
 0x61a   : > { %v5914_v17 = vmax.f32 %v5913_v46, %v5226_v12  ;;  %4328 = vmatmul.bf16.gmra.mxu2 %v16138_v5  ;;  %v12818_v46 = vor.u32 %v14935_v49, %v12815_v10 }
 0x61b   : > { %v4054_v41 = vpop.f32.mrf.mxu3  ;;  %v4245_v13 = vpop.f32.mrf.mxu1 }
 0x61c   : > { %v4553_v6 = vmax.f32 %v4552_v43, %v4054_v41  ;;  %v17169_v38 = vmax.f32 %v4619_v11, %v4245_v13  ;;  %5449 = vmatpush.bf16.msrb.mxu3 %v12818_v46 }
 0x61d   : > { %v4289_v31 = vpop.f32.mrf.mxu2 }
 0x61e   : > { %v4633_v2 = vmax.f32 %v4632_v20, %v4289_v31  ;;  %5312 = vmatmul.bf16.gmra.mxu1 %v16278_v18 }
 0x620   : > { %4372 = vmatmul.bf16.gmra.mxu3 %v15980_v1 }
 0x621   : > { %v5229_v16 = vpop.f32.mrf.mxu0 }
 0x622   : > { %v5915_v42 = vmax.f32 %v5914_v17, %v5229_v16 }
 0x623   : > { %v4057_v50 = vpop.f32.mrf.mxu3  ;;  %v17173_v21 = vpop.f32.mrf.mxu1 }
 0x624   : > { %v4554_v14 = vmax.f32 %v4553_v6, %v4057_v50  ;;  %v4621_v28 = vmax.f32 %v17169_v38, %v17173_v21  ;;  %5544 = vmatmul.bf16.vlgmr.msrb.gmra.mxu0 %v16165_v9 }
 0x625   : > { %v4291_v1 = vpop.f32.mrf.mxu2 }
 0x626   : > { %v4634_v61 = vmax.f32 %v4633_v2, %v4291_v1 }
 0x629   : > { %v5231_v29 = vpop.f32.mrf.mxu0 }
 0x62a   : > { %v5916_v43 = vmax.f32 %v5915_v42, %v5231_v29  ;;  %4333 = vmatmul.bf16.gmra.mxu2 %v16154_v44 }
 0x62b   : > { %v4059_v11 = vpop.f32.mrf.mxu3  ;;  %v5278_v39 = vpop.f32.mrf.mxu1 }
 0x62c   : > { %v4555_v22 = vmax.f32 %v4554_v14, %v4059_v11 }
 0x62d   : > { %v4294_v48 = vpop.f32.mrf.mxu2 }
 0x62e   : > { %v4635_v55 = vmax.f32 %v4634_v61, %v4294_v48  ;;  %5317 = vmatmul.bf16.gmra.mxu1 %v16301_v4  ;;  %v12783_v48 = vld [vmem:[%s20881_s6 + $0x128] sm:$0xf0] }
 0x630   : > { %4377 = vmatmul.bf16.gmra.mxu3 %v15997_v32 }
 0x631   : > { %v5234_v20 = vpop.f32.mrf.mxu0 }
 0x632   : > { %v5917_v12 = vmax.f32 %v5916_v43, %v5234_v20 }
 0x633   : > { %v4062_v17 = vpop.f32.mrf.mxu3  ;;  %v5280_v41 = vpop.f32.mrf.mxu1 }
 0x634   : > { %v4556_v13 = vmax.f32 %v4555_v22, %v4062_v17  ;;  %v5931_v6 = vmax.f32 %v5278_v39, %v5280_v41  ;;  %5549 = vmatmul.bf16.gmra.mxu0 %v16176_v56  ;;  %v14927_v22 = vld [vmem:[%s20881_s6 + $0x10c] sm:$0xf] }
 0x635   : > { %v4296_v31 = vpop.f32.mrf.mxu2  ;;  %v12786_v20 = vor.u32 %v14927_v22, %v12783_v48 }
 0x636   : > { %v4636_v2 = vmax.f32 %v4635_v55, %v4296_v31 }
 0x637   : > { %5450 = vmatpush.bf16.msrb.mxu3 %v12786_v20 }
 0x639   : > { %v5236_v16 = vpop.f32.mrf.mxu0 }
 0x63a   : > { %v5918_v42 = vmax.f32 %v5917_v12, %v5236_v16  ;;  %5366 = vmatmul.bf16.vlgmr.msra.gmra.mxu2 %v16165_v9 }
 0x63b   : > { %v4064_v50 = vpop.f32.mrf.mxu3  ;;  %v5283_v14 = vpop.f32.mrf.mxu1 }
 0x63c   : > { %v4557_v49 = vmax.f32 %v4556_v13, %v4064_v50  ;;  %v5932_v10 = vmax.f32 %v5931_v6, %v5283_v14 }
 0x63d   : > { %v4299_v1 = vpop.f32.mrf.mxu2 }
 0x63e   : > { %v4637_v32 = vmax.f32 %v4636_v2, %v4299_v1  ;;  %5322 = vmatmul.bf16.gmra.mxu1 %v16312_v51 }
 0x640   : > { %4382 = vmatmul.bf16.gmra.mxu3 %v16008_v59 }
 0x641   : > { %v5239_v46 = vpop.f32.mrf.mxu0 }
 0x642   : > { %v5919_v61 = vmax.f32 %v5918_v42, %v5239_v46 }
 0x643   : > { %v4067_v29 = vpop.f32.mrf.mxu3  ;;  %v5285_v43 = vpop.f32.mrf.mxu1 }
 0x644   : > { %v17191_v11 = vmax.f32 %v4557_v49, %v4067_v29  ;;  %v5933_v39 = vmax.f32 %v5932_v10, %v5285_v43  ;;  %5554 = vmatmul.bf16.gmra.mxu0 %v16199_v40 }
 0x645   : > { %v4301_v55 = vpop.f32.mrf.mxu2 }
 0x646   : > { %v4638_v59 = vmax.f32 %v4637_v32, %v4301_v55 }
 0x649   : > { %v5241_v12 = vpop.f32.mrf.mxu0 }
 0x64a   : > { %v5920_v17 = vmax.f32 %v5919_v61, %v5241_v12  ;;  %5371 = vmatmul.bf16.gmra.mxu2 %v16176_v56 }
 0x64b   : > { %v17201_v41 = vpop.f32.mrf.mxu3  ;;  %v5288_v13 = vpop.f32.mrf.mxu1 }
 0x64c   : > { %v4559_v6 = vmax.f32 %v17191_v11, %v17201_v41  ;;  %v5934_v31 = vmax.f32 %v5933_v39, %v5288_v13 }
 0x64d   : > { %v4304_v2 = vpop.f32.mrf.mxu2 }
 0x64e   : > { %v4639_v16 = vmax.f32 %v4638_v59, %v4304_v2  ;;  %5327 = vmatmul.bf16.gmra.mxu1 %v16340_v54  ;;  %v12751_v2 = vld [vmem:[%s20881_s6 + $0xe8] sm:$0xf0] }
 0x650   : > { %4387 = vmatmul.bf16.gmra.mxu3 %v16025_v27 }
 0x651   : > { %v5244_v42 = vpop.f32.mrf.mxu0 }
 0x652   : > { %v5921_v50 = vmax.f32 %v5920_v17, %v5244_v42 }
 0x653   : > { %v4348_v14 = vpop.f32.mrf.mxu3  ;;  %v5290_v49 = vpop.f32.mrf.mxu1 }
 0x654   : > { %v5935_v10 = vmax.f32 %v5934_v31, %v5290_v49  ;;  %5559 = vmatmul.bf16.gmra.mxu0 %v16222_v26  ;;  %v14919_v31 = vld [vmem:[%s20881_s6 + $0xcc] sm:$0xf] }
 0x655   : > { %v4306_v1 = vpop.f32.mrf.mxu2  ;;  %v12754_v42 = vor.u32 %v14919_v31, %v12751_v2  ;;  %v12823_v31 = vld [vmem:[%s20881_s6 + $0x170] sm:$0xf0] }
 0x656   : > { %v4640_v32 = vmax.f32 %v4639_v16, %v4306_v1 }
 0x657   : > { %5451 = vmatpush.bf16.msrb.mxu3 %v12754_v42 }
 0x659   : > { %v5246_v46 = vpop.f32.mrf.mxu0 }
 0x65a   : > { %v5922_v61 = vmax.f32 %v5921_v50, %v5246_v46  ;;  %5376 = vmatmul.bf16.gmra.mxu2 %v16199_v40  ;;  %v14952_v46 = vld [vmem:[%s20881_s6 + $0x1d4] sm:$0xf] }
 0x65b   : > { %v4350_v29 = vpop.f32.mrf.mxu3  ;;  %v5293_v43 = vpop.f32.mrf.mxu1 }
 0x65c   : > { %v4653_v39 = vmax.f32 %v4348_v14, %v4350_v29  ;;  %v5936_v22 = vmax.f32 %v5935_v10, %v5293_v43 }
 0x65d   : > { %v4309_v48 = vpop.f32.mrf.mxu2 }
 0x65e   : > { %v4641_v55 = vmax.f32 %v4640_v32, %v4309_v48  ;;  %5332 = vmatmul.bf16.gmra.mxu1 %v16363_v60  ;;  %v12855_v48 = vld [vmem:[%s20881_s6 + $0x1b0] sm:$0xf0] }
 0x660   : > { %4392 = vmatmul.bf16.gmra.mxu3 %v16036_v58 }
 0x661   : > { %v5249_v27 = vpop.f32.mrf.mxu0 }
 0x662   : > { %v5923_v20 = vmax.f32 %v5922_v61, %v5249_v27  ;;  %v12887_v61 = vld [vmem:[%s20881_s6 + $0x1f0] sm:$0xf0] }
 0x663   : > { %v4353_v59 = vpop.f32.mrf.mxu3  ;;  %v5295_v12 = vpop.f32.mrf.mxu1  ;;  %v12890_v43 = vor.u32 %v14952_v46, %v12887_v61 }
 0x664   : > { %v4654_v17 = vmax.f32 %v4653_v39, %v4353_v59  ;;  %v5937_v13 = vmax.f32 %v5936_v22, %v5295_v12  ;;  %5564 = vmatmul.bf16.gmra.mxu0 %v16239_v8  ;;  %v14944_v22 = vld [vmem:[%s20881_s6 + $0x194] sm:$0xf] }
 0x665   : > { %v4311_v16 = vpop.f32.mrf.mxu2  ;;  %5625 = vmatpush.bf16.msrb.mxu1 %v12890_v43  ;;  %v12858_v27 = vor.u32 %v14944_v22, %v12855_v48  ;;  %v12759_v43 = vld [vmem:[%s20881_s6 + $0xf0] sm:$0xf0] }
 0x666   : > { %v4642_v50 = vmax.f32 %v4641_v55, %v4311_v16 }
 0x669   : > { %v5251_v58 = vpop.f32.mrf.mxu0  ;;  %5626 = vmatpush.bf16.msrb.mxu1 %v12858_v27  ;;  %v12727_v27 = vld [vmem:[%s20881_s6 + $0xb0] sm:$0xf0] }
 0x66a   : > { %v5924_v14 = vmax.f32 %v5923_v20, %v5251_v58  ;;  %5381 = vmatmul.bf16.gmra.mxu2 %v16222_v26  ;;  %v12791_v58 = vld [vmem:[%s20881_s6 + $0x130] sm:$0xf0] }
 0x66b   : > { %v4355_v49 = vpop.f32.mrf.mxu3  ;;  %v5298_v10 = vpop.f32.mrf.mxu1 }
 0x66c   : > { %v4655_v1 = vmax.f32 %v4654_v17, %v4355_v49  ;;  %v5938_v32 = vmax.f32 %v5937_v13, %v5298_v10 }
 0x66d   : > { %v4314_v29 = vpop.f32.mrf.mxu2 }
 0x66e   : > { %v4643_v39 = vmax.f32 %v4642_v50, %v4314_v29  ;;  %5337 = vmatmul.bf16.gmra.mxu1 %v16380_v57  ;;  %v14928_v50 = vld [vmem:[%s20881_s6 + $0x114] sm:$0xf] }
 0x66f   : > { %v12794_v49 = vor.u32 %v14928_v50, %v12791_v58  ;;  %v14920_v29 = vld [vmem:[%s20881_s6 + $0xd4] sm:$0xf] }
 0x670   : > { %4397 = vmatmul.bf16.gmra.mxu3 %v16059_v35  ;;  %v14936_v35 = vld [vmem:[%s20881_s6 + $0x154] sm:$0xf]  ;;  %v12762_v22 = vor.u32 %v14920_v29, %v12759_v43 }
 0x671   : > { %v5254_v55 = vpop.f32.mrf.mxu0  ;;  %v12826_v16 = vor.u32 %v14936_v35, %v12823_v31  ;;  %v12695_v58 = vld [vmem:[%s20881_s6 + $0x70] sm:$0xf0] }
 0x672   : > { %v5925_v20 = vmax.f32 %v5924_v14, %v5254_v55  ;;  %v14912_v55 = vld [vmem:[%s20881_s6 + $0x94] sm:$0xf] }
 0x673   : > { %v4358_v59 = vpop.f32.mrf.mxu3  ;;  %v5300_v12 = vpop.f32.mrf.mxu1  ;;  %5627 = vmatpush.bf16.msrb.mxu1 %v12826_v16  ;;  %v14904_v16 = vld [vmem:[%s20881_s6 + $0x54] sm:$0xf] }
 0x674   : > { %v4656_v17 = vmax.f32 %v4655_v1, %v4358_v59  ;;  %v5939_v13 = vmax.f32 %v5938_v32, %v5300_v12  ;;  %5569 = vmatmul.bf16.gmra.mxu0 %v16250_v52  ;;  %v12730_v59 = vor.u32 %v14912_v55, %v12727_v27 }
 0x675   : > { %v4316_v2 = vpop.f32.mrf.mxu2 }
 0x676   : > { %v4644_v42 = vmax.f32 %v4643_v39, %v4316_v2  ;;  %v12719_v2 = vld [vmem:[%s20881_s6 + $0xa8] sm:$0xf0] }
 0x677   : > { %5628 = vmatpush.bf16.msrb.mxu1 %v12794_v49  ;;  %v12698_v49 = vor.u32 %v14904_v16, %v12695_v58 }
 0x679   : > { %v5256_v14 = vpop.f32.mrf.mxu0 }
 0x67a   : > { %v5926_v10 = vmax.f32 %v5925_v20, %v5256_v14  ;;  %5386 = vmatmul.bf16.gmra.mxu2 %v16239_v8 }
 0x67b   : > { %v4360_v1 = vpop.f32.mrf.mxu3  ;;  %v5303_v32 = vpop.f32.mrf.mxu1  ;;  %5629 = vmatpush.bf16.msrb.mxu1 %v12762_v22 }
 0x67c   : > { %v4657_v46 = vmax.f32 %v4656_v17, %v4360_v1  ;;  %v5940_v61 = vmax.f32 %v5939_v13, %v5303_v32  ;;  %v12663_v1 = vld [vmem:[%s20881_s6 + $0x30] sm:$0xf0] }
 0x67d   : > { %v4319_v39 = vpop.f32.mrf.mxu2 }
 0x67e   : > { %v4645_v48 = vmax.f32 %v4644_v42, %v4319_v39  ;;  %5342 = vmatmul.bf16.gmra.mxu1 %v16391_v47 }
 0x67f   : > { %5630 = vmatpush.bf16.msrb.mxu1 %v12730_v59 }
 0x680   : > { %4402 = vmatmul.bf16.gmra.mxu3 %v16087_v15  ;;  %v14911_v15 = vld [vmem:[%s20881_s6 + $0x8c] sm:$0xf] }
 0x681   : > { %v5259_v20 = vpop.f32.mrf.mxu0  ;;  %v12722_v50 = vor.u32 %v14911_v15, %v12719_v2 }
 0x682   : > { %v5927_v12 = vmax.f32 %v5926_v10, %v5259_v20  ;;  %v14896_v10 = vld [vmem:[%s20881_s6 + $0x14] sm:$0xf] }
 0x683   : > { %v4363_v17 = vpop.f32.mrf.mxu3  ;;  %v5305_v13 = vpop.f32.mrf.mxu1  ;;  %5452 = vmatpush.bf16.msrb.mxu3 %v12722_v50  ;;  %5631 = vmatpush.bf16.msrb.mxu1 %v12698_v49  ;;  %v20960_v50 = vmax.f32 %v16286_v33, %v16297_v62  ;;  %v14903_v33 = vld [vmem:[%s20881_s6 + $0x4c] sm:$0xf] }
 0x684   : > { %v4658_v35 = vmax.f32 %v4657_v46, %v4363_v17  ;;  %v5941_v31 = vmax.f32 %v5940_v61, %v5305_v13  ;;  %5574 = vmatmul.bf16.gmra.mxu0 %v16267_v36  ;;  %v12666_v46 = vor.u32 %v14896_v10, %v12663_v1  ;;  %v12687_v62 = vld [vmem:[%s20881_s6 + $0x68] sm:$0xf0] }
 0x685   : > { %v4321_v42 = vpop.f32.mrf.mxu2 }
 0x686   : > { %v4646_v14 = vmax.f32 %v4645_v48, %v4321_v42 }
 0x687   : > { %5632 = vmatpush.bf16.msrb.mxu1 %v12666_v46 }
 0x689   : > { %v5261_v32 = vpop.f32.mrf.mxu0 }
 0x68a   : > { %v5928_v61 = vmax.f32 %v5927_v12, %v5261_v32  ;;  %5391 = vmatmul.bf16.gmra.mxu2 %v16250_v52 }
 0x68b   : > { %v4365_v29 = vpop.f32.mrf.mxu3  ;;  %v5308_v43 = vpop.f32.mrf.mxu1 }
 0x68c   : > { %v4659_v39 = vmax.f32 %v4658_v35, %v4365_v29  ;;  %v5942_v22 = vmax.f32 %v5941_v31, %v5308_v43 }
 0x68d   : > { %v4324_v48 = vpop.f32.mrf.mxu2 }
 0x68e   : > { %v4647_v55 = vmax.f32 %v4646_v14, %v4324_v48  ;;  %5347 = vmatmul.bf16.gmra.mxu1 %v16419_v0 }
 0x690   : > { %4407 = vmatmul.bf16.gmra.mxu3 %v16104_v53 }
 0x691   : > { %v5264_v27 = vpop.f32.mrf.mxu0 }
 0x692   : > { %v5929_v20 = vmax.f32 %v5928_v61, %v5264_v27  ;;  %v12655_v27 = vld [vmem:[%s20881_s6 + $0x28] sm:$0xf0] }
 0x693   : > { %v4368_v59 = vpop.f32.mrf.mxu3  ;;  %v5310_v17 = vpop.f32.mrf.mxu1 }
 0x694   : > { %v4660_v13 = vmax.f32 %v4659_v39, %v4368_v59  ;;  %v5943_v15 = vmax.f32 %v5942_v22, %v5310_v17  ;;  %5579 = vmatmul.bf16.gmra.mxu0 %v16278_v18  ;;  %v12690_v39 = vor.u32 %v14903_v33, %v12687_v62 }
 0x695   : > { %v4326_v12 = vpop.f32.mrf.mxu2 }
 0x696   : > { %v4648_v2 = vmax.f32 %v4647_v55, %v4326_v12  ;;  %5453 = vmatpush.bf16.msrb.mxu3 %v12690_v39  ;;  %v14895_v55 = vld [vmem:[%s20881_s6 + $0xc] sm:$0xf] }
 0x697   : > { %v12658_v17 = vor.u32 %v14895_v55, %v12655_v27 }
 0x699   : > { %v5266_v16 = vpop.f32.mrf.mxu0 }
 0x69a   : > { %v5930_v35 = vmax.f32 %v5929_v20, %v5266_v16  ;;  %5396 = vmatmul.bf16.gmra.mxu2 %v16267_v36  ;;  %5454 = vmatpush.bf16.msrb.mxu3 %v12658_v17 }
 0x69b   : > { %v4370_v31 = vpop.f32.mrf.mxu3  ;;  %v5313_v42 = vpop.f32.mrf.mxu1 }
 0x69c   : > { %v17288_v53 = vmax.f32 %v20960_v50, %v5930_v35  ;;  %v4661_v58 = vmax.f32 %v4660_v13, %v4370_v31  ;;  %v5944_v14 = vmax.f32 %v5943_v15, %v5313_v42 }
 0x69d   : > { %v4329_v49 = vpop.f32.mrf.mxu2 }
 0x69e   : > { %v4649_v10 = vmax.f32 %v4648_v2, %v4329_v49  ;;  %5352 = vmatmul.bf16.gmra.mxu1 %v16430_v63 }
 0x6a0   : > { %4412 = vmatmul.bf16.gmra.mxu3 %v16115_v23 }
 0x6a1   : > { %v5545_v1 = vpop.f32.mrf.mxu0 }
 0x6a3   : > { %v4373_v32 = vpop.f32.mrf.mxu3  ;;  %v5315_v46 = vpop.f32.mrf.mxu1 }
 0x6a4   : > { %v4662_v61 = vmax.f32 %v4661_v58, %v4373_v32  ;;  %v5945_v29 = vmax.f32 %v5944_v14, %v5315_v46  ;;  %5584 = vmatmul.bf16.gmra.mxu0 %v16301_v4 }
 0x6a5   : > { %v4331_v43 = vpop.f32.mrf.mxu2 }
 0x6a6   : > { %v4650_v22 = vmax.f32 %v4649_v10, %v4331_v43 }
 0x6a9   : > { %v5547_v23 = vpop.f32.mrf.mxu0 }
 0x6aa   : > { %v6024_v48 = vmax.f32 %v5545_v1, %v5547_v23  ;;  %5401 = vmatmul.bf16.gmra.mxu2 %v16278_v18 }
 0x6ab   : > { %v4375_v20 = vpop.f32.mrf.mxu3  ;;  %v5318_v59 = vpop.f32.mrf.mxu1 }
 0x6ac   : > { %v4663_v13 = vmax.f32 %v4662_v61, %v4375_v20  ;;  %v5946_v15 = vmax.f32 %v5945_v29, %v5318_v59 }
 0x6ad   : > { %v4334_v12 = vpop.f32.mrf.mxu2 }
 0x6ae   : > { %v17306_v2 = vmax.f32 %v4650_v22, %v4334_v12  ;;  %5633 = vmatmul.bf16.vlgmr.msrb.gmra.mxu1 %v16165_v9 }
 0x6b0   : > { %4417 = vmatmul.bf16.gmra.mxu3 %v16138_v5 }
 0x6b1   : > { %v5550_v16 = vpop.f32.mrf.mxu0 }
 0x6b2   : > { %v6025_v35 = vmax.f32 %v6024_v48, %v5550_v16 }
 0x6b3   : > { %v4378_v31 = vpop.f32.mrf.mxu3  ;;  %v5320_v42 = vpop.f32.mrf.mxu1 }
 0x6b4   : > { %v4664_v50 = vmax.f32 %v4663_v13, %v4378_v31  ;;  %v5947_v58 = vmax.f32 %v5946_v15, %v5320_v42  ;;  %5589 = vmatmul.bf16.gmra.mxu0 %v16312_v51 }
 0x6b5   : > { %v17311_v14 = vpop.f32.mrf.mxu2 }
 0x6b9   : > { %v5552_v10 = vpop.f32.mrf.mxu0 }
 0x6ba   : > { %v6026_v1 = vmax.f32 %v6025_v35, %v5552_v10  ;;  %5406 = vmatmul.bf16.gmra.mxu2 %v16301_v4 }
 0x6bb   : > { %v4380_v32 = vpop.f32.mrf.mxu3  ;;  %v5323_v46 = vpop.f32.mrf.mxu1 }
 0x6bc   : > { %v4665_v5 = vmax.f32 %v4664_v50, %v4380_v32  ;;  %v5948_v61 = vmax.f32 %v5947_v58, %v5323_v46 }
 0x6bd   : > { %v5367_v29 = vpop.f32.mrf.mxu2 }
 0x6be   : > { %5638 = vmatmul.bf16.gmra.mxu1 %v16176_v56 }
 0x6c0   : > { %4422 = vmatmul.bf16.gmra.mxu3 %v16154_v44 }
 0x6c1   : > { %v5555_v33 = vpop.f32.mrf.mxu0 }
 0x6c2   : > { %v6027_v62 = vmax.f32 %v6026_v1, %v5555_v33 }
 0x6c3   : > { %v4383_v43 = vpop.f32.mrf.mxu3  ;;  %v5325_v39 = vpop.f32.mrf.mxu1 }
 0x6c4   : > { %v4666_v22 = vmax.f32 %v4665_v5, %v4383_v43  ;;  %v5949_v23 = vmax.f32 %v5948_v61, %v5325_v39  ;;  %5594 = vmatmul.bf16.gmra.mxu0 %v16340_v54 }
 0x6c5   : > { %v5369_v48 = vpop.f32.mrf.mxu2 }
 0x6c6   : > { %v5962_v55 = vmax.f32 %v5367_v29, %v5369_v48  ;;  %v14957_v48 = vld [vmem:[%s20881_s6 + $0x1f4] sm:$0xf0] }
 0x6c9   : > { %v5557_v27 = vpop.f32.mrf.mxu0 }
 0x6ca   : > { %v6028_v20 = vmax.f32 %v6027_v62, %v5557_v27  ;;  %5411 = vmatmul.bf16.gmra.mxu2 %v16312_v51 }
 0x6cb   : > { %v4385_v59 = vpop.f32.mrf.mxu3  ;;  %v5328_v17 = vpop.f32.mrf.mxu1 }
 0x6cc   : > { %v4667_v13 = vmax.f32 %v4666_v22, %v4385_v59  ;;  %v5950_v15 = vmax.f32 %v5949_v23, %v5328_v17  ;;  %v12893_v23 = vld [vmem:[%s20881_s6 + $0x1d8] sm:$0xf]  ;;  %v15018_v17 = vld [vmem:[%s20881_s6 + $0x1dc] sm:$0xf0] }
 0x6cd   : > { %v5372_v12 = vpop.f32.mrf.mxu2  ;;  %v12894_v59 = vor.u32 %v14957_v48, %v12893_v23  ;;  %v14994_v48 = vld [vmem:[%s20881_s6 + $0x11c] sm:$0xf0] }
 0x6ce   : > { %v5963_v44 = vmax.f32 %v5962_v55, %v5372_v12  ;;  %5643 = vmatmul.bf16.gmra.mxu1 %v16199_v40  ;;  %v13125_v55 = vld [vmem:[%s20881_s6 + $0x1c0] sm:$0xf]  ;;  %v14953_v12 = vld [vmem:[%s20881_s6 + $0x1dc] sm:$0xf] }
 0x6cf   : > { %5714 = vmatpush.bf16.msrb.mxu2 %v12894_v59  ;;  %v12997_v59 = vld [vmem:[%s20881_s6 + $0xc0] sm:$0xf] }
 0x6d0   : > { %5455 = vmatmul.bf16.vlgmr.msrb.gmra.mxu3 %v16165_v9 }
 0x6d1   : > { %v5560_v16 = vpop.f32.mrf.mxu0 }
 0x6d2   : > { %v6029_v35 = vmax.f32 %v6028_v20, %v5560_v16  ;;  %v13126_v16 = vor.u32 %v15018_v17, %v13125_v55  ;;  %v14986_v17 = vld [vmem:[%s20881_s6 + $0xdc] sm:$0xf0] }
 0x6d3   : > { %v4388_v31 = vpop.f32.mrf.mxu3  ;;  %v5330_v42 = vpop.f32.mrf.mxu1 }
 0x6d4   : > { %v4668_v50 = vmax.f32 %v4667_v13, %v4388_v31  ;;  %v5951_v58 = vmax.f32 %v5950_v15, %v5330_v42  ;;  %5599 = vmatmul.bf16.gmra.mxu0 %v16363_v60 }
 0x6d5   : > { %v5374_v10 = vpop.f32.mrf.mxu2  ;;  %6644 = vmatpush.bf16.msra.mxu0 %v13126_v16 }
 0x6d6   : > { %v5964_v1 = vmax.f32 %v5963_v44, %v5374_v10  ;;  %v12895_v44 = vld [vmem:[%s20881_s6 + $0x1f8] sm:$0xf0] }
 0x6d7   : > { %v12898_v31 = vor.u32 %v14953_v12, %v12895_v44  ;;  %v12998_v12 = vor.u32 %v14986_v17, %v12997_v59  ;;  %v12829_v59 = vld [vmem:[%s20881_s6 + $0x158] sm:$0xf] }
 0x6d8   : > { %v14941_v17 = vld [vmem:[%s20881_s6 + $0x174] sm:$0xf0] }
 0x6d9   : > { %v5562_v32 = vpop.f32.mrf.mxu0  ;;  %5803 = vmatpush.bf16.msra.mxu3 %v12898_v31 }
 0x6da   : > { %v6030_v46 = vmax.f32 %v6029_v35, %v5562_v32  ;;  %5416 = vmatmul.bf16.gmra.mxu2 %v16340_v54 }
 0x6db   : > { %v4390_v5 = vpop.f32.mrf.mxu3  ;;  %v5333_v61 = vpop.f32.mrf.mxu1 }
 0x6dc   : > { %v4669_v29 = vmax.f32 %v4668_v50, %v4390_v5  ;;  %v5952_v33 = vmax.f32 %v5951_v58, %v5333_v61  ;;  %v13093_v50 = vld [vmem:[%s20881_s6 + $0x180] sm:$0xf] }
 0x6dd   : > { %v5377_v62 = vpop.f32.mrf.mxu2  ;;  %v15010_v58 = vld [vmem:[%s20881_s6 + $0x19c] sm:$0xf0] }
 0x6de   : > { %v5965_v43 = vmax.f32 %v5964_v1, %v5377_v62  ;;  %5648 = vmatmul.bf16.gmra.mxu1 %v16222_v26  ;;  %v13094_v10 = vor.u32 %v15010_v58, %v13093_v50  ;;  %v15002_v5 = vld [vmem:[%s20881_s6 + $0x15c] sm:$0xf0] }
 0x6df   : > { %v14978_v50 = vld [vmem:[%s20881_s6 + $0x9c] sm:$0xf0] }
 0x6e0   : > { %5460 = vmatmul.bf16.gmra.mxu3 %v16176_v56  ;;  %6645 = vmatpush.bf16.msra.mxu0 %v13094_v10 }
 0x6e1   : > { %v5565_v39 = vpop.f32.mrf.mxu0 }
 0x6e2   : > { %v6031_v22 = vmax.f32 %v6030_v46, %v5565_v39  ;;  %v13061_v46 = vld [vmem:[%s20881_s6 + $0x140] sm:$0xf] }
 0x6e3   : > { %v4393_v27 = vpop.f32.mrf.mxu3  ;;  %v5335_v20 = vpop.f32.mrf.mxu1 }
 0x6e4   : > { %v4670_v13 = vmax.f32 %v4669_v29, %v4393_v27  ;;  %v5953_v15 = vmax.f32 %v5952_v33, %v5335_v20  ;;  %5604 = vmatmul.bf16.gmra.mxu0 %v16380_v57  ;;  %v13062_v33 = vor.u32 %v15002_v5, %v13061_v46  ;;  %v14970_v46 = vld [vmem:[%s20881_s6 + $0x5c] sm:$0xf0] }
 0x6e5   : > { %v5379_v35 = vpop.f32.mrf.mxu2 }
 0x6e6   : > { %v5966_v42 = vmax.f32 %v5965_v43, %v5379_v35  ;;  %6646 = vmatpush.bf16.msra.mxu0 %v13062_v33 }
 0x6e9   : > { %v5567_v1 = vpop.f32.mrf.mxu0 }
 0x6ea   : > { %v6032_v32 = vmax.f32 %v6031_v22, %v5567_v1  ;;  %5421 = vmatmul.bf16.gmra.mxu2 %v16363_v60  ;;  %v13029_v22 = vld [vmem:[%s20881_s6 + $0x100] sm:$0xf] }
 0x6eb   : > { %v4395_v61 = vpop.f32.mrf.mxu3  ;;  %v5338_v29 = vpop.f32.mrf.mxu1  ;;  %v13030_v55 = vor.u32 %v14994_v48, %v13029_v22 }
 0x6ec   : > { %v4671_v62 = vmax.f32 %v4670_v13, %v4395_v61  ;;  %v5954_v43 = vmax.f32 %v5953_v15, %v5338_v29 }
 0x6ed   : > { %v5382_v39 = vpop.f32.mrf.mxu2  ;;  %6647 = vmatpush.bf16.msra.mxu0 %v13030_v55  ;;  %v12901_v55 = vld [vmem:[%s20881_s6] sm:$0xf] }
 0x6ee   : > { %v5967_v23 = vmax.f32 %v5966_v42, %v5382_v39  ;;  %5653 = vmatmul.bf16.gmra.mxu1 %v16239_v8  ;;  %v12965_v42 = vld [vmem:[%s20881_s6 + $0x80] sm:$0xf]  ;;  %v14949_v39 = vld [vmem:[%s20881_s6 + $0x1b4] sm:$0xf0] }
 0x6ef   : > { %v12966_v58 = vor.u32 %v14978_v50, %v12965_v42  ;;  %v12797_v42 = vld [vmem:[%s20881_s6 + $0x118] sm:$0xf] }
 0x6f0   : > { %5465 = vmatmul.bf16.gmra.mxu3 %v16199_v40  ;;  %v14933_v50 = vld [vmem:[%s20881_s6 + $0x134] sm:$0xf0] }
 0x6f1   : > { %v5570_v27 = vpop.f32.mrf.mxu0  ;;  %6648 = vmatpush.bf16.msra.mxu0 %v12998_v12 }
 0x6f2   : > { %v6033_v20 = vmax.f32 %v6032_v32, %v5570_v27  ;;  %v12933_v32 = vld [vmem:[%s20881_s6 + $0x40] sm:$0xf] }
 0x6f3   : > { %v4398_v13 = vpop.f32.mrf.mxu3  ;;  %v5340_v15 = vpop.f32.mrf.mxu1  ;;  %v12934_v29 = vor.u32 %v14970_v46, %v12933_v32  ;;  %v14962_v27 = vld [vmem:[%s20881_s6 + $0x1c] sm:$0xf0]  ;;  %v12863_v46 = vld [vmem:[%s20881_s6 + $0x1b8] sm:$0xf0] }
 0x6f4   : > { %v4672_v44 = vmax.f32 %v4671_v62, %v4398_v13  ;;  %v5955_v16 = vmax.f32 %v5954_v43, %v5340_v15  ;;  %5609 = vmatmul.bf16.gmra.mxu0 %v16391_v47  ;;  %v12861_v43 = vld [vmem:[%s20881_s6 + $0x198] sm:$0xf]  ;;  %v12830_v15 = vor.u32 %v14941_v17, %v12829_v59 }
 0x6f5   : > { %v5384_v35 = vpop.f32.mrf.mxu2  ;;  %6649 = vmatpush.bf16.msra.mxu0 %v12966_v58  ;;  %v12862_v22 = vor.u32 %v14949_v39, %v12861_v43 }
 0x6f6   : > { %v5968_v31 = vmax.f32 %v5967_v23, %v5384_v35 }
 0x6f7   : > { %5715 = vmatpush.bf16.msrb.mxu2 %v12862_v22 }
 0x6f9   : > { %v5572_v10 = vpop.f32.mrf.mxu0  ;;  %6650 = vmatpush.bf16.msra.mxu0 %v12934_v29  ;;  %v14925_v29 = vld [vmem:[%s20881_s6 + $0xf4] sm:$0xf0] }
 0x6fa   : > { %v6034_v1 = vmax.f32 %v6033_v20, %v5572_v10  ;;  %5426 = vmatmul.bf16.gmra.mxu2 %v16380_v57  ;;  %v12902_v20 = vor.u32 %v14962_v27, %v12901_v55  ;;  %v12798_v10 = vor.u32 %v14933_v50, %v12797_v42  ;;  %v12733_v55 = vld [vmem:[%s20881_s6 + $0x98] sm:$0xf] }
 0x6fb   : > { %v4400_v5 = vpop.f32.mrf.mxu3  ;;  %v5343_v61 = vpop.f32.mrf.mxu1  ;;  %5716 = vmatpush.bf16.msrb.mxu2 %v12830_v15  ;;  %v14917_v27 = vld [vmem:[%s20881_s6 + $0xb4] sm:$0xf0] }
 0x6fc   : > { %v4673_v33 = vmax.f32 %v4672_v44, %v4400_v5  ;;  %v5956_v62 = vmax.f32 %v5955_v16, %v5343_v61  ;;  %v12765_v61 = vld [vmem:[%s20881_s6 + $0xd8] sm:$0xf]  ;;  %v12734_v59 = vor.u32 %v14917_v27, %v12733_v55 }
 0x6fd   : > { %v5387_v23 = vpop.f32.mrf.mxu2  ;;  %6651 = vmatpush.bf16.msra.mxu0 %v12902_v20  ;;  %v14909_v15 = vld [vmem:[%s20881_s6 + $0x74] sm:$0xf0] }
 0x6fe   : > { %v5969_v48 = vmax.f32 %v5968_v31, %v5387_v23  ;;  %5658 = vmatmul.bf16.gmra.mxu1 %v16250_v52 }
 0x6ff   : > { %5717 = vmatpush.bf16.msrb.mxu2 %v12798_v10  ;;  %v14901_v10 = vld [vmem:[%s20881_s6 + $0x34] sm:$0xf0] }
 0x700   : > { %5470 = vmatmul.bf16.gmra.mxu3 %v16222_v26 }
 0x701   : > { %v5575_v13 = vpop.f32.mrf.mxu0 }
 0x702   : > { %v6035_v12 = vmax.f32 %v6034_v1, %v5575_v13  ;;  %v14945_v1 = vld [vmem:[%s20881_s6 + $0x19c] sm:$0xf]  ;;  %v12701_v13 = vld [vmem:[%s20881_s6 + $0x58] sm:$0xf] }
 0x703   : > { %v4403_v44 = vpop.f32.mrf.mxu3  ;;  %v5345_v16 = vpop.f32.mrf.mxu1  ;;  %v12866_v5 = vor.u32 %v14945_v1, %v12863_v46 }
 0x704   : > { %v4674_v35 = vmax.f32 %v4673_v33, %v4403_v44  ;;  %v5957_v31 = vmax.f32 %v5956_v62, %v5345_v16  ;;  %5614 = vmatmul.bf16.gmra.mxu0 %v16419_v0  ;;  %v12766_v62 = vor.u32 %v14925_v29, %v12765_v61  ;;  %v12702_v44 = vor.u32 %v14909_v15, %v12701_v13  ;;  %v12831_v13 = vld [vmem:[%s20881_s6 + $0x178] sm:$0xf0] }
 0x705   : > { %v5389_v58 = vpop.f32.mrf.mxu2  ;;  %5804 = vmatpush.bf16.msra.mxu3 %v12866_v5 }
 0x706   : > { %v5970_v32 = vmax.f32 %v5969_v48, %v5389_v58  ;;  %5718 = vmatpush.bf16.msrb.mxu2 %v12766_v62  ;;  %v12669_v58 = vld [vmem:[%s20881_s6 + $0x18] sm:$0xf] }
 0x707   : > { %v12670_v1 = vor.u32 %v14901_v10, %v12669_v58 }
 0x709   : > { %v5577_v33 = vpop.f32.mrf.mxu0 }
 0x70a   : > { %v6036_v43 = vmax.f32 %v6035_v12, %v5577_v33  ;;  %5431 = vmatmul.bf16.gmra.mxu2 %v16391_v47 }
 0x70b   : > { %v4405_v39 = vpop.f32.mrf.mxu3  ;;  %v5348_v23 = vpop.f32.mrf.mxu1  ;;  %5719 = vmatpush.bf16.msrb.mxu2 %v12734_v59 }
 0x70c   : > { %v4675_v22 = vmax.f32 %v4674_v35, %v4405_v39  ;;  %v5958_v48 = vmax.f32 %v5957_v31, %v5348_v23 }
 0x70d   : > { %v5392_v20 = vpop.f32.mrf.mxu2 }
 0x70e   : > { %v5971_v17 = vmax.f32 %v5970_v32, %v5392_v20  ;;  %5663 = vmatmul.bf16.gmra.mxu1 %v16267_v36 }
 0x70f   : > { %5720 = vmatpush.bf16.msrb.mxu2 %v12702_v44  ;;  %v20961_v44 = vmax.f32 %v16582_v37, %v16593_v34 }
 0x710   : > { %5475 = vmatmul.bf16.gmra.mxu3 %v16239_v8 }
 0x711   : > { %v5580_v12 = vpop.f32.mrf.mxu0 }
 0x712   : > { %v6037_v16 = vmax.f32 %v6036_v43, %v5580_v12 }
 0x713   : > { %v4408_v35 = vpop.f32.mrf.mxu3  ;;  %v5350_v31 = vpop.f32.mrf.mxu1  ;;  %5721 = vmatpush.bf16.msrb.mxu2 %v12670_v1 }
 0x714   : > { %v4676_v42 = vmax.f32 %v4675_v22, %v4408_v35  ;;  %v5959_v50 = vmax.f32 %v5958_v48, %v5350_v31  ;;  %5619 = vmatmul.bf16.gmra.mxu0 %v16430_v63 }
 0x715   : > { %v5394_v32 = vpop.f32.mrf.mxu2 }
 0x716   : > { %v5972_v46 = vmax.f32 %v5971_v17, %v5394_v32  ;;  %v14937_v17 = vld [vmem:[%s20881_s6 + $0x15c] sm:$0xf] }
 0x717   : > { %v12834_v12 = vor.u32 %v14937_v17, %v12831_v13 }
 0x719   : > { %v5582_v5 = vpop.f32.mrf.mxu0  ;;  %5805 = vmatpush.bf16.msra.mxu3 %v12834_v12 }
 0x71a   : > { %v6038_v61 = vmax.f32 %v6037_v16, %v5582_v5  ;;  %5436 = vmatmul.bf16.gmra.mxu2 %v16419_v0 }
 0x71b   : > { %v4410_v29 = vpop.f32.mrf.mxu3  ;;  %v5353_v33 = vpop.f32.mrf.mxu1 }
 0x71c   : > { %v4677_v62 = vmax.f32 %v4676_v42, %v4410_v29  ;;  %v5960_v43 = vmax.f32 %v5959_v50, %v5353_v33 }
 0x71d   : > { %v5397_v39 = vpop.f32.mrf.mxu2 }
 0x71e   : > { %v5973_v23 = vmax.f32 %v5972_v46, %v5397_v39  ;;  %5668 = vmatmul.bf16.gmra.mxu1 %v16278_v18 }
 0x720   : > { %5480 = vmatmul.bf16.gmra.mxu3 %v16250_v52 }
 0x721   : > { %v5585_v22 = vpop.f32.mrf.mxu0 }
 0x722   : > { %v6039_v48 = vmax.f32 %v6038_v61, %v5585_v22 }
 0x723   : > { %v4413_v55 = vpop.f32.mrf.mxu3  ;;  %v5355_v27 = vpop.f32.mrf.mxu1 }
 0x724   : > { %v4678_v20 = vmax.f32 %v4677_v62, %v4413_v55  ;;  %v5961_v59 = vmax.f32 %v5960_v43, %v5355_v27  ;;  %6652 = vmatmul.bf16.vlgmr.msra.gmra.mxu0 %v16441_v3 }
 0x725   : > { %v5399_v15 = vpop.f32.mrf.mxu2 }
 0x726   : > { %v17460_v16 = vmax.f32 %v20961_v44, %v5961_v59  ;;  %v5974_v35 = vmax.f32 %v5973_v23, %v5399_v15 }
 0x729   : > { %v5587_v31 = vpop.f32.mrf.mxu0 }
 0x72a   : > { %v6040_v42 = vmax.f32 %v6039_v48, %v5587_v31  ;;  %5441 = vmatmul.bf16.gmra.mxu2 %v16430_v63  ;;  %v14929_v31 = vld [vmem:[%s20881_s6 + $0x11c] sm:$0xf] }
 0x72b   : > { %v4415_v50 = vpop.f32.mrf.mxu3  ;;  %v5634_v58 = vpop.f32.mrf.mxu1 }
 0x72c   : > { %v4679_v10 = vmax.f32 %v4678_v20, %v4415_v50 }
 0x72d   : > { %v5402_v32 = vpop.f32.mrf.mxu2 }
 0x72e   : > { %v5975_v1 = vmax.f32 %v5974_v35, %v5402_v32  ;;  %5673 = vmatmul.bf16.gmra.mxu1 %v16301_v4  ;;  %v20962_v35 = vld [vmem:[#allocation8_spill] sm:$0xff] }
 0x730   : > { %5485 = vmatmul.bf16.gmra.mxu3 %v16267_v36 }
 0x731   : > { %v5590_v46 = vpop.f32.mrf.mxu0 }
 0x732   : > { %v6041_v5 = vmax.f32 %v6040_v42, %v5590_v46  ;;  %v12799_v42 = vld [vmem:[%s20881_s6 + $0x138] sm:$0xf0] }
 0x733   : > { %v4418_v37 = vpop.f32.mrf.mxu3  ;;  %v5636_v34 = vpop.f32.mrf.mxu1 }
 0x734   : > { %v4680_v61 = vmax.f32 %v4679_v10, %v4418_v37  ;;  %v6055_v29 = vmax.f32 %v5634_v58, %v5636_v34  ;;  %6657 = vmatmul.bf16.gmra.mxu0 %v16452_v7  ;;  %v12802_v58 = vor.u32 %v14929_v31, %v12799_v42 }
 0x735   : > { %v5404_v33 = vpop.f32.mrf.mxu2 }
 0x736   : > { %v5976_v62 = vmax.f32 %v5975_v1, %v5404_v33  ;;  %5806 = vmatpush.bf16.msra.mxu3 %v12802_v58 }
 0x739   : > { %v5592_v43 = vpop.f32.mrf.mxu0 }
 0x73a   : > { %v6042_v39 = vmax.f32 %v6041_v5, %v5592_v43  ;;  %5722 = vmatmul.bf16.vlgmr.msrb.gmra.mxu2 %v16165_v9 }
 0x73b   : > { %v4420_v23 = vpop.f32.mrf.mxu3  ;;  %v5639_v22 = vpop.f32.mrf.mxu1 }
 0x73c   : > { %v4681_v48 = vmax.f32 %v4680_v61, %v4420_v23  ;;  %v6056_v55 = vmax.f32 %v6055_v29, %v5639_v22  ;;  %v20963_v22 = vld [vmem:[#allocation9_spill] sm:$0xff] }
 0x73d   : > { %v5407_v27 = vpop.f32.mrf.mxu2 }
 0x73e   : > { %v5977_v20 = vmax.f32 %v5976_v62, %v5407_v27  ;;  %5678 = vmatmul.bf16.gmra.mxu1 %v16312_v51 }
 0x740   : > { %5490 = vmatmul.bf16.gmra.mxu3 %v16278_v18 }
 0x741   : > { %v5595_v59 = vpop.f32.mrf.mxu0 }
 0x742   : > { %v6043_v17 = vmax.f32 %v6042_v39, %v5595_v59 }
 0x743   : > { %v4423_v13 = vpop.f32.mrf.mxu3  ;;  %v5641_v15 = vpop.f32.mrf.mxu1 }
 0x744   : > { %v17469_v12 = vmax.f32 %v4681_v48, %v4423_v13  ;;  %v6057_v44 = vmax.f32 %v6056_v55, %v5641_v15  ;;  %6662 = vmatmul.bf16.gmra.mxu0 %v20962_v35 }
 0x745   : > { %v5409_v50 = vpop.f32.mrf.mxu2 }
 0x746   : > { %v5978_v10 = vmax.f32 %v5977_v20, %v5409_v50 }
 0x749   : > { %v5597_v32 = vpop.f32.mrf.mxu0 }
 0x74a   : > { %v6044_v1 = vmax.f32 %v6043_v17, %v5597_v32  ;;  %5727 = vmatmul.bf16.gmra.mxu2 %v16176_v56 }
 0x74b   : > { %v17479_v46 = vpop.f32.mrf.mxu3  ;;  %v5644_v5 = vpop.f32.mrf.mxu1 }
 0x74c   : > { %v6058_v34 = vmax.f32 %v6057_v44, %v5644_v5  ;;  %v20964_v5 = vld [vmem:[#allocation10_spill] sm:$0xff] }
 0x74d   : > { %v5412_v61 = vpop.f32.mrf.mxu2 }
 0x74e   : > { %v5979_v29 = vmax.f32 %v5978_v10, %v5412_v61  ;;  %5683 = vmatmul.bf16.gmra.mxu1 %v16340_v54  ;;  %v12767_v61 = vld [vmem:[%s20881_s6 + $0xf8] sm:$0xf0] }
 0x750   : > { %5495 = vmatmul.bf16.gmra.mxu3 %v16301_v4 }
 0x751   : > { %v5600_v33 = vpop.f32.mrf.mxu0 }
 0x752   : > { %v6045_v62 = vmax.f32 %v6044_v1, %v5600_v33 }
 0x753   : > { %v5456_v43 = vpop.f32.mrf.mxu3  ;;  %v5646_v39 = vpop.f32.mrf.mxu1 }
 0x754   : > { %v6059_v23 = vmax.f32 %v6058_v34, %v5646_v39  ;;  %6667 = vmatmul.bf16.gmra.mxu0 %v20963_v22  ;;  %v14921_v34 = vld [vmem:[%s20881_s6 + $0xdc] sm:$0xf] }
 0x755   : > { %v5414_v48 = vpop.f32.mrf.mxu2  ;;  %v12770_v33 = vor.u32 %v14921_v34, %v12767_v61  ;;  %v20965_v61 = vld [vmem:[#allocation11_spill] sm:$0xff] }
 0x756   : > { %v5980_v55 = vmax.f32 %v5979_v29, %v5414_v48 }
 0x757   : > { %5807 = vmatpush.bf16.msra.mxu3 %v12770_v33  ;;  %v13063_v33 = vld [vmem:[%s20881_s6 + $0x160] sm:$0xf0] }
 0x759   : > { %v5602_v27 = vpop.f32.mrf.mxu0 }
 0x75a   : > { %v6046_v20 = vmax.f32 %v6045_v62, %v5602_v27  ;;  %5732 = vmatmul.bf16.gmra.mxu2 %v16199_v40 }
 0x75b   : > { %v5458_v59 = vpop.f32.mrf.mxu3  ;;  %v5649_v17 = vpop.f32.mrf.mxu1 }
 0x75c   : > { %v5993_v13 = vmax.f32 %v5456_v43, %v5458_v59  ;;  %v6060_v15 = vmax.f32 %v6059_v23, %v5649_v17  ;;  %v13127_v59 = vld [vmem:[%s20881_s6 + $0x1e0] sm:$0xf0] }
 0x75d   : > { %v5417_v44 = vpop.f32.mrf.mxu2 }
 0x75e   : > { %v5981_v31 = vmax.f32 %v5980_v55, %v5417_v44  ;;  %5688 = vmatmul.bf16.gmra.mxu1 %v16363_v60  ;;  %v15006_v44 = vld [vmem:[%s20881_s6 + $0x184] sm:$0xf] }
 0x760   : > { %5500 = vmatmul.bf16.gmra.mxu3 %v16312_v51 }
 0x761   : > { %v5605_v42 = vpop.f32.mrf.mxu0 }
 0x762   : > { %v6047_v50 = vmax.f32 %v6046_v20, %v5605_v42  ;;  %v15014_v20 = vld [vmem:[%s20881_s6 + $0x1c4] sm:$0xf] }
 0x763   : > { %v5461_v58 = vpop.f32.mrf.mxu3  ;;  %v5651_v10 = vpop.f32.mrf.mxu1 }
 0x764   : > { %v5994_v32 = vmax.f32 %v5993_v13, %v5461_v58  ;;  %v6061_v1 = vmax.f32 %v6060_v15, %v5651_v10  ;;  %6672 = vmatmul.bf16.gmra.mxu0 %v20964_v5  ;;  %v13130_v13 = vor.u32 %v15014_v20, %v13127_v59 }
 0x765   : > { %v5419_v29 = vpop.f32.mrf.mxu2 }
 0x766   : > { %v5982_v62 = vmax.f32 %v5981_v31, %v5419_v29  ;;  %6733 = vmatpush.bf16.msra.mxu1 %v13130_v13  ;;  %v13095_v31 = vld [vmem:[%s20881_s6 + $0x1a0] sm:$0xf0] }
 0x767   : > { %v14998_v29 = vld [vmem:[%s20881_s6 + $0x144] sm:$0xf] }
 0x769   : > { %v5607_v43 = vpop.f32.mrf.mxu0 }
 0x76a   : > { %v6048_v39 = vmax.f32 %v6047_v50, %v5607_v43  ;;  %5737 = vmatmul.bf16.gmra.mxu2 %v16222_v26  ;;  %v13098_v50 = vor.u32 %v15006_v44, %v13095_v31  ;;  %v13066_v43 = vor.u32 %v14998_v29, %v13063_v33  ;;  %v12999_v31 = vld [vmem:[%s20881_s6 + $0xe0] sm:$0xf0] }
 0x76b   : > { %v5463_v23 = vpop.f32.mrf.mxu3  ;;  %v5654_v48 = vpop.f32.mrf.mxu1 }
 0x76c   : > { %v5995_v55 = vmax.f32 %v5994_v32, %v5463_v23  ;;  %v6062_v27 = vmax.f32 %v6061_v1, %v5654_v48  ;;  %6734 = vmatpush.bf16.msra.mxu1 %v13098_v50  ;;  %v13031_v48 = vld [vmem:[%s20881_s6 + $0x120] sm:$0xf0] }
 0x76d   : > { %v5422_v17 = vpop.f32.mrf.mxu2 }
 0x76e   : > { %v5983_v15 = vmax.f32 %v5982_v62, %v5422_v17  ;;  %5693 = vmatmul.bf16.gmra.mxu1 %v16380_v57 }
 0x770   : > { %5505 = vmatmul.bf16.gmra.mxu3 %v16340_v54  ;;  %6735 = vmatpush.bf16.msra.mxu1 %v13066_v43 }
 0x771   : > { %v5610_v42 = vpop.f32.mrf.mxu0 }
 0x772   : > { %v6049_v58 = vmax.f32 %v6048_v39, %v5610_v42  ;;  %v14990_v39 = vld [vmem:[%s20881_s6 + $0x104] sm:$0xf] }
 0x773   : > { %v5466_v10 = vpop.f32.mrf.mxu3  ;;  %v5656_v32 = vpop.f32.mrf.mxu1 }
 0x774   : > { %v5996_v1 = vmax.f32 %v5995_v55, %v5466_v10  ;;  %v6063_v34 = vmax.f32 %v6062_v27, %v5656_v32  ;;  %6677 = vmatmul.bf16.gmra.mxu0 %v20965_v61  ;;  %v13034_v27 = vor.u32 %v14990_v39, %v13031_v48  ;;  %v12967_v32 = vld [vmem:[%s20881_s6 + $0xa0] sm:$0xf0]  ;;  %v14913_v48 = vld [vmem:[%s20881_s6 + $0x9c] sm:$0xf] }
 0x775   : > { %v5424_v62 = vpop.f32.mrf.mxu2  ;;  %v20966_v39 = vld [vmem:[#allocation12_spill] sm:$0xff] }
 0x776   : > { %v5984_v23 = vmax.f32 %v5983_v15, %v5424_v62  ;;  %6736 = vmatpush.bf16.msra.mxu1 %v13034_v27  ;;  %v14982_v15 = vld [vmem:[%s20881_s6 + $0xc4] sm:$0xf] }
 0x777   : > { %v13002_v50 = vor.u32 %v14982_v15, %v12999_v31  ;;  %v14966_v27 = vld [vmem:[%s20881_s6 + $0x44] sm:$0xf] }
 0x778   : > { %v14958_v15 = vld [vmem:[%s20881_s6 + $0x4] sm:$0xf] }
 0x779   : > { %v5612_v55 = vpop.f32.mrf.mxu0  ;;  %v12903_v31 = vld [vmem:[%s20881_s6 + $0x20] sm:$0xf0] }
 0x77a   : > { %v6050_v20 = vmax.f32 %v6049_v58, %v5612_v55  ;;  %5742 = vmatmul.bf16.gmra.mxu2 %v16239_v8  ;;  %6737 = vmatpush.bf16.msra.mxu1 %v13002_v50  ;;  %v14974_v58 = vld [vmem:[%s20881_s6 + $0x84] sm:$0xf]  ;;  %v12735_v55 = vld [vmem:[%s20881_s6 + $0xb8] sm:$0xf0]  ;;  %v12906_v50 = vor.u32 %v14958_v15, %v12903_v31 }
 0x77b   : > { %v5468_v59 = vpop.f32.mrf.mxu3  ;;  %v5659_v17 = vpop.f32.mrf.mxu1 }
 0x77c   : > { %v5997_v13 = vmax.f32 %v5996_v1, %v5468_v59  ;;  %v6064_v44 = vmax.f32 %v6063_v34, %v5659_v17  ;;  %v12970_v34 = vor.u32 %v14974_v58, %v12967_v32  ;;  %v12738_v59 = vor.u32 %v14913_v48, %v12735_v55  ;;  %v12935_v17 = vld [vmem:[%s20881_s6 + $0x60] sm:$0xf0] }
 0x77d   : > { %v5427_v42 = vpop.f32.mrf.mxu2 }
 0x77e   : > { %v5985_v10 = vmax.f32 %v5984_v23, %v5427_v42  ;;  %5698 = vmatmul.bf16.gmra.mxu1 %v16391_v47  ;;  %5808 = vmatpush.bf16.msra.mxu3 %v12738_v59 }
 0x77f   : > { %6738 = vmatpush.bf16.msra.mxu1 %v12970_v34 }
 0x780   : > { %5510 = vmatmul.bf16.gmra.mxu3 %v16363_v60 }
 0x781   : > { %v5615_v1 = vpop.f32.mrf.mxu0 }
 0x782   : > { %v6051_v29 = vmax.f32 %v6050_v20, %v5615_v1 }
 0x783   : > { %v5471_v33 = vpop.f32.mrf.mxu3  ;;  %v5661_v62 = vpop.f32.mrf.mxu1 }
 0x784   : > { %v5998_v43 = vmax.f32 %v5997_v13, %v5471_v33  ;;  %v6065_v23 = vmax.f32 %v6064_v44, %v5661_v62  ;;  %6682 = vmatmul.bf16.gmra.mxu0 %v20966_v39  ;;  %v12938_v44 = vor.u32 %v14966_v27, %v12935_v17 }
 0x785   : > { %v5429_v20 = vpop.f32.mrf.mxu2 }
 0x786   : > { %v5986_v13 = vmax.f32 %v5985_v10, %v5429_v20  ;;  %6739 = vmatpush.bf16.msra.mxu1 %v12938_v44 }
 0x789   : > { %v5617_v42 = vpop.f32.mrf.mxu0 }
 0x78a   : > { %v6052_v58 = vmax.f32 %v6051_v29, %v5617_v42  ;;  %5747 = vmatmul.bf16.gmra.mxu2 %v16250_v52  ;;  %6740 = vmatpush.bf16.msra.mxu1 %v12906_v50  ;;  %v20967_v29 = vld [vmem:[#allocation13_spill] sm:$0xff]  ;;  %v20968_v42 = vmax.f32 %v16998_v45, %v17002_v19  ;;  %v14905_v45 = vld [vmem:[%s20881_s6 + $0x5c] sm:$0xf] }
 0x78b   : > { %v5473_v32 = vpop.f32.mrf.mxu3  ;;  %v5664_v1 = vpop.f32.mrf.mxu1  ;;  %v12703_v19 = vld [vmem:[%s20881_s6 + $0x78] sm:$0xf0] }
 0x78c   : > { %v5999_v34 = vmax.f32 %v5998_v43, %v5473_v32  ;;  %v6066_v10 = vmax.f32 %v6065_v23, %v5664_v1 }
 0x78d   : > { %v5432_v33 = vpop.f32.mrf.mxu2 }
 0x78e   : > { %v5987_v62 = vmax.f32 %v5986_v13, %v5432_v33  ;;  %5703 = vmatmul.bf16.gmra.mxu1 %v16419_v0 }
 0x790   : > { %5515 = vmatmul.bf16.gmra.mxu3 %v16380_v57 }
 0x791   : > { %v5620_v48 = vpop.f32.mrf.mxu0 }
 0x792   : > { %v6053_v55 = vmax.f32 %v6052_v58, %v5620_v48 }
 0x793   : > { %v5476_v27 = vpop.f32.mrf.mxu3  ;;  %v5666_v20 = vpop.f32.mrf.mxu1 }
 0x794   : > { %v6000_v59 = vmax.f32 %v5999_v34, %v5476_v27  ;;  %v6067_v17 = vmax.f32 %v6066_v10, %v5666_v20  ;;  %6687 = vmatmul.bf16.gmra.mxu0 %v20967_v29  ;;  %v20969_v27 = vld [vmem:[#allocation14_spill] sm:$0xff] }
 0x795   : > { %v5434_v44 = vpop.f32.mrf.mxu2 }
 0x796   : > { %v5988_v15 = vmax.f32 %v5987_v62, %v5434_v44 }
 0x799   : > { %v5622_v31 = vpop.f32.mrf.mxu0 }
 0x79a   : > { %v6054_v43 = vmax.f32 %v6053_v55, %v5622_v31  ;;  %5752 = vmatmul.bf16.gmra.mxu2 %v16267_v36  ;;  %v14897_v31 = vld [vmem:[%s20881_s6 + $0x1c] sm:$0xf] }
 0x79b   : > { %v5478_v23 = vpop.f32.mrf.mxu3  ;;  %v5669_v13 = vpop.f32.mrf.mxu1 }
 0x79c   : > { %v17566_v50 = vmax.f32 %v20968_v42, %v6054_v43  ;;  %v6001_v58 = vmax.f32 %v6000_v59, %v5478_v23  ;;  %v6068_v32 = vmax.f32 %v6067_v17, %v5669_v13  ;;  %v12706_v59 = vor.u32 %v14905_v45, %v12703_v19  ;;  %v12671_v43 = vld [vmem:[%s20881_s6 + $0x38] sm:$0xf0] }
 0x79d   : > { %v5437_v1 = vpop.f32.mrf.mxu2  ;;  %v12674_v42 = vor.u32 %v14897_v31, %v12671_v43 }
 0x79e   : > { %v5989_v34 = vmax.f32 %v5988_v15, %v5437_v1  ;;  %5708 = vmatmul.bf16.gmra.mxu1 %v16430_v63  ;;  %5809 = vmatpush.bf16.msra.mxu3 %v12706_v59  ;;  %v20970_v59 = vld [vmem:[#allocation15_spill] sm:$0xff] }
 0x7a0   : > { %5520 = vmatmul.bf16.gmra.mxu3 %v16391_v47 }
 0x7a1   : > { %v6653_v10 = vpop.f32.mrf.mxu0 }
 0x7a2   : > { %5810 = vmatpush.bf16.msra.mxu3 %v12674_v42 }
 0x7a3   : > { %v5481_v33 = vpop.f32.mrf.mxu3  ;;  %v5671_v62 = vpop.f32.mrf.mxu1 }
 0x7a4   : > { %v6002_v48 = vmax.f32 %v6001_v58, %v5481_v33  ;;  %v6069_v55 = vmax.f32 %v6068_v32, %v5671_v62  ;;  %6692 = vmatmul.bf16.gmra.mxu0 %v20969_v27 }
 0x7a5   : > { %v5439_v20 = vpop.f32.mrf.mxu2 }
 0x7a6   : > { %v5990_v17 = vmax.f32 %v5989_v34, %v5439_v20 }
 0x7a9   : > { %v6655_v44 = vpop.f32.mrf.mxu0 }
 0x7aa   : > { %v7364_v15 = vmax.f32 %v6653_v10, %v6655_v44  ;;  %5757 = vmatmul.bf16.gmra.mxu2 %v16278_v18 }
 0x7ab   : > { %v5483_v23 = vpop.f32.mrf.mxu3  ;;  %v5674_v13 = vpop.f32.mrf.mxu1 }
 0x7ac   : > { %v6003_v58 = vmax.f32 %v6002_v48, %v5483_v23  ;;  %v6070_v32 = vmax.f32 %v6069_v55, %v5674_v13  ;;  %v20971_v48 = vld [vmem:[#allocation30_spill] sm:$0xff] }
 0x7ad   : > { %v5442_v1 = vpop.f32.mrf.mxu2  ;;  %v20972_v55 = vmax.f32 %v16881_v25, %v20971_v48 }
 0x7ae   : > { %v5991_v34 = vmax.f32 %v5990_v17, %v5442_v1  ;;  %6741 = vmatmul.bf16.vlgmr.msra.gmra.mxu1 %v16441_v3 }
 0x7b0   : > { %5525 = vmatmul.bf16.gmra.mxu3 %v16419_v0 }
 0x7b1   : > { %v6658_v10 = vpop.f32.mrf.mxu0 }
 0x7b2   : > { %v7365_v33 = vmax.f32 %v7364_v15, %v6658_v10 }
 0x7b3   : > { %v5486_v62 = vpop.f32.mrf.mxu3  ;;  %v5676_v45 = vpop.f32.mrf.mxu1 }
 0x7b4   : > { %v6004_v19 = vmax.f32 %v6003_v58, %v5486_v62  ;;  %v6071_v20 = vmax.f32 %v6070_v32, %v5676_v45  ;;  %6697 = vmatmul.bf16.gmra.mxu0 %v20970_v59  ;;  %v20973_v62 = vld [vmem:[#allocation16_spill] sm:$0xff] }
 0x7b5   : > { %v5444_v44 = vpop.f32.mrf.mxu2 }
 0x7b6   : > { %v5992_v37 = vmax.f32 %v5991_v34, %v5444_v44 }
 0x7b8   : > { %v17590_v31 = vmax.f32 %v20972_v55, %v5992_v37 }
 0x7b9   : > { %v6660_v17 = vpop.f32.mrf.mxu0 }
 0x7ba   : > { %v7366_v43 = vmax.f32 %v7365_v33, %v6660_v17  ;;  %5762 = vmatmul.bf16.gmra.mxu2 %v16301_v4 }
 0x7bb   : > { %v5488_v23 = vpop.f32.mrf.mxu3  ;;  %v5679_v13 = vpop.f32.mrf.mxu1 }
 0x7bc   : > { %v6005_v15 = vmax.f32 %v6004_v19, %v5488_v23  ;;  %v6072_v42 = vmax.f32 %v6071_v20, %v5679_v13 }
 0x7bd   : > { %v5723_v1 = vpop.f32.mrf.mxu2 }
 0x7be   : > { %6746 = vmatmul.bf16.gmra.mxu1 %v16452_v7 }
 0x7c0   : > { %5530 = vmatmul.bf16.gmra.mxu3 %v16430_v63 }
 0x7c1   : > { %v6663_v58 = vpop.f32.mrf.mxu0 }
 0x7c2   : > { %v7367_v32 = vmax.f32 %v7366_v43, %v6663_v58 }
 0x7c3   : > { %v5491_v34 = vpop.f32.mrf.mxu3  ;;  %v5681_v10 = vpop.f32.mrf.mxu1 }
 0x7c4   : > { %v6006_v25 = vmax.f32 %v6005_v15, %v5491_v34  ;;  %v6073_v37 = vmax.f32 %v6072_v42, %v5681_v10  ;;  %6702 = vmatmul.bf16.gmra.mxu0 %v20973_v62  ;;  %v20974_v10 = vld [vmem:[#allocation17_spill] sm:$0xff] }
 0x7c5   : > { %v5725_v33 = vpop.f32.mrf.mxu2 }
 0x7c6   : > { %v6086_v45 = vmax.f32 %v5723_v1, %v5725_v33 }
 0x7c9   : > { %v6665_v44 = vpop.f32.mrf.mxu0 }
 0x7ca   : > { %v7368_v48 = vmax.f32 %v7367_v32, %v6665_v44  ;;  %5767 = vmatmul.bf16.gmra.mxu2 %v16312_v51 }
 0x7cb   : > { %v5493_v19 = vpop.f32.mrf.mxu3  ;;  %v5684_v20 = vpop.f32.mrf.mxu1 }
 0x7cc   : > { %v6007_v55 = vmax.f32 %v6006_v25, %v5493_v19  ;;  %v6074_v17 = vmax.f32 %v6073_v37, %v5684_v20 }
 0x7cd   : > { %v5728_v23 = vpop.f32.mrf.mxu2 }
 0x7ce   : > { %v6087_v13 = vmax.f32 %v6086_v45, %v5728_v23  ;;  %6751 = vmatmul.bf16.gmra.mxu1 %v20962_v35  ;;  %v15019_v23 = vld [vmem:[%s20881_s6 + $0x1e4] sm:$0xf0] }
 0x7d0   : > { %5811 = vmatmul.bf16.vlgmr.msra.gmra.mxu3 %v16165_v9 }
 0x7d1   : > { %v6668_v43 = vpop.f32.mrf.mxu0 }
 0x7d2   : > { %v7369_v15 = vmax.f32 %v7368_v48, %v6668_v43 }
 0x7d3   : > { %v5496_v42 = vpop.f32.mrf.mxu3  ;;  %v5686_v58 = vpop.f32.mrf.mxu1 }
 0x7d4   : > { %v6008_v34 = vmax.f32 %v6007_v55, %v5496_v42  ;;  %v6075_v1 = vmax.f32 %v6074_v17, %v5686_v58  ;;  %6707 = vmatmul.bf16.gmra.mxu0 %v20974_v10  ;;  %v13133_v17 = vld [vmem:[%s20881_s6 + $0x1c8] sm:$0xf] }
 0x7d5   : > { %v5730_v32 = vpop.f32.mrf.mxu2  ;;  %v13134_v42 = vor.u32 %v15019_v23, %v13133_v17  ;;  %v15004_v23 = vld [vmem:[%s20881_s6 + $0x16c] sm:$0xf0] }
 0x7d6   : > { %v6088_v33 = vmax.f32 %v6087_v13, %v5730_v32  ;;  %v13141_v13 = vld [vmem:[%s20881_s6 + $0x1d0] sm:$0xf]  ;;  %v13135_v32 = vld [vmem:[%s20881_s6 + $0x1e8] sm:$0xf0] }
 0x7d7   : > { %6822 = vmatpush.bf16.msra.mxu2 %v13134_v42 }
 0x7d9   : > { %v6670_v44 = vpop.f32.mrf.mxu0 }
 0x7da   : > { %v7370_v49 = vmax.f32 %v7369_v15, %v6670_v44  ;;  %5772 = vmatmul.bf16.gmra.mxu2 %v16340_v54 }
 0x7db   : > { %v5498_v25 = vpop.f32.mrf.mxu3  ;;  %v5689_v37 = vpop.f32.mrf.mxu1 }
 0x7dc   : > { %v6009_v45 = vmax.f32 %v6008_v34, %v5498_v25  ;;  %v6076_v19 = vmax.f32 %v6075_v1, %v5689_v37  ;;  %v20975_v34 = vld [vmem:[#allocation18_spill] sm:$0xff]  ;;  %v15015_v1 = vld [vmem:[%s20881_s6 + $0x1cc] sm:$0xf] }
 0x7dd   : > { %v5733_v20 = vpop.f32.mrf.mxu2  ;;  %v13138_v25 = vor.u32 %v15015_v1, %v13135_v32 }
 0x7de   : > { %v6089_v9 = vmax.f32 %v6088_v33, %v5733_v20  ;;  %6756 = vmatmul.bf16.gmra.mxu1 %v20963_v22 }
 0x7df   : > { %6911 = vmatpush.bf16.msrb.mxu3 %v13138_v25 }
 0x7e0   : > { %5816 = vmatmul.bf16.gmra.mxu3 %v16176_v56  ;;  %v15020_v56 = vld [vmem:[%s20881_s6 + $0x1ec] sm:$0xf0] }
 0x7e1   : > { %v6673_v48 = vpop.f32.mrf.mxu0  ;;  %v13142_v33 = vor.u32 %v15020_v56, %v13141_v13 }
 0x7e2   : > { %v7371_v55 = vmax.f32 %v7370_v49, %v6673_v48 }
 0x7e3   : > { %v5501_v43 = vpop.f32.mrf.mxu3  ;;  %v5691_v15 = vpop.f32.mrf.mxu1  ;;  %7000 = vmatpush.bf16.msrb.mxu0 %v13142_v33  ;;  %v14996_v33 = vld [vmem:[%s20881_s6 + $0x12c] sm:$0xf0] }
 0x7e4   : > { %v6010_v49 = vmax.f32 %v6009_v45, %v5501_v43  ;;  %v6077_v58 = vmax.f32 %v6076_v19, %v5691_v15  ;;  %6712 = vmatmul.bf16.gmra.mxu0 %v20975_v34  ;;  %v13109_v45 = vld [vmem:[%s20881_s6 + $0x190] sm:$0xf] }
 0x7e5   : > { %v5735_v44 = vpop.f32.mrf.mxu2  ;;  %v15012_v19 = vld [vmem:[%s20881_s6 + $0x1ac] sm:$0xf0] }
 0x7e6   : > { %v6090_v37 = vmax.f32 %v6089_v9, %v5735_v44  ;;  %v13110_v20 = vor.u32 %v15012_v19, %v13109_v45  ;;  %v13077_v9 = vld [vmem:[%s20881_s6 + $0x150] sm:$0xf] }
 0x7e7   : > { %v13078_v15 = vor.u32 %v15004_v23, %v13077_v9  ;;  %v20976_v23 = vld [vmem:[#allocation19_spill] sm:$0xff] }
 0x7e8   : > { %7001 = vmatpush.bf16.msrb.mxu0 %v13110_v20 }
 0x7e9   : > { %v6675_v48 = vpop.f32.mrf.mxu0 }
 0x7ea   : > { %v7372_v17 = vmax.f32 %v7371_v55, %v6675_v48  ;;  %5777 = vmatmul.bf16.gmra.mxu2 %v16363_v60  ;;  %v13045_v55 = vld [vmem:[%s20881_s6 + $0x110] sm:$0xf] }
 0x7eb   : > { %v5503_v13 = vpop.f32.mrf.mxu3  ;;  %v5694_v43 = vpop.f32.mrf.mxu1  ;;  %v13046_v44 = vor.u32 %v14996_v33, %v13045_v55 }
 0x7ec   : > { %v6011_v42 = vmax.f32 %v6010_v49, %v5503_v13  ;;  %v6078_v56 = vmax.f32 %v6077_v58, %v5694_v43  ;;  %7002 = vmatpush.bf16.msrb.mxu0 %v13078_v15  ;;  %v13013_v49 = vld [vmem:[%s20881_s6 + $0xd0] sm:$0xf] }
 0x7ed   : > { %v5738_v1 = vpop.f32.mrf.mxu2  ;;  %v14988_v58 = vld [vmem:[%s20881_s6 + $0xec] sm:$0xf0] }
 0x7ee   : > { %v6091_v32 = vmax.f32 %v6090_v37, %v5738_v1  ;;  %6761 = vmatmul.bf16.gmra.mxu1 %v20964_v5  ;;  %v13014_v20 = vor.u32 %v14988_v58, %v13013_v49  ;;  %v14980_v43 = vld [vmem:[%s20881_s6 + $0xac] sm:$0xf0]  ;;  %v15011_v58 = vld [vmem:[%s20881_s6 + $0x1a4] sm:$0xf0] }
 0x7f0   : > { %5821 = vmatmul.bf16.gmra.mxu3 %v16199_v40  ;;  %7003 = vmatpush.bf16.msrb.mxu0 %v13046_v44 }
 0x7f1   : > { %v6678_v25 = vpop.f32.mrf.mxu0 }
 0x7f2   : > { %v7373_v45 = vmax.f32 %v7372_v17, %v6678_v25  ;;  %v12981_v17 = vld [vmem:[%s20881_s6 + $0x90] sm:$0xf] }
 0x7f3   : > { %v5506_v37 = vpop.f32.mrf.mxu3  ;;  %v5696_v19 = vpop.f32.mrf.mxu1  ;;  %v12982_v15 = vor.u32 %v14980_v43, %v12981_v17  ;;  %v13069_v17 = vld [vmem:[%s20881_s6 + $0x148] sm:$0xf] }
 0x7f4   : > { %v6012_v48 = vmax.f32 %v6011_v42, %v5506_v37  ;;  %v6079_v9 = vmax.f32 %v6078_v56, %v5696_v19  ;;  %6717 = vmatmul.bf16.gmra.mxu0 %v20976_v23  ;;  %v12949_v42 = vld [vmem:[%s20881_s6 + $0x50] sm:$0xf] }
 0x7f5   : > { %v5740_v13 = vpop.f32.mrf.mxu2  ;;  %7004 = vmatpush.bf16.msrb.mxu0 %v13014_v20  ;;  %v14972_v56 = vld [vmem:[%s20881_s6 + $0x6c] sm:$0xf0] }
 0x7f6   : > { %v6092_v40 = vmax.f32 %v6091_v32, %v5740_v13  ;;  %v12950_v44 = vor.u32 %v14972_v56, %v12949_v42  ;;  %v12917_v13 = vld [vmem:[%s20881_s6 + $0x10] sm:$0xf] }
 0x7f9   : > { %v6680_v1 = vpop.f32.mrf.mxu0  ;;  %7005 = vmatpush.bf16.msrb.mxu0 %v12982_v15 }
 0x7fa   : > { %v7374_v55 = vmax.f32 %v7373_v45, %v6680_v1  ;;  %5782 = vmatmul.bf16.gmra.mxu2 %v16380_v57  ;;  %v13101_v45 = vld [vmem:[%s20881_s6 + $0x188] sm:$0xf] }
 0x7fb   : > { %v5508_v32 = vpop.f32.mrf.mxu3  ;;  %v5699_v33 = vpop.f32.mrf.mxu1  ;;  %v13102_v19 = vor.u32 %v15011_v58, %v13101_v45  ;;  %v14995_v45 = vld [vmem:[%s20881_s6 + $0x124] sm:$0xf0] }
 0x7fc   : > { %v6013_v25 = vmax.f32 %v6012_v48, %v5508_v32  ;;  %v6080_v49 = vmax.f32 %v6079_v9, %v5699_v33  ;;  %v14964_v48 = vld [vmem:[%s20881_s6 + $0x2c] sm:$0xf0] }
 0x7fd   : > { %v5743_v37 = vpop.f32.mrf.mxu2  ;;  %7006 = vmatpush.bf16.msrb.mxu0 %v12950_v44  ;;  %6823 = vmatpush.bf16.msra.mxu2 %v13102_v19  ;;  %v12918_v9 = vor.u32 %v14964_v48, %v12917_v13  ;;  %v20977_v44 = vld [vmem:[#allocation20_spill] sm:$0xff] }
 0x7fe   : > { %v6093_v20 = vmax.f32 %v6092_v40, %v5743_v37  ;;  %6766 = vmatmul.bf16.gmra.mxu1 %v20965_v61  ;;  %v15003_v40 = vld [vmem:[%s20881_s6 + $0x164] sm:$0xf0] }
 0x7ff   : > { %v13070_v15 = vor.u32 %v15003_v40, %v13069_v17  ;;  %v13005_v13 = vld [vmem:[%s20881_s6 + $0xc8] sm:$0xf] }
 0x800   : > { %5826 = vmatmul.bf16.gmra.mxu3 %v16222_v26  ;;  %v13037_v26 = vld [vmem:[%s20881_s6 + $0x108] sm:$0xf] }
 0x801   : > { %v6683_v43 = vpop.f32.mrf.mxu0  ;;  %7007 = vmatpush.bf16.msrb.mxu0 %v12918_v9  ;;  %6824 = vmatpush.bf16.msra.mxu2 %v13070_v15  ;;  %v13038_v37 = vor.u32 %v14995_v45, %v13037_v26  ;;  %v14987_v48 = vld [vmem:[%s20881_s6 + $0xe4] sm:$0xf0] }
 0x802   : > { %v7375_v1 = vmax.f32 %v7374_v55, %v6683_v43  ;;  %v15007_v55 = vld [vmem:[%s20881_s6 + $0x18c] sm:$0xf]  ;;  %v14979_v26 = vld [vmem:[%s20881_s6 + $0xa4] sm:$0xf0] }
 0x803   : > { %v5511_v42 = vpop.f32.mrf.mxu3  ;;  %v5701_v56 = vpop.f32.mrf.mxu1 }
 0x804   : > { %v6014_v32 = vmax.f32 %v6013_v25, %v5511_v42  ;;  %v6081_v33 = vmax.f32 %v6080_v49, %v5701_v56  ;;  %6722 = vmatmul.bf16.gmra.mxu0 %v20977_v44  ;;  %v13103_v25 = vld [vmem:[%s20881_s6 + $0x1a8] sm:$0xf0]  ;;  %v12973_v56 = vld [vmem:[%s20881_s6 + $0x88] sm:$0xf] }
 0x805   : > { %v5745_v58 = vpop.f32.mrf.mxu2  ;;  %v13106_v49 = vor.u32 %v15007_v55, %v13103_v25  ;;  %6825 = vmatpush.bf16.msra.mxu2 %v13038_v37 }
 0x806   : > { %v6094_v19 = vmax.f32 %v6093_v20, %v5745_v58  ;;  %v13006_v20 = vor.u32 %v14987_v48, %v13005_v13  ;;  %v12974_v58 = vor.u32 %v14979_v26, %v12973_v56 }
 0x807   : > { %6912 = vmatpush.bf16.msrb.mxu3 %v13106_v49 }
 0x809   : > { %v6685_v9 = vpop.f32.mrf.mxu0  ;;  %6826 = vmatpush.bf16.msra.mxu2 %v13006_v20  ;;  %v14963_v20 = vld [vmem:[%s20881_s6 + $0x24] sm:$0xf0] }
 0x80a   : > { %v7376_v17 = vmax.f32 %v7375_v1, %v6685_v9  ;;  %5787 = vmatmul.bf16.gmra.mxu2 %v16391_v47  ;;  %v12941_v1 = vld [vmem:[%s20881_s6 + $0x48] sm:$0xf] }
 0x80b   : > { %v5513_v40 = vpop.f32.mrf.mxu3  ;;  %v5704_v43 = vpop.f32.mrf.mxu1  ;;  %v20978_v9 = vld [vmem:[#allocation21_spill] sm:$0xff] }
 0x80c   : > { %v6015_v15 = vmax.f32 %v6014_v32, %v5513_v40  ;;  %v6082_v42 = vmax.f32 %v6081_v33, %v5704_v43  ;;  %v14971_v32 = vld [vmem:[%s20881_s6 + $0x64] sm:$0xf0] }
 0x80d   : > { %v5748_v45 = vpop.f32.mrf.mxu2  ;;  %6827 = vmatpush.bf16.msra.mxu2 %v12974_v58  ;;  %v12942_v55 = vor.u32 %v14971_v32, %v12941_v1 }
 0x80e   : > { %v6095_v37 = vmax.f32 %v6094_v19, %v5748_v45  ;;  %6771 = vmatmul.bf16.gmra.mxu1 %v20966_v39 }
 0x810   : > { %5831 = vmatmul.bf16.gmra.mxu3 %v16239_v8  ;;  %v12909_v8 = vld [vmem:[%s20881_s6 + $0x8] sm:$0xf] }
 0x811   : > { %v6688_v33 = vpop.f32.mrf.mxu0  ;;  %6828 = vmatpush.bf16.msra.mxu2 %v12942_v55  ;;  %v12910_v43 = vor.u32 %v14963_v20, %v12909_v8 }
 0x812   : > { %v7377_v25 = vmax.f32 %v7376_v17, %v6688_v33 }
 0x813   : > { %v5516_v49 = vpop.f32.mrf.mxu3  ;;  %v5706_v13 = vpop.f32.mrf.mxu1 }
 0x814   : > { %v6016_v19 = vmax.f32 %v6015_v15, %v5516_v49  ;;  %v6083_v48 = vmax.f32 %v6082_v42, %v5706_v13  ;;  %6727 = vmatmul.bf16.gmra.mxu0 %v20978_v9 }
 0x815   : > { %v5750_v40 = vpop.f32.mrf.mxu2  ;;  %6829 = vmatpush.bf16.msra.mxu2 %v12910_v43 }
 0x816   : > { %v6096_v56 = vmax.f32 %v6095_v37, %v5750_v40 }
 0x819   : > { %v6690_v17 = vpop.f32.mrf.mxu0 }
 0x81a   : > { %v7378_v26 = vmax.f32 %v7377_v25, %v6690_v17  ;;  %5792 = vmatmul.bf16.gmra.mxu2 %v16419_v0  ;;  %v14999_v25 = vld [vmem:[%s20881_s6 + $0x14c] sm:$0xf] }
 0x81b   : > { %v5518_v15 = vpop.f32.mrf.mxu3  ;;  %v5709_v42 = vpop.f32.mrf.mxu1 }
 0x81c   : > { %v6017_v45 = vmax.f32 %v6016_v19, %v5518_v15  ;;  %v6084_v58 = vmax.f32 %v6083_v48, %v5709_v42  ;;  %v13071_v19 = vld [vmem:[%s20881_s6 + $0x168] sm:$0xf0] }
 0x81d   : > { %v5753_v1 = vpop.f32.mrf.mxu2  ;;  %v13074_v20 = vor.u32 %v14999_v25, %v13071_v19 }
 0x81e   : > { %v6097_v32 = vmax.f32 %v6096_v56, %v5753_v1  ;;  %6776 = vmatmul.bf16.gmra.mxu1 %v20967_v29 }
 0x81f   : > { %6913 = vmatpush.bf16.msrb.mxu3 %v13074_v20 }
 0x820   : > { %5836 = vmatmul.bf16.gmra.mxu3 %v16250_v52 }
 0x821   : > { %v6693_v33 = vpop.f32.mrf.mxu0 }
 0x822   : > { %v7379_v55 = vmax.f32 %v7378_v26, %v6693_v33 }
 0x823   : > { %v5521_v49 = vpop.f32.mrf.mxu3  ;;  %v5711_v13 = vpop.f32.mrf.mxu1 }
 0x824   : > { %v6018_v37 = vmax.f32 %v6017_v45, %v5521_v49  ;;  %v6085_v8 = vmax.f32 %v6084_v58, %v5711_v13  ;;  %7008 = vmatmul.bf16.vlgmr.msrb.gmra.mxu0 %v16441_v3 }
 0x825   : > { %v5755_v48 = vpop.f32.mrf.mxu2 }
 0x826   : > { %v17737_v52 = vmax.f32 %v4621_v28, %v6085_v8  ;;  %v6098_v40 = vmax.f32 %v6097_v32, %v5755_v48 }
 0x829   : > { %v6695_v43 = vpop.f32.mrf.mxu0 }
 0x82a   : > { %v7380_v56 = vmax.f32 %v7379_v55, %v6695_v43  ;;  %5797 = vmatmul.bf16.gmra.mxu2 %v16430_v63 }
 0x82b   : > { %v5523_v17 = vpop.f32.mrf.mxu3  ;;  %v6742_v26 = vpop.f32.mrf.mxu1 }
 0x82c   : > { %v6019_v15 = vmax.f32 %v6018_v37, %v5523_v17 }
 0x82d   : > { %v5758_v42 = vpop.f32.mrf.mxu2 }
 0x82e   : > { %v6099_v45 = vmax.f32 %v6098_v40, %v5758_v42  ;;  %6781 = vmatmul.bf16.gmra.mxu1 %v20969_v27  ;;  %v13039_v42 = vld [vmem:[%s20881_s6 + $0x128] sm:$0xf0] }
 0x830   : > { %5841 = vmatmul.bf16.gmra.mxu3 %v16267_v36 }
 0x831   : > { %v6698_v58 = vpop.f32.mrf.mxu0 }
 0x832   : > { %v7381_v1 = vmax.f32 %v7380_v56, %v6698_v58 }
 0x833   : > { %v5526_v38 = vpop.f32.mrf.mxu3  ;;  %v6744_v21 = vpop.f32.mrf.mxu1 }
 0x834   : > { %v6020_v28 = vmax.f32 %v6019_v15, %v5526_v38  ;;  %v7395_v32 = vmax.f32 %v6742_v26, %v6744_v21  ;;  %7013 = vmatmul.bf16.gmra.mxu0 %v16452_v7  ;;  %v14991_v15 = vld [vmem:[%s20881_s6 + $0x10c] sm:$0xf] }
 0x835   : > { %v5760_v33 = vpop.f32.mrf.mxu2  ;;  %v13042_v58 = vor.u32 %v14991_v15, %v13039_v42 }
 0x836   : > { %v6100_v55 = vmax.f32 %v6099_v45, %v5760_v33 }
 0x837   : > { %6914 = vmatpush.bf16.msrb.mxu3 %v13042_v58 }
 0x839   : > { %v6700_v49 = vpop.f32.mrf.mxu0 }
 0x83a   : > { %v7382_v13 = vmax.f32 %v7381_v1, %v6700_v49  ;;  %6830 = vmatmul.bf16.vlgmr.msra.gmra.mxu2 %v16441_v3 }
 0x83b   : > { %v5528_v37 = vpop.f32.mrf.mxu3  ;;  %v6747_v8 = vpop.f32.mrf.mxu1 }
 0x83c   : > { %v6021_v25 = vmax.f32 %v6020_v28, %v5528_v37  ;;  %v7396_v19 = vmax.f32 %v7395_v32, %v6747_v8 }
 0x83d   : > { %v5763_v48 = vpop.f32.mrf.mxu2 }
 0x83e   : > { %v6101_v36 = vmax.f32 %v6100_v55, %v5763_v48  ;;  %6786 = vmatmul.bf16.gmra.mxu1 %v20970_v59 }
 0x840   : > { %5846 = vmatmul.bf16.gmra.mxu3 %v16278_v18 }
 0x841   : > { %v6703_v20 = vpop.f32.mrf.mxu0 }
 0x842   : > { %v7383_v40 = vmax.f32 %v7382_v13, %v6703_v20 }
 0x843   : > { %v5531_v43 = vpop.f32.mrf.mxu3  ;;  %v6749_v56 = vpop.f32.mrf.mxu1 }
 0x844   : > { %v6022_v17 = vmax.f32 %v6021_v25, %v5531_v43  ;;  %v7397_v26 = vmax.f32 %v7396_v19, %v6749_v56  ;;  %7018 = vmatmul.bf16.gmra.mxu0 %v20962_v35 }
 0x845   : > { %v5765_v45 = vpop.f32.mrf.mxu2 }
 0x846   : > { %v6102_v1 = vmax.f32 %v6101_v36, %v5765_v45 }
 0x849   : > { %v6705_v18 = vpop.f32.mrf.mxu0 }
 0x84a   : > { %v7384_v38 = vmax.f32 %v7383_v40, %v6705_v18  ;;  %6835 = vmatmul.bf16.gmra.mxu2 %v16452_v7  ;;  %v14983_v18 = vld [vmem:[%s20881_s6 + $0xcc] sm:$0xf] }
 0x84b   : > { %v5533_v21 = vpop.f32.mrf.mxu3  ;;  %v6752_v28 = vpop.f32.mrf.mxu1 }
 0x84c   : > { %v6023_v32 = vmax.f32 %v6022_v17, %v5533_v21  ;;  %v7398_v33 = vmax.f32 %v7397_v26, %v6752_v28 }
 0x84d   : > { %v5768_v55 = vpop.f32.mrf.mxu2 }
 0x84e   : > { %v17757_v49 = vmax.f32 %v4559_v6, %v6023_v32  ;;  %v6103_v13 = vmax.f32 %v6102_v1, %v5768_v55  ;;  %6791 = vmatmul.bf16.gmra.mxu1 %v20973_v62 }
 0x850   : > { %5851 = vmatmul.bf16.gmra.mxu3 %v16301_v4 }
 0x851   : > { %v6708_v37 = vpop.f32.mrf.mxu0 }
 0x852   : > { %v7385_v8 = vmax.f32 %v7384_v38, %v6708_v37  ;;  %v13007_v38 = vld [vmem:[%s20881_s6 + $0xe8] sm:$0xf0] }
 0x853   : > { %v5812_v25 = vpop.f32.mrf.mxu3  ;;  %v6754_v19 = vpop.f32.mrf.mxu1  ;;  %v13010_v28 = vor.u32 %v14983_v18, %v13007_v38  ;;  %v13047_v18 = vld [vmem:[%s20881_s6 + $0x130] sm:$0xf0] }
 0x854   : > { %v7399_v48 = vmax.f32 %v7398_v33, %v6754_v19  ;;  %7023 = vmatmul.bf16.gmra.mxu0 %v20963_v22  ;;  %v13143_v19 = vld [vmem:[%s20881_s6 + $0x1f0] sm:$0xf0] }
 0x855   : > { %v5770_v36 = vpop.f32.mrf.mxu2  ;;  %6915 = vmatpush.bf16.msrb.mxu3 %v13010_v28 }
 0x856   : > { %v6104_v20 = vmax.f32 %v6103_v13, %v5770_v36 }
 0x859   : > { %v6710_v40 = vpop.f32.mrf.mxu0 }
 0x85a   : > { %v7386_v43 = vmax.f32 %v7385_v8, %v6710_v40  ;;  %6840 = vmatmul.bf16.gmra.mxu2 %v20962_v35  ;;  %v15008_v40 = vld [vmem:[%s20881_s6 + $0x194] sm:$0xf] }
 0x85b   : > { %v5814_v11 = vpop.f32.mrf.mxu3  ;;  %v6757_v41 = vpop.f32.mrf.mxu1 }
 0x85c   : > { %v6117_v6 = vmax.f32 %v5812_v25, %v5814_v11  ;;  %v7400_v56 = vmax.f32 %v7399_v48, %v6757_v41  ;;  %v15016_v25 = vld [vmem:[%s20881_s6 + $0x1d4] sm:$0xf] }
 0x85d   : > { %v5773_v17 = vpop.f32.mrf.mxu2  ;;  %v13146_v36 = vor.u32 %v15016_v25, %v13143_v19 }
 0x85e   : > { %v6105_v26 = vmax.f32 %v6104_v20, %v5773_v17  ;;  %6796 = vmatmul.bf16.gmra.mxu1 %v20974_v10 }
 0x85f   : > { %7089 = vmatpush.bf16.msrb.mxu1 %v13146_v36  ;;  %v12983_v36 = vld [vmem:[%s20881_s6 + $0xb0] sm:$0xf0] }
 0x860   : > { %5856 = vmatmul.bf16.gmra.mxu3 %v16312_v51 }
 0x861   : > { %v6713_v4 = vpop.f32.mrf.mxu0 }
 0x862   : > { %v7387_v15 = vmax.f32 %v7386_v43, %v6713_v4  ;;  %v13111_v43 = vld [vmem:[%s20881_s6 + $0x1b0] sm:$0xf0] }
 0x863   : > { %v5817_v42 = vpop.f32.mrf.mxu3  ;;  %v6759_v45 = vpop.f32.mrf.mxu1  ;;  %v13114_v41 = vor.u32 %v15008_v40, %v13111_v43 }
 0x864   : > { %v6118_v58 = vmax.f32 %v6117_v6, %v5817_v42  ;;  %v7401_v1 = vmax.f32 %v7400_v56, %v6759_v45  ;;  %7028 = vmatmul.bf16.gmra.mxu0 %v20964_v5 }
 0x865   : > { %v5775_v21 = vpop.f32.mrf.mxu2  ;;  %7090 = vmatpush.bf16.msrb.mxu1 %v13114_v41 }
 0x866   : > { %v6106_v32 = vmax.f32 %v6105_v26, %v5775_v21 }
 0x869   : > { %v6715_v51 = vpop.f32.mrf.mxu0 }
 0x86a   : > { %v7388_v33 = vmax.f32 %v7387_v15, %v6715_v51  ;;  %6845 = vmatmul.bf16.gmra.mxu2 %v20963_v22  ;;  %v13079_v15 = vld [vmem:[%s20881_s6 + $0x170] sm:$0xf0] }
 0x86b   : > { %v5819_v55 = vpop.f32.mrf.mxu3  ;;  %v6762_v13 = vpop.f32.mrf.mxu1 }
 0x86c   : > { %v6119_v37 = vmax.f32 %v6118_v58, %v5819_v55  ;;  %v7402_v8 = vmax.f32 %v7401_v1, %v6762_v13  ;;  %v14992_v1 = vld [vmem:[%s20881_s6 + $0x114] sm:$0xf] }
 0x86d   : > { %v5778_v48 = vpop.f32.mrf.mxu2  ;;  %v13050_v21 = vor.u32 %v14992_v1, %v13047_v18  ;;  %v14984_v13 = vld [vmem:[%s20881_s6 + $0xd4] sm:$0xf] }
 0x86e   : > { %v6107_v20 = vmax.f32 %v6106_v32, %v5778_v48  ;;  %6801 = vmatmul.bf16.gmra.mxu1 %v20975_v34  ;;  %v14976_v48 = vld [vmem:[%s20881_s6 + $0x94] sm:$0xf] }
 0x86f   : > { %v12986_v40 = vor.u32 %v14976_v48, %v12983_v36  ;;  %v12919_v1 = vld [vmem:[%s20881_s6 + $0x30] sm:$0xf0] }
 0x870   : > { %5861 = vmatmul.bf16.gmra.mxu3 %v16340_v54  ;;  %v15000_v54 = vld [vmem:[%s20881_s6 + $0x154] sm:$0xf] }
 0x871   : > { %v6718_v11 = vpop.f32.mrf.mxu0  ;;  %v13082_v45 = vor.u32 %v15000_v54, %v13079_v15  ;;  %v12951_v15 = vld [vmem:[%s20881_s6 + $0x70] sm:$0xf0] }
 0x872   : > { %v7389_v6 = vmax.f32 %v7388_v33, %v6718_v11 }
 0x873   : > { %v5822_v56 = vpop.f32.mrf.mxu3  ;;  %v6764_v17 = vpop.f32.mrf.mxu1  ;;  %7091 = vmatpush.bf16.msrb.mxu1 %v13082_v45 }
 0x874   : > { %v6120_v26 = vmax.f32 %v6119_v37, %v5822_v56  ;;  %v7403_v4 = vmax.f32 %v7402_v8, %v6764_v17  ;;  %7033 = vmatmul.bf16.gmra.mxu0 %v20965_v61  ;;  %v13015_v37 = vld [vmem:[%s20881_s6 + $0xf0] sm:$0xf0]  ;;  %v12975_v17 = vld [vmem:[%s20881_s6 + $0xa8] sm:$0xf0] }
 0x875   : > { %v5780_v42 = vpop.f32.mrf.mxu2  ;;  %v13018_v25 = vor.u32 %v14984_v13, %v13015_v37 }
 0x876   : > { %v6108_v58 = vmax.f32 %v6107_v20, %v5780_v42 }
 0x877   : > { %7092 = vmatpush.bf16.msrb.mxu1 %v13050_v21 }
 0x879   : > { %v6720_v38 = vpop.f32.mrf.mxu0 }
 0x87a   : > { %v7390_v28 = vmax.f32 %v7389_v6, %v6720_v38  ;;  %6850 = vmatmul.bf16.gmra.mxu2 %v20964_v5 }
 0x87b   : > { %v5824_v32 = vpop.f32.mrf.mxu3  ;;  %v6767_v51 = vpop.f32.mrf.mxu1  ;;  %7093 = vmatpush.bf16.msrb.mxu1 %v13018_v25 }
 0x87c   : > { %v6121_v33 = vmax.f32 %v6120_v26, %v5824_v32  ;;  %v7404_v55 = vmax.f32 %v7403_v4, %v6767_v51  ;;  %v14968_v26 = vld [vmem:[%s20881_s6 + $0x54] sm:$0xf] }
 0x87d   : > { %v5783_v8 = vpop.f32.mrf.mxu2  ;;  %v12954_v45 = vor.u32 %v14968_v26, %v12951_v15 }
 0x87e   : > { %v6109_v19 = vmax.f32 %v6108_v58, %v5783_v8  ;;  %6806 = vmatmul.bf16.gmra.mxu1 %v20976_v23  ;;  %v14960_v58 = vld [vmem:[%s20881_s6 + $0x14] sm:$0xf] }
 0x87f   : > { %7094 = vmatpush.bf16.msrb.mxu1 %v12986_v40  ;;  %v12922_v38 = vor.u32 %v14960_v58, %v12919_v1  ;;  %v12943_v58 = vld [vmem:[%s20881_s6 + $0x68] sm:$0xf0] }
 0x880   : > { %5866 = vmatmul.bf16.gmra.mxu3 %v16363_v60  ;;  %v14975_v60 = vld [vmem:[%s20881_s6 + $0x8c] sm:$0xf] }
 0x881   : > { %v6723_v20 = vpop.f32.mrf.mxu0  ;;  %v12978_v54 = vor.u32 %v14975_v60, %v12975_v17 }
 0x882   : > { %v7391_v43 = vmax.f32 %v7390_v28, %v6723_v20 }
 0x883   : > { %v5827_v11 = vpop.f32.mrf.mxu3  ;;  %v6769_v41 = vpop.f32.mrf.mxu1  ;;  %6916 = vmatpush.bf16.msrb.mxu3 %v12978_v54  ;;  %7095 = vmatpush.bf16.msrb.mxu1 %v12954_v45 }
 0x884   : > { %v6122_v6 = vmax.f32 %v6121_v33, %v5827_v11  ;;  %v7405_v56 = vmax.f32 %v7404_v55, %v6769_v41  ;;  %7038 = vmatmul.bf16.gmra.mxu0 %v20966_v39 }
 0x885   : > { %v5785_v4 = vpop.f32.mrf.mxu2 }
 0x886   : > { %v6110_v42 = vmax.f32 %v6109_v19, %v5785_v4 }
 0x887   : > { %7096 = vmatpush.bf16.msrb.mxu1 %v12922_v38 }
 0x889   : > { %v6725_v18 = vpop.f32.mrf.mxu0 }
 0x88a   : > { %v7392_v21 = vmax.f32 %v7391_v43, %v6725_v18  ;;  %6855 = vmatmul.bf16.gmra.mxu2 %v20965_v61 }
 0x88b   : > { %v5829_v28 = vpop.f32.mrf.mxu3  ;;  %v6772_v32 = vpop.f32.mrf.mxu1 }
 0x88c   : > { %v6123_v51 = vmax.f32 %v6122_v6, %v5829_v28  ;;  %v7406_v33 = vmax.f32 %v7405_v56, %v6772_v32  ;;  %v14959_v28 = vld [vmem:[%s20881_s6 + $0xc] sm:$0xf] }
 0x88d   : > { %v5788_v55 = vpop.f32.mrf.mxu2  ;;  %v12911_v32 = vld [vmem:[%s20881_s6 + $0x28] sm:$0xf0] }
 0x88e   : > { %v6111_v13 = vmax.f32 %v6110_v42, %v5788_v55  ;;  %6811 = vmatmul.bf16.gmra.mxu1 %v20977_v44  ;;  %v12914_v55 = vor.u32 %v14959_v28, %v12911_v32 }
 0x890   : > { %5871 = vmatmul.bf16.gmra.mxu3 %v16380_v57 }
 0x891   : > { %v6728_v37 = vpop.f32.mrf.mxu0 }
 0x892   : > { %v7393_v8 = vmax.f32 %v7392_v21, %v6728_v37 }
 0x893   : > { %v5832_v25 = vpop.f32.mrf.mxu3  ;;  %v6774_v19 = vpop.f32.mrf.mxu1 }
 0x894   : > { %v6124_v48 = vmax.f32 %v6123_v51, %v5832_v25  ;;  %v7407_v36 = vmax.f32 %v7406_v33, %v6774_v19  ;;  %7043 = vmatmul.bf16.gmra.mxu0 %v20967_v29 }
 0x895   : > { %v5790_v20 = vpop.f32.mrf.mxu2 }
 0x896   : > { %v6112_v40 = vmax.f32 %v6111_v13, %v5790_v20 }
 0x899   : > { %v6730_v43 = vpop.f32.mrf.mxu0 }
 0x89a   : > { %v7394_v11 = vmax.f32 %v7393_v8, %v6730_v43  ;;  %6860 = vmatmul.bf16.gmra.mxu2 %v20966_v39 }
 0x89b   : > { %v5834_v41 = vpop.f32.mrf.mxu3  ;;  %v6777_v6 = vpop.f32.mrf.mxu1 }
 0x89c   : > { %v17840_v56 = vmax.f32 %v17288_v53, %v7394_v11  ;;  %v6125_v57 = vmax.f32 %v6124_v48, %v5834_v41  ;;  %v7408_v60 = vmax.f32 %v7407_v36, %v6777_v6  ;;  %v14967_v53 = vld [vmem:[%s20881_s6 + $0x4c] sm:$0xf]  ;;  %v20979_v6 = vmax.f32 %v17306_v2, %v17311_v14 }
 0x89d   : > { %v5793_v17 = vpop.f32.mrf.mxu2  ;;  %v12946_v18 = vor.u32 %v14967_v53, %v12943_v58 }
 0x89e   : > { %v6113_v26 = vmax.f32 %v6112_v40, %v5793_v17  ;;  %6816 = vmatmul.bf16.gmra.mxu1 %v20978_v9 }
 0x89f   : > { %6917 = vmatpush.bf16.msrb.mxu3 %v12946_v18 }
 0x8a0   : > { %5876 = vmatmul.bf16.gmra.mxu3 %v16391_v47 }
 0x8a1   : > { %v7009_v4 = vpop.f32.mrf.mxu0 }
 0x8a3   : > { %v5837_v54 = vpop.f32.mrf.mxu3  ;;  %v6779_v15 = vpop.f32.mrf.mxu1  ;;  %6918 = vmatpush.bf16.msrb.mxu3 %v12914_v55 }
 0x8a4   : > { %v6126_v42 = vmax.f32 %v6125_v57, %v5837_v54  ;;  %v7409_v45 = vmax.f32 %v7408_v60, %v6779_v15  ;;  %7048 = vmatmul.bf16.gmra.mxu0 %v20969_v27 }
 0x8a5   : > { %v5795_v1 = vpop.f32.mrf.mxu2 }
 0x8a6   : > { %v6114_v38 = vmax.f32 %v6113_v26, %v5795_v1 }
 0x8a9   : > { %v7011_v47 = vpop.f32.mrf.mxu0 }
 0x8aa   : > { %v7488_v21 = vmax.f32 %v7009_v4, %v7011_v47  ;;  %6865 = vmatmul.bf16.gmra.mxu2 %v20967_v29 }
 0x8ab   : > { %v5839_v51 = vpop.f32.mrf.mxu3  ;;  %v6782_v33 = vpop.f32.mrf.mxu1 }
 0x8ac   : > { %v6127_v13 = vmax.f32 %v6126_v42, %v5839_v51  ;;  %v7410_v37 = vmax.f32 %v7409_v45, %v6782_v33 }
 0x8ad   : > { %v5798_v8 = vpop.f32.mrf.mxu2 }
 0x8ae   : > { %v6115_v25 = vmax.f32 %v6114_v38, %v5798_v8  ;;  %7097 = vmatmul.bf16.vlgmr.msrb.gmra.mxu1 %v16441_v3 }
 0x8b0   : > { %5881 = vmatmul.bf16.gmra.mxu3 %v16419_v0 }
 0x8b1   : > { %v7014_v19 = vpop.f32.mrf.mxu0 }
 0x8b2   : > { %v7489_v48 = vmax.f32 %v7488_v21, %v7014_v19 }
 0x8b3   : > { %v5842_v36 = vpop.f32.mrf.mxu3  ;;  %v6784_v20 = vpop.f32.mrf.mxu1 }
 0x8b4   : > { %v6128_v40 = vmax.f32 %v6127_v13, %v5842_v36  ;;  %v7411_v43 = vmax.f32 %v7410_v37, %v6784_v20  ;;  %7053 = vmatmul.bf16.gmra.mxu0 %v20970_v59 }
 0x8b5   : > { %v5800_v11 = vpop.f32.mrf.mxu2 }
 0x8b6   : > { %v6116_v41 = vmax.f32 %v6115_v25, %v5800_v11 }
 0x8b8   : > { %v17864_v57 = vmax.f32 %v20979_v6, %v6116_v41 }
 0x8b9   : > { %v7016_v60 = vpop.f32.mrf.mxu0 }
 0x8ba   : > { %v7490_v17 = vmax.f32 %v7489_v48, %v7016_v60  ;;  %6870 = vmatmul.bf16.gmra.mxu2 %v20969_v27 }
 0x8bb   : > { %v5844_v0 = vpop.f32.mrf.mxu3  ;;  %v6787_v26 = vpop.f32.mrf.mxu1 }
 0x8bc   : > { %v6129_v4 = vmax.f32 %v6128_v40, %v5844_v0  ;;  %v7412_v54 = vmax.f32 %v7411_v43, %v6787_v26 }
 0x8bd   : > { %v6831_v15 = vpop.f32.mrf.mxu2 }
 0x8be   : > { %7102 = vmatmul.bf16.gmra.mxu1 %v16452_v7 }
 0x8c0   : > { %5886 = vmatmul.bf16.gmra.mxu3 %v16430_v63 }
 0x8c1   : > { %v7019_v42 = vpop.f32.mrf.mxu0 }
 0x8c2   : > { %v7491_v45 = vmax.f32 %v7490_v17, %v7019_v42 }
 0x8c3   : > { %v5847_v53 = vpop.f32.mrf.mxu3  ;;  %v6789_v58 = vpop.f32.mrf.mxu1 }
 0x8c4   : > { %v6130_v2 = vmax.f32 %v6129_v4, %v5847_v53  ;;  %v7413_v14 = vmax.f32 %v7412_v54, %v6789_v58  ;;  %7058 = vmatmul.bf16.gmra.mxu0 %v20973_v62  ;;  %v13149_v4 = vld [vmem:[%s20881_s6 + $0x1d8] sm:$0xf]  ;;  %v15082_v58 = vld [vmem:[%s20881_s6 + $0x1dc] sm:$0xf0] }
 0x8c5   : > { %v6833_v1 = vpop.f32.mrf.mxu2  ;;  %v15021_v54 = vld [vmem:[%s20881_s6 + $0x1f4] sm:$0xf0] }
 0x8c6   : > { %v7426_v18 = vmax.f32 %v6831_v15, %v6833_v1  ;;  %v13381_v15 = vld [vmem:[%s20881_s6 + $0x1c0] sm:$0xf]  ;;  %v13150_v53 = vor.u32 %v15021_v54, %v13149_v4  ;;  %v15017_v1 = vld [vmem:[%s20881_s6 + $0x1dc] sm:$0xf] }
 0x8c8   : > { %7178 = vmatpush.bf16.msrb.mxu2 %v13150_v53 }
 0x8c9   : > { %v7021_v38 = vpop.f32.mrf.mxu0 }
 0x8ca   : > { %v7492_v47 = vmax.f32 %v7491_v45, %v7021_v38  ;;  %6875 = vmatmul.bf16.gmra.mxu2 %v20970_v59  ;;  %v13382_v38 = vor.u32 %v15082_v58, %v13381_v15  ;;  %v13221_v58 = vld [vmem:[%s20881_s6 + $0x80] sm:$0xf] }
 0x8cb   : > { %v5849_v21 = vpop.f32.mrf.mxu3  ;;  %v6792_v28 = vpop.f32.mrf.mxu1 }
 0x8cc   : > { %v6131_v32 = vmax.f32 %v6130_v2, %v5849_v21  ;;  %v7414_v51 = vmax.f32 %v7413_v14, %v6792_v28  ;;  %8108 = vmatpush.bf16.msra.mxu0 %v13382_v38  ;;  %v13189_v38 = vld [vmem:[%s20881_s6 + $0x40] sm:$0xf] }
 0x8cd   : > { %v6836_v33 = vpop.f32.mrf.mxu2 }
 0x8ce   : > { %v7427_v63 = vmax.f32 %v7426_v18, %v6836_v33  ;;  %7107 = vmatmul.bf16.gmra.mxu1 %v20962_v35  ;;  %v13151_v18 = vld [vmem:[%s20881_s6 + $0x1f8] sm:$0xf0] }
 0x8cf   : > { %v13154_v21 = vor.u32 %v15017_v1, %v13151_v18 }
 0x8d0   : > { %6919 = vmatmul.bf16.vlgmr.msrb.gmra.mxu3 %v16441_v3 }
 0x8d1   : > { %v7024_v55 = vpop.f32.mrf.mxu0  ;;  %7267 = vmatpush.bf16.msra.mxu3 %v13154_v21 }
 0x8d2   : > { %v7493_v13 = vmax.f32 %v7492_v47, %v7024_v55 }
 0x8d3   : > { %v5852_v37 = vpop.f32.mrf.mxu3  ;;  %v6794_v8 = vpop.f32.mrf.mxu1 }
 0x8d4   : > { %v6132_v25 = vmax.f32 %v6131_v32, %v5852_v37  ;;  %v7415_v19 = vmax.f32 %v7414_v51, %v6794_v8  ;;  %7063 = vmatmul.bf16.gmra.mxu0 %v20974_v10  ;;  %v13349_v32 = vld [vmem:[%s20881_s6 + $0x180] sm:$0xf] }
 0x8d5   : > { %v6838_v48 = vpop.f32.mrf.mxu2  ;;  %v15074_v51 = vld [vmem:[%s20881_s6 + $0x19c] sm:$0xf0] }
 0x8d6   : > { %v7428_v36 = vmax.f32 %v7427_v63, %v6838_v48  ;;  %v13350_v33 = vor.u32 %v15074_v51, %v13349_v32  ;;  %v15066_v37 = vld [vmem:[%s20881_s6 + $0x15c] sm:$0xf0] }
 0x8d8   : > { %8109 = vmatpush.bf16.msra.mxu0 %v13350_v33 }
 0x8d9   : > { %v7026_v20 = vpop.f32.mrf.mxu0 }
 0x8da   : > { %v7494_v40 = vmax.f32 %v7493_v13, %v7026_v20  ;;  %6880 = vmatmul.bf16.gmra.mxu2 %v20973_v62  ;;  %v13317_v13 = vld [vmem:[%s20881_s6 + $0x140] sm:$0xf] }
 0x8db   : > { %v5854_v43 = vpop.f32.mrf.mxu3  ;;  %v6797_v11 = vpop.f32.mrf.mxu1 }
 0x8dc   : > { %v6133_v41 = vmax.f32 %v6132_v25, %v5854_v43  ;;  %v7416_v6 = vmax.f32 %v7415_v19, %v6797_v11  ;;  %v13318_v19 = vor.u32 %v15066_v37, %v13317_v13  ;;  %v13285_v43 = vld [vmem:[%s20881_s6 + $0x100] sm:$0xf] }
 0x8dd   : > { %v6841_v60 = vpop.f32.mrf.mxu2  ;;  %v15058_v11 = vld [vmem:[%s20881_s6 + $0x11c] sm:$0xf0] }
 0x8de   : > { %v7429_v17 = vmax.f32 %v7428_v36, %v6841_v60  ;;  %7112 = vmatmul.bf16.gmra.mxu1 %v20963_v22  ;;  %8110 = vmatpush.bf16.msra.mxu0 %v13318_v19  ;;  %v15026_v19 = vld [vmem:[%s20881_s6 + $0x1c] sm:$0xf0] }
 0x8e0   : > { %6924 = vmatmul.bf16.gmra.mxu3 %v16452_v7 }
 0x8e1   : > { %v7029_v0 = vpop.f32.mrf.mxu0 }
 0x8e2   : > { %v7495_v26 = vmax.f32 %v7494_v40, %v7029_v0  ;;  %v15050_v0 = vld [vmem:[%s20881_s6 + $0xdc] sm:$0xf0] }
 0x8e3   : > { %v5857_v42 = vpop.f32.mrf.mxu3  ;;  %v6799_v45 = vpop.f32.mrf.mxu1 }
 0x8e4   : > { %v6134_v2 = vmax.f32 %v6133_v41, %v5857_v42  ;;  %v7417_v14 = vmax.f32 %v7416_v6, %v6799_v45  ;;  %7068 = vmatmul.bf16.gmra.mxu0 %v20975_v34  ;;  %v13286_v41 = vor.u32 %v15058_v11, %v13285_v43 }
 0x8e5   : > { %v6843_v47 = vpop.f32.mrf.mxu2 }
 0x8e6   : > { %v7430_v28 = vmax.f32 %v7429_v17, %v6843_v47  ;;  %8111 = vmatpush.bf16.msra.mxu0 %v13286_v41  ;;  %v13253_v17 = vld [vmem:[%s20881_s6 + $0xc0] sm:$0xf] }
 0x8e7   : > { %v13254_v54 = vor.u32 %v15050_v0, %v13253_v17  ;;  %v15034_v47 = vld [vmem:[%s20881_s6 + $0x5c] sm:$0xf0]  ;;  %v13053_v0 = vld [vmem:[%s20881_s6 + $0x118] sm:$0xf] }
 0x8e8   : > { %v13190_v32 = vor.u32 %v15034_v47, %v13189_v38 }
 0x8e9   : > { %v7031_v63 = vpop.f32.mrf.mxu0 }
 0x8ea   : > { %v7496_v55 = vmax.f32 %v7495_v26, %v7031_v63  ;;  %6885 = vmatmul.bf16.gmra.mxu2 %v20974_v10  ;;  %8112 = vmatpush.bf16.msra.mxu0 %v13254_v54  ;;  %v13117_v63 = vld [vmem:[%s20881_s6 + $0x198] sm:$0xf] }
 0x8eb   : > { %v5859_v8 = vpop.f32.mrf.mxu3  ;;  %v6802_v25 = vpop.f32.mrf.mxu1 }
 0x8ec   : > { %v6135_v48 = vmax.f32 %v6134_v2, %v5859_v8  ;;  %v7418_v36 = vmax.f32 %v7417_v14, %v6802_v25  ;;  %v15042_v2 = vld [vmem:[%s20881_s6 + $0x9c] sm:$0xf0] }
 0x8ed   : > { %v6846_v20 = vpop.f32.mrf.mxu2  ;;  %v13222_v14 = vor.u32 %v15042_v2, %v13221_v58  ;;  %v13157_v25 = vld [vmem:[%s20881_s6] sm:$0xf]  ;;  %v13021_v58 = vld [vmem:[%s20881_s6 + $0xd8] sm:$0xf] }
 0x8ee   : > { %v7431_v40 = vmax.f32 %v7430_v28, %v6846_v20  ;;  %7117 = vmatmul.bf16.gmra.mxu1 %v20964_v5  ;;  %v15005_v20 = vld [vmem:[%s20881_s6 + $0x174] sm:$0xf0] }
 0x8ef   : > { %8113 = vmatpush.bf16.msra.mxu0 %v13222_v14  ;;  %v14989_v2 = vld [vmem:[%s20881_s6 + $0xf4] sm:$0xf0] }
 0x8f0   : > { %6929 = vmatmul.bf16.gmra.mxu3 %v20962_v35 }
 0x8f1   : > { %v7034_v6 = vpop.f32.mrf.mxu0 }
 0x8f2   : > { %v7497_v60 = vmax.f32 %v7496_v55, %v7034_v6  ;;  %v15013_v55 = vld [vmem:[%s20881_s6 + $0x1b4] sm:$0xf0] }
 0x8f3   : > { %v5862_v26 = vpop.f32.mrf.mxu3  ;;  %v6804_v4 = vpop.f32.mrf.mxu1  ;;  %v13118_v37 = vor.u32 %v15013_v55, %v13117_v63  ;;  %8114 = vmatpush.bf16.msra.mxu0 %v13190_v32  ;;  %v12989_v32 = vld [vmem:[%s20881_s6 + $0x98] sm:$0xf] }
 0x8f4   : > { %v6136_v15 = vmax.f32 %v6135_v48, %v5862_v26  ;;  %v7419_v42 = vmax.f32 %v7418_v36, %v6804_v4  ;;  %7073 = vmatmul.bf16.gmra.mxu0 %v20976_v23  ;;  %v13158_v48 = vor.u32 %v15026_v19, %v13157_v25  ;;  %v13085_v36 = vld [vmem:[%s20881_s6 + $0x158] sm:$0xf] }
 0x8f5   : > { %v6848_v45 = vpop.f32.mrf.mxu2  ;;  %7179 = vmatpush.bf16.msrb.mxu2 %v13118_v37  ;;  %v13086_v43 = vor.u32 %v15005_v20, %v13085_v36  ;;  %v14997_v26 = vld [vmem:[%s20881_s6 + $0x134] sm:$0xf0] }
 0x8f6   : > { %v7432_v53 = vmax.f32 %v7431_v40, %v6848_v45  ;;  %v13054_v54 = vor.u32 %v14997_v26, %v13053_v0  ;;  %v13119_v45 = vld [vmem:[%s20881_s6 + $0x1b8] sm:$0xf0]  ;;  %v14973_v37 = vld [vmem:[%s20881_s6 + $0x74] sm:$0xf0] }
 0x8f7   : > { %8115 = vmatpush.bf16.msra.mxu0 %v13158_v48 }
 0x8f9   : > { %v7036_v1 = vpop.f32.mrf.mxu0  ;;  %7180 = vmatpush.bf16.msrb.mxu2 %v13086_v43  ;;  %v12925_v43 = vld [vmem:[%s20881_s6 + $0x18] sm:$0xf] }
 0x8fa   : > { %v7498_v18 = vmax.f32 %v7497_v60, %v7036_v1  ;;  %6890 = vmatmul.bf16.gmra.mxu2 %v20975_v34  ;;  %v13022_v1 = vor.u32 %v14989_v2, %v13021_v58 }
 0x8fb   : > { %v5864_v21 = vpop.f32.mrf.mxu3  ;;  %v6807_v28 = vpop.f32.mrf.mxu1 }
 0x8fc   : > { %v6137_v51 = vmax.f32 %v6136_v15, %v5864_v21  ;;  %v7420_v33 = vmax.f32 %v7419_v42, %v6807_v28  ;;  %v15009_v42 = vld [vmem:[%s20881_s6 + $0x19c] sm:$0xf] }
 0x8fd   : > { %v6851_v13 = vpop.f32.mrf.mxu2  ;;  %7181 = vmatpush.bf16.msrb.mxu2 %v13054_v54 }
 0x8fe   : > { %v7433_v8 = vmax.f32 %v7432_v53, %v6851_v13  ;;  %7122 = vmatmul.bf16.gmra.mxu1 %v20965_v61  ;;  %v13122_v53 = vor.u32 %v15009_v42, %v13119_v45  ;;  %v12957_v13 = vld [vmem:[%s20881_s6 + $0x58] sm:$0xf] }
 0x8ff   : > { %v12958_v25 = vor.u32 %v14973_v37, %v12957_v13 }
 0x900   : > { %6934 = vmatmul.bf16.gmra.mxu3 %v20963_v22 }
 0x901   : > { %v7039_v40 = vpop.f32.mrf.mxu0  ;;  %7268 = vmatpush.bf16.msra.mxu3 %v13122_v53  ;;  %7182 = vmatpush.bf16.msrb.mxu2 %v13022_v1 }
 0x902   : > { %v7499_v11 = vmax.f32 %v7498_v18, %v7039_v40 }
 0x903   : > { %v5867_v41 = vpop.f32.mrf.mxu3  ;;  %v6809_v6 = vpop.f32.mrf.mxu1 }
 0x904   : > { %v6138_v60 = vmax.f32 %v6137_v51, %v5867_v41  ;;  %v7421_v17 = vmax.f32 %v7420_v33, %v6809_v6  ;;  %7078 = vmatmul.bf16.gmra.mxu0 %v20977_v44  ;;  %v14981_v51 = vld [vmem:[%s20881_s6 + $0xb4] sm:$0xf0] }
 0x905   : > { %v6853_v4 = vpop.f32.mrf.mxu2  ;;  %v12990_v63 = vor.u32 %v14981_v51, %v12989_v32 }
 0x906   : > { %v7434_v15 = vmax.f32 %v7433_v8, %v6853_v4 }
 0x907   : > { %7183 = vmatpush.bf16.msrb.mxu2 %v12990_v63 }
 0x909   : > { %v7041_v14 = vpop.f32.mrf.mxu0 }
 0x90a   : > { %v7500_v18 = vmax.f32 %v7499_v11, %v7041_v14  ;;  %6895 = vmatmul.bf16.gmra.mxu2 %v20976_v23  ;;  %v14965_v11 = vld [vmem:[%s20881_s6 + $0x34] sm:$0xf0] }
 0x90b   : > { %v5869_v38 = vpop.f32.mrf.mxu3  ;;  %v6812_v47 = vpop.f32.mrf.mxu1  ;;  %7184 = vmatpush.bf16.msrb.mxu2 %v12958_v25  ;;  %v12926_v6 = vor.u32 %v14965_v11, %v12925_v43  ;;  %v20981_v11 = vld [vmem:[#allocation23_spill] sm:$0xff] }
 0x90c   : > { %v6139_v21 = vmax.f32 %v6138_v60, %v5869_v38  ;;  %v7422_v28 = vmax.f32 %v7421_v17, %v6812_v47  ;;  %v20980_v38 = vld [vmem:[#allocation22_spill] sm:$0xff]  ;;  %v15001_v47 = vld [vmem:[%s20881_s6 + $0x15c] sm:$0xf] }
 0x90d   : > { %v6856_v33 = vpop.f32.mrf.mxu2 }
 0x90e   : > { %v7435_v55 = vmax.f32 %v7434_v15, %v6856_v33  ;;  %7127 = vmatmul.bf16.gmra.mxu1 %v20966_v39 }
 0x90f   : > { %7185 = vmatpush.bf16.msrb.mxu2 %v12926_v6 }
 0x910   : > { %6939 = vmatmul.bf16.gmra.mxu3 %v20964_v5 }
 0x911   : > { %v7044_v8 = vpop.f32.mrf.mxu0 }
 0x912   : > { %v7501_v19 = vmax.f32 %v7500_v18, %v7044_v8 }
 0x913   : > { %v5872_v48 = vpop.f32.mrf.mxu3  ;;  %v6814_v36 = vpop.f32.mrf.mxu1 }
 0x914   : > { %v6140_v20 = vmax.f32 %v6139_v21, %v5872_v48  ;;  %v7423_v40 = vmax.f32 %v7422_v28, %v6814_v36  ;;  %7083 = vmatmul.bf16.gmra.mxu0 %v20978_v9  ;;  %v13087_v21 = vld [vmem:[%s20881_s6 + $0x178] sm:$0xf0] }
 0x915   : > { %v6858_v41 = vpop.f32.mrf.mxu2  ;;  %v13090_v32 = vor.u32 %v15001_v47, %v13087_v21  ;;  %v14993_v47 = vld [vmem:[%s20881_s6 + $0x11c] sm:$0xf] }
 0x916   : > { %v7436_v60 = vmax.f32 %v7435_v55, %v6858_v41  ;;  %v13055_v21 = vld [vmem:[%s20881_s6 + $0x138] sm:$0xf0] }
 0x917   : > { %7269 = vmatpush.bf16.msra.mxu3 %v13090_v32  ;;  %v13058_v32 = vor.u32 %v14993_v47, %v13055_v21  ;;  %v20985_v21 = vld [vmem:[#allocation26_spill] sm:$0xff] }
 0x919   : > { %v7046_v17 = vpop.f32.mrf.mxu0 }
 0x91a   : > { %v7502_v0 = vmax.f32 %v7501_v19, %v7046_v17  ;;  %6900 = vmatmul.bf16.gmra.mxu2 %v20977_v44 }
 0x91b   : > { %v5874_v26 = vpop.f32.mrf.mxu3  ;;  %v6817_v4 = vpop.f32.mrf.mxu1  ;;  %7270 = vmatpush.bf16.msra.mxu3 %v13058_v32  ;;  %v13023_v32 = vld [vmem:[%s20881_s6 + $0xf8] sm:$0xf0] }
 0x91c   : > { %v6141_v54 = vmax.f32 %v6140_v20, %v5874_v26  ;;  %v7424_v15 = vmax.f32 %v7423_v40, %v6817_v4 }
 0x91d   : > { %v6861_v42 = vpop.f32.mrf.mxu2 }
 0x91e   : > { %v7437_v45 = vmax.f32 %v7436_v60, %v6861_v42  ;;  %7132 = vmatmul.bf16.gmra.mxu1 %v20967_v29 }
 0x920   : > { %6944 = vmatmul.bf16.gmra.mxu3 %v20965_v61 }
 0x921   : > { %v7049_v53 = vpop.f32.mrf.mxu0 }
 0x922   : > { %v7503_v58 = vmax.f32 %v7502_v0, %v7049_v53 }
 0x923   : > { %v5877_v2 = vpop.f32.mrf.mxu3  ;;  %v6819_v14 = vpop.f32.mrf.mxu1 }
 0x924   : > { %v6142_v1 = vmax.f32 %v6141_v54, %v5877_v2  ;;  %v7425_v18 = vmax.f32 %v7424_v15, %v6819_v14  ;;  %8116 = vmatmul.bf16.vlgmr.msra.gmra.mxu0 %v20980_v38 }
 0x925   : > { %v6863_v28 = vpop.f32.mrf.mxu2 }
 0x926   : > { %v18009_v51 = vmax.f32 %v17460_v16, %v7425_v18  ;;  %v7438_v33 = vmax.f32 %v7437_v45, %v6863_v28  ;;  %v20982_v18 = vld [vmem:[#allocation24_spill] sm:$0xff] }
 0x929   : > { %v7051_v63 = vpop.f32.mrf.mxu0 }
 0x92a   : > { %v7504_v55 = vmax.f32 %v7503_v58, %v7051_v63  ;;  %6905 = vmatmul.bf16.gmra.mxu2 %v20978_v9 }
 0x92b   : > { %v5879_v13 = vpop.f32.mrf.mxu3  ;;  %v7098_v37 = vpop.f32.mrf.mxu1 }
 0x92c   : > { %v6143_v8 = vmax.f32 %v6142_v1, %v5879_v13 }
 0x92d   : > { %v6866_v25 = vpop.f32.mrf.mxu2 }
 0x92e   : > { %v7439_v19 = vmax.f32 %v7438_v33, %v6866_v25  ;;  %7137 = vmatmul.bf16.gmra.mxu1 %v20969_v27 }
 0x930   : > { %6949 = vmatmul.bf16.gmra.mxu3 %v20966_v39 }
 0x931   : > { %v7054_v48 = vpop.f32.mrf.mxu0 }
 0x932   : > { %v7505_v36 = vmax.f32 %v7504_v55, %v7054_v48  ;;  %v20983_v48 = vmax.f32 %v17469_v12, %v17479_v46 }
 0x933   : > { %v5882_v20 = vpop.f32.mrf.mxu3  ;;  %v7100_v16 = vpop.f32.mrf.mxu1 }
 0x934   : > { %v6144_v40 = vmax.f32 %v6143_v8, %v5882_v20  ;;  %v7519_v43 = vmax.f32 %v7098_v37, %v7100_v16  ;;  %8121 = vmatmul.bf16.gmra.mxu0 %v20981_v11 }
 0x935   : > { %v6868_v41 = vpop.f32.mrf.mxu2 }
 0x936   : > { %v7440_v6 = vmax.f32 %v7439_v19, %v6868_v41 }
 0x939   : > { %v7056_v60 = vpop.f32.mrf.mxu0 }
 0x93a   : > { %v7506_v17 = vmax.f32 %v7505_v36, %v7056_v60  ;;  %7186 = vmatmul.bf16.vlgmr.msrb.gmra.mxu2 %v16441_v3  ;;  %v20984_v60 = vld [vmem:[#allocation25_spill] sm:$0xff] }
 0x93b   : > { %v5884_v0 = vpop.f32.mrf.mxu3  ;;  %v7103_v26 = vpop.f32.mrf.mxu1 }
 0x93c   : > { %v6145_v4 = vmax.f32 %v6144_v40, %v5884_v0  ;;  %v7520_v54 = vmax.f32 %v7519_v43, %v7103_v26 }
 0x93d   : > { %v6871_v15 = vpop.f32.mrf.mxu2 }
 0x93e   : > { %v7441_v42 = vmax.f32 %v7440_v6, %v6871_v15  ;;  %7142 = vmatmul.bf16.gmra.mxu1 %v20970_v59 }
 0x940   : > { %6954 = vmatmul.bf16.gmra.mxu3 %v20967_v29 }
 0x941   : > { %v7059_v45 = vpop.f32.mrf.mxu0 }
 0x942   : > { %v7507_v53 = vmax.f32 %v7506_v17, %v7059_v45 }
 0x943   : > { %v5887_v58 = vpop.f32.mrf.mxu3  ;;  %v7105_v2 = vpop.f32.mrf.mxu1 }
 0x944   : > { %v6146_v14 = vmax.f32 %v6145_v4, %v5887_v58  ;;  %v7521_v1 = vmax.f32 %v7520_v54, %v7105_v2  ;;  %8126 = vmatmul.bf16.gmra.mxu0 %v20982_v18 }
 0x945   : > { %v6873_v28 = vpop.f32.mrf.mxu2 }
 0x946   : > { %v7442_v33 = vmax.f32 %v7441_v42, %v6873_v28  ;;  %v14985_v28 = vld [vmem:[%s20881_s6 + $0xdc] sm:$0xf] }
 0x949   : > { %v7061_v63 = vpop.f32.mrf.mxu0 }
 0x94a   : > { %v7508_v55 = vmax.f32 %v7507_v53, %v7061_v63  ;;  %7191 = vmatmul.bf16.gmra.mxu2 %v16452_v7  ;;  %v13026_v63 = vor.u32 %v14985_v28, %v13023_v32 }
 0x94b   : > { %v5889_v13 = vpop.f32.mrf.mxu3  ;;  %v7108_v37 = vpop.f32.mrf.mxu1 }
 0x94c   : > { %v6147_v8 = vmax.f32 %v6146_v14, %v5889_v13  ;;  %v7522_v25 = vmax.f32 %v7521_v1, %v7108_v37  ;;  %7271 = vmatpush.bf16.msra.mxu3 %v13026_v63 }
 0x94d   : > { %v6876_v19 = vpop.f32.mrf.mxu2 }
 0x94e   : > { %v18029_v36 = vmax.f32 %v20983_v48, %v6147_v8  ;;  %v7443_v20 = vmax.f32 %v7442_v33, %v6876_v19  ;;  %7147 = vmatmul.bf16.gmra.mxu1 %v20973_v62 }
 0x950   : > { %6959 = vmatmul.bf16.gmra.mxu3 %v20969_v27 }
 0x951   : > { %v7064_v16 = vpop.f32.mrf.mxu0 }
 0x952   : > { %v7509_v40 = vmax.f32 %v7508_v55, %v7064_v16  ;;  %v13383_v16 = vld [vmem:[%s20881_s6 + $0x1e0] sm:$0xf0] }
 0x953   : > { %v6920_v43 = vpop.f32.mrf.mxu3  ;;  %v7110_v41 = vpop.f32.mrf.mxu1 }
 0x954   : > { %v7523_v6 = vmax.f32 %v7522_v25, %v7110_v41  ;;  %8131 = vmatmul.bf16.gmra.mxu0 %v20984_v60 }
 0x955   : > { %v6878_v17 = vpop.f32.mrf.mxu2 }
 0x956   : > { %v7444_v0 = vmax.f32 %v7443_v20, %v6878_v17  ;;  %v15078_v20 = vld [vmem:[%s20881_s6 + $0x1c4] sm:$0xf] }
 0x957   : > { %v13351_v17 = vld [vmem:[%s20881_s6 + $0x1a0] sm:$0xf0] }
 0x959   : > { %v7066_v26 = vpop.f32.mrf.mxu0 }
 0x95a   : > { %v7510_v4 = vmax.f32 %v7509_v40, %v7066_v26  ;;  %7196 = vmatmul.bf16.gmra.mxu2 %v20962_v35 }
 0x95b   : > { %v6922_v12 = vpop.f32.mrf.mxu3  ;;  %v7113_v46 = vpop.f32.mrf.mxu1 }
 0x95c   : > { %v7457_v54 = vmax.f32 %v6920_v43, %v6922_v12  ;;  %v7524_v15 = vmax.f32 %v7523_v6, %v7113_v46  ;;  %v13386_v43 = vor.u32 %v15078_v20, %v13383_v16  ;;  %v15070_v6 = vld [vmem:[%s20881_s6 + $0x184] sm:$0xf] }
 0x95d   : > { %v6881_v42 = vpop.f32.mrf.mxu2  ;;  %v13354_v26 = vor.u32 %v15070_v6, %v13351_v17  ;;  %v15038_v16 = vld [vmem:[%s20881_s6 + $0x84] sm:$0xf] }
 0x95e   : > { %v7445_v45 = vmax.f32 %v7444_v0, %v6881_v42  ;;  %7152 = vmatmul.bf16.gmra.mxu1 %v20974_v10  ;;  %v20986_v42 = vld [vmem:[#allocation27_spill] sm:$0xff] }
 0x95f   : > { %8197 = vmatpush.bf16.msra.mxu1 %v13386_v43 }
 0x960   : > { %6964 = vmatmul.bf16.gmra.mxu3 %v20970_v59 }
 0x961   : > { %v7069_v53 = vpop.f32.mrf.mxu0 }
 0x962   : > { %v7511_v58 = vmax.f32 %v7510_v4, %v7069_v53  ;;  %v13319_v53 = vld [vmem:[%s20881_s6 + $0x160] sm:$0xf0] }
 0x963   : > { %v6925_v2 = vpop.f32.mrf.mxu3  ;;  %v7115_v14 = vpop.f32.mrf.mxu1  ;;  %8198 = vmatpush.bf16.msra.mxu1 %v13354_v26 }
 0x964   : > { %v7458_v1 = vmax.f32 %v7457_v54, %v6925_v2  ;;  %v7525_v47 = vmax.f32 %v7524_v15, %v7115_v14  ;;  %8136 = vmatmul.bf16.gmra.mxu0 %v20985_v21 }
 0x965   : > { %v6883_v33 = vpop.f32.mrf.mxu2 }
 0x966   : > { %v7446_v55 = vmax.f32 %v7445_v45, %v6883_v33  ;;  %v15062_v45 = vld [vmem:[%s20881_s6 + $0x144] sm:$0xf] }
 0x967   : > { %v13322_v2 = vor.u32 %v15062_v45, %v13319_v53 }
 0x969   : > { %v7071_v13 = vpop.f32.mrf.mxu0  ;;  %8199 = vmatpush.bf16.msra.mxu1 %v13322_v2 }
 0x96a   : > { %v7512_v37 = vmax.f32 %v7511_v58, %v7071_v13  ;;  %7201 = vmatmul.bf16.gmra.mxu2 %v20963_v22 }
 0x96b   : > { %v6927_v8 = vpop.f32.mrf.mxu3  ;;  %v7118_v25 = vpop.f32.mrf.mxu1 }
 0x96c   : > { %v7459_v19 = vmax.f32 %v7458_v1, %v6927_v8  ;;  %v7526_v48 = vmax.f32 %v7525_v47, %v7118_v25  ;;  %v15054_v1 = vld [vmem:[%s20881_s6 + $0x104] sm:$0xf] }
 0x96d   : > { %v6886_v40 = vpop.f32.mrf.mxu2  ;;  %v13287_v47 = vld [vmem:[%s20881_s6 + $0x120] sm:$0xf0] }
 0x96e   : > { %v7447_v41 = vmax.f32 %v7446_v55, %v6886_v40  ;;  %7157 = vmatmul.bf16.gmra.mxu1 %v20975_v34  ;;  %v13290_v32 = vor.u32 %v15054_v1, %v13287_v47  ;;  %v15046_v8 = vld [vmem:[%s20881_s6 + $0xc4] sm:$0xf] }
 0x96f   : > { %v13255_v25 = vld [vmem:[%s20881_s6 + $0xe0] sm:$0xf0] }
 0x970   : > { %6969 = vmatmul.bf16.gmra.mxu3 %v20973_v62  ;;  %8200 = vmatpush.bf16.msra.mxu1 %v13290_v32  ;;  %v13223_v40 = vld [vmem:[%s20881_s6 + $0xa0] sm:$0xf0] }
 0x971   : > { %v7074_v0 = vpop.f32.mrf.mxu0  ;;  %v15022_v1 = vld [vmem:[%s20881_s6 + $0x4] sm:$0xf] }
 0x972   : > { %v7513_v4 = vmax.f32 %v7512_v37, %v7074_v0  ;;  %v13159_v47 = vld [vmem:[%s20881_s6 + $0x20] sm:$0xf0] }
 0x973   : > { %v6930_v12 = vpop.f32.mrf.mxu3  ;;  %v7120_v46 = vpop.f32.mrf.mxu1  ;;  %v13162_v32 = vor.u32 %v15022_v1, %v13159_v47 }
 0x974   : > { %v7460_v54 = vmax.f32 %v7459_v19, %v6930_v12  ;;  %v7527_v15 = vmax.f32 %v7526_v48, %v7120_v46  ;;  %8141 = vmatmul.bf16.gmra.mxu0 %v20986_v42  ;;  %v13258_v48 = vor.u32 %v15046_v8, %v13255_v25  ;;  %v20987_v12 = vld [vmem:[#allocation28_spill] sm:$0xff]  ;;  %v14977_v46 = vld [vmem:[%s20881_s6 + $0x9c] sm:$0xf] }
 0x975   : > { %v6888_v58 = vpop.f32.mrf.mxu2 }
 0x976   : > { %v7448_v14 = vmax.f32 %v7447_v41, %v6888_v58  ;;  %8201 = vmatpush.bf16.msra.mxu1 %v13258_v48  ;;  %v13226_v41 = vor.u32 %v15038_v16, %v13223_v40  ;;  %v13191_v58 = vld [vmem:[%s20881_s6 + $0x60] sm:$0xf0] }
 0x979   : > { %v7076_v28 = vpop.f32.mrf.mxu0 }
 0x97a   : > { %v7514_v33 = vmax.f32 %v7513_v4, %v7076_v28  ;;  %7206 = vmatmul.bf16.gmra.mxu2 %v20964_v5  ;;  %8202 = vmatpush.bf16.msra.mxu1 %v13226_v41  ;;  %v20988_v41 = vld [vmem:[#allocation29_spill] sm:$0xff] }
 0x97b   : > { %v6932_v63 = vpop.f32.mrf.mxu3  ;;  %v7123_v55 = vpop.f32.mrf.mxu1 }
 0x97c   : > { %v7461_v13 = vmax.f32 %v7460_v54, %v6932_v63  ;;  %v7528_v37 = vmax.f32 %v7527_v15, %v7123_v55  ;;  %v12991_v54 = vld [vmem:[%s20881_s6 + $0xb8] sm:$0xf0]  ;;  %v15030_v15 = vld [vmem:[%s20881_s6 + $0x44] sm:$0xf] }
 0x97d   : > { %v6891_v19 = vpop.f32.mrf.mxu2  ;;  %v12994_v53 = vor.u32 %v14977_v46, %v12991_v54 }
 0x97e   : > { %v7449_v20 = vmax.f32 %v7448_v14, %v6891_v19  ;;  %7162 = vmatmul.bf16.gmra.mxu1 %v20976_v23  ;;  %v13194_v14 = vor.u32 %v15030_v15, %v13191_v58 }
 0x97f   : > { %7272 = vmatpush.bf16.msra.mxu3 %v12994_v53 }
 0x980   : > { %6974 = vmatmul.bf16.gmra.mxu3 %v20974_v10  ;;  %8203 = vmatpush.bf16.msra.mxu1 %v13194_v14 }
 0x981   : > { %v7079_v43 = vpop.f32.mrf.mxu0 }
 0x982   : > { %v7515_v6 = vmax.f32 %v7514_v33, %v7079_v43 }
 0x983   : > { %v6935_v17 = vpop.f32.mrf.mxu3  ;;  %v7125_v0 = vpop.f32.mrf.mxu1 }
 0x984   : > { %v7462_v26 = vmax.f32 %v7461_v13, %v6935_v17  ;;  %v7529_v4 = vmax.f32 %v7528_v37, %v7125_v0  ;;  %8146 = vmatmul.bf16.gmra.mxu0 %v20987_v12  ;;  %8204 = vmatpush.bf16.msra.mxu1 %v13162_v32  ;;  %v20989_v32 = vld [vmem:[#allocation31_spill] sm:$0xff] }
 0x985   : > { %v6893_v45 = vpop.f32.mrf.mxu2 }
 0x986   : > { %v7450_v2 = vmax.f32 %v7449_v20, %v6893_v45 }
 0x989   : > { %v7081_v28 = vpop.f32.mrf.mxu0 }
 0x98a   : > { %v7516_v33 = vmax.f32 %v7515_v6, %v7081_v28  ;;  %7211 = vmatmul.bf16.gmra.mxu2 %v20965_v61 }
 0x98b   : > { %v6937_v63 = vpop.f32.mrf.mxu3  ;;  %v7128_v55 = vpop.f32.mrf.mxu1 }
 0x98c   : > { %v7463_v13 = vmax.f32 %v7462_v26, %v6937_v63  ;;  %v7530_v37 = vmax.f32 %v7529_v4, %v7128_v55 }
 0x98d   : > { %v6896_v8 = vpop.f32.mrf.mxu2 }
 0x98e   : > { %v7451_v25 = vmax.f32 %v7450_v2, %v6896_v8  ;;  %7167 = vmatmul.bf16.gmra.mxu1 %v20977_v44 }
 0x990   : > { %6979 = vmatmul.bf16.gmra.mxu3 %v20975_v34 }
 0x991   : > { %v7084_v19 = vpop.f32.mrf.mxu0 }
 0x992   : > { %v7517_v48 = vmax.f32 %v7516_v33, %v7084_v19  ;;  %v12959_v33 = vld [vmem:[%s20881_s6 + $0x78] sm:$0xf0] }
 0x993   : > { %v6940_v20 = vpop.f32.mrf.mxu3  ;;  %v7130_v16 = vpop.f32.mrf.mxu1  ;;  %v12927_v19 = vld [vmem:[%s20881_s6 + $0x38] sm:$0xf0] }
 0x994   : > { %v7464_v40 = vmax.f32 %v7463_v13, %v6940_v20  ;;  %v7531_v43 = vmax.f32 %v7530_v37, %v7130_v16  ;;  %8151 = vmatmul.bf16.gmra.mxu0 %v20988_v41 }
 0x995   : > { %v6898_v6 = vpop.f32.mrf.mxu2 }
 0x996   : > { %v7452_v17 = vmax.f32 %v7451_v25, %v6898_v6  ;;  %v14961_v25 = vld [vmem:[%s20881_s6 + $0x1c] sm:$0xf] }
 0x997   : > { %v12930_v16 = vor.u32 %v14961_v25, %v12927_v19 }
 0x999   : > { %v7086_v0 = vpop.f32.mrf.mxu0 }
 0x99a   : > { %v7518_v26 = vmax.f32 %v7517_v48, %v7086_v0  ;;  %7216 = vmatmul.bf16.gmra.mxu2 %v20966_v39 }
 0x99b   : > { %v6942_v4 = vpop.f32.mrf.mxu3  ;;  %v7133_v46 = vpop.f32.mrf.mxu1 }
 0x99c   : > { %v18112_v54 = vmax.f32 %v17566_v50, %v7518_v26  ;;  %v7465_v15 = vmax.f32 %v7464_v40, %v6942_v4  ;;  %v7532_v45 = vmax.f32 %v7531_v43, %v7133_v46  ;;  %v14969_v50 = vld [vmem:[%s20881_s6 + $0x5c] sm:$0xf] }
 0x99d   : > { %v6901_v53 = vpop.f32.mrf.mxu2  ;;  %v12962_v55 = vor.u32 %v14969_v50, %v12959_v33 }
 0x99e   : > { %v7453_v58 = vmax.f32 %v7452_v17, %v6901_v53  ;;  %7172 = vmatmul.bf16.gmra.mxu1 %v20978_v9  ;;  %v20990_v53 = vld [vmem:[#allocation32_spill] sm:$0xff] }
 0x99f   : > { %7273 = vmatpush.bf16.msra.mxu3 %v12962_v55 }
 0x9a0   : > { %6984 = vmatmul.bf16.gmra.mxu3 %v20976_v23 }
 0x9a1   : > { %v8117_v2 = vpop.f32.mrf.mxu0 }
 0x9a3   : > { %v6945_v14 = vpop.f32.mrf.mxu3  ;;  %v7135_v1 = vpop.f32.mrf.mxu1  ;;  %7274 = vmatpush.bf16.msra.mxu3 %v12930_v16 }
 0x9a4   : > { %v7466_v47 = vmax.f32 %v7465_v15, %v6945_v14  ;;  %v7533_v28 = vmax.f32 %v7532_v45, %v7135_v1  ;;  %8156 = vmatmul.bf16.gmra.mxu0 %v20989_v32 }
 0x9a5   : > { %v6903_v63 = vpop.f32.mrf.mxu2 }
 0x9a6   : > { %v7454_v13 = vmax.f32 %v7453_v58, %v6903_v63 }
 0x9a9   : > { %v8119_v37 = vpop.f32.mrf.mxu0 }
 0x9aa   : > { %v8828_v8 = vmax.f32 %v8117_v2, %v8119_v37  ;;  %7221 = vmatmul.bf16.gmra.mxu2 %v20967_v29 }
 0x9ab   : > { %v6947_v48 = vpop.f32.mrf.mxu3  ;;  %v7138_v20 = vpop.f32.mrf.mxu1 }
 0x9ac   : > { %v7467_v40 = vmax.f32 %v7466_v47, %v6947_v48  ;;  %v7534_v43 = vmax.f32 %v7533_v28, %v7138_v20  ;;  %v20991_v48 = vld [vmem:[#allocation33_spill] sm:$0xff] }
 0x9ad   : > { %v6906_v6 = vpop.f32.mrf.mxu2 }
 0x9ae   : > { %v7455_v17 = vmax.f32 %v7454_v13, %v6906_v6  ;;  %8205 = vmatmul.bf16.vlgmr.msra.gmra.mxu1 %v20980_v38 }
 0x9b0   : > { %6989 = vmatmul.bf16.gmra.mxu3 %v20977_v44 }
 0x9b1   : > { %v8122_v0 = vpop.f32.mrf.mxu0 }
 0x9b2   : > { %v8829_v26 = vmax.f32 %v8828_v8, %v8122_v0 }
 0x9b3   : > { %v6950_v4 = vpop.f32.mrf.mxu3  ;;  %v7140_v46 = vpop.f32.mrf.mxu1 }
 0x9b4   : > { %v7468_v15 = vmax.f32 %v7467_v40, %v6950_v4  ;;  %v7535_v45 = vmax.f32 %v7534_v43, %v7140_v46  ;;  %8161 = vmatmul.bf16.gmra.mxu0 %v20990_v53 }
 0x9b5   : > { %v6908_v58 = vpop.f32.mrf.mxu2 }
 0x9b6   : > { %v7456_v2 = vmax.f32 %v7455_v17, %v6908_v58 }
 0x9b8   : > { %v18134_v14 = vmax.f32 %v17590_v31, %v7456_v2 }
 0x9b9   : > { %v8124_v1 = vpop.f32.mrf.mxu0 }
 0x9ba   : > { %v8830_v47 = vmax.f32 %v8829_v26, %v8124_v1  ;;  %7226 = vmatmul.bf16.gmra.mxu2 %v20969_v27 }
 0x9bb   : > { %v6952_v28 = vpop.f32.mrf.mxu3  ;;  %v7143_v50 = vpop.f32.mrf.mxu1 }
 0x9bc   : > { %v7469_v33 = vmax.f32 %v7468_v15, %v6952_v28  ;;  %v7536_v63 = vmax.f32 %v7535_v45, %v7143_v50  ;;  %v20992_v28 = vld [vmem:[#allocation34_spill] sm:$0xff] }
 0x9bd   : > { %v7187_v55 = vpop.f32.mrf.mxu2 }
 0x9be   : > { %8210 = vmatmul.bf16.gmra.mxu1 %v20981_v11 }
 0x9c0   : > { %6994 = vmatmul.bf16.gmra.mxu3 %v20978_v9 }
 0x9c1   : > { %v8127_v13 = vpop.f32.mrf.mxu0 }
 0x9c2   : > { %v8831_v37 = vmax.f32 %v8830_v47, %v8127_v13 }
 0x9c3   : > { %v6955_v8 = vpop.f32.mrf.mxu3  ;;  %v7145_v25 = vpop.f32.mrf.mxu1 }
 0x9c4   : > { %v7470_v19 = vmax.f32 %v7469_v33, %v6955_v8  ;;  %v7537_v31 = vmax.f32 %v7536_v63, %v7145_v25  ;;  %8166 = vmatmul.bf16.gmra.mxu0 %v20991_v48 }
 0x9c5   : > { %v7189_v20 = vpop.f32.mrf.mxu2 }
 0x9c6   : > { %v7550_v16 = vmax.f32 %v7187_v55, %v7189_v20 }
 0x9c9   : > { %v8129_v40 = vpop.f32.mrf.mxu0 }
 0x9ca   : > { %v8832_v43 = vmax.f32 %v8831_v37, %v8129_v40  ;;  %7231 = vmatmul.bf16.gmra.mxu2 %v20970_v59  ;;  %v15083_v40 = vld [vmem:[%s20881_s6 + $0x1e4] sm:$0xf0] }
 0x9cb   : > { %v6957_v6 = vpop.f32.mrf.mxu3  ;;  %v7148_v17 = vpop.f32.mrf.mxu1 }
 0x9cc   : > { %v7471_v0 = vmax.f32 %v7470_v19, %v6957_v6  ;;  %v7538_v26 = vmax.f32 %v7537_v31, %v7148_v17 }
 0x9cd   : > { %v7192_v4 = vpop.f32.mrf.mxu2 }
 0x9ce   : > { %v7551_v46 = vmax.f32 %v7550_v16, %v7192_v4  ;;  %8215 = vmatmul.bf16.gmra.mxu1 %v20982_v18  ;;  %v13389_v16 = vld [vmem:[%s20881_s6 + $0x1c8] sm:$0xf] }
 0x9d0   : > { %7275 = vmatmul.bf16.vlgmr.msra.gmra.mxu3 %v16441_v3 }
 0x9d1   : > { %v8132_v15 = vpop.f32.mrf.mxu0 }
 0x9d2   : > { %v8833_v45 = vmax.f32 %v8832_v43, %v8132_v15  ;;  %v13397_v43 = vld [vmem:[%s20881_s6 + $0x1d0] sm:$0xf]  ;;  %v15079_v15 = vld [vmem:[%s20881_s6 + $0x1cc] sm:$0xf] }
 0x9d3   : > { %v6960_v58 = vpop.f32.mrf.mxu3  ;;  %v7150_v2 = vpop.f32.mrf.mxu1 }
 0x9d4   : > { %v7472_v1 = vmax.f32 %v7471_v0, %v6960_v58  ;;  %v7539_v47 = vmax.f32 %v7538_v26, %v7150_v2  ;;  %8171 = vmatmul.bf16.gmra.mxu0 %v20992_v28  ;;  %v13390_v0 = vor.u32 %v15083_v40, %v13389_v16 }
 0x9d5   : > { %v7194_v50 = vpop.f32.mrf.mxu2 }
 0x9d6   : > { %v7552_v33 = vmax.f32 %v7551_v46, %v7194_v50  ;;  %v20993_v46 = vld [vmem:[#allocation35_spill] sm:$0xff]  ;;  %8286 = vmatpush.bf16.msra.mxu2 %v13390_v0  ;;  %v13365_v50 = vld [vmem:[%s20881_s6 + $0x190] sm:$0xf] }
 0x9d9   : > { %v8134_v63 = vpop.f32.mrf.mxu0 }
 0x9da   : > { %v8834_v55 = vmax.f32 %v8833_v45, %v8134_v63  ;;  %7236 = vmatmul.bf16.gmra.mxu2 %v20973_v62  ;;  %v13391_v45 = vld [vmem:[%s20881_s6 + $0x1e8] sm:$0xf0] }
 0x9db   : > { %v6962_v13 = vpop.f32.mrf.mxu3  ;;  %v7153_v37 = vpop.f32.mrf.mxu1 }
 0x9dc   : > { %v7473_v8 = vmax.f32 %v7472_v1, %v6962_v13  ;;  %v7540_v25 = vmax.f32 %v7539_v47, %v7153_v37  ;;  %v13394_v1 = vor.u32 %v15079_v15, %v13391_v45  ;;  %v13333_v37 = vld [vmem:[%s20881_s6 + $0x150] sm:$0xf] }
 0x9dd   : > { %v7197_v19 = vpop.f32.mrf.mxu2 }
 0x9de   : > { %v7553_v3 = vmax.f32 %v7552_v33, %v7197_v19  ;;  %8220 = vmatmul.bf16.gmra.mxu1 %v20984_v60  ;;  %v15076_v33 = vld [vmem:[%s20881_s6 + $0x1ac] sm:$0xf0]  ;;  %8375 = vmatpush.bf16.msrb.mxu3 %v13394_v1 }
 0x9df   : > { %v13366_v63 = vor.u32 %v15076_v33, %v13365_v50  ;;  %v13237_v33 = vld [vmem:[%s20881_s6 + $0x90] sm:$0xf] }
 0x9e0   : > { %7280 = vmatmul.bf16.gmra.mxu3 %v16452_v7  ;;  %v15084_v7 = vld [vmem:[%s20881_s6 + $0x1ec] sm:$0xf0] }
 0x9e1   : > { %v8137_v31 = vpop.f32.mrf.mxu0  ;;  %v13398_v58 = vor.u32 %v15084_v7, %v13397_v43 }
 0x9e2   : > { %v8835_v20 = vmax.f32 %v8834_v55, %v8137_v31 }
 0x9e3   : > { %v6965_v6 = vpop.f32.mrf.mxu3  ;;  %v7155_v17 = vpop.f32.mrf.mxu1  ;;  %8464 = vmatpush.bf16.msrb.mxu0 %v13398_v58 }
 0x9e4   : > { %v7474_v26 = vmax.f32 %v7473_v8, %v6965_v6  ;;  %v7541_v4 = vmax.f32 %v7540_v25, %v7155_v17  ;;  %8176 = vmatmul.bf16.gmra.mxu0 %v20993_v46  ;;  %v15068_v8 = vld [vmem:[%s20881_s6 + $0x16c] sm:$0xf0] }
 0x9e5   : > { %v7199_v2 = vpop.f32.mrf.mxu2  ;;  %v15060_v6 = vld [vmem:[%s20881_s6 + $0x12c] sm:$0xf0] }
 0x9e6   : > { %v7554_v47 = vmax.f32 %v7553_v3, %v7199_v2  ;;  %v13334_v3 = vor.u32 %v15068_v8, %v13333_v37  ;;  %v13205_v8 = vld [vmem:[%s20881_s6 + $0x50] sm:$0xf] }
 0x9e7   : > { %8465 = vmatpush.bf16.msrb.mxu0 %v13366_v63  ;;  %v15044_v63 = vld [vmem:[%s20881_s6 + $0xac] sm:$0xf0] }
 0x9e9   : > { %v8139_v55 = vpop.f32.mrf.mxu0 }
 0x9ea   : > { %v8836_v13 = vmax.f32 %v8835_v20, %v8139_v55  ;;  %7241 = vmatmul.bf16.gmra.mxu2 %v20974_v10  ;;  %v13301_v20 = vld [vmem:[%s20881_s6 + $0x110] sm:$0xf]  ;;  %v13238_v55 = vor.u32 %v15044_v63, %v13237_v33 }
 0x9eb   : > { %v6967_v25 = vpop.f32.mrf.mxu3  ;;  %v7158_v19 = vpop.f32.mrf.mxu1  ;;  %8466 = vmatpush.bf16.msrb.mxu0 %v13334_v3  ;;  %v13302_v17 = vor.u32 %v15060_v6, %v13301_v20  ;;  %v15075_v20 = vld [vmem:[%s20881_s6 + $0x1a4] sm:$0xf0] }
 0x9ec   : > { %v7475_v31 = vmax.f32 %v7474_v26, %v6967_v25  ;;  %v7542_v16 = vmax.f32 %v7541_v4, %v7158_v19  ;;  %v13269_v26 = vld [vmem:[%s20881_s6 + $0xd0] sm:$0xf] }
 0x9ed   : > { %v7202_v40 = vpop.f32.mrf.mxu2  ;;  %v15052_v4 = vld [vmem:[%s20881_s6 + $0xec] sm:$0xf0] }
 0x9ee   : > { %v7555_v43 = vmax.f32 %v7554_v47, %v7202_v40  ;;  %8225 = vmatmul.bf16.gmra.mxu1 %v20985_v21  ;;  %v13270_v58 = vor.u32 %v15052_v4, %v13269_v26  ;;  %v20994_v47 = vld [vmem:[#allocation36_spill] sm:$0xff]  ;;  %v15036_v25 = vld [vmem:[%s20881_s6 + $0x6c] sm:$0xf0] }
 0x9ef   : > { %8467 = vmatpush.bf16.msrb.mxu0 %v13302_v17  ;;  %v15028_v26 = vld [vmem:[%s20881_s6 + $0x2c] sm:$0xf0] }
 0x9f0   : > { %7285 = vmatmul.bf16.gmra.mxu3 %v20962_v35 }
 0x9f1   : > { %v8142_v0 = vpop.f32.mrf.mxu0 }
 0x9f2   : > { %v8837_v7 = vmax.f32 %v8836_v13, %v8142_v0 }
 0x9f3   : > { %v6970_v15 = vpop.f32.mrf.mxu3  ;;  %v7160_v45 = vpop.f32.mrf.mxu1  ;;  %8468 = vmatpush.bf16.msrb.mxu0 %v13270_v58 }
 0x9f4   : > { %v7476_v2 = vmax.f32 %v7475_v31, %v6970_v15  ;;  %v7543_v1 = vmax.f32 %v7542_v16, %v7160_v45  ;;  %8181 = vmatmul.bf16.gmra.mxu0 %v20994_v47  ;;  %v13206_v31 = vor.u32 %v15036_v25, %v13205_v8  ;;  %v13325_v15 = vld [vmem:[%s20881_s6 + $0x148] sm:$0xf] }
 0x9f5   : > { %v7204_v50 = vpop.f32.mrf.mxu2  ;;  %v15067_v45 = vld [vmem:[%s20881_s6 + $0x164] sm:$0xf0] }
 0x9f6   : > { %v7556_v35 = vmax.f32 %v7555_v43, %v7204_v50  ;;  %v13357_v43 = vld [vmem:[%s20881_s6 + $0x188] sm:$0xf] }
 0x9f7   : > { %8469 = vmatpush.bf16.msrb.mxu0 %v13238_v55  ;;  %v13358_v17 = vor.u32 %v15075_v20, %v13357_v43  ;;  %v15059_v55 = vld [vmem:[%s20881_s6 + $0x124] sm:$0xf0] }
 0x9f9   : > { %v8144_v13 = vpop.f32.mrf.mxu0  ;;  %8287 = vmatpush.bf16.msra.mxu2 %v13358_v17 }
 0x9fa   : > { %v8838_v37 = vmax.f32 %v8837_v7, %v8144_v13  ;;  %7246 = vmatmul.bf16.gmra.mxu2 %v20975_v34  ;;  %v13173_v7 = vld [vmem:[%s20881_s6 + $0x10] sm:$0xf] }
 0x9fb   : > { %v6972_v19 = vpop.f32.mrf.mxu3  ;;  %v7163_v3 = vpop.f32.mrf.mxu1  ;;  %8470 = vmatpush.bf16.msrb.mxu0 %v13206_v31  ;;  %v13174_v4 = vor.u32 %v15028_v26, %v13173_v7  ;;  %v13261_v31 = vld [vmem:[%s20881_s6 + $0xc8] sm:$0xf] }
 0x9fc   : > { %v7477_v16 = vmax.f32 %v7476_v2, %v6972_v19  ;;  %v7544_v40 = vmax.f32 %v7543_v1, %v7163_v3  ;;  %v13326_v2 = vor.u32 %v15067_v45, %v13325_v15  ;;  %v13359_v19 = vld [vmem:[%s20881_s6 + $0x1a8] sm:$0xf0]  ;;  %v13229_v26 = vld [vmem:[%s20881_s6 + $0x88] sm:$0xf] }
 0x9fd   : > { %v7207_v6 = vpop.f32.mrf.mxu2 }
 0x9fe   : > { %v7557_v0 = vmax.f32 %v7556_v35, %v7207_v6  ;;  %8230 = vmatmul.bf16.gmra.mxu1 %v20986_v42  ;;  %8288 = vmatpush.bf16.msra.mxu2 %v13326_v2  ;;  %v13197_v2 = vld [vmem:[%s20881_s6 + $0x48] sm:$0xf] }
 0x9ff   : > { %8471 = vmatpush.bf16.msrb.mxu0 %v13174_v4  ;;  %v15043_v4 = vld [vmem:[%s20881_s6 + $0xa4] sm:$0xf0] }
 0xa00   : > { %7290 = vmatmul.bf16.gmra.mxu3 %v20963_v22  ;;  %v13293_v22 = vld [vmem:[%s20881_s6 + $0x108] sm:$0xf]  ;;  %v13230_v45 = vor.u32 %v15043_v4, %v13229_v26 }
 0xa01   : > { %v8147_v58 = vpop.f32.mrf.mxu0  ;;  %v13294_v8 = vor.u32 %v15059_v55, %v13293_v22 }
 0xa02   : > { %v8839_v1 = vmax.f32 %v8838_v37, %v8147_v58  ;;  %v15071_v37 = vld [vmem:[%s20881_s6 + $0x18c] sm:$0xf] }
 0xa03   : > { %v6975_v50 = vpop.f32.mrf.mxu3  ;;  %v7165_v35 = vpop.f32.mrf.mxu1  ;;  %v13362_v3 = vor.u32 %v15071_v37, %v13359_v19  ;;  %8289 = vmatpush.bf16.msra.mxu2 %v13294_v8  ;;  %v15027_v8 = vld [vmem:[%s20881_s6 + $0x24] sm:$0xf0] }
 0xa04   : > { %v7478_v33 = vmax.f32 %v7477_v16, %v6975_v50  ;;  %v7545_v63 = vmax.f32 %v7544_v40, %v7165_v35  ;;  %8186 = vmatmul.bf16.gmra.mxu0 %v17027_v30  ;;  %v15051_v16 = vld [vmem:[%s20881_s6 + $0xe4] sm:$0xf0] }
 0xa05   : > { %v7209_v13 = vpop.f32.mrf.mxu2  ;;  %8376 = vmatpush.bf16.msrb.mxu3 %v13362_v3  ;;  %v13262_v43 = vor.u32 %v15051_v16, %v13261_v31 }
 0xa06   : > { %v7558_v25 = vmax.f32 %v7557_v0, %v7209_v13 }
 0xa07   : > { %8290 = vmatpush.bf16.msra.mxu2 %v13262_v43 }
 0xa09   : > { %v8149_v40 = vpop.f32.mrf.mxu0 }
 0xa0a   : > { %v8840_v20 = vmax.f32 %v8839_v1, %v8149_v40  ;;  %7251 = vmatmul.bf16.gmra.mxu2 %v20976_v23  ;;  %v15035_v1 = vld [vmem:[%s20881_s6 + $0x64] sm:$0xf0] }
 0xa0b   : > { %v6977_v6 = vpop.f32.mrf.mxu3  ;;  %v7168_v17 = vpop.f32.mrf.mxu1  ;;  %8291 = vmatpush.bf16.msra.mxu2 %v13230_v45  ;;  %v13198_v35 = vor.u32 %v15035_v1, %v13197_v2  ;;  %v13327_v2 = vld [vmem:[%s20881_s6 + $0x168] sm:$0xf0] }
 0xa0c   : > { %v7479_v0 = vmax.f32 %v7478_v33, %v6977_v6  ;;  %v7546_v7 = vmax.f32 %v7545_v63, %v7168_v17 }
 0xa0d   : > { %v7212_v15 = vpop.f32.mrf.mxu2 }
 0xa0e   : > { %v7559_v58 = vmax.f32 %v7558_v25, %v7212_v15  ;;  %8235 = vmatmul.bf16.gmra.mxu1 %v20987_v12 }
 0xa0f   : > { %8292 = vmatpush.bf16.msra.mxu2 %v13198_v35 }
 0xa10   : > { %7295 = vmatmul.bf16.gmra.mxu3 %v20964_v5  ;;  %v13165_v5 = vld [vmem:[%s20881_s6 + $0x8] sm:$0xf] }
 0xa11   : > { %v8152_v50 = vpop.f32.mrf.mxu0  ;;  %v13166_v37 = vor.u32 %v15027_v8, %v13165_v5 }
 0xa12   : > { %v8841_v33 = vmax.f32 %v8840_v20, %v8152_v50 }
 0xa13   : > { %v6980_v63 = vpop.f32.mrf.mxu3  ;;  %v7170_v22 = vpop.f32.mrf.mxu1  ;;  %8293 = vmatpush.bf16.msra.mxu2 %v13166_v37 }
 0xa14   : > { %v7480_v55 = vmax.f32 %v7479_v0, %v6980_v63  ;;  %v7547_v13 = vmax.f32 %v7546_v7, %v7170_v22  ;;  %8191 = vmatmul.bf16.gmra.mxu0 %v17035_v24 }
 0xa15   : > { %v7214_v25 = vpop.f32.mrf.mxu2 }
 0xa16   : > { %v7560_v19 = vmax.f32 %v7559_v58, %v7214_v25  ;;  %v15063_v58 = vld [vmem:[%s20881_s6 + $0x14c] sm:$0xf] }
 0xa17   : > { %v13330_v50 = vor.u32 %v15063_v58, %v13327_v2 }
 0xa19   : > { %v8154_v3 = vpop.f32.mrf.mxu0  ;;  %8377 = vmatpush.bf16.msrb.mxu3 %v13330_v50  ;;  %v15055_v50 = vld [vmem:[%s20881_s6 + $0x10c] sm:$0xf] }
 0xa1a   : > { %v8842_v31 = vmax.f32 %v8841_v33, %v8154_v3  ;;  %7256 = vmatmul.bf16.gmra.mxu2 %v20977_v44 }
 0xa1b   : > { %v6982_v16 = vpop.f32.mrf.mxu3  ;;  %v7173_v40 = vpop.f32.mrf.mxu1 }
 0xa1c   : > { %v7481_v43 = vmax.f32 %v7480_v55, %v6982_v16  ;;  %v7548_v20 = vmax.f32 %v7547_v13, %v7173_v40 }
 0xa1d   : > { %v7217_v6 = vpop.f32.mrf.mxu2 }
 0xa1e   : > { %v7561_v17 = vmax.f32 %v7560_v19, %v7217_v6  ;;  %8240 = vmatmul.bf16.gmra.mxu1 %v20988_v41 }
 0xa20   : > { %7300 = vmatmul.bf16.gmra.mxu3 %v20965_v61 }
 0xa21   : > { %v8157_v0 = vpop.f32.mrf.mxu0 }
 0xa22   : > { %v8843_v7 = vmax.f32 %v8842_v31, %v8157_v0 }
 0xa23   : > { %v6985_v26 = vpop.f32.mrf.mxu3  ;;  %v7175_v4 = vpop.f32.mrf.mxu1 }
 0xa24   : > { %v7482_v15 = vmax.f32 %v7481_v43, %v6985_v26  ;;  %v7549_v45 = vmax.f32 %v7548_v20, %v7175_v4  ;;  %8472 = vmatmul.bf16.vlgmr.msrb.gmra.mxu0 %v20980_v38 }
 0xa25   : > { %v7219_v1 = vpop.f32.mrf.mxu2 }
 0xa26   : > { %v18279_v61 = vmax.f32 %v17737_v52, %v7549_v45  ;;  %v7562_v35 = vmax.f32 %v7561_v17, %v7219_v1 }
 0xa29   : > { %v8159_v33 = vpop.f32.mrf.mxu0 }
 0xa2a   : > { %v8844_v63 = vmax.f32 %v8843_v7, %v8159_v33  ;;  %7261 = vmatmul.bf16.gmra.mxu2 %v20978_v9 }
 0xa2b   : > { %v6987_v22 = vpop.f32.mrf.mxu3  ;;  %v8206_v55 = vpop.f32.mrf.mxu1 }
 0xa2c   : > { %v7483_v13 = vmax.f32 %v7482_v15, %v6987_v22 }
 0xa2d   : > { %v7222_v5 = vpop.f32.mrf.mxu2 }
 0xa2e   : > { %v7563_v8 = vmax.f32 %v7562_v35, %v7222_v5  ;;  %8245 = vmatmul.bf16.gmra.mxu1 %v20989_v32  ;;  %v13295_v35 = vld [vmem:[%s20881_s6 + $0x128] sm:$0xf0] }
 0xa30   : > { %7305 = vmatmul.bf16.gmra.mxu3 %v20966_v39 }
 0xa31   : > { %v8162_v25 = vpop.f32.mrf.mxu0 }
 0xa32   : > { %v8845_v37 = vmax.f32 %v8844_v63, %v8162_v25  ;;  %v13298_v63 = vor.u32 %v15055_v50, %v13295_v35  ;;  %v15047_v35 = vld [vmem:[%s20881_s6 + $0xcc] sm:$0xf] }
 0xa33   : > { %v6990_v19 = vpop.f32.mrf.mxu3  ;;  %v8208_v52 = vpop.f32.mrf.mxu1 }
 0xa34   : > { %v7484_v3 = vmax.f32 %v7483_v13, %v6990_v19  ;;  %v8859_v31 = vmax.f32 %v8206_v55, %v8208_v52  ;;  %8477 = vmatmul.bf16.gmra.mxu0 %v20981_v11  ;;  %8378 = vmatpush.bf16.msrb.mxu3 %v13298_v63 }
 0xa35   : > { %v7224_v16 = vpop.f32.mrf.mxu2 }
 0xa36   : > { %v7564_v40 = vmax.f32 %v7563_v8, %v7224_v16 }
 0xa39   : > { %v8164_v43 = vpop.f32.mrf.mxu0 }
 0xa3a   : > { %v8846_v20 = vmax.f32 %v8845_v37, %v8164_v43  ;;  %8294 = vmatmul.bf16.vlgmr.msra.gmra.mxu2 %v20980_v38 }
 0xa3b   : > { %v6992_v6 = vpop.f32.mrf.mxu3  ;;  %v8211_v17 = vpop.f32.mrf.mxu1 }
 0xa3c   : > { %v7485_v0 = vmax.f32 %v7484_v3, %v6992_v6  ;;  %v8860_v7 = vmax.f32 %v8859_v31, %v8211_v17 }
 0xa3d   : > { %v7227_v26 = vpop.f32.mrf.mxu2 }
 0xa3e   : > { %v7565_v39 = vmax.f32 %v7564_v40, %v7227_v26  ;;  %8250 = vmatmul.bf16.gmra.mxu1 %v20990_v53 }
 0xa40   : > { %7310 = vmatmul.bf16.gmra.mxu3 %v20967_v29 }
 0xa41   : > { %v8167_v4 = vpop.f32.mrf.mxu0 }
 0xa42   : > { %v8847_v15 = vmax.f32 %v8846_v20, %v8167_v4 }
 0xa43   : > { %v6995_v45 = vpop.f32.mrf.mxu3  ;;  %v8213_v58 = vpop.f32.mrf.mxu1 }
 0xa44   : > { %v7486_v2 = vmax.f32 %v7485_v0, %v6995_v45  ;;  %v8861_v1 = vmax.f32 %v8860_v7, %v8213_v58  ;;  %8482 = vmatmul.bf16.gmra.mxu0 %v20982_v18 }
 0xa45   : > { %v7229_v33 = vpop.f32.mrf.mxu2 }
 0xa46   : > { %v7566_v22 = vmax.f32 %v7565_v39, %v7229_v33  ;;  %v13263_v33 = vld [vmem:[%s20881_s6 + $0xe8] sm:$0xf0] }
 0xa49   : > { %v8169_v29 = vpop.f32.mrf.mxu0 }
 0xa4a   : > { %v8848_v55 = vmax.f32 %v8847_v15, %v8169_v29  ;;  %8299 = vmatmul.bf16.gmra.mxu2 %v20981_v11 }
 0xa4b   : > { %v6997_v13 = vpop.f32.mrf.mxu3  ;;  %v8216_v5 = vpop.f32.mrf.mxu1 }
 0xa4c   : > { %v7487_v8 = vmax.f32 %v7486_v2, %v6997_v13  ;;  %v8862_v25 = vmax.f32 %v8861_v1, %v8216_v5 }
 0xa4d   : > { %v7232_v37 = vpop.f32.mrf.mxu2 }
 0xa4e   : > { %v18297_v19 = vmax.f32 %v17757_v49, %v7487_v8  ;;  %v7567_v52 = vmax.f32 %v7566_v22, %v7232_v37  ;;  %8255 = vmatmul.bf16.gmra.mxu1 %v20991_v48  ;;  %v13266_v22 = vor.u32 %v15047_v35, %v13263_v33  ;;  %v15080_v37 = vld [vmem:[%s20881_s6 + $0x1d4] sm:$0xf] }
 0xa50   : > { %7315 = vmatmul.bf16.gmra.mxu3 %v20969_v27 }
 0xa51   : > { %v8172_v3 = vpop.f32.mrf.mxu0  ;;  %8379 = vmatpush.bf16.msrb.mxu3 %v13266_v22 }
 0xa52   : > { %v8849_v31 = vmax.f32 %v8848_v55, %v8172_v3 }
 0xa53   : > { %v7276_v16 = vpop.f32.mrf.mxu3  ;;  %v8218_v40 = vpop.f32.mrf.mxu1 }
 0xa54   : > { %v8863_v43 = vmax.f32 %v8862_v25, %v8218_v40  ;;  %8487 = vmatmul.bf16.gmra.mxu0 %v20984_v60  ;;  %v15072_v40 = vld [vmem:[%s20881_s6 + $0x194] sm:$0xf] }
 0xa55   : > { %v7234_v20 = vpop.f32.mrf.mxu2 }
 0xa56   : > { %v7568_v6 = vmax.f32 %v7567_v52, %v7234_v20  ;;  %v13399_v52 = vld [vmem:[%s20881_s6 + $0x1f0] sm:$0xf0] }
 0xa59   : > { %v8174_v17 = vpop.f32.mrf.mxu0 }
 0xa5a   : > { %v8850_v0 = vmax.f32 %v8849_v31, %v8174_v17  ;;  %8304 = vmatmul.bf16.gmra.mxu2 %v20982_v18  ;;  %v13402_v31 = vor.u32 %v15080_v37, %v13399_v52 }
 0xa5b   : > { %v7278_v49 = vpop.f32.mrf.mxu3  ;;  %v8221_v7 = vpop.f32.mrf.mxu1 }
 0xa5c   : > { %v7581_v26 = vmax.f32 %v7276_v16, %v7278_v49  ;;  %v8864_v39 = vmax.f32 %v8863_v43, %v8221_v7  ;;  %8553 = vmatpush.bf16.msrb.mxu1 %v13402_v31  ;;  %v13367_v43 = vld [vmem:[%s20881_s6 + $0x1b0] sm:$0xf0] }
 0xa5d   : > { %v7237_v4 = vpop.f32.mrf.mxu2 }
 0xa5e   : > { %v7569_v15 = vmax.f32 %v7568_v6, %v7237_v4  ;;  %8260 = vmatmul.bf16.gmra.mxu1 %v20992_v28  ;;  %v13370_v6 = vor.u32 %v15072_v40, %v13367_v43 }
 0xa60   : > { %7320 = vmatmul.bf16.gmra.mxu3 %v20970_v59  ;;  %8554 = vmatpush.bf16.msrb.mxu1 %v13370_v6 }
 0xa61   : > { %v8177_v27 = vpop.f32.mrf.mxu0 }
 0xa62   : > { %v8851_v45 = vmax.f32 %v8850_v0, %v8177_v27 }
 0xa63   : > { %v7281_v58 = vpop.f32.mrf.mxu3  ;;  %v8223_v2 = vpop.f32.mrf.mxu1 }
 0xa64   : > { %v7582_v1 = vmax.f32 %v7581_v26, %v7281_v58  ;;  %v8865_v50 = vmax.f32 %v8864_v39, %v8223_v2  ;;  %8492 = vmatmul.bf16.gmra.mxu0 %v20985_v21  ;;  %v13335_v39 = vld [vmem:[%s20881_s6 + $0x170] sm:$0xf0] }
 0xa65   : > { %v7239_v63 = vpop.f32.mrf.mxu2  ;;  %v13303_v58 = vld [vmem:[%s20881_s6 + $0x130] sm:$0xf0] }
 0xa66   : > { %v7570_v29 = vmax.f32 %v7569_v15, %v7239_v63 }
 0xa69   : > { %v8179_v59 = vpop.f32.mrf.mxu0 }
 0xa6a   : > { %v8852_v55 = vmax.f32 %v8851_v45, %v8179_v59  ;;  %8309 = vmatmul.bf16.gmra.mxu2 %v20984_v60  ;;  %v15056_v45 = vld [vmem:[%s20881_s6 + $0x114] sm:$0xf] }
 0xa6b   : > { %v7283_v13 = vpop.f32.mrf.mxu3  ;;  %v8226_v5 = vpop.f32.mrf.mxu1  ;;  %v13271_v59 = vld [vmem:[%s20881_s6 + $0xf0] sm:$0xf0] }
 0xa6c   : > { %v7583_v8 = vmax.f32 %v7582_v1, %v7283_v13  ;;  %v8866_v25 = vmax.f32 %v8865_v50, %v8226_v5  ;;  %v13306_v1 = vor.u32 %v15056_v45, %v13303_v58  ;;  %v15039_v58 = vld [vmem:[%s20881_s6 + $0x8c] sm:$0xf] }
 0xa6d   : > { %v7242_v3 = vpop.f32.mrf.mxu2 }
 0xa6e   : > { %v7571_v16 = vmax.f32 %v7570_v29, %v7242_v3  ;;  %8265 = vmatmul.bf16.gmra.mxu1 %v20993_v46  ;;  %v15048_v29 = vld [vmem:[%s20881_s6 + $0xd4] sm:$0xf] }
 0xa6f   : > { %v13274_v13 = vor.u32 %v15048_v29, %v13271_v59 }
 0xa70   : > { %7325 = vmatmul.bf16.gmra.mxu3 %v20973_v62  ;;  %v15064_v62 = vld [vmem:[%s20881_s6 + $0x154] sm:$0xf] }
 0xa71   : > { %v8182_v20 = vpop.f32.mrf.mxu0  ;;  %v13338_v15 = vor.u32 %v15064_v62, %v13335_v39 }
 0xa72   : > { %v8853_v17 = vmax.f32 %v8852_v55, %v8182_v20  ;;  %v13207_v20 = vld [vmem:[%s20881_s6 + $0x70] sm:$0xf0] }
 0xa73   : > { %v7286_v0 = vpop.f32.mrf.mxu3  ;;  %v8228_v49 = vpop.f32.mrf.mxu1  ;;  %8555 = vmatpush.bf16.msrb.mxu1 %v13338_v15 }
 0xa74   : > { %v7584_v7 = vmax.f32 %v7583_v8, %v7286_v0  ;;  %v8867_v26 = vmax.f32 %v8866_v25, %v8228_v49  ;;  %8497 = vmatmul.bf16.gmra.mxu0 %v20986_v42  ;;  %v15040_v8 = vld [vmem:[%s20881_s6 + $0x94] sm:$0xf] }
 0xa75   : > { %v7244_v4 = vpop.f32.mrf.mxu2  ;;  %v13239_v25 = vld [vmem:[%s20881_s6 + $0xb0] sm:$0xf0] }
 0xa76   : > { %v7572_v27 = vmax.f32 %v7571_v16, %v7244_v4  ;;  %v13242_v52 = vor.u32 %v15040_v8, %v13239_v25  ;;  %v15024_v49 = vld [vmem:[%s20881_s6 + $0x14] sm:$0xf] }
 0xa77   : > { %8556 = vmatpush.bf16.msrb.mxu1 %v13306_v1 }
 0xa79   : > { %v8184_v2 = vpop.f32.mrf.mxu0 }
 0xa7a   : > { %v8854_v50 = vmax.f32 %v8853_v17, %v8184_v2  ;;  %8314 = vmatmul.bf16.gmra.mxu2 %v20985_v21  ;;  %v13231_v2 = vld [vmem:[%s20881_s6 + $0xa8] sm:$0xf0] }
 0xa7b   : > { %v7288_v35 = vpop.f32.mrf.mxu3  ;;  %v8231_v33 = vpop.f32.mrf.mxu1  ;;  %8557 = vmatpush.bf16.msrb.mxu1 %v13274_v13 }
 0xa7c   : > { %v7585_v63 = vmax.f32 %v7584_v7, %v7288_v35  ;;  %v8868_v22 = vmax.f32 %v8867_v26, %v8231_v33  ;;  %v13175_v7 = vld [vmem:[%s20881_s6 + $0x30] sm:$0xf0] }
 0xa7d   : > { %v7247_v55 = vpop.f32.mrf.mxu2  ;;  %v13178_v62 = vor.u32 %v15024_v49, %v13175_v7 }
 0xa7e   : > { %v7573_v5 = vmax.f32 %v7572_v27, %v7247_v55  ;;  %8270 = vmatmul.bf16.gmra.mxu1 %v20994_v47 }
 0xa7f   : > { %8558 = vmatpush.bf16.msrb.mxu1 %v13242_v52 }
 0xa80   : > { %7330 = vmatmul.bf16.gmra.mxu3 %v20974_v10  ;;  %v15032_v10 = vld [vmem:[%s20881_s6 + $0x54] sm:$0xf] }
 0xa81   : > { %v8187_v37 = vpop.f32.mrf.mxu0  ;;  %v13210_v17 = vor.u32 %v15032_v10, %v13207_v20 }
 0xa82   : > { %v8855_v3 = vmax.f32 %v8854_v50, %v8187_v37  ;;  %v13234_v50 = vor.u32 %v15039_v58, %v13231_v2 }
 0xa83   : > { %v7291_v31 = vpop.f32.mrf.mxu3  ;;  %v8233_v16 = vpop.f32.mrf.mxu1  ;;  %8559 = vmatpush.bf16.msrb.mxu1 %v13210_v17 }
 0xa84   : > { %v7586_v40 = vmax.f32 %v7585_v63, %v7291_v31  ;;  %v8869_v43 = vmax.f32 %v8868_v22, %v8233_v16  ;;  %8502 = vmatmul.bf16.gmra.mxu0 %v20987_v12  ;;  %8380 = vmatpush.bf16.msrb.mxu3 %v13234_v50 }
 0xa85   : > { %v7249_v6 = vpop.f32.mrf.mxu2 }
 0xa86   : > { %v7574_v0 = vmax.f32 %v7573_v5, %v7249_v6 }
 0xa87   : > { %8560 = vmatpush.bf16.msrb.mxu1 %v13178_v62 }
 0xa89   : > { %v8189_v26 = vpop.f32.mrf.mxu0 }
 0xa8a   : > { %v8856_v39 = vmax.f32 %v8855_v3, %v8189_v26  ;;  %8319 = vmatmul.bf16.gmra.mxu2 %v20986_v42 }
 0xa8b   : > { %v7293_v4 = vpop.f32.mrf.mxu3  ;;  %v8236_v15 = vpop.f32.mrf.mxu1 }
 0xa8c   : > { %v7587_v27 = vmax.f32 %v7586_v40, %v7293_v4  ;;  %v8870_v45 = vmax.f32 %v8869_v43, %v8236_v15  ;;  %v13167_v4 = vld [vmem:[%s20881_s6 + $0x28] sm:$0xf0] }
 0xa8d   : > { %v7252_v1 = vpop.f32.mrf.mxu2 }
 0xa8e   : > { %v7575_v35 = vmax.f32 %v7574_v0, %v7252_v1  ;;  %8275 = vmatmul.bf16.gmra.mxu1 %v17027_v30  ;;  %v13199_v0 = vld [vmem:[%s20881_s6 + $0x68] sm:$0xf0] }
 0xa90   : > { %7335 = vmatmul.bf16.gmra.mxu3 %v20975_v34 }
 0xa91   : > { %v8192_v33 = vpop.f32.mrf.mxu0 }
 0xa92   : > { %v8857_v63 = vmax.f32 %v8856_v39, %v8192_v33  ;;  %v15023_v39 = vld [vmem:[%s20881_s6 + $0xc] sm:$0xf] }
 0xa93   : > { %v7296_v22 = vpop.f32.mrf.mxu3  ;;  %v8238_v29 = vpop.f32.mrf.mxu1 }
 0xa94   : > { %v7588_v59 = vmax.f32 %v7587_v27, %v7296_v22  ;;  %v8871_v55 = vmax.f32 %v8870_v45, %v8238_v29  ;;  %8507 = vmatmul.bf16.gmra.mxu0 %v20988_v41  ;;  %v13170_v45 = vor.u32 %v15023_v39, %v13167_v4 }
 0xa95   : > { %v7254_v13 = vpop.f32.mrf.mxu2 }
 0xa96   : > { %v7576_v5 = vmax.f32 %v7575_v35, %v7254_v13 }
 0xa99   : > { %v8194_v8 = vpop.f32.mrf.mxu0 }
 0xa9a   : > { %v8858_v25 = vmax.f32 %v8857_v63, %v8194_v8  ;;  %8324 = vmatmul.bf16.gmra.mxu2 %v20987_v12 }
 0xa9b   : > { %v7298_v37 = vpop.f32.mrf.mxu3  ;;  %v8241_v52 = vpop.f32.mrf.mxu1 }
 0xa9c   : > { %v18380_v3 = vmax.f32 %v17840_v56, %v8858_v25  ;;  %v7589_v34 = vmax.f32 %v7588_v59, %v7298_v37  ;;  %v8872_v31 = vmax.f32 %v8871_v55, %v8241_v52  ;;  %v15031_v56 = vld [vmem:[%s20881_s6 + $0x4c] sm:$0xf] }
 0xa9d   : > { %v7257_v16 = vpop.f32.mrf.mxu2  ;;  %v13202_v7 = vor.u32 %v15031_v56, %v13199_v0 }
 0xa9e   : > { %v7577_v40 = vmax.f32 %v7576_v5, %v7257_v16  ;;  %8280 = vmatmul.bf16.gmra.mxu1 %v17035_v24 }
 0xa9f   : > { %8381 = vmatpush.bf16.msrb.mxu3 %v13202_v7 }
 0xaa0   : > { %7340 = vmatmul.bf16.gmra.mxu3 %v20976_v23 }
 0xaa1   : > { %v8473_v43 = vpop.f32.mrf.mxu0 }
 0xaa3   : > { %v7301_v10 = vpop.f32.mrf.mxu3  ;;  %v8243_v20 = vpop.f32.mrf.mxu1  ;;  %8382 = vmatpush.bf16.msrb.mxu3 %v13170_v45 }
 0xaa4   : > { %v7590_v6 = vmax.f32 %v7589_v34, %v7301_v10  ;;  %v8873_v17 = vmax.f32 %v8872_v31, %v8243_v20  ;;  %8512 = vmatmul.bf16.gmra.mxu0 %v20989_v32 }
 0xaa5   : > { %v7259_v49 = vpop.f32.mrf.mxu2 }
 0xaa6   : > { %v7578_v26 = vmax.f32 %v7577_v40, %v7259_v49 }
 0xaa9   : > { %v8475_v23 = vpop.f32.mrf.mxu0 }
 0xaaa   : > { %v8952_v62 = vmax.f32 %v8473_v43, %v8475_v23  ;;  %8329 = vmatmul.bf16.gmra.mxu2 %v20988_v41 }
 0xaab   : > { %v7303_v15 = vpop.f32.mrf.mxu3  ;;  %v8246_v27 = vpop.f32.mrf.mxu1 }
 0xaac   : > { %v7591_v58 = vmax.f32 %v7590_v6, %v7303_v15  ;;  %v8874_v2 = vmax.f32 %v8873_v17, %v8246_v27 }
 0xaad   : > { %v7262_v1 = vpop.f32.mrf.mxu2 }
 0xaae   : > { %v7579_v50 = vmax.f32 %v7578_v26, %v7262_v1  ;;  %8561 = vmatmul.bf16.vlgmr.msrb.gmra.mxu1 %v20980_v38 }
 0xab0   : > { %7345 = vmatmul.bf16.gmra.mxu3 %v20977_v44 }
 0xab1   : > { %v8478_v35 = vpop.f32.mrf.mxu0 }
 0xab2   : > { %v8953_v33 = vmax.f32 %v8952_v62, %v8478_v35 }
 0xab3   : > { %v7306_v63 = vpop.f32.mrf.mxu3  ;;  %v8248_v22 = vpop.f32.mrf.mxu1 }
 0xab4   : > { %v7592_v29 = vmax.f32 %v7591_v58, %v7306_v63  ;;  %v8875_v59 = vmax.f32 %v8874_v2, %v8248_v22  ;;  %8517 = vmatmul.bf16.gmra.mxu0 %v20990_v53 }
 0xab5   : > { %v7264_v55 = vpop.f32.mrf.mxu2 }
 0xab6   : > { %v7580_v13 = vmax.f32 %v7579_v50, %v7264_v55 }
 0xab8   : > { %v18402_v5 = vmax.f32 %v17864_v57, %v7580_v13 }
 0xab9   : > { %v8480_v8 = vpop.f32.mrf.mxu0 }
 0xaba   : > { %v8954_v25 = vmax.f32 %v8953_v33, %v8480_v8  ;;  %8334 = vmatmul.bf16.gmra.mxu2 %v20989_v32 }
 0xabb   : > { %v7308_v37 = vpop.f32.mrf.mxu3  ;;  %v8251_v52 = vpop.f32.mrf.mxu1 }
 0xabc   : > { %v7593_v44 = vmax.f32 %v7592_v29, %v7308_v37  ;;  %v8876_v34 = vmax.f32 %v8875_v59, %v8251_v52  ;;  %v15085_v37 = vld [vmem:[%s20881_s6 + $0x1f4] sm:$0xf0]  ;;  %v13525_v52 = vld [vmem:[%s20883_s8 + $0xe0] sm:$0xf] }
 0xabd   : > { %v8295_v31 = vpop.f32.mrf.mxu2 }
 0xabe   : > { %8566 = vmatmul.bf16.gmra.mxu1 %v20981_v11 }
 0xac0   : > { %7350 = vmatmul.bf16.gmra.mxu3 %v20978_v9 }
 0xac1   : > { %v8483_v16 = vpop.f32.mrf.mxu0 }
 0xac2   : > { %v8955_v40 = vmax.f32 %v8954_v25, %v8483_v16  ;;  %v13405_v25 = vld [vmem:[%s20881_s6 + $0x1d8] sm:$0xf]  ;;  %v15116_v16 = vld [vmem:[%s20883_s8 + $0xec] sm:$0xf0] }
 0xac3   : > { %v7311_v43 = vpop.f32.mrf.mxu3  ;;  %v8253_v10 = vpop.f32.mrf.mxu1 }
 0xac4   : > { %v7594_v20 = vmax.f32 %v7593_v44, %v7311_v43  ;;  %v8877_v57 = vmax.f32 %v8876_v34, %v8253_v10  ;;  %8522 = vmatmul.bf16.gmra.mxu0 %v20991_v48  ;;  %v15081_v10 = vld [vmem:[%s20881_s6 + $0x1dc] sm:$0xf] }
 0xac5   : > { %v8297_v6 = vpop.f32.mrf.mxu2 }
 0xac6   : > { %v8890_v17 = vmax.f32 %v8295_v31, %v8297_v6  ;;  %v13406_v31 = vor.u32 %v15085_v37, %v13405_v25 }
 0xac8   : > { %8642 = vmatpush.bf16.msrb.mxu2 %v13406_v31 }
 0xac9   : > { %v8485_v56 = vpop.f32.mrf.mxu0 }
 0xaca   : > { %v8956_v0 = vmax.f32 %v8955_v40, %v8485_v56  ;;  %8339 = vmatmul.bf16.gmra.mxu2 %v20990_v53 }
 0xacb   : > { %v7313_v49 = vpop.f32.mrf.mxu3  ;;  %v8256_v7 = vpop.f32.mrf.mxu1 }
 0xacc   : > { %v7595_v26 = vmax.f32 %v7594_v20, %v7313_v49  ;;  %v8878_v23 = vmax.f32 %v8877_v57, %v8256_v7  ;;  %v13407_v20 = vld [vmem:[%s20881_s6 + $0x1f8] sm:$0xf0]  ;;  %v13526_v57 = vor.u32 %v15116_v16, %v13525_v52  ;;  %v15112_v49 = vld [vmem:[%s20883_s8 + $0xcc] sm:$0xf0] }
 0xacd   : > { %v8300_v62 = vpop.f32.mrf.mxu2 }
 0xace   : > { %v8891_v9 = vmax.f32 %v8890_v17, %v8300_v62  ;;  %8571 = vmatmul.bf16.gmra.mxu1 %v20982_v18  ;;  %v13410_v17 = vor.u32 %v15081_v10, %v13407_v20  ;;  %10739 = vmatpush.bf16.msra.mxu0 %v13526_v57  ;;  %v13493_v62 = vld [vmem:[%s20883_s8 + $0xa0] sm:$0xf] }
 0xad0   : > { %8383 = vmatmul.bf16.vlgmr.msrb.gmra.mxu3 %v20980_v38 }
 0xad1   : > { %v8488_v39 = vpop.f32.mrf.mxu0  ;;  %8731 = vmatpush.bf16.msra.mxu3 %v13410_v17 }
 0xad2   : > { %v8957_v4 = vmax.f32 %v8956_v0, %v8488_v39  ;;  %v13509_v0 = vld [vmem:[%s20883_s8 + $0xc0] sm:$0xf] }
 0xad3   : > { %v7316_v15 = vpop.f32.mrf.mxu3  ;;  %v8258_v27 = vpop.f32.mrf.mxu1  ;;  %v13510_v7 = vor.u32 %v15112_v49, %v13509_v0  ;;  %v15077_v0 = vld [vmem:[%s20881_s6 + $0x1b4] sm:$0xf0] }
 0xad4   : > { %v7596_v45 = vmax.f32 %v7595_v26, %v7316_v15  ;;  %v8879_v58 = vmax.f32 %v8878_v23, %v8258_v27  ;;  %8527 = vmatmul.bf16.gmra.mxu0 %v20992_v28 }
 0xad5   : > { %v8302_v2 = vpop.f32.mrf.mxu2  ;;  %10740 = vmatpush.bf16.msra.mxu0 %v13510_v7 }
 0xad6   : > { %v8892_v1 = vmax.f32 %v8891_v9, %v8302_v2  ;;  %v15108_v9 = vld [vmem:[%s20883_s8 + $0xac] sm:$0xf0] }
 0xad7   : > { %v13494_v15 = vor.u32 %v15108_v9, %v13493_v62  ;;  %v15088_v62 = vld [vmem:[%s20883_s8 + $0xc] sm:$0xf0] }
 0xad9   : > { %v8490_v50 = vpop.f32.mrf.mxu0  ;;  %10741 = vmatpush.bf16.msra.mxu0 %v13494_v15  ;;  %v15069_v15 = vld [vmem:[%s20881_s6 + $0x174] sm:$0xf0] }
 0xada   : > { %v8958_v35 = vmax.f32 %v8957_v4, %v8490_v50  ;;  %8344 = vmatmul.bf16.gmra.mxu2 %v20991_v48  ;;  %v15104_v50 = vld [vmem:[%s20883_s8 + $0x8c] sm:$0xf0] }
 0xadb   : > { %v7318_v33 = vpop.f32.mrf.mxu3  ;;  %v8261_v63 = vpop.f32.mrf.mxu1 }
 0xadc   : > { %v7597_v22 = vmax.f32 %v7596_v45, %v7318_v33  ;;  %v8880_v29 = vmax.f32 %v8879_v58, %v8261_v63 }
 0xadd   : > { %v8305_v59 = vpop.f32.mrf.mxu2 }
 0xade   : > { %v8893_v55 = vmax.f32 %v8892_v1, %v8305_v59  ;;  %8576 = vmatmul.bf16.gmra.mxu1 %v20984_v60  ;;  %v13477_v1 = vld [vmem:[%s20883_s8 + $0x80] sm:$0xf] }
 0xae0   : > { %8388 = vmatmul.bf16.gmra.mxu3 %v20981_v11 }
 0xae1   : > { %v8493_v13 = vpop.f32.mrf.mxu0 }
 0xae2   : > { %v8959_v8 = vmax.f32 %v8958_v35, %v8493_v13  ;;  %v13478_v35 = vor.u32 %v15104_v50, %v13477_v1 }
 0xae3   : > { %v7321_v44 = vpop.f32.mrf.mxu3  ;;  %v8263_v34 = vpop.f32.mrf.mxu1 }
 0xae4   : > { %v7598_v40 = vmax.f32 %v7597_v22, %v7321_v44  ;;  %v8881_v43 = vmax.f32 %v8880_v29, %v8263_v34  ;;  %8532 = vmatmul.bf16.gmra.mxu0 %v20993_v46  ;;  %v13461_v22 = vld [vmem:[%s20883_s8 + $0x60] sm:$0xf]  ;;  %v15100_v29 = vld [vmem:[%s20883_s8 + $0x6c] sm:$0xf0] }
 0xae5   : > { %v8307_v6 = vpop.f32.mrf.mxu2  ;;  %10742 = vmatpush.bf16.msra.mxu0 %v13478_v35  ;;  %v13462_v13 = vor.u32 %v15100_v29, %v13461_v22  ;;  %v13445_v44 = vld [vmem:[%s20883_s8 + $0x40] sm:$0xf]  ;;  %v15096_v34 = vld [vmem:[%s20883_s8 + $0x4c] sm:$0xf0]  ;;  %v15061_v22 = vld [vmem:[%s20881_s6 + $0x134] sm:$0xf0] }
 0xae6   : > { %v8894_v56 = vmax.f32 %v8893_v55, %v8307_v6  ;;  %v13446_v31 = vor.u32 %v15096_v34, %v13445_v44 }
 0xae9   : > { %v8495_v26 = vpop.f32.mrf.mxu0  ;;  %10743 = vmatpush.bf16.msra.mxu0 %v13462_v13 }
 0xaea   : > { %v8960_v23 = vmax.f32 %v8959_v8, %v8495_v26  ;;  %8349 = vmatmul.bf16.gmra.mxu2 %v20992_v28 }
 0xaeb   : > { %v7323_v39 = vpop.f32.mrf.mxu3  ;;  %v8266_v4 = vpop.f32.mrf.mxu1 }
 0xaec   : > { %v7599_v27 = vmax.f32 %v7598_v40, %v7323_v39  ;;  %v8882_v45 = vmax.f32 %v8881_v43, %v8266_v4  ;;  %v13429_v40 = vld [vmem:[%s20883_s8 + $0x20] sm:$0xf]  ;;  %v15092_v43 = vld [vmem:[%s20883_s8 + $0x2c] sm:$0xf0]  ;;  %v13341_v4 = vld [vmem:[%s20881_s6 + $0x158] sm:$0xf] }
 0xaed   : > { %v8310_v58 = vpop.f32.mrf.mxu2  ;;  %10744 = vmatpush.bf16.msra.mxu0 %v13446_v31  ;;  %v13430_v57 = vor.u32 %v15092_v43, %v13429_v40  ;;  %v13245_v40 = vld [vmem:[%s20881_s6 + $0x98] sm:$0xf] }
 0xaee   : > { %v8895_v2 = vmax.f32 %v8894_v56, %v8310_v58  ;;  %8581 = vmatmul.bf16.gmra.mxu1 %v20985_v21  ;;  %v13373_v56 = vld [vmem:[%s20881_s6 + $0x198] sm:$0xf]  ;;  %v9103_v58 = vrot.slane %v18380_v3, 4 }
 0xaef   : > { %v13374_v7 = vor.u32 %v15077_v0, %v13373_v56  ;;  %v15045_v43 = vld [vmem:[%s20881_s6 + $0xb4] sm:$0xf0] }
 0xaf0   : > { %8393 = vmatmul.bf16.gmra.mxu3 %v20982_v18  ;;  %v13213_v56 = vld [vmem:[%s20881_s6 + $0x58] sm:$0xf] }
 0xaf1   : > { %v8498_v33 = vpop.f32.mrf.mxu0  ;;  %10745 = vmatpush.bf16.msra.mxu0 %v13430_v57  ;;  %8643 = vmatpush.bf16.msrb.mxu2 %v13374_v7  ;;  %v15037_v0 = vld [vmem:[%s20881_s6 + $0x74] sm:$0xf0] }
 0xaf2   : > { %v8961_v63 = vmax.f32 %v8960_v23, %v8498_v33  ;;  %v13413_v23 = vld [vmem:[%s20883_s8] sm:$0xf]  ;;  %v13214_v7 = vor.u32 %v15037_v0, %v13213_v56 }
 0xaf3   : > { %v7326_v59 = vpop.f32.mrf.mxu3  ;;  %v8268_v55 = vpop.f32.mrf.mxu1  ;;  %v13414_v9 = vor.u32 %v15088_v62, %v13413_v23  ;;  %v18528_v62 = vld [vmem:[%s20882_s7] sm:$0xff] }
 0xaf4   : > { %v7600_v8 = vmax.f32 %v7599_v27, %v7326_v59  ;;  %v8883_v25 = vmax.f32 %v8882_v45, %v8268_v55  ;;  %8537 = vmatmul.bf16.gmra.mxu0 %v20994_v47  ;;  %v13342_v45 = vor.u32 %v15069_v15, %v13341_v4  ;;  %v9104_v55 = vmax.f32 %v18380_v3, %v9103_v58 }
 0xaf5   : > { %v8312_v37 = vpop.f32.mrf.mxu2  ;;  %10746 = vmatpush.bf16.msra.mxu0 %v13414_v9 }
 0xaf6   : > { %v8896_v52 = vmax.f32 %v8895_v2, %v8312_v37  ;;  %8644 = vmatpush.bf16.msrb.mxu2 %v13342_v45  ;;  %v9105_v44 = vrot.slane %v9104_v55, 2  ;;  %v15029_v45 = vld [vmem:[%s20881_s6 + $0x34] sm:$0xf0] }
 0xaf8   : > { %v9106_v57 = vmax.f32 %v9104_v55, %v9105_v44 }
 0xaf9   : > { %v8500_v16 = vpop.f32.mrf.mxu0 }
 0xafa   : > { %8354 = vmatmul.bf16.gmra.mxu2 %v20993_v46  ;;  %v8962_v39 = vmax.f32 %v8961_v63, %v8500_v16  ;;  %v13309_v63 = vld [vmem:[%s20881_s6 + $0x118] sm:$0xf] }
 0xafb   : > { %v7328_v10 = vpop.f32.mrf.mxu3  ;;  %v8271_v20 = vpop.f32.mrf.mxu1  ;;  %v13310_v59 = vor.u32 %v15061_v22, %v13309_v63  ;;  %v13375_v63 = vld [vmem:[%s20881_s6 + $0x1b8] sm:$0xf0] }
 0xafc   : > { %v7601_v6 = vmax.f32 %v7600_v8, %v7328_v10  ;;  %v8884_v17 = vmax.f32 %v8883_v25, %v8271_v20  ;;  %v13277_v8 = vld [vmem:[%s20881_s6 + $0xd8] sm:$0xf]  ;;  %v13246_v20 = vor.u32 %v15045_v43, %v13245_v40 }
 0xafd   : > { %v8315_v49 = vpop.f32.mrf.mxu2  ;;  %8645 = vmatpush.bf16.msrb.mxu2 %v13310_v59  ;;  %v15053_v25 = vld [vmem:[%s20881_s6 + $0xf4] sm:$0xf0] }
 0xafe   : > { %v8897_v26 = vmax.f32 %v8896_v52, %v8315_v49  ;;  %8586 = vmatmul.bf16.gmra.mxu1 %v20986_v42  ;;  %v13278_v52 = vor.u32 %v15053_v25, %v13277_v8 }
 0xb00   : > { %8398 = vmatmul.bf16.gmra.mxu3 %v20984_v60 }
 0xb01   : > { %v8503_v27 = vpop.f32.mrf.mxu0  ;;  %8646 = vmatpush.bf16.msrb.mxu2 %v13278_v52 }
 0xb02   : > { %v8963_v2 = vmax.f32 %v8962_v39, %v8503_v27  ;;  %v13181_v27 = vld [vmem:[%s20881_s6 + $0x18] sm:$0xf] }
 0xb03   : > { %v7331_v1 = vpop.f32.mrf.mxu3  ;;  %v8273_v50 = vpop.f32.mrf.mxu1 }
 0xb04   : > { %v7602_v35 = vmax.f32 %v7601_v6, %v7331_v1  ;;  %v8885_v33 = vmax.f32 %v8884_v17, %v8273_v50  ;;  %8542 = vmatmul.bf16.gmra.mxu0 %v17027_v30  ;;  %v9153_v50 = vperm.slane %v18528_v62, 0 }
 0xb05   : > { %v8317_v29 = vpop.f32.mrf.mxu2  ;;  %8647 = vmatpush.bf16.msrb.mxu2 %v13246_v20 }
 0xb06   : > { %v8898_v13 = vmax.f32 %v8897_v26, %v8317_v29  ;;  %v9107_v26 = vrot.slane %v9106_v57, 1 }
 0xb08   : > { %v9108_v1 = vmax.f32 %v9106_v57, %v9107_v26  ;;  %v15065_v57 = vld [vmem:[%s20881_s6 + $0x15c] sm:$0xf] }
 0xb09   : > { %v8505_v37 = vpop.f32.mrf.mxu0  ;;  %8648 = vmatpush.bf16.msrb.mxu2 %v13214_v7 }
 0xb0a   : > { %8359 = vmatmul.bf16.gmra.mxu2 %v20994_v47  ;;  %v8964_v17 = vmax.f32 %v8963_v2, %v8505_v37  ;;  %v13182_v2 = vor.u32 %v15029_v45, %v13181_v27  ;;  %v9169_v59 = vadd.f32 %v9153_v50, %v9108_v1 }
 0xb0b   : > { %v7333_v34 = vpop.f32.mrf.mxu3  ;;  %v8276_v31 = vpop.f32.mrf.mxu1 }
 0xb0c   : > { %v7603_v16 = vmax.f32 %v7602_v35, %v7333_v34  ;;  %v8886_v3 = vmax.f32 %v8885_v33, %v8276_v31  ;;  %v15073_v33 = vld [vmem:[%s20881_s6 + $0x19c] sm:$0xf]  ;;  %v9177_v52 = vmax.f32 %v9169_v59, 0.0 }
 0xb0d   : > { %v8320_v10 = vpop.f32.mrf.mxu2  ;;  %v13378_v22 = vor.u32 %v15073_v33, %v13375_v63  ;;  %8649 = vmatpush.bf16.msrb.mxu2 %v13182_v2 }
 0xb0e   : > { %v8899_v6 = vmax.f32 %v8898_v13, %v8320_v10  ;;  %8591 = vmatmul.bf16.gmra.mxu1 %v20987_v12 }
 0xb0f   : > { %8732 = vmatpush.bf16.msra.mxu3 %v13378_v22 }
 0xb10   : > { %8403 = vmatmul.bf16.gmra.mxu3 %v20985_v21 }
 0xb11   : > { %v8508_v49 = vpop.f32.mrf.mxu0 }
 0xb12   : > { %v8965_v23 = vmax.f32 %v8964_v17, %v8508_v49 }
 0xb13   : > { %v7336_v9 = vpop.f32.mrf.mxu3  ;;  %v8278_v39 = vpop.f32.mrf.mxu1 }
 0xb14   : > { %v7604_v4 = vmax.f32 %v7603_v16, %v7336_v9  ;;  %v8887_v15 = vmax.f32 %v8886_v3, %v8278_v39  ;;  %8547 = vmatmul.bf16.gmra.mxu0 %v17035_v24  ;;  %v18547_v3 = vpack.c.bf16 %v9177_v52, %v9177_v52 }
 0xb15   : > { %v8322_v58 = vpop.f32.mrf.mxu2 }
 0xb16   : > { %v8900_v35 = vmax.f32 %v8899_v6, %v8322_v58  ;;  %v13343_v6 = vld [vmem:[%s20881_s6 + $0x178] sm:$0xf0] }
 0xb17   : > { %v13346_v56 = vor.u32 %v15065_v57, %v13343_v6 }
 0xb19   : > { %v8510_v29 = vpop.f32.mrf.mxu0  ;;  %8733 = vmatpush.bf16.msra.mxu3 %v13346_v56 }
 0xb1a   : > { %8364 = vmatmul.bf16.gmra.mxu2 %v17027_v30  ;;  %v8966_v34 = vmax.f32 %v8965_v23, %v8510_v29 }
 0xb1b   : > { %v7338_v55 = vpop.f32.mrf.mxu3  ;;  %v8281_v13 = vpop.f32.mrf.mxu1 }
 0xb1c   : > { %v7605_v8 = vmax.f32 %v7604_v4, %v7338_v55  ;;  %v8888_v25 = vmax.f32 %v8887_v15, %v8281_v13 }
 0xb1d   : > { %v8325_v37 = vpop.f32.mrf.mxu2 }
 0xb1e   : > { %v8901_v44 = vmax.f32 %v8900_v35, %v8325_v37  ;;  %8596 = vmatmul.bf16.gmra.mxu1 %v20988_v41 }
 0xb20   : > { %8408 = vmatmul.bf16.gmra.mxu3 %v20986_v42 }
 0xb21   : > { %v8513_v31 = vpop.f32.mrf.mxu0 }
 0xb22   : > { %v8967_v16 = vmax.f32 %v8966_v34, %v8513_v31 }
 0xb23   : > { %v7341_v40 = vpop.f32.mrf.mxu3  ;;  %v8283_v43 = vpop.f32.mrf.mxu1 }
 0xb24   : > { %v7606_v10 = vmax.f32 %v7605_v8, %v7341_v40  ;;  %v8889_v20 = vmax.f32 %v8888_v25, %v8283_v43  ;;  %10747 = vmatmul.bf16.vlgmr.msra.gmra.mxu0 %v18547_v3  ;;  %v13311_v40 = vld [vmem:[%s20881_s6 + $0x138] sm:$0xf0] }
 0xb25   : > { %v8327_v17 = vpop.f32.mrf.mxu2 }
 0xb26   : > { %v18557_v0 = vmax.f32 %v18009_v51, %v8889_v20  ;;  %v8902_v49 = vmax.f32 %v8901_v44, %v8327_v17 }
 0xb29   : > { %v8515_v7 = vpop.f32.mrf.mxu0 }
 0xb2a   : > { %8369 = vmatmul.bf16.gmra.mxu2 %v17035_v24  ;;  %v8968_v15 = vmax.f32 %v8967_v16, %v8515_v7  ;;  %v15057_v16 = vld [vmem:[%s20881_s6 + $0x11c] sm:$0xf] }
 0xb2b   : > { %v7343_v26 = vpop.f32.mrf.mxu3  ;;  %v8562_v23 = vpop.f32.mrf.mxu1 }
 0xb2c   : > { %v7607_v9 = vmax.f32 %v7606_v10, %v7343_v26  ;;  %v13314_v10 = vor.u32 %v15057_v16, %v13311_v40 }
 0xb2d   : > { %v8330_v39 = vpop.f32.mrf.mxu2 }
 0xb2e   : > { %v8903_v4 = vmax.f32 %v8902_v49, %v8330_v39  ;;  %8601 = vmatmul.bf16.gmra.mxu1 %v20989_v32  ;;  %8734 = vmatpush.bf16.msra.mxu3 %v13314_v10  ;;  %v15228_v10 = vld [vmem:[%s20883_s8 + $0x46c] sm:$0xf0] }
 0xb30   : > { %8413 = vmatmul.bf16.gmra.mxu3 %v20987_v12 }
 0xb31   : > { %v8518_v27 = vpop.f32.mrf.mxu0 }
 0xb32   : > { %v8969_v45 = vmax.f32 %v8968_v15, %v8518_v27  ;;  %v14037_v15 = vld [vmem:[%s20883_s8 + $0x4e0] sm:$0xf]  ;;  %v15244_v27 = vld [vmem:[%s20883_s8 + $0x4ec] sm:$0xf0] }
 0xb33   : > { %v7346_v58 = vpop.f32.mrf.mxu3  ;;  %v8564_v51 = vpop.f32.mrf.mxu1 }
 0xb34   : > { %v7608_v2 = vmax.f32 %v7607_v9, %v7346_v58  ;;  %v8983_v1 = vmax.f32 %v8562_v23, %v8564_v51 }
 0xb35   : > { %v8332_v50 = vpop.f32.mrf.mxu2 }
 0xb36   : > { %v8904_v35 = vmax.f32 %v8903_v4, %v8332_v50 }
 0xb39   : > { %v8520_v33 = vpop.f32.mrf.mxu0 }
 0xb3a   : > { %8650 = vmatmul.bf16.vlgmr.msrb.gmra.mxu2 %v20980_v38  ;;  %v8970_v8 = vmax.f32 %v8969_v45, %v8520_v33 }
 0xb3b   : > { %v7348_v63 = vpop.f32.mrf.mxu3  ;;  %v8567_v22 = vpop.f32.mrf.mxu1 }
 0xb3c   : > { %v7609_v29 = vmax.f32 %v7608_v2, %v7348_v63  ;;  %v8984_v59 = vmax.f32 %v8983_v1, %v8567_v22  ;;  %v14021_v2 = vld [vmem:[%s20883_s8 + $0x4c0] sm:$0xf]  ;;  %v15240_v1 = vld [vmem:[%s20883_s8 + $0x4cc] sm:$0xf0] }
 0xb3d   : > { %v8335_v55 = vpop.f32.mrf.mxu2  ;;  %v14022_v50 = vor.u32 %v15240_v1, %v14021_v2  ;;  %v14005_v22 = vld [vmem:[%s20883_s8 + $0x4a0] sm:$0xf]  ;;  %v15220_v2 = vld [vmem:[%s20883_s8 + $0x42c] sm:$0xf0] }
 0xb3e   : > { %v8905_v13 = vmax.f32 %v8904_v35, %v8335_v55  ;;  %8606 = vmatmul.bf16.gmra.mxu1 %v20990_v53 }
 0xb40   : > { %8418 = vmatmul.bf16.gmra.mxu3 %v20988_v41 }
 0xb41   : > { %v8523_v25 = vpop.f32.mrf.mxu0 }
 0xb42   : > { %v18565_v37 = vmax.f32 %v8970_v8, %v8523_v25 }
 0xb43   : > { %v7351_v52 = vpop.f32.mrf.mxu3  ;;  %v8569_v44 = vpop.f32.mrf.mxu1 }
 0xb44   : > { %v7610_v34 = vmax.f32 %v7609_v29, %v7351_v52  ;;  %v8985_v31 = vmax.f32 %v8984_v59, %v8569_v44  ;;  %v15236_v29 = vld [vmem:[%s20883_s8 + $0x4ac] sm:$0xf0]  ;;  %v13989_v52 = vld [vmem:[%s20883_s8 + $0x480] sm:$0xf] }
 0xb45   : > { %v8337_v43 = vpop.f32.mrf.mxu2  ;;  %v15232_v44 = vld [vmem:[%s20883_s8 + $0x48c] sm:$0xf0] }
 0xb46   : > { %v8906_v20 = vmax.f32 %v8905_v13, %v8337_v43  ;;  %v14006_v13 = vor.u32 %v15236_v29, %v14005_v22  ;;  %v13973_v43 = vld [vmem:[%s20883_s8 + $0x460] sm:$0xf]  ;;  %v15148_v22 = vld [vmem:[%s20883_s8 + $0x1ec] sm:$0xf0] }
 0xb49   : > { %v18573_v57 = vpop.f32.mrf.mxu0 }
 0xb4a   : > { %8655 = vmatmul.bf16.gmra.mxu2 %v20981_v11 }
 0xb4b   : > { %v7353_v6 = vpop.f32.mrf.mxu3  ;;  %v8572_v17 = vpop.f32.mrf.mxu1 }
 0xb4c   : > { %v7611_v56 = vmax.f32 %v7610_v34, %v7353_v6  ;;  %v8986_v49 = vmax.f32 %v8985_v31, %v8572_v17  ;;  %v13990_v34 = vor.u32 %v15232_v44, %v13989_v52  ;;  %v15049_v17 = vld [vmem:[%s20881_s6 + $0xdc] sm:$0xf]  ;;  %v13637_v52 = vld [vmem:[%s20883_s8 + $0x1c0] sm:$0xf]  ;;  %v15144_v44 = vld [vmem:[%s20883_s8 + $0x1cc] sm:$0xf0] }
 0xb4d   : > { %v8340_v7 = vpop.f32.mrf.mxu2 }
 0xb4e   : > { %v18577_v26 = vmax.f32 %v18029_v36, %v7611_v56  ;;  %v8907_v23 = vmax.f32 %v8906_v20, %v8340_v7  ;;  %8611 = vmatmul.bf16.gmra.mxu1 %v20991_v48  ;;  %v14038_v36 = vor.u32 %v15244_v27, %v14037_v15  ;;  %v13279_v56 = vld [vmem:[%s20881_s6 + $0xf8] sm:$0xf0]  ;;  %v15224_v15 = vld [vmem:[%s20883_s8 + $0x44c] sm:$0xf0] }
 0xb50   : > { %8423 = vmatmul.bf16.gmra.mxu3 %v20989_v32  ;;  %10791 = vmatpush.bf16.msrb.mxu0 %v14038_v36 }
 0xb51   : > { %v18581_v9 = vpop.f32.mrf.mxu0 }
 0xb53   : > { %v8384_v39 = vpop.f32.mrf.mxu3  ;;  %v8574_v4 = vpop.f32.mrf.mxu1 }
 0xb54   : > { %v8987_v45 = vmax.f32 %v8986_v49, %v8574_v4  ;;  %10792 = vmatpush.bf16.msrb.mxu0 %v14022_v50  ;;  %v13974_v49 = vor.u32 %v15228_v10, %v13973_v43  ;;  %v13957_v4 = vld [vmem:[%s20883_s8 + $0x440] sm:$0xf]  ;;  %v13527_v43 = vld [vmem:[%s20883_s8 + $0xf0] sm:$0xf0] }
 0xb55   : > { %v8342_v58 = vpop.f32.mrf.mxu2  ;;  %v13958_v27 = vor.u32 %v15224_v15, %v13957_v4  ;;  %v13511_v15 = vld [vmem:[%s20883_s8 + $0xd0] sm:$0xf0] }
 0xb56   : > { %v8908_v51 = vmax.f32 %v8907_v23, %v8342_v58  ;;  %v13282_v23 = vor.u32 %v15049_v17, %v13279_v56 }
 0xb58   : > { %10793 = vmatpush.bf16.msrb.mxu0 %v14006_v13  ;;  %8735 = vmatpush.bf16.msra.mxu3 %v13282_v23  ;;  %v13925_v13 = vld [vmem:[%s20883_s8 + $0x400] sm:$0xf]  ;;  %v15110_v23 = vld [vmem:[%s20883_s8 + $0xc4] sm:$0xf] }
 0xb59   : > { %v18595_v35 = vpop.f32.mrf.mxu0 }
 0xb5a   : > { %8660 = vmatmul.bf16.gmra.mxu2 %v20982_v18 }
 0xb5b   : > { %v8386_v33 = vpop.f32.mrf.mxu3  ;;  %v8577_v63 = vpop.f32.mrf.mxu1 }
 0xb5c   : > { %v8921_v59 = vmax.f32 %v8384_v39, %v8386_v33  ;;  %v8988_v55 = vmax.f32 %v8987_v45, %v8577_v63  ;;  %10794 = vmatpush.bf16.msrb.mxu0 %v13990_v34  ;;  %v13653_v63 = vld [vmem:[%s20883_s8 + $0x1e0] sm:$0xf]  ;;  %v15114_v34 = vld [vmem:[%s20883_s8 + $0xe4] sm:$0xf] }
 0xb5d   : > { %v8345_v8 = vpop.f32.mrf.mxu2  ;;  %v13530_v10 = vor.u32 %v15114_v34, %v13527_v43  ;;  %v13479_v34 = vld [vmem:[%s20883_s8 + $0x90] sm:$0xf0] }
 0xb5e   : > { %v8909_v25 = vmax.f32 %v8908_v51, %v8345_v8  ;;  %8616 = vmatmul.bf16.gmra.mxu1 %v20992_v28  ;;  %v13941_v51 = vld [vmem:[%s20883_s8 + $0x420] sm:$0xf]  ;;  %v15216_v8 = vld [vmem:[%s20883_s8 + $0x40c] sm:$0xf0] }
 0xb5f   : > { %v13942_v33 = vor.u32 %v15220_v2, %v13941_v51  ;;  %v15136_v51 = vld [vmem:[%s20883_s8 + $0x18c] sm:$0xf0]  ;;  %v15106_v2 = vld [vmem:[%s20883_s8 + $0xa4] sm:$0xf] }
 0xb60   : > { %8428 = vmatmul.bf16.gmra.mxu3 %v20990_v53  ;;  %10795 = vmatpush.bf16.msrb.mxu0 %v13974_v49  ;;  %v13621_v49 = vld [vmem:[%s20883_s8 + $0x1a0] sm:$0xf] }
 0xb61   : > { %v18612_v31 = vpop.f32.mrf.mxu0 }
 0xb63   : > { %v8389_v16 = vpop.f32.mrf.mxu3  ;;  %v8579_v40 = vpop.f32.mrf.mxu1 }
 0xb64   : > { %v8922_v20 = vmax.f32 %v8921_v59, %v8389_v16  ;;  %v8989_v6 = vmax.f32 %v8988_v55, %v8579_v40  ;;  %10796 = vmatpush.bf16.msrb.mxu0 %v13958_v27  ;;  %v13654_v59 = vor.u32 %v15148_v22, %v13653_v63  ;;  %v13638_v40 = vor.u32 %v15144_v44, %v13637_v52 }
 0xb65   : > { %v8347_v7 = vpop.f32.mrf.mxu2 }
 0xb66   : > { %v8910_v39 = vmax.f32 %v8909_v25, %v8347_v7  ;;  %10752 = vmatpush.bf16.msra.mxu1 %v13654_v59  ;;  %v13926_v25 = vor.u32 %v15216_v8, %v13925_v13  ;;  %v15140_v7 = vld [vmem:[%s20883_s8 + $0x1ac] sm:$0xf0]  ;;  %v13589_v13 = vld [vmem:[%s20883_s8 + $0x160] sm:$0xf] }
 0xb67   : > { %v13622_v4 = vor.u32 %v15140_v7, %v13621_v49  ;;  %v15132_v8 = vld [vmem:[%s20883_s8 + $0x16c] sm:$0xf0]  ;;  %v13463_v49 = vld [vmem:[%s20883_s8 + $0x70] sm:$0xf0] }
 0xb68   : > { %10797 = vmatpush.bf16.msrb.mxu0 %v13942_v33  ;;  %v13495_v33 = vld [vmem:[%s20883_s8 + $0xb0] sm:$0xf0]  ;;  %v13590_v44 = vor.u32 %v15132_v8, %v13589_v13 }
 0xb69   : > { %v18632_v45 = vpop.f32.mrf.mxu0  ;;  %v13498_v63 = vor.u32 %v15106_v2, %v13495_v33  ;;  %v13447_v2 = vld [vmem:[%s20883_s8 + $0x50] sm:$0xf0] }
 0xb6a   : > { %8665 = vmatmul.bf16.gmra.mxu2 %v20984_v60  ;;  %10753 = vmatpush.bf16.msra.mxu1 %v13638_v40 }
 0xb6b   : > { %v8391_v36 = vpop.f32.mrf.mxu3  ;;  %v8582_v58 = vpop.f32.mrf.mxu1 }
 0xb6c   : > { %v8923_v1 = vmax.f32 %v8922_v20, %v8391_v36  ;;  %v8990_v50 = vmax.f32 %v8989_v6, %v8582_v58  ;;  %10798 = vmatpush.bf16.msrb.mxu0 %v13926_v25  ;;  %v13514_v36 = vor.u32 %v15110_v23, %v13511_v15  ;;  %v13605_v58 = vld [vmem:[%s20883_s8 + $0x180] sm:$0xf]  ;;  %v15102_v25 = vld [vmem:[%s20883_s8 + $0x84] sm:$0xf] }
 0xb6d   : > { %v8350_v29 = vpop.f32.mrf.mxu2  ;;  %v13482_v43 = vor.u32 %v15102_v25, %v13479_v34  ;;  %v13557_v15 = vld [vmem:[%s20883_s8 + $0x120] sm:$0xf] }
 0xb6e   : > { %v8911_v55 = vmax.f32 %v8910_v39, %v8350_v29  ;;  %8621 = vmatmul.bf16.gmra.mxu1 %v20993_v46 }
 0xb6f   : > { %10754 = vmatpush.bf16.msra.mxu1 %v13622_v4 }
 0xb70   : > { %8433 = vmatmul.bf16.gmra.mxu3 %v20991_v48  ;;  %10843 = vmatpush.bf16.msra.mxu0 %v13530_v10  ;;  %v13573_v10 = vld [vmem:[%s20883_s8 + $0x140] sm:$0xf] }
 0xb71   : > { %v18664_v16 = vpop.f32.mrf.mxu0 }
 0xb73   : > { %v8394_v20 = vpop.f32.mrf.mxu3  ;;  %v8584_v6 = vpop.f32.mrf.mxu1 }
 0xb74   : > { %v8924_v17 = vmax.f32 %v8923_v1, %v8394_v20  ;;  %v8991_v56 = vmax.f32 %v8990_v50, %v8584_v6  ;;  %10844 = vmatpush.bf16.msra.mxu0 %v13514_v36  ;;  %v13606_v50 = vor.u32 %v15136_v51, %v13605_v58  ;;  %v15128_v20 = vld [vmem:[%s20883_s8 + $0x14c] sm:$0xf0]  ;;  %v15094_v36 = vld [vmem:[%s20883_s8 + $0x44] sm:$0xf] }
 0xb75   : > { %v8352_v39 = vpop.f32.mrf.mxu2 }
 0xb76   : > { %v8912_v27 = vmax.f32 %v8911_v55, %v8352_v39  ;;  %10755 = vmatpush.bf16.msra.mxu1 %v13606_v50  ;;  %v8972_v50 = vmax.f32 %v18565_v37, %v18573_v57  ;;  %v15090_v37 = vld [vmem:[%s20883_s8 + $0x24] sm:$0xf]  ;;  %v13431_v57 = vld [vmem:[%s20883_s8 + $0x30] sm:$0xf0] }
 0xb78   : > { %10845 = vmatpush.bf16.msra.mxu0 %v13498_v63  ;;  %v13450_v63 = vor.u32 %v15094_v36, %v13447_v2 }
 0xb79   : > { %v18690_v1 = vpop.f32.mrf.mxu0 }
 0xb7a   : > { %8670 = vmatmul.bf16.gmra.mxu2 %v20985_v21  ;;  %10756 = vmatpush.bf16.msra.mxu1 %v13590_v44  ;;  %v9109_v44 = vrot.slane %v18557_v0, 4 }
 0xb7b   : > { %v8396_v22 = vpop.f32.mrf.mxu3  ;;  %v8587_v29 = vpop.f32.mrf.mxu1 }
 0xb7c   : > { %v8925_v59 = vmax.f32 %v8924_v17, %v8396_v22  ;;  %v8992_v55 = vmax.f32 %v8991_v56, %v8587_v29  ;;  %10846 = vmatpush.bf16.msra.mxu0 %v13482_v43  ;;  %v13574_v17 = vor.u32 %v15128_v20, %v13573_v10  ;;  %v15098_v56 = vld [vmem:[%s20883_s8 + $0x64] sm:$0xf]  ;;  %v8973_v22 = vmax.f32 %v8972_v50, %v18581_v9  ;;  %v13541_v29 = vld [vmem:[%s20883_s8 + $0x100] sm:$0xf] }
 0xb7d   : > { %v8355_v52 = vpop.f32.mrf.mxu2  ;;  %v13466_v7 = vor.u32 %v15098_v56, %v13463_v49 }
 0xb7e   : > { %v8913_v40 = vmax.f32 %v8912_v27, %v8355_v52  ;;  %8626 = vmatmul.bf16.gmra.mxu1 %v20994_v47  ;;  %v15124_v27 = vld [vmem:[%s20883_s8 + $0x12c] sm:$0xf0]  ;;  %v8974_v9 = vmax.f32 %v8973_v22, %v18595_v35  ;;  %v13434_v52 = vor.u32 %v15090_v37, %v13431_v57  ;;  %v13415_v35 = vld [vmem:[%s20883_s8 + $0x10] sm:$0xf0] }
 0xb7f   : > { %10757 = vmatpush.bf16.msra.mxu1 %v13574_v17  ;;  %v13558_v51 = vor.u32 %v15124_v27, %v13557_v15  ;;  %v15086_v17 = vld [vmem:[%s20883_s8 + $0x4] sm:$0xf] }
 0xb80   : > { %8438 = vmatmul.bf16.gmra.mxu3 %v20992_v28  ;;  %10847 = vmatpush.bf16.msra.mxu0 %v13466_v7  ;;  %v8975_v43 = vmax.f32 %v8974_v9, %v18612_v31  ;;  %v13418_v56 = vor.u32 %v15086_v17, %v13415_v35  ;;  %v15041_v31 = vld [vmem:[%s20881_s6 + $0x9c] sm:$0xf] }
 0xb81   : > { %v8543_v6 = vpop.f32.mrf.mxu0 }
 0xb82   : > { %v8976_v49 = vmax.f32 %v8975_v43, %v18632_v45 }
 0xb83   : > { %v8399_v23 = vpop.f32.mrf.mxu3  ;;  %v8589_v39 = vpop.f32.mrf.mxu1  ;;  %10758 = vmatpush.bf16.msra.mxu1 %v13558_v51 }
 0xb84   : > { %v8926_v4 = vmax.f32 %v8925_v59, %v8399_v23  ;;  %10848 = vmatpush.bf16.msra.mxu0 %v13450_v63  ;;  %v15120_v59 = vld [vmem:[%s20883_s8 + $0x10c] sm:$0xf0]  ;;  %v8993_v25 = vmax.f32 %v8992_v55, %v8589_v39  ;;  %v13247_v23 = vld [vmem:[%s20881_s6 + $0xb8] sm:$0xf0]  ;;  %v9110_v39 = vmax.f32 %v18557_v0, %v9109_v44  ;;  %v8977_v15 = vmax.f32 %v8976_v49, %v18664_v16 }
 0xb85   : > { %v8357_v58 = vpop.f32.mrf.mxu2  ;;  %v13542_v8 = vor.u32 %v15120_v59, %v13541_v29 }
 0xb86   : > { %v8914_v33 = vmax.f32 %v8913_v40, %v8357_v58  ;;  %v8978_v27 = vmax.f32 %v8977_v15, %v18690_v1  ;;  %v9111_v36 = vrot.slane %v9110_v39, 2  ;;  %v13215_v15 = vld [vmem:[%s20881_s6 + $0x78] sm:$0xf0] }
 0xb87   : > { %10759 = vmatpush.bf16.msra.mxu1 %v13542_v8 }
 0xb88   : > { %10849 = vmatpush.bf16.msra.mxu0 %v13434_v52  ;;  %v8979_v2 = vmax.f32 %v8978_v27, %v8543_v6  ;;  %v9112_v29 = vmax.f32 %v9110_v39, %v9111_v36 }
 0xb89   : > { %v8545_v13 = vpop.f32.mrf.mxu0 }
 0xb8a   : > { %8675 = vmatmul.bf16.gmra.mxu2 %v20986_v42  ;;  %v8980_v63 = vmax.f32 %v8979_v2, %v8545_v13  ;;  %v9113_v37 = vrot.slane %v9112_v29, 1  ;;  %v14039_v2 = vld [vmem:[%s20883_s8 + $0x4f0] sm:$0xf0] }
 0xb8b   : > { %v8401_v34 = vpop.f32.mrf.mxu3  ;;  %v8592_v40 = vpop.f32.mrf.mxu1 }
 0xb8c   : > { %v8927_v10 = vmax.f32 %v8926_v4, %v8401_v34  ;;  %v8994_v20 = vmax.f32 %v8993_v25, %v8592_v40  ;;  %v13250_v4 = vor.u32 %v15041_v31, %v13247_v23  ;;  %10850 = vmatpush.bf16.msra.mxu0 %v13418_v56  ;;  %v9114_v13 = vmax.f32 %v9112_v29, %v9113_v37  ;;  %v13183_v29 = vld [vmem:[%s20881_s6 + $0x38] sm:$0xf0] }
 0xb8d   : > { %v8360_v55 = vpop.f32.mrf.mxu2  ;;  %v9154_v40 = vperm.slane %v18528_v62, 1  ;;  %v9157_v31 = vperm.slane %v18528_v62, 4  ;;  %v15242_v62 = vld [vmem:[%s20883_s8 + $0x4e4] sm:$0xf] }
 0xb8e   : > { %v8915_v7 = vmax.f32 %v8914_v33, %v8360_v55  ;;  %8631 = vmatmul.bf16.gmra.mxu1 %v17027_v30  ;;  %8736 = vmatpush.bf16.msra.mxu3 %v13250_v4  ;;  %v15033_v4 = vld [vmem:[%s20881_s6 + $0x5c] sm:$0xf] }
 0xb8f   : > { %v9170_v17 = vadd.f32 %v9154_v40, %v9114_v13  ;;  %v13218_v27 = vor.u32 %v15033_v4, %v13215_v15 }
 0xb90   : > { %8443 = vmatmul.bf16.gmra.mxu3 %v20993_v46 }
 0xb91   : > { %v8548_v45 = vpop.f32.mrf.mxu0  ;;  %v9178_v39 = vmax.f32 %v9170_v17, 0.0 }
 0xb92   : > { %v8981_v0 = vmax.f32 %v8980_v63, %v8548_v45  ;;  %8737 = vmatpush.bf16.msra.mxu3 %v13218_v27 }
 0xb93   : > { %v8404_v58 = vpop.f32.mrf.mxu3  ;;  %v8594_v51 = vpop.f32.mrf.mxu1  ;;  %v18792_v63 = vpack.c.bf16 %v9178_v39, %v9178_v39 }
 0xb94   : > { %v8928_v50 = vmax.f32 %v8927_v10, %v8404_v58  ;;  %v8995_v8 = vmax.f32 %v8994_v20, %v8594_v51 }
 0xb95   : > { %v8362_v33 = vpop.f32.mrf.mxu2 }
 0xb96   : > { %v8916_v22 = vmax.f32 %v8915_v7, %v8362_v33 }
 0xb99   : > { %v8550_v59 = vpop.f32.mrf.mxu0 }
 0xb9a   : > { %v8982_v16 = vmax.f32 %v8981_v0, %v8550_v59  ;;  %8680 = vmatmul.bf16.gmra.mxu2 %v20987_v12 }
 0xb9b   : > { %v8406_v57 = vpop.f32.mrf.mxu3  ;;  %v8597_v9 = vpop.f32.mrf.mxu1 }
 0xb9c   : > { %v9080_v1 = vmax.f32 %v18112_v54, %v8982_v16  ;;  %v8929_v25 = vmax.f32 %v8928_v50, %v8406_v57  ;;  %v8996_v52 = vmax.f32 %v8995_v8, %v8597_v9  ;;  %v14042_v57 = vor.u32 %v15242_v62, %v14039_v2  ;;  %v15218_v62 = vld [vmem:[%s20883_s8 + $0x424] sm:$0xf]  ;;  %v13943_v2 = vld [vmem:[%s20883_s8 + $0x430] sm:$0xf0] }
 0xb9d   : > { %v8365_v44 = vpop.f32.mrf.mxu2 }
 0xb9e   : > { %v9127_v6 = vrot.slane %v9080_v1, 4  ;;  %v8917_v34 = vmax.f32 %v8916_v22, %v8365_v44  ;;  %8636 = vmatmul.bf16.gmra.mxu1 %v17035_v24  ;;  %v15025_v22 = vld [vmem:[%s20881_s6 + $0x1c] sm:$0xf] }
 0xb9f   : > { %v13186_v16 = vor.u32 %v15025_v22, %v13183_v29 }
 0xba0   : > { %v9128_v43 = vmax.f32 %v9080_v1, %v9127_v6  ;;  %8448 = vmatmul.bf16.gmra.mxu3 %v20994_v47  ;;  %v15234_v6 = vld [vmem:[%s20883_s8 + $0x4a4] sm:$0xf] }
 0xba1   : > { %v18776_v10 = vpop.f32.mrf.mxu0  ;;  %8738 = vmatpush.bf16.msra.mxu3 %v13186_v16  ;;  %v13927_v16 = vld [vmem:[%s20883_s8 + $0x410] sm:$0xf0] }
 0xba2   : > { %v9129_v20 = vrot.slane %v9128_v43, 2 }
 0xba3   : > { %v8409_v35 = vpop.f32.mrf.mxu3  ;;  %v8599_v55 = vpop.f32.mrf.mxu1 }
 0xba4   : > { %v9130_v54 = vmax.f32 %v9128_v43, %v9129_v20  ;;  %v8930_v56 = vmax.f32 %v8929_v25, %v8409_v35  ;;  %v8997_v51 = vmax.f32 %v8996_v52, %v8599_v55  ;;  %v15238_v25 = vld [vmem:[%s20883_s8 + $0x4c4] sm:$0xf]  ;;  %v14023_v52 = vld [vmem:[%s20883_s8 + $0x4d0] sm:$0xf0] }
 0xba5   : > { %v8367_v49 = vpop.f32.mrf.mxu2  ;;  %v14026_v44 = vor.u32 %v15238_v25, %v14023_v52  ;;  %v15230_v55 = vld [vmem:[%s20883_s8 + $0x484] sm:$0xf] }
 0xba6   : > { %v9131_v7 = vrot.slane %v9130_v54, 1  ;;  %v8918_v23 = vmax.f32 %v8917_v34, %v8367_v49  ;;  %v14007_v34 = vld [vmem:[%s20883_s8 + $0x4b0] sm:$0xf0] }
 0xba7   : > { %v14010_v17 = vor.u32 %v15234_v6, %v14007_v34  ;;  %v13517_v34 = vld [vmem:[%s20883_s8 + $0xc8] sm:$0xf] }
 0xba8   : > { %v9132_v45 = vmax.f32 %v9130_v54, %v9131_v7  ;;  %v13991_v54 = vld [vmem:[%s20883_s8 + $0x490] sm:$0xf0] }
 0xba9   : > { %v10750_v36 = vpop.f32.mrf.mxu0  ;;  %v13994_v49 = vor.u32 %v15230_v55, %v13991_v54  ;;  %v13501_v55 = vld [vmem:[%s20883_s8 + $0xa8] sm:$0xf]  ;;  %v15109_v54 = vld [vmem:[%s20883_s8 + $0xb4] sm:$0xf0] }
 0xbaa   : > { %v9173_v58 = vadd.f32 %v9157_v31, %v9132_v45  ;;  %8685 = vmatmul.bf16.gmra.mxu2 %v20988_v41  ;;  %v15226_v31 = vld [vmem:[%s20883_s8 + $0x464] sm:$0xf] }
 0xbab   : > { %v8411_v50 = vpop.f32.mrf.mxu3  ;;  %v8602_v33 = vpop.f32.mrf.mxu1  ;;  %v15222_v36 = vld [vmem:[%s20883_s8 + $0x444] sm:$0xf] }
 0xbac   : > { %v9181_v0 = vmax.f32 %v9173_v58, 0.0  ;;  %v8931_v59 = vmax.f32 %v8930_v56, %v8411_v50  ;;  %v8998_v8 = vmax.f32 %v8997_v51, %v8602_v33  ;;  %v13959_v58 = vld [vmem:[%s20883_s8 + $0x450] sm:$0xf0] }
 0xbad   : > { %v8370_v37 = vpop.f32.mrf.mxu2  ;;  %v13962_v51 = vor.u32 %v15222_v36, %v13959_v58 }
 0xbae   : > { %v18800_v9 = vpack.c.bf16 %v9181_v0, %v9181_v0  ;;  %v8919_v1 = vmax.f32 %v8918_v23, %v8370_v37  ;;  %10760 = vmatmul.bf16.vlgmr.msra.gmra.mxu1 %v18792_v63  ;;  %v13975_v23 = vld [vmem:[%s20883_s8 + $0x470] sm:$0xf0]  ;;  %v13946_v0 = vor.u32 %v15218_v62, %v13943_v2  ;;  %v13533_v37 = vld [vmem:[%s20883_s8 + $0xe8] sm:$0xf]  ;;  %v15097_v2 = vld [vmem:[%s20883_s8 + $0x54] sm:$0xf0] }
 0xbaf   : > { %v13978_v27 = vor.u32 %v15226_v31, %v13975_v23  ;;  %v13485_v23 = vld [vmem:[%s20883_s8 + $0x88] sm:$0xf] }
 0xbb0   : > { %8453 = vmatmul.bf16.gmra.mxu3 %v17027_v30  ;;  %10799 = vmatmul.bf16.vlgmr.msrb.gmra.mxu0 %v18800_v9  ;;  %v13453_v62 = vld [vmem:[%s20883_s8 + $0x48] sm:$0xf] }
 0xbb1   : > { %10895 = vmatpush.bf16.msrb.mxu0 %v14042_v57  ;;  %v15117_v57 = vld [vmem:[%s20883_s8 + $0xf4] sm:$0xf0] }
 0xbb2   : > { %v13534_v52 = vor.u32 %v15117_v57, %v13533_v37 }
 0xbb3   : > { %v8414_v13 = vpop.f32.mrf.mxu3  ;;  %v8604_v40 = vpop.f32.mrf.mxu1 }
 0xbb4   : > { %v8932_v43 = vmax.f32 %v8931_v59, %v8414_v13  ;;  %v8999_v7 = vmax.f32 %v8998_v8, %v8604_v40  ;;  %v15214_v8 = vld [vmem:[%s20883_s8 + $0x404] sm:$0xf]  ;;  %v15113_v13 = vld [vmem:[%s20883_s8 + $0xd4] sm:$0xf0] }
 0xbb5   : > { %10896 = vmatpush.bf16.msrb.mxu0 %v14026_v44  ;;  %v8372_v20 = vpop.f32.mrf.mxu2 }
 0xbb6   : > { %v8920_v35 = vmax.f32 %v8919_v1, %v8372_v20  ;;  %v13930_v1 = vor.u32 %v15214_v8, %v13927_v16  ;;  %v13437_v8 = vld [vmem:[%s20883_s8 + $0x28] sm:$0xf]  ;;  %v15093_v16 = vld [vmem:[%s20883_s8 + $0x34] sm:$0xf0] }
 0xbb7   : > { %v13438_v57 = vor.u32 %v15093_v16, %v13437_v8  ;;  %v13997_v8 = vld [vmem:[%s20883_s8 + $0x488] sm:$0xf]  ;;  %v15233_v16 = vld [vmem:[%s20883_s8 + $0x494] sm:$0xf0] }
 0xbb8   : > { %v18824_v56 = vmax.f32 %v18134_v14, %v8920_v35  ;;  %v13518_v35 = vor.u32 %v15113_v13, %v13517_v34 }
 0xbb9   : > { %10897 = vmatpush.bf16.msrb.mxu0 %v14010_v17 }
 0xbba   : > { %8690 = vmatmul.bf16.gmra.mxu2 %v20989_v32 }
 0xbbb   : > { %v8416_v39 = vpop.f32.mrf.mxu3  ;;  %v8607_v4 = vpop.f32.mrf.mxu1 }
 0xbbc   : > { %v8933_v15 = vmax.f32 %v8932_v43, %v8416_v39  ;;  %v9000_v45 = vmax.f32 %v8999_v7, %v8607_v4  ;;  %v15105_v39 = vld [vmem:[%s20883_s8 + $0x94] sm:$0xf0] }
 0xbbd   : > { %10898 = vmatpush.bf16.msrb.mxu0 %v13994_v49  ;;  %v8651_v14 = vpop.f32.mrf.mxu2  ;;  %v13502_v49 = vor.u32 %v15109_v54, %v13501_v55  ;;  %v14133_v54 = vld [vmem:[%s20883_s8 + $0x5a0] sm:$0xf] }
 0xbc0   : > { %8458 = vmatmul.bf16.gmra.mxu3 %v17035_v24  ;;  %10851 = vmatmul.bf16.vlgmr.msra.gmra.mxu0 %v18547_v3 }
 0xbc1   : > { %10899 = vmatpush.bf16.msrb.mxu0 %v13978_v27  ;;  %v15101_v27 = vld [vmem:[%s20883_s8 + $0x74] sm:$0xf0] }
 0xbc3   : > { %v8419_v50 = vpop.f32.mrf.mxu3  ;;  %v8609_v33 = vpop.f32.mrf.mxu1 }
 0xbc4   : > { %v8934_v22 = vmax.f32 %v8933_v15, %v8419_v50  ;;  %v9001_v25 = vmax.f32 %v9000_v45, %v8609_v33 }
 0xbc5   : > { %10900 = vmatpush.bf16.msrb.mxu0 %v13962_v51  ;;  %v8653_v29 = vpop.f32.mrf.mxu2 }
 0xbc6   : > { %v9014_v59 = vmax.f32 %v8651_v14, %v8653_v29  ;;  %v13469_v14 = vld [vmem:[%s20883_s8 + $0x68] sm:$0xf]  ;;  %v13454_v29 = vor.u32 %v15097_v2, %v13453_v62  ;;  %v15237_v2 = vld [vmem:[%s20883_s8 + $0x4b4] sm:$0xf0] }
 0xbc7   : > { %v13470_v36 = vor.u32 %v15101_v27, %v13469_v14  ;;  %v14013_v62 = vld [vmem:[%s20883_s8 + $0x4a8] sm:$0xf] }
 0xbc9   : > { %10901 = vmatpush.bf16.msrb.mxu0 %v13946_v0  ;;  %v14165_v0 = vld [vmem:[%s20883_s8 + $0x5e0] sm:$0xf] }
 0xbca   : > { %8695 = vmatmul.bf16.gmra.mxu2 %v20990_v53 }
 0xbcb   : > { %v8421_v44 = vpop.f32.mrf.mxu3  ;;  %v8612_v6 = vpop.f32.mrf.mxu1 }
 0xbcc   : > { %v8935_v40 = vmax.f32 %v8934_v22, %v8421_v44  ;;  %v18866_v43 = vmax.f32 %v9001_v25, %v8612_v6  ;;  %v15272_v25 = vld [vmem:[%s20883_s8 + $0x5cc] sm:$0xf0]  ;;  %v13421_v6 = vld [vmem:[%s20883_s8 + $0x8] sm:$0xf] }
 0xbcd   : > { %10902 = vmatpush.bf16.msrb.mxu0 %v13930_v1  ;;  %v8656_v20 = vpop.f32.mrf.mxu2  ;;  %v14149_v1 = vld [vmem:[%s20883_s8 + $0x5c0] sm:$0xf] }
 0xbce   : > { %v9015_v17 = vmax.f32 %v9014_v59, %v8656_v20  ;;  %v15276_v59 = vld [vmem:[%s20883_s8 + $0x5ec] sm:$0xf0]  ;;  %v14150_v34 = vor.u32 %v15272_v25, %v14149_v1  ;;  %v15245_v20 = vld [vmem:[%s20883_s8 + $0x4f4] sm:$0xf0]  ;;  %v13998_v25 = vor.u32 %v15233_v16, %v13997_v8 }
 0xbcf   : > { %v14166_v37 = vor.u32 %v15276_v59, %v14165_v0  ;;  %v14014_v0 = vor.u32 %v15237_v2, %v14013_v62  ;;  %v13655_v62 = vld [vmem:[%s20883_s8 + $0x1f0] sm:$0xf0] }
 0xbd0   : > { %8739 = vmatmul.bf16.vlgmr.msra.gmra.mxu3 %v20980_v38  ;;  %10903 = vmatmul.bf16.vlgmr.msrb.gmra.mxu0 %v18800_v9  ;;  %v13486_v38 = vor.u32 %v15105_v39, %v13485_v23  ;;  %v14029_v39 = vld [vmem:[%s20883_s8 + $0x4c8] sm:$0xf] }
 0xbd1   : > { %10947 = vmatpush.bf16.msra.mxu0 %v13534_v52  ;;  %10804 = vmatpush.bf16.msrb.mxu1 %v14166_v37  ;;  %v14085_v37 = vld [vmem:[%s20883_s8 + $0x540] sm:$0xf] }
 0xbd3   : > { %v8424_v7 = vpop.f32.mrf.mxu3  ;;  %v18876_v31 = vpop.f32.mrf.mxu1 }
 0xbd4   : > { %v8936_v4 = vmax.f32 %v8935_v40, %v8424_v7  ;;  %v14045_v40 = vld [vmem:[%s20883_s8 + $0x4e8] sm:$0xf] }
 0xbd5   : > { %10948 = vmatpush.bf16.msra.mxu0 %v13518_v35  ;;  %v8658_v15 = vpop.f32.mrf.mxu2  ;;  %10805 = vmatpush.bf16.msrb.mxu1 %v14150_v34  ;;  %v14046_v7 = vor.u32 %v15245_v20, %v14045_v40  ;;  %v15229_v34 = vld [vmem:[%s20883_s8 + $0x474] sm:$0xf0]  ;;  %v14069_v20 = vld [vmem:[%s20883_s8 + $0x520] sm:$0xf] }
 0xbd6   : > { %v9016_v45 = vmax.f32 %v9015_v17, %v8658_v15  ;;  %v14117_v15 = vld [vmem:[%s20883_s8 + $0x580] sm:$0xf] }
 0xbd9   : > { %10949 = vmatpush.bf16.msra.mxu0 %v13502_v49  ;;  %v15268_v49 = vld [vmem:[%s20883_s8 + $0x5ac] sm:$0xf0] }
 0xbda   : > { %8700 = vmatmul.bf16.gmra.mxu2 %v20991_v48  ;;  %v14134_v23 = vor.u32 %v15268_v49, %v14133_v54  ;;  %v13965_v54 = vld [vmem:[%s20883_s8 + $0x448] sm:$0xf]  ;;  %v15225_v49 = vld [vmem:[%s20883_s8 + $0x454] sm:$0xf0] }
 0xbdb   : > { %v8426_v58 = vpop.f32.mrf.mxu3  ;;  %v18891_v51 = vpop.f32.mrf.mxu1 }
 0xbdc   : > { %v8937_v50 = vmax.f32 %v8936_v4, %v8426_v58  ;;  %v15241_v4 = vld [vmem:[%s20883_s8 + $0x4d4] sm:$0xf0]  ;;  %10806 = vmatpush.bf16.msrb.mxu1 %v14134_v23  ;;  %v15180_v23 = vld [vmem:[%s20883_s8 + $0x2ec] sm:$0xf0] }
 0xbdd   : > { %10950 = vmatpush.bf16.msra.mxu0 %v13486_v38  ;;  %v8661_v33 = vpop.f32.mrf.mxu2  ;;  %v14030_v27 = vor.u32 %v15241_v4, %v14029_v39  ;;  %v14053_v4 = vld [vmem:[%s20883_s8 + $0x500] sm:$0xf] }
 0xbde   : > { %v9017_v22 = vmax.f32 %v9016_v45, %v8661_v33  ;;  %v15264_v45 = vld [vmem:[%s20883_s8 + $0x58c] sm:$0xf0] }
 0xbe0   : > { %8744 = vmatmul.bf16.gmra.mxu3 %v20981_v11  ;;  %v15089_v11 = vld [vmem:[%s20883_s8 + $0x14] sm:$0xf0] }
 0xbe1   : > { %10951 = vmatpush.bf16.msra.mxu0 %v13470_v36  ;;  %v13422_v55 = vor.u32 %v15089_v11, %v13421_v6  ;;  %v14118_v36 = vor.u32 %v15264_v45, %v14117_v15  ;;  %v13981_v11 = vld [vmem:[%s20883_s8 + $0x468] sm:$0xf]  ;;  %v15248_v15 = vld [vmem:[%s20883_s8 + $0x50c] sm:$0xf0] }
 0xbe3   : > { %v8429_v52 = vpop.f32.mrf.mxu3  ;;  %v18918_v44 = vpop.f32.mrf.mxu1  ;;  %10807 = vmatpush.bf16.msrb.mxu1 %v14118_v36  ;;  %v14054_v36 = vor.u32 %v15248_v15, %v14053_v4  ;;  %v13519_v15 = vld [vmem:[%s20883_s8 + $0xd8] sm:$0xf0] }
 0xbe4   : > { %v8938_v13 = vmax.f32 %v8937_v50, %v8429_v52 }
 0xbe5   : > { %10952 = vmatpush.bf16.msra.mxu0 %v13454_v29  ;;  %v8663_v17 = vpop.f32.mrf.mxu2  ;;  %v15260_v29 = vld [vmem:[%s20883_s8 + $0x56c] sm:$0xf0] }
 0xbe6   : > { %v9018_v35 = vmax.f32 %v9017_v22, %v8663_v17  ;;  %v14101_v22 = vld [vmem:[%s20883_s8 + $0x560] sm:$0xf]  ;;  %v15252_v17 = vld [vmem:[%s20883_s8 + $0x52c] sm:$0xf0] }
 0xbe7   : > { %v14102_v59 = vor.u32 %v15260_v29, %v14101_v22 }
 0xbe9   : > { %10953 = vmatpush.bf16.msra.mxu0 %v13438_v57  ;;  %10808 = vmatpush.bf16.msrb.mxu1 %v14102_v59  ;;  %v15256_v57 = vld [vmem:[%s20883_s8 + $0x54c] sm:$0xf0] }
 0xbea   : > { %8705 = vmatmul.bf16.gmra.mxu2 %v20992_v28  ;;  %v14086_v52 = vor.u32 %v15256_v57, %v14085_v37  ;;  %v15176_v59 = vld [vmem:[%s20883_s8 + $0x2cc] sm:$0xf0]  ;;  %v15142_v57 = vld [vmem:[%s20883_s8 + $0x1c4] sm:$0xf] }
 0xbeb   : > { %v8431_v38 = vpop.f32.mrf.mxu3  ;;  %v18951_v14 = vpop.f32.mrf.mxu1 }
 0xbec   : > { %v8939_v58 = vmax.f32 %v8938_v13, %v8431_v38 }
 0xbed   : > { %10954 = vmatpush.bf16.msra.mxu0 %v13422_v55  ;;  %v8666_v50 = vpop.f32.mrf.mxu2  ;;  %10809 = vmatpush.bf16.msrb.mxu1 %v14086_v52  ;;  %v14070_v55 = vor.u32 %v15252_v17, %v14069_v20  ;;  %v15217_v52 = vld [vmem:[%s20883_s8 + $0x414] sm:$0xf0] }
 0xbee   : > { %v9019_v33 = vmax.f32 %v9018_v35, %v8666_v50  ;;  %v13982_v35 = vor.u32 %v15229_v34, %v13981_v11  ;;  %v13949_v50 = vld [vmem:[%s20883_s8 + $0x428] sm:$0xf]  ;;  %v13535_v34 = vld [vmem:[%s20883_s8 + $0xf8] sm:$0xf0] }
 0xbf0   : > { %10955 = vmatmul.bf16.vlgmr.msra.gmra.mxu0 %v18547_v3  ;;  %8749 = vmatmul.bf16.gmra.mxu3 %v20982_v18 }
 0xbf1   : > { %10999 = vmatpush.bf16.msrb.mxu0 %v14046_v7  ;;  %10810 = vmatpush.bf16.msrb.mxu1 %v14070_v55  ;;  %v13781_v7 = vld [vmem:[%s20883_s8 + $0x2e0] sm:$0xf]  ;;  %v15138_v55 = vld [vmem:[%s20883_s8 + $0x1a4] sm:$0xf] }
 0xbf2   : > { %v13782_v39 = vor.u32 %v15180_v23, %v13781_v7  ;;  %v15111_v23 = vld [vmem:[%s20883_s8 + $0xcc] sm:$0xf] }
 0xbf3   : > { %v8434_v1 = vpop.f32.mrf.mxu3  ;;  %v18979_v18 = vpop.f32.mrf.mxu1 }
 0xbf4   : > { %v8940_v6 = vmax.f32 %v8939_v58, %v8434_v1  ;;  %v15146_v58 = vld [vmem:[%s20883_s8 + $0x1e4] sm:$0xf]  ;;  %10765 = vmatpush.bf16.msra.mxu2 %v13782_v39  ;;  %v13639_v1 = vld [vmem:[%s20883_s8 + $0x1d0] sm:$0xf0] }
 0xbf5   : > { %11000 = vmatpush.bf16.msrb.mxu0 %v14030_v27  ;;  %v8668_v13 = vpop.f32.mrf.mxu2  ;;  %v13966_v27 = vor.u32 %v15225_v49, %v13965_v54  ;;  %v13658_v22 = vor.u32 %v15146_v58, %v13655_v62  ;;  %10811 = vmatpush.bf16.msrb.mxu1 %v14054_v36  ;;  %v13642_v11 = vor.u32 %v15142_v57, %v13639_v1  ;;  %v13623_v54 = vld [vmem:[%s20883_s8 + $0x1b0] sm:$0xf0]  ;;  %v15134_v62 = vld [vmem:[%s20883_s8 + $0x184] sm:$0xf] }
 0xbf6   : > { %v9020_v40 = vmax.f32 %v9019_v33, %v8668_v13  ;;  %v15221_v33 = vld [vmem:[%s20883_s8 + $0x434] sm:$0xf0]  ;;  %v15172_v13 = vld [vmem:[%s20883_s8 + $0x2ac] sm:$0xf0]  ;;  %v13626_v39 = vor.u32 %v15138_v55, %v13623_v54  ;;  %v15130_v57 = vld [vmem:[%s20883_s8 + $0x164] sm:$0xf] }
 0xbf7   : > { %v13950_v37 = vor.u32 %v15221_v33, %v13949_v50  ;;  %v13522_v50 = vor.u32 %v15111_v23, %v13519_v15  ;;  %v15107_v33 = vld [vmem:[%s20883_s8 + $0xac] sm:$0xf]  ;;  %v13591_v1 = vld [vmem:[%s20883_s8 + $0x170] sm:$0xf0]  ;;  %v15126_v55 = vld [vmem:[%s20883_s8 + $0x144] sm:$0xf] }
 0xbf8   : > { %v13575_v54 = vld [vmem:[%s20883_s8 + $0x150] sm:$0xf0]  ;;  %v15099_v23 = vld [vmem:[%s20883_s8 + $0x6c] sm:$0xf]  ;;  %v13685_v15 = vld [vmem:[%s20883_s8 + $0x220] sm:$0xf] }
 0xbf9   : > { %11001 = vmatpush.bf16.msrb.mxu0 %v14014_v0  ;;  %v13765_v0 = vld [vmem:[%s20883_s8 + $0x2c0] sm:$0xf]  ;;  %10856 = vmatpush.bf16.msra.mxu1 %v13658_v22 }
 0xbfa   : > { %8710 = vmatmul.bf16.gmra.mxu2 %v20993_v46  ;;  %v13766_v16 = vor.u32 %v15176_v59, %v13765_v0  ;;  %v13717_v0 = vld [vmem:[%s20883_s8 + $0x260] sm:$0xf]  ;;  %v15164_v59 = vld [vmem:[%s20883_s8 + $0x26c] sm:$0xf0] }
 0xbfb   : > { %v8436_v45 = vpop.f32.mrf.mxu3  ;;  %v19012_v38 = vpop.f32.mrf.mxu1 }
 0xbfc   : > { %v8941_v2 = vmax.f32 %v8940_v6, %v8436_v45  ;;  %v15115_v6 = vld [vmem:[%s20883_s8 + $0xec] sm:$0xf]  ;;  %10766 = vmatpush.bf16.msra.mxu2 %v13766_v16  ;;  %v13733_v45 = vld [vmem:[%s20883_s8 + $0x280] sm:$0xf] }
 0xbfd   : > { %11002 = vmatpush.bf16.msrb.mxu0 %v13998_v25  ;;  %v8671_v29 = vpop.f32.mrf.mxu2  ;;  %v13933_v25 = vld [vmem:[%s20883_s8 + $0x408] sm:$0xf]  ;;  %10857 = vmatpush.bf16.msra.mxu1 %v13642_v11  ;;  %v13538_v7 = vor.u32 %v15115_v6, %v13535_v34  ;;  %v15103_v6 = vld [vmem:[%s20883_s8 + $0x8c] sm:$0xf]  ;;  %v13594_v11 = vor.u32 %v15130_v57, %v13591_v1  ;;  %v15118_v57 = vld [vmem:[%s20883_s8 + $0x104] sm:$0xf] }
 0xbfe   : > { %v19032_v8 = vmax.f32 %v9020_v40, %v8671_v29  ;;  %v13503_v29 = vld [vmem:[%s20883_s8 + $0xb8] sm:$0xf0]  ;;  %v13543_v1 = vld [vmem:[%s20883_s8 + $0x110] sm:$0xf0] }
 0xc00   : > { %8754 = vmatmul.bf16.gmra.mxu3 %v20984_v60  ;;  %v13749_v60 = vld [vmem:[%s20883_s8 + $0x2a0] sm:$0xf] }
 0xc01   : > { %11003 = vmatpush.bf16.msrb.mxu0 %v13982_v35  ;;  %v13750_v40 = vor.u32 %v15172_v13, %v13749_v60  ;;  %v13934_v35 = vor.u32 %v15217_v52, %v13933_v25  ;;  %10858 = vmatpush.bf16.msra.mxu1 %v13626_v39  ;;  %v13506_v52 = vor.u32 %v15107_v33, %v13503_v29  ;;  %v13487_v60 = vld [vmem:[%s20883_s8 + $0x98] sm:$0xf0]  ;;  %v13701_v13 = vld [vmem:[%s20883_s8 + $0x240] sm:$0xf] }
 0xc02   : > { %v13578_v39 = vor.u32 %v15126_v55, %v13575_v54  ;;  %v13455_v29 = vld [vmem:[%s20883_s8 + $0x58] sm:$0xf0] }
 0xc03   : > { %v8439_v20 = vpop.f32.mrf.mxu3  ;;  %v19059_v17 = vpop.f32.mrf.mxu1  ;;  %10767 = vmatpush.bf16.msra.mxu2 %v13750_v40  ;;  %v15160_v40 = vld [vmem:[%s20883_s8 + $0x24c] sm:$0xf0] }
 0xc04   : > { %v19067_v49 = vmax.f32 %v8941_v2, %v8439_v20  ;;  %v13607_v2 = vld [vmem:[%s20883_s8 + $0x190] sm:$0xf0] }
 0xc05   : > { %11004 = vmatpush.bf16.msrb.mxu0 %v13966_v27  ;;  %v8673_v4 = vpop.f32.mrf.mxu2  ;;  %v15168_v27 = vld [vmem:[%s20883_s8 + $0x28c] sm:$0xf0]  ;;  %v13610_v22 = vor.u32 %v15134_v62, %v13607_v2 }
 0xc06   : > { %v9022_v36 = vmax.f32 %v19032_v8, %v8673_v4  ;;  %v13734_v58 = vor.u32 %v15168_v27, %v13733_v45  ;;  %v13718_v8 = vor.u32 %v15164_v59, %v13717_v0  ;;  %v13471_v4 = vld [vmem:[%s20883_s8 + $0x78] sm:$0xf0]  ;;  %v13669_v0 = vld [vmem:[%s20883_s8 + $0x200] sm:$0xf] }
 0xc07   : > { %10859 = vmatpush.bf16.msra.mxu1 %v13610_v22 }
 0xc08   : > { %10768 = vmatpush.bf16.msra.mxu2 %v13734_v58  ;;  %v13559_v58 = vld [vmem:[%s20883_s8 + $0x130] sm:$0xf0] }
 0xc09   : > { %11005 = vmatpush.bf16.msrb.mxu0 %v13950_v37 }
 0xc0a   : > { %8715 = vmatmul.bf16.gmra.mxu2 %v20994_v47 }
 0xc0b   : > { %v8441_v16 = vpop.f32.mrf.mxu3  ;;  %v19102_v37 = vpop.f32.mrf.mxu1  ;;  %10860 = vmatpush.bf16.msra.mxu1 %v13594_v11  ;;  %v13439_v11 = vld [vmem:[%s20883_s8 + $0x38] sm:$0xf0] }
 0xc0c   : > { %v8943_v25 = vmax.f32 %v19067_v49, %v8441_v16  ;;  %10769 = vmatpush.bf16.msra.mxu2 %v13718_v8  ;;  %v9003_v49 = vmax.f32 %v18866_v43, %v18876_v31  ;;  %v15156_v43 = vld [vmem:[%s20883_s8 + $0x22c] sm:$0xf0]  ;;  %v9115_v16 = vrot.slane %v18824_v56, 4 }
 0xc0d   : > { %11006 = vmatpush.bf16.msrb.mxu0 %v13934_v35  ;;  %v8676_v34 = vpop.f32.mrf.mxu2  ;;  %v13702_v35 = vor.u32 %v15160_v40, %v13701_v13  ;;  %v13686_v31 = vor.u32 %v15156_v43, %v13685_v15 }
 0xc0e   : > { %v9023_v20 = vmax.f32 %v9022_v36, %v8676_v34  ;;  %v15122_v36 = vld [vmem:[%s20883_s8 + $0x124] sm:$0xf] }
 0xc0f   : > { %10861 = vmatpush.bf16.msra.mxu1 %v13578_v39  ;;  %v13562_v33 = vor.u32 %v15122_v36, %v13559_v58 }
 0xc10   : > { %11007 = vmatmul.bf16.vlgmr.msrb.gmra.mxu0 %v18800_v9  ;;  %8759 = vmatmul.bf16.gmra.mxu3 %v20985_v21  ;;  %v9004_v21 = vmax.f32 %v9003_v49, %v18891_v51  ;;  %v15095_v51 = vld [vmem:[%s20883_s8 + $0x4c] sm:$0xf] }
 0xc11   : > { %11051 = vmatpush.bf16.msra.mxu0 %v13538_v7  ;;  %v13490_v7 = vor.u32 %v15103_v6, %v13487_v60  ;;  %10770 = vmatpush.bf16.msra.mxu2 %v13702_v35  ;;  %v13546_v6 = vor.u32 %v15118_v57, %v13543_v1  ;;  %v9116_v60 = vmax.f32 %v18824_v56, %v9115_v16  ;;  %v13999_v57 = vld [vmem:[%s20883_s8 + $0x498] sm:$0xf0] }
 0xc12   : > { %v9005_v62 = vmax.f32 %v9004_v21, %v18918_v44  ;;  %v15152_v44 = vld [vmem:[%s20883_s8 + $0x20c] sm:$0xf0] }
 0xc13   : > { %v8444_v45 = vpop.f32.mrf.mxu3  ;;  %v8634_v27 = vpop.f32.mrf.mxu1  ;;  %v13670_v8 = vor.u32 %v15152_v44, %v13669_v0  ;;  %10862 = vmatpush.bf16.msra.mxu1 %v13562_v33  ;;  %v9117_v39 = vrot.slane %v9116_v60, 2 }
 0xc14   : > { %v8944_v2 = vmax.f32 %v8943_v25, %v8444_v45  ;;  %v9006_v59 = vmax.f32 %v9005_v62, %v18951_v14  ;;  %v15091_v14 = vld [vmem:[%s20883_s8 + $0x2c] sm:$0xf]  ;;  %v19206_v45 = vld [vmem:[%s20884_s9] sm:$0xf] }
 0xc15   : > { %11052 = vmatpush.bf16.msra.mxu0 %v13522_v50  ;;  %v13474_v50 = vor.u32 %v15099_v23, %v13471_v4  ;;  %v8678_v22 = vpop.f32.mrf.mxu2  ;;  %10771 = vmatpush.bf16.msra.mxu2 %v13686_v31  ;;  %v13442_v54 = vor.u32 %v15091_v14, %v13439_v11  ;;  %v14031_v31 = vld [vmem:[%s20883_s8 + $0x4d8] sm:$0xf0] }
 0xc16   : > { %v9007_v25 = vmax.f32 %v9006_v59, %v18979_v18  ;;  %v9024_v35 = vmax.f32 %v9023_v20, %v8678_v22  ;;  %v14047_v20 = vld [vmem:[%s20883_s8 + $0x4f8] sm:$0xf0]  ;;  %v15235_v22 = vld [vmem:[%s20883_s8 + $0x4ac] sm:$0xf] }
 0xc17   : > { %10863 = vmatpush.bf16.msra.mxu1 %v13546_v6 }
 0xc18   : > { %v9008_v34 = vmax.f32 %v9007_v25, %v19012_v38  ;;  %v13423_v38 = vld [vmem:[%s20883_s8 + $0x18] sm:$0xf0] }
 0xc19   : > { %11053 = vmatpush.bf16.msra.mxu0 %v13506_v52  ;;  %v13458_v52 = vor.u32 %v15095_v51, %v13455_v29  ;;  %10772 = vmatpush.bf16.msra.mxu2 %v13670_v8  ;;  %v10731_v51 = vperm.slane %v19206_v45, 0  ;;  %v14015_v29 = vld [vmem:[%s20883_s8 + $0x4b8] sm:$0xf0] }
 0xc1a   : > { %8720 = vmatmul.bf16.gmra.mxu2 %v17027_v30  ;;  %v9009_v40 = vmax.f32 %v9008_v34, %v19059_v17  ;;  %v15243_v17 = vld [vmem:[%s20883_s8 + $0x4ec] sm:$0xf]  ;;  %v14018_v59 = vor.u32 %v15235_v22, %v14015_v29  ;;  %v14151_v22 = vld [vmem:[%s20883_s8 + $0x5d0] sm:$0xf0] }
 0xc1b   : > { %v8446_v13 = vpop.f32.mrf.mxu3  ;;  %v8637_v18 = vpop.f32.mrf.mxu1  ;;  %v14050_v43 = vor.u32 %v15243_v17, %v14047_v20  ;;  %v10749_v8 = vadd.f32 %v18776_v10, %v10731_v51  ;;  %v15223_v17 = vld [vmem:[%s20883_s8 + $0x44c] sm:$0xf]  ;;  %v13967_v20 = vld [vmem:[%s20883_s8 + $0x458] sm:$0xf0] }
 0xc1c   : > { %v8945_v55 = vmax.f32 %v8944_v2, %v8446_v13  ;;  %v9010_v56 = vmax.f32 %v9009_v40, %v19102_v37  ;;  %v15239_v37 = vld [vmem:[%s20883_s8 + $0x4cc] sm:$0xf] }
 0xc1d   : > { %11054 = vmatpush.bf16.msra.mxu0 %v13490_v7  ;;  %v8681_v49 = vpop.f32.mrf.mxu2  ;;  %v15087_v7 = vld [vmem:[%s20883_s8 + $0xc] sm:$0xf] }
 0xc1e   : > { %v9025_v23 = vmax.f32 %v9024_v35, %v8681_v49  ;;  %v9011_v4 = vmax.f32 %v9010_v56, %v8634_v27  ;;  %v13426_v15 = vor.u32 %v15087_v7, %v13423_v38  ;;  %v9118_v27 = vmax.f32 %v9116_v60, %v9117_v39 }
 0xc20   : > { %8764 = vmatmul.bf16.gmra.mxu3 %v20986_v42  ;;  %v9012_v21 = vmax.f32 %v9011_v4, %v8637_v18  ;;  %v9119_v0 = vrot.slane %v9118_v27, 1 }
 0xc21   : > { %11055 = vmatpush.bf16.msra.mxu0 %v13474_v50  ;;  %v14034_v50 = vor.u32 %v15239_v37, %v14031_v31  ;;  %v14167_v37 = vld [vmem:[%s20883_s8 + $0x5f0] sm:$0xf0] }
 0xc22   : > { %v9120_v1 = vmax.f32 %v9118_v27, %v9119_v0  ;;  %v15215_v0 = vld [vmem:[%s20883_s8 + $0x40c] sm:$0xf] }
 0xc23   : > { %v8449_v36 = vpop.f32.mrf.mxu3  ;;  %v8639_v58 = vpop.f32.mrf.mxu1 }
 0xc24   : > { %v8946_v42 = vmax.f32 %v8945_v55, %v8449_v36  ;;  %v9013_v62 = vmax.f32 %v9012_v21, %v8639_v58  ;;  %v15227_v55 = vld [vmem:[%s20883_s8 + $0x46c] sm:$0xf]  ;;  %v13970_v36 = vor.u32 %v15223_v17, %v13967_v20 }
 0xc25   : > { %11056 = vmatpush.bf16.msra.mxu0 %v13458_v52  ;;  %v8683_v2 = vpop.f32.mrf.mxu2 }
 0xc26   : > { %v9081_v33 = vmax.f32 %v18279_v61, %v9013_v62  ;;  %v15231_v61 = vld [vmem:[%s20883_s8 + $0x48c] sm:$0xf]  ;;  %v9026_v14 = vmax.f32 %v9025_v23, %v8683_v2  ;;  %v13951_v62 = vld [vmem:[%s20883_s8 + $0x438] sm:$0xf0] }
 0xc27   : > { %v14002_v18 = vor.u32 %v15231_v61, %v13999_v57  ;;  %v15266_v57 = vld [vmem:[%s20883_s8 + $0x5a4] sm:$0xf] }
 0xc28   : > { %v9133_v44 = vrot.slane %v9081_v33, 4 }
 0xc29   : > { %11057 = vmatpush.bf16.msra.mxu0 %v13442_v54  ;;  %v13983_v54 = vld [vmem:[%s20883_s8 + $0x478] sm:$0xf0] }
 0xc2a   : > { %v9134_v16 = vmax.f32 %v9081_v33, %v9133_v44  ;;  %8725 = vmatmul.bf16.gmra.mxu2 %v17035_v24  ;;  %v13986_v56 = vor.u32 %v15227_v55, %v13983_v54  ;;  %v15270_v33 = vld [vmem:[%s20883_s8 + $0x5c4] sm:$0xf]  ;;  %v13935_v44 = vld [vmem:[%s20883_s8 + $0x418] sm:$0xf0] }
 0xc2b   : > { %v8451_v10 = vpop.f32.mrf.mxu3  ;;  %v10761_v52 = vpop.f32.mrf.mxu1  ;;  %v15258_v55 = vld [vmem:[%s20883_s8 + $0x564] sm:$0xf] }
 0xc2c   : > { %v9135_v6 = vrot.slane %v9134_v16, 2  ;;  %v8947_v11 = vmax.f32 %v8946_v42, %v8451_v10  ;;  %v19231_v34 = vadd.f32 %v10761_v52, %v10749_v8  ;;  %v15219_v42 = vld [vmem:[%s20883_s8 + $0x42c] sm:$0xf]  ;;  %v14154_v8 = vor.u32 %v15270_v33, %v14151_v22  ;;  %v13645_v33 = vld [vmem:[%s20883_s8 + $0x1c8] sm:$0xf] }
 0xc2d   : > { %11058 = vmatpush.bf16.msra.mxu0 %v13426_v15  ;;  %v8686_v60 = vpop.f32.mrf.mxu2  ;;  %v19233_v13 = vpop.f32.mrf.mxu0  ;;  %v13954_v29 = vor.u32 %v15219_v42, %v13951_v62  ;;  %v13938_v52 = vor.u32 %v15215_v0, %v13935_v44  ;;  %v15145_v22 = vld [vmem:[%s20883_s8 + $0x1d4] sm:$0xf0]  ;;  %v13629_v0 = vld [vmem:[%s20883_s8 + $0x1a8] sm:$0xf] }
 0xc2e   : > { %v9136_v40 = vmax.f32 %v9134_v16, %v9135_v6  ;;  %v9027_v35 = vmax.f32 %v9026_v14, %v8686_v60  ;;  %v14119_v60 = vld [vmem:[%s20883_s8 + $0x590] sm:$0xf0]  ;;  %v15141_v44 = vld [vmem:[%s20883_s8 + $0x1b4] sm:$0xf0] }
 0xc30   : > { %11059 = vmatmul.bf16.vlgmr.msra.gmra.mxu0 %v18547_v3  ;;  %v19228_v3 = vld [vmem:[%s20882_s7] sm:$0xff]  ;;  %v9137_v7 = vrot.slane %v9136_v40, 1  ;;  %8769 = vmatmul.bf16.gmra.mxu3 %v20987_v12 }
 0xc31   : > { %11103 = vmatpush.bf16.msrb.mxu0 %v14050_v43  ;;  %v9155_v25 = vperm.slane %v19228_v3, 2  ;;  %v9158_v38 = vperm.slane %v19228_v3, 5  ;;  %v15274_v12 = vld [vmem:[%s20883_s8 + $0x5e4] sm:$0xf] }
 0xc32   : > { %v9138_v23 = vmax.f32 %v9136_v40, %v9137_v7  ;;  %v14170_v2 = vor.u32 %v15274_v12, %v14167_v37 }
 0xc33   : > { %v9171_v49 = vadd.f32 %v9155_v25, %v9120_v1  ;;  %v8454_v39 = vpop.f32.mrf.mxu3  ;;  %v10763_v4 = vpop.f32.mrf.mxu1  ;;  %v14135_v1 = vld [vmem:[%s20883_s8 + $0x5b0] sm:$0xf0] }
 0xc34   : > { %v9174_v43 = vadd.f32 %v9158_v38, %v9138_v23  ;;  %v8948_v21 = vmax.f32 %v8947_v11, %v8454_v39  ;;  %v14138_v14 = vor.u32 %v15266_v57, %v14135_v1  ;;  %v15262_v11 = vld [vmem:[%s20883_s8 + $0x584] sm:$0xf]  ;;  %v14071_v4 = vld [vmem:[%s20883_s8 + $0x530] sm:$0xf0]  ;;  %v13613_v1 = vld [vmem:[%s20883_s8 + $0x188] sm:$0xf] }
 0xc35   : > { %11104 = vmatpush.bf16.msrb.mxu0 %v14034_v50  ;;  %v9179_v15 = vmax.f32 %v9171_v49, 0.0  ;;  %v8688_v31 = vpop.f32.mrf.mxu2  ;;  %v10802_v27 = vpop.f32.mrf.mxu0  ;;  %v14122_v40 = vor.u32 %v15262_v11, %v14119_v60  ;;  %v15254_v38 = vld [vmem:[%s20883_s8 + $0x544] sm:$0xf]  ;;  %v15133_v11 = vld [vmem:[%s20883_s8 + $0x174] sm:$0xf0] }
 0xc36   : > { %v9182_v58 = vmax.f32 %v9174_v43, 0.0  ;;  %v9028_v16 = vmax.f32 %v9027_v35, %v8688_v31  ;;  %v15250_v39 = vld [vmem:[%s20883_s8 + $0x524] sm:$0xf]  ;;  %v14055_v27 = vld [vmem:[%s20883_s8 + $0x510] sm:$0xf0] }
 0xc37   : > { %v19263_v51 = vpack.c.bf16 %v9179_v15, %v9179_v15  ;;  %v14074_v37 = vor.u32 %v15250_v39, %v14071_v4  ;;  %v15246_v31 = vld [vmem:[%s20883_s8 + $0x504] sm:$0xf]  ;;  %v13549_v4 = vld [vmem:[%s20883_s8 + $0x108] sm:$0xf] }
 0xc38   : > { %v19261_v50 = vpack.c.bf16 %v9182_v58, %v9182_v58  ;;  %v14058_v42 = vor.u32 %v15246_v31, %v14055_v27  ;;  %v14293_v27 = vld [vmem:[%s20883_s8 + $0x6e0] sm:$0xf] }
 0xc39   : > { %11105 = vmatpush.bf16.msrb.mxu0 %v14018_v59 }
 0xc3a   : > { %10773 = vmatmul.bf16.vlgmr.msra.gmra.mxu2 %v19263_v51  ;;  %10812 = vmatmul.bf16.vlgmr.msrb.gmra.mxu1 %v19261_v50 }
 0xc3b   : > { %10908 = vmatpush.bf16.msrb.mxu1 %v14170_v2  ;;  %v8456_v59 = vpop.f32.mrf.mxu3 }
 0xc3c   : > { %v8949_v61 = vmax.f32 %v8948_v21, %v8456_v59 }
 0xc3d   : > { %11106 = vmatpush.bf16.msrb.mxu0 %v14002_v18  ;;  %v8691_v25 = vpop.f32.mrf.mxu2  ;;  %v19285_v10 = vpop.f32.mrf.mxu0 }
 0xc3e   : > { %v9029_v6 = vmax.f32 %v9028_v16, %v8691_v25  ;;  %v15137_v25 = vld [vmem:[%s20883_s8 + $0x194] sm:$0xf0] }
 0xc3f   : > { %10909 = vmatpush.bf16.msrb.mxu1 %v14154_v8 }
 0xc40   : > { %8774 = vmatmul.bf16.gmra.mxu3 %v20988_v41  ;;  %v14103_v41 = vld [vmem:[%s20883_s8 + $0x570] sm:$0xf0] }
 0xc41   : > { %11107 = vmatpush.bf16.msrb.mxu0 %v13986_v56  ;;  %v14106_v7 = vor.u32 %v15258_v55, %v14103_v41  ;;  %v13581_v55 = vld [vmem:[%s20883_s8 + $0x148] sm:$0xf]  ;;  %v13909_v41 = vld [vmem:[%s20883_s8 + $0x3e0] sm:$0xf] }
 0xc43   : > { %10910 = vmatpush.bf16.msrb.mxu1 %v14138_v14  ;;  %v8459_v18 = vpop.f32.mrf.mxu3  ;;  %v13597_v14 = vld [vmem:[%s20883_s8 + $0x168] sm:$0xf] }
 0xc44   : > { %v8950_v35 = vmax.f32 %v8949_v61, %v8459_v18  ;;  %v13630_v61 = vor.u32 %v15141_v44, %v13629_v0 }
 0xc45   : > { %11108 = vmatpush.bf16.msrb.mxu0 %v13970_v36  ;;  %v8693_v54 = vpop.f32.mrf.mxu2  ;;  %v10854_v49 = vpop.f32.mrf.mxu0  ;;  %v13661_v36 = vld [vmem:[%s20883_s8 + $0x1e8] sm:$0xf] }
 0xc46   : > { %v9030_v17 = vmax.f32 %v9029_v6, %v8693_v54  ;;  %v13614_v6 = vor.u32 %v15137_v25, %v13613_v1  ;;  %v15212_v54 = vld [vmem:[%s20883_s8 + $0x3ec] sm:$0xf0]  ;;  %v14125_v25 = vld [vmem:[%s20883_s8 + $0x588] sm:$0xf] }
 0xc47   : > { %10911 = vmatpush.bf16.msrb.mxu1 %v14122_v40  ;;  %v13598_v40 = vor.u32 %v15133_v11, %v13597_v14  ;;  %v13910_v49 = vor.u32 %v15212_v54, %v13909_v41  ;;  %v14109_v41 = vld [vmem:[%s20883_s8 + $0x568] sm:$0xf]  ;;  %v15261_v54 = vld [vmem:[%s20883_s8 + $0x574] sm:$0xf0] }
 0xc49   : > { %11109 = vmatpush.bf16.msrb.mxu0 %v13954_v29  ;;  %v13646_v29 = vor.u32 %v15145_v22, %v13645_v33  ;;  %10778 = vmatpush.bf16.msrb.mxu3 %v13910_v49  ;;  %v14277_v33 = vld [vmem:[%s20883_s8 + $0x6c0] sm:$0xf]  ;;  %v15304_v22 = vld [vmem:[%s20883_s8 + $0x6cc] sm:$0xf0] }
 0xc4a   : > { %10864 = vmatmul.bf16.vlgmr.msra.gmra.mxu1 %v18792_v63  ;;  %v14278_v44 = vor.u32 %v15304_v22, %v14277_v33  ;;  %v14229_v49 = vld [vmem:[%s20883_s8 + $0x660] sm:$0xf]  ;;  %v14061_v22 = vld [vmem:[%s20883_s8 + $0x508] sm:$0xf] }
 0xc4b   : > { %10912 = vmatpush.bf16.msrb.mxu1 %v14106_v7  ;;  %v8461_v56 = vpop.f32.mrf.mxu3 }
 0xc4c   : > { %v8951_v20 = vmax.f32 %v8950_v35, %v8461_v56 }
 0xc4d   : > { %11110 = vmatpush.bf16.msrb.mxu0 %v13938_v52  ;;  %v8696_v15 = vpop.f32.mrf.mxu2  ;;  %v19314_v43 = vpop.f32.mrf.mxu0 }
 0xc4e   : > { %v19317_v21 = vmax.f32 %v18297_v19, %v8951_v20  ;;  %v9031_v12 = vmax.f32 %v9030_v17, %v8696_v15  ;;  %v15149_v19 = vld [vmem:[%s20883_s8 + $0x1f4] sm:$0xf0] }
 0xc4f   : > { %v15121_v15 = vld [vmem:[%s20883_s8 + $0x114] sm:$0xf0] }
 0xc50   : > { %11111 = vmatmul.bf16.vlgmr.msrb.gmra.mxu0 %v18800_v9  ;;  %v14087_v9 = vld [vmem:[%s20883_s8 + $0x550] sm:$0xf0]  ;;  %8779 = vmatmul.bf16.gmra.mxu3 %v20989_v32  ;;  %v13662_v32 = vor.u32 %v15149_v19, %v13661_v36  ;;  %v13550_v31 = vor.u32 %v15121_v15, %v13549_v4  ;;  %v15308_v36 = vld [vmem:[%s20883_s8 + $0x6ec] sm:$0xf0]  ;;  %v14213_v4 = vld [vmem:[%s20883_s8 + $0x640] sm:$0xf] }
 0xc51   : > { %v14090_v23 = vor.u32 %v15254_v38, %v14087_v9  ;;  %v13565_v38 = vld [vmem:[%s20883_s8 + $0x128] sm:$0xf]  ;;  %v15125_v9 = vld [vmem:[%s20883_s8 + $0x134] sm:$0xf0]  ;;  %v15288_v15 = vld [vmem:[%s20883_s8 + $0x64c] sm:$0xf0] }
 0xc52   : > { %v13566_v20 = vor.u32 %v15125_v9, %v13565_v38  ;;  %v14110_v38 = vor.u32 %v15261_v54, %v14109_v41  ;;  %v13647_v41 = vld [vmem:[%s20883_s8 + $0x1d8] sm:$0xf0]  ;;  %v15174_v54 = vld [vmem:[%s20883_s8 + $0x2c4] sm:$0xf] }
 0xc53   : > { %10913 = vmatpush.bf16.msrb.mxu1 %v14090_v23  ;;  %v8740_v58 = vpop.f32.mrf.mxu3 }
 0xc55   : > { %v8698_v62 = vpop.f32.mrf.mxu2  ;;  %v10906_v2 = vpop.f32.mrf.mxu0 }
 0xc56   : > { %v9032_v8 = vmax.f32 %v9031_v12, %v8698_v62  ;;  %v14173_v12 = vld [vmem:[%s20883_s8 + $0x5e8] sm:$0xf] }
 0xc57   : > { %10914 = vmatpush.bf16.msrb.mxu1 %v14074_v37  ;;  %v15277_v37 = vld [vmem:[%s20883_s8 + $0x5f4] sm:$0xf0] }
 0xc58   : > { %v14174_v19 = vor.u32 %v15277_v37, %v14173_v12 }
 0xc5b   : > { %10915 = vmatpush.bf16.msrb.mxu1 %v14058_v42  ;;  %v8742_v59 = vpop.f32.mrf.mxu3 }
 0xc5c   : > { %v9045_v16 = vmax.f32 %v8740_v58, %v8742_v59  ;;  %v14294_v58 = vor.u32 %v15308_v36, %v14293_v27  ;;  %v14141_v59 = vld [vmem:[%s20883_s8 + $0x5a8] sm:$0xf]  ;;  %v14214_v27 = vor.u32 %v15288_v15, %v14213_v4  ;;  %v15253_v36 = vld [vmem:[%s20883_s8 + $0x534] sm:$0xf0]  ;;  %v13751_v4 = vld [vmem:[%s20883_s8 + $0x2b0] sm:$0xf0] }
 0xc5d   : > { %v8701_v57 = vpop.f32.mrf.mxu2 }
 0xc5e   : > { %10916 = vmatmul.bf16.vlgmr.msrb.gmra.mxu1 %v19261_v50  ;;  %v19351_v52 = vmax.f32 %v9032_v8, %v8701_v57  ;;  %10817 = vmatpush.bf16.msrb.mxu2 %v14294_v58  ;;  %v15269_v8 = vld [vmem:[%s20883_s8 + $0x5b4] sm:$0xf0]  ;;  %v15208_v58 = vld [vmem:[%s20883_s8 + $0x3cc] sm:$0xf0] }
 0xc5f   : > { %10960 = vmatpush.bf16.msra.mxu1 %v13662_v32  ;;  %v14157_v32 = vld [vmem:[%s20883_s8 + $0x5c8] sm:$0xf]  ;;  %v14142_v57 = vor.u32 %v15269_v8, %v14141_v59  ;;  %v15147_v59 = vld [vmem:[%s20883_s8 + $0x1ec] sm:$0xf]  ;;  %v13663_v8 = vld [vmem:[%s20883_s8 + $0x1f8] sm:$0xf0] }
 0xc60   : > { %8784 = vmatmul.bf16.gmra.mxu3 %v20990_v53  ;;  %v15129_v53 = vld [vmem:[%s20883_s8 + $0x154] sm:$0xf0] }
 0xc61   : > { %v13582_v7 = vor.u32 %v15129_v53, %v13581_v55 }
 0xc62   : > { %10818 = vmatpush.bf16.msrb.mxu2 %v14278_v44 }
 0xc63   : > { %10961 = vmatpush.bf16.msra.mxu1 %v13646_v29  ;;  %v8745_v60 = vpop.f32.mrf.mxu3 }
 0xc64   : > { %v9046_v18 = vmax.f32 %v9045_v16, %v8745_v60  ;;  %v14261_v16 = vld [vmem:[%s20883_s8 + $0x6a0] sm:$0xf] }
 0xc65   : > { %v19360_v35 = vpop.f32.mrf.mxu2  ;;  %v14245_v60 = vld [vmem:[%s20883_s8 + $0x680] sm:$0xf] }
 0xc67   : > { %10962 = vmatpush.bf16.msra.mxu1 %v13630_v61  ;;  %v15300_v61 = vld [vmem:[%s20883_s8 + $0x6ac] sm:$0xf0] }
 0xc68   : > { %v14262_v1 = vor.u32 %v15300_v61, %v14261_v16  ;;  %v14181_v61 = vld [vmem:[%s20883_s8 + $0x600] sm:$0xf] }
 0xc6a   : > { %10819 = vmatpush.bf16.msrb.mxu2 %v14262_v1 }
 0xc6b   : > { %10963 = vmatpush.bf16.msra.mxu1 %v13614_v6  ;;  %v8747_v23 = vpop.f32.mrf.mxu3  ;;  %v15265_v6 = vld [vmem:[%s20883_s8 + $0x594] sm:$0xf0] }
 0xc6c   : > { %v9047_v17 = vmax.f32 %v9046_v18, %v8747_v23  ;;  %v15296_v18 = vld [vmem:[%s20883_s8 + $0x68c] sm:$0xf0]  ;;  %v14126_v55 = vor.u32 %v15265_v6, %v14125_v25  ;;  %v14093_v23 = vld [vmem:[%s20883_s8 + $0x548] sm:$0xf] }
 0xc6d   : > { %v19380_v56 = vpop.f32.mrf.mxu0  ;;  %v19382_v39 = vpop.f32.mrf.mxu2  ;;  %v14246_v53 = vor.u32 %v15296_v18, %v14245_v60  ;;  %v13666_v60 = vor.u32 %v15147_v59, %v13663_v8  ;;  %v15200_v59 = vld [vmem:[%s20883_s8 + $0x38c] sm:$0xf0] }
 0xc6f   : > { %10964 = vmatpush.bf16.msra.mxu1 %v13598_v40  ;;  %10820 = vmatpush.bf16.msrb.mxu2 %v14246_v53  ;;  %v15143_v53 = vld [vmem:[%s20883_s8 + $0x1cc] sm:$0xf] }
 0xc70   : > { %8789 = vmatmul.bf16.gmra.mxu3 %v20991_v48  ;;  %v15273_v48 = vld [vmem:[%s20883_s8 + $0x5d4] sm:$0xf0] }
 0xc71   : > { %v14158_v0 = vor.u32 %v15273_v48, %v14157_v32  ;;  %v14197_v48 = vld [vmem:[%s20883_s8 + $0x620] sm:$0xf] }
 0xc73   : > { %10965 = vmatpush.bf16.msra.mxu1 %v13582_v7  ;;  %v8750_v62 = vpop.f32.mrf.mxu3  ;;  %v15292_v7 = vld [vmem:[%s20883_s8 + $0x66c] sm:$0xf0] }
 0xc74   : > { %v9048_v2 = vmax.f32 %v9047_v17, %v8750_v62  ;;  %v14230_v9 = vor.u32 %v15292_v7, %v14229_v49  ;;  %v15257_v17 = vld [vmem:[%s20883_s8 + $0x554] sm:$0xf0]  ;;  %v15284_v62 = vld [vmem:[%s20883_s8 + $0x62c] sm:$0xf0]  ;;  %v13767_v49 = vld [vmem:[%s20883_s8 + $0x2d0] sm:$0xf0]  ;;  %v13650_v7 = vor.u32 %v15143_v53, %v13647_v41 }
 0xc75   : > { %v10958_v42 = vpop.f32.mrf.mxu0  ;;  %v19415_v29 = vpop.f32.mrf.mxu2  ;;  %v14094_v37 = vor.u32 %v15257_v17, %v14093_v23  ;;  %v14198_v33 = vor.u32 %v15284_v62, %v14197_v48  ;;  %v15139_v23 = vld [vmem:[%s20883_s8 + $0x1ac] sm:$0xf]  ;;  %v13735_v48 = vld [vmem:[%s20883_s8 + $0x290] sm:$0xf0]  ;;  %v15158_v41 = vld [vmem:[%s20883_s8 + $0x244] sm:$0xf] }
 0xc76   : > { %10821 = vmatpush.bf16.msrb.mxu2 %v14230_v9 }
 0xc77   : > { %10966 = vmatpush.bf16.msra.mxu1 %v13566_v20 }
 0xc7a   : > { %10822 = vmatpush.bf16.msrb.mxu2 %v14214_v27  ;;  %v13615_v27 = vld [vmem:[%s20883_s8 + $0x198] sm:$0xf0] }
 0xc7b   : > { %10967 = vmatpush.bf16.msra.mxu1 %v13550_v31  ;;  %v8752_v14 = vpop.f32.mrf.mxu3  ;;  %v14077_v31 = vld [vmem:[%s20883_s8 + $0x528] sm:$0xf] }
 0xc7c   : > { %v9049_v11 = vmax.f32 %v9048_v2, %v8752_v14  ;;  %v14078_v2 = vor.u32 %v15253_v36, %v14077_v31  ;;  %v15178_v14 = vld [vmem:[%s20883_s8 + $0x2e4] sm:$0xf]  ;;  %v13877_v36 = vld [vmem:[%s20883_s8 + $0x3a0] sm:$0xf] }
 0xc7d   : > { %v19442_v40 = vpop.f32.mrf.mxu2 }
 0xc7e   : > { %10968 = vmatmul.bf16.vlgmr.msra.gmra.mxu1 %v18792_v63  ;;  %10823 = vmatpush.bf16.msrb.mxu2 %v14198_v33 }
 0xc7f   : > { %11012 = vmatpush.bf16.msrb.mxu1 %v14174_v19  ;;  %v13893_v19 = vld [vmem:[%s20883_s8 + $0x3c0] sm:$0xf] }
 0xc80   : > { %8794 = vmatmul.bf16.gmra.mxu3 %v20992_v28  ;;  %v13894_v32 = vor.u32 %v15208_v58, %v13893_v19  ;;  %v15204_v19 = vld [vmem:[%s20883_s8 + $0x3ac] sm:$0xf0] }
 0xc81   : > { %v13878_v58 = vor.u32 %v15204_v19, %v13877_v36 }
 0xc82   : > { %10779 = vmatpush.bf16.msrb.mxu3 %v13894_v32  ;;  %v15166_v32 = vld [vmem:[%s20883_s8 + $0x284] sm:$0xf] }
 0xc83   : > { %11013 = vmatpush.bf16.msrb.mxu1 %v14158_v0  ;;  %v8755_v28 = vpop.f32.mrf.mxu3  ;;  %v15249_v0 = vld [vmem:[%s20883_s8 + $0x514] sm:$0xf0]  ;;  %v13738_v33 = vor.u32 %v15166_v32, %v13735_v48  ;;  %v13813_v32 = vld [vmem:[%s20883_s8 + $0x320] sm:$0xf] }
 0xc84   : > { %v9050_v20 = vmax.f32 %v9049_v11, %v8755_v28  ;;  %v14062_v25 = vor.u32 %v15249_v0, %v14061_v22  ;;  %v13783_v11 = vld [vmem:[%s20883_s8 + $0x2f0] sm:$0xf0]  ;;  %v13599_v0 = vld [vmem:[%s20883_s8 + $0x178] sm:$0xf0] }
 0xc85   : > { %v19469_v12 = vpop.f32.mrf.mxu2  ;;  %v13786_v18 = vor.u32 %v15178_v14, %v13783_v11  ;;  %v15127_v14 = vld [vmem:[%s20883_s8 + $0x14c] sm:$0xf] }
 0xc86   : > { %10780 = vmatpush.bf16.msrb.mxu3 %v13878_v58  ;;  %v13551_v58 = vld [vmem:[%s20883_s8 + $0x118] sm:$0xf0] }
 0xc87   : > { %11014 = vmatpush.bf16.msrb.mxu1 %v14142_v57  ;;  %v15280_v57 = vld [vmem:[%s20883_s8 + $0x60c] sm:$0xf0] }
 0xc88   : > { %v14182_v6 = vor.u32 %v15280_v57, %v14181_v61  ;;  %v15162_v57 = vld [vmem:[%s20883_s8 + $0x264] sm:$0xf] }
 0xc8a   : > { %10824 = vmatpush.bf16.msrb.mxu2 %v14182_v6 }
 0xc8b   : > { %11015 = vmatpush.bf16.msrb.mxu1 %v14126_v55  ;;  %v8757_v44 = vpop.f32.mrf.mxu3 }
 0xc8c   : > { %v9051_v16 = vmax.f32 %v9050_v20, %v8757_v44  ;;  %v15170_v20 = vld [vmem:[%s20883_s8 + $0x2a4] sm:$0xf]  ;;  %v13861_v44 = vld [vmem:[%s20883_s8 + $0x380] sm:$0xf] }
 0xc8d   : > { %v19483_v42 = vpop.f32.mrf.mxu0  ;;  %v19509_v1 = vpop.f32.mrf.mxu2  ;;  %v13754_v31 = vor.u32 %v15170_v20, %v13751_v4 }
 0xc8e   : > { %10869 = vmatpush.bf16.msra.mxu2 %v13786_v18  ;;  %v13845_v18 = vld [vmem:[%s20883_s8 + $0x360] sm:$0xf] }
 0xc8f   : > { %11016 = vmatpush.bf16.msrb.mxu1 %v14110_v38  ;;  %v13770_v38 = vor.u32 %v15174_v54, %v13767_v49  ;;  %v13703_v54 = vld [vmem:[%s20883_s8 + $0x250] sm:$0xf0]  ;;  %v9034_v49 = vmax.f32 %v19351_v52, %v19360_v35  ;;  %v15192_v52 = vld [vmem:[%s20883_s8 + $0x34c] sm:$0xf0] }
 0xc90   : > { %8799 = vmatmul.bf16.gmra.mxu3 %v20993_v46  ;;  %v13631_v46 = vld [vmem:[%s20883_s8 + $0x1b8] sm:$0xf0] }
 0xc91   : > { %v13634_v15 = vor.u32 %v15139_v23, %v13631_v46  ;;  %v13567_v23 = vld [vmem:[%s20883_s8 + $0x138] sm:$0xf0]  ;;  %v13829_v46 = vld [vmem:[%s20883_s8 + $0x340] sm:$0xf]  ;;  %v9035_v35 = vmax.f32 %v9034_v49, %v19382_v39  ;;  %v15119_v39 = vld [vmem:[%s20883_s8 + $0x10c] sm:$0xf] }
 0xc92   : > { %10870 = vmatpush.bf16.msra.mxu2 %v13770_v38  ;;  %v15123_v38 = vld [vmem:[%s20883_s8 + $0x12c] sm:$0xf]  ;;  %v13830_v4 = vor.u32 %v15192_v52, %v13829_v46  ;;  %v14143_v49 = vld [vmem:[%s20883_s8 + $0x5b8] sm:$0xf0] }
 0xc93   : > { %11017 = vmatpush.bf16.msrb.mxu1 %v14094_v37  ;;  %v8760_v9 = vpop.f32.mrf.mxu3  ;;  %v15135_v37 = vld [vmem:[%s20883_s8 + $0x18c] sm:$0xf]  ;;  %v13570_v36 = vor.u32 %v15123_v38, %v13567_v23  ;;  %v14127_v46 = vld [vmem:[%s20883_s8 + $0x598] sm:$0xf0] }
 0xc94   : > { %v9052_v17 = vmax.f32 %v9051_v16, %v8760_v9  ;;  %v13618_v62 = vor.u32 %v15135_v37, %v13615_v27  ;;  %v13862_v16 = vor.u32 %v15200_v59, %v13861_v44  ;;  %v15154_v37 = vld [vmem:[%s20883_s8 + $0x224] sm:$0xf]  ;;  %v9036_v27 = vmax.f32 %v9035_v35, %v19415_v29  ;;  %v15188_v29 = vld [vmem:[%s20883_s8 + $0x32c] sm:$0xf0] }
 0xc95   : > { %v11010_v55 = vpop.f32.mrf.mxu0  ;;  %v19537_v28 = vpop.f32.mrf.mxu2  ;;  %v13554_v44 = vor.u32 %v15119_v39, %v13551_v58  ;;  %v15255_v58 = vld [vmem:[%s20883_s8 + $0x54c] sm:$0xf] }
 0xc96   : > { %10871 = vmatpush.bf16.msra.mxu2 %v13754_v31  ;;  %10781 = vmatpush.bf16.msrb.mxu3 %v13862_v16  ;;  %v15196_v55 = vld [vmem:[%s20883_s8 + $0x36c] sm:$0xf0]  ;;  %v13687_v31 = vld [vmem:[%s20883_s8 + $0x230] sm:$0xf0]  ;;  %v9037_v48 = vmax.f32 %v9036_v27, %v19442_v40 }
 0xc97   : > { %11018 = vmatpush.bf16.msrb.mxu1 %v14078_v2  ;;  %v15131_v2 = vld [vmem:[%s20883_s8 + $0x16c] sm:$0xf]  ;;  %v13846_v53 = vor.u32 %v15196_v55, %v13845_v18  ;;  %v13690_v19 = vor.u32 %v15154_v37, %v13687_v31  ;;  %v9121_v55 = vrot.slane %v19317_v21, 4  ;;  %v14111_v37 = vld [vmem:[%s20883_s8 + $0x578] sm:$0xf0] }
 0xc98   : > { %v13602_v6 = vor.u32 %v15131_v2, %v13599_v0  ;;  %v14175_v2 = vld [vmem:[%s20883_s8 + $0x5f8] sm:$0xf0]  ;;  %v13671_v0 = vld [vmem:[%s20883_s8 + $0x210] sm:$0xf0]  ;;  %v9038_v40 = vmax.f32 %v9037_v48, %v19469_v12  ;;  %v15271_v12 = vld [vmem:[%s20883_s8 + $0x5cc] sm:$0xf] }
 0xc9a   : > { %10872 = vmatpush.bf16.msra.mxu2 %v13738_v33  ;;  %10782 = vmatpush.bf16.msrb.mxu3 %v13846_v53  ;;  %v13814_v33 = vor.u32 %v15188_v29, %v13813_v32 }
 0xc9b   : > { %11019 = vmatpush.bf16.msrb.mxu1 %v14062_v25  ;;  %v8762_v22 = vpop.f32.mrf.mxu3  ;;  %v13719_v25 = vld [vmem:[%s20883_s8 + $0x270] sm:$0xf0] }
 0xc9c   : > { %v9053_v8 = vmax.f32 %v9052_v17, %v8762_v22  ;;  %v13722_v11 = vor.u32 %v15162_v57, %v13719_v25  ;;  %v15150_v22 = vld [vmem:[%s20883_s8 + $0x204] sm:$0xf]  ;;  %v13797_v57 = vld [vmem:[%s20883_s8 + $0x300] sm:$0xf]  ;;  %v15184_v25 = vld [vmem:[%s20883_s8 + $0x30c] sm:$0xf0] }
 0xc9d   : > { %v19575_v61 = vpop.f32.mrf.mxu2  ;;  %v13674_v59 = vor.u32 %v15150_v22, %v13671_v0  ;;  %v15251_v0 = vld [vmem:[%s20883_s8 + $0x52c] sm:$0xf] }
 0xc9e   : > { %11020 = vmatmul.bf16.vlgmr.msrb.gmra.mxu1 %v19261_v50  ;;  %10873 = vmatpush.bf16.msra.mxu2 %v13722_v11  ;;  %v14159_v11 = vld [vmem:[%s20883_s8 + $0x5d8] sm:$0xf0] }
 0xc9f   : > { %11064 = vmatpush.bf16.msra.mxu1 %v13666_v60  ;;  %v13583_v60 = vld [vmem:[%s20883_s8 + $0x158] sm:$0xf0]  ;;  %10783 = vmatpush.bf16.msrb.mxu3 %v13830_v4 }
 0xca0   : > { %8804 = vmatmul.bf16.gmra.mxu3 %v20994_v47  ;;  %v13706_v47 = vor.u32 %v15158_v41, %v13703_v54  ;;  %v15267_v54 = vld [vmem:[%s20883_s8 + $0x5ac] sm:$0xf] }
 0xca2   : > { %10874 = vmatpush.bf16.msra.mxu2 %v13706_v47 }
 0xca3   : > { %11065 = vmatpush.bf16.msra.mxu1 %v13650_v7  ;;  %v13586_v7 = vor.u32 %v15127_v14, %v13583_v60  ;;  %v8765_v9 = vpop.f32.mrf.mxu3  ;;  %10784 = vmatpush.bf16.msrb.mxu3 %v13814_v33  ;;  %v13798_v60 = vor.u32 %v15184_v25, %v13797_v57  ;;  %v9159_v57 = vperm.slane %v19228_v3, 6 }
 0xca4   : > { %v9054_v17 = vmax.f32 %v9053_v8, %v8765_v9  ;;  %v14146_v9 = vor.u32 %v15267_v54, %v14143_v49 }
 0xca6   : > { %10875 = vmatpush.bf16.msra.mxu2 %v13690_v19 }
 0xca7   : > { %11066 = vmatpush.bf16.msra.mxu1 %v13634_v15  ;;  %v8723_v15 = vpop.f32.mrf.mxu2  ;;  %10785 = vmatpush.bf16.msrb.mxu3 %v13798_v60 }
 0xcaa   : > { %10876 = vmatpush.bf16.msra.mxu2 %v13674_v59  ;;  %v9156_v59 = vperm.slane %v19228_v3, 3  ;;  %v15306_v3 = vld [vmem:[%s20883_s8 + $0x6e4] sm:$0xf] }
 0xcab   : > { %11067 = vmatpush.bf16.msra.mxu1 %v13618_v62  ;;  %v15275_v62 = vld [vmem:[%s20883_s8 + $0x5ec] sm:$0xf]  ;;  %v8767_v8 = vpop.f32.mrf.mxu3 }
 0xcac   : > { %v14178_v16 = vor.u32 %v15275_v62, %v14175_v2  ;;  %v9055_v38 = vmax.f32 %v9054_v17, %v8767_v8 }
 0xcad   : > { %v19617_v20 = vpop.f32.mrf.mxu0 }
 0xcaf   : > { %11068 = vmatpush.bf16.msra.mxu1 %v13602_v6  ;;  %v9039_v6 = vmax.f32 %v9038_v40, %v19509_v1  ;;  %v8726_v18 = vpop.f32.mrf.mxu2  ;;  %v14162_v1 = vor.u32 %v15271_v12, %v14159_v11  ;;  %v14079_v40 = vld [vmem:[%s20883_s8 + $0x538] sm:$0xf0]  ;;  %v15247_v11 = vld [vmem:[%s20883_s8 + $0x50c] sm:$0xf] }
 0xcb0   : > { %8809 = vmatmul.bf16.gmra.mxu3 %v17027_v30  ;;  %v15263_v30 = vld [vmem:[%s20883_s8 + $0x58c] sm:$0xf] }
 0xcb1   : > { %v9040_v53 = vmax.f32 %v9039_v6, %v19537_v28  ;;  %v9122_v28 = vmax.f32 %v19317_v21, %v9121_v55  ;;  %v14130_v17 = vor.u32 %v15263_v30, %v14127_v46  ;;  %v14082_v6 = vor.u32 %v15251_v0, %v14079_v40 }
 0xcb3   : > { %11069 = vmatpush.bf16.msra.mxu1 %v13586_v7  ;;  %v9041_v41 = vmax.f32 %v9040_v53, %v19575_v61  ;;  %v8770_v47 = vpop.f32.mrf.mxu3  ;;  %v9123_v35 = vrot.slane %v9122_v28, 2 }
 0xcb4   : > { %v9056_v23 = vmax.f32 %v9055_v38, %v8770_v47 }
 0xcb5   : > { %v11062_v14 = vpop.f32.mrf.mxu0  ;;  %v9042_v7 = vmax.f32 %v9041_v41, %v8723_v15  ;;  %v15259_v15 = vld [vmem:[%s20883_s8 + $0x56c] sm:$0xf]  ;;  %v9124_v31 = vmax.f32 %v9122_v28, %v9123_v35  ;;  %v14263_v35 = vld [vmem:[%s20883_s8 + $0x6b0] sm:$0xf0] }
 0xcb6   : > { %v14114_v39 = vor.u32 %v15259_v15, %v14111_v37  ;;  %v14247_v15 = vld [vmem:[%s20883_s8 + $0x690] sm:$0xf0] }
 0xcb7   : > { %11070 = vmatpush.bf16.msra.mxu1 %v13570_v36  ;;  %v9043_v61 = vmax.f32 %v9042_v7, %v8726_v18  ;;  %v8728_v52 = vpop.f32.mrf.mxu2  ;;  %v19683_v21 = vpop.f32.mrf.mxu1  ;;  %v9125_v29 = vrot.slane %v9124_v31, 1 }
 0xcb9   : > { %v9126_v8 = vmax.f32 %v9124_v31, %v9125_v29 }
 0xcbb   : > { %11071 = vmatpush.bf16.msra.mxu1 %v13554_v44  ;;  %v8772_v36 = vpop.f32.mrf.mxu3  ;;  %v10732_v44 = vperm.slane %v19206_v45, 1  ;;  %v14063_v45 = vld [vmem:[%s20883_s8 + $0x518] sm:$0xf0]  ;;  %v9172_v55 = vadd.f32 %v9156_v59, %v9126_v8  ;;  %v14183_v59 = vld [vmem:[%s20883_s8 + $0x610] sm:$0xf0] }
 0xcbc   : > { %v9057_v25 = vmax.f32 %v9056_v23, %v8772_v36  ;;  %v14066_v54 = vor.u32 %v15247_v11, %v14063_v45  ;;  %v15290_v36 = vld [vmem:[%s20883_s8 + $0x664] sm:$0xf] }
 0xcbd   : > { %v10853_v18 = vadd.f32 %v19285_v10, %v10732_v44  ;;  %v9180_v47 = vmax.f32 %v9172_v55, 0.0  ;;  %v15278_v44 = vld [vmem:[%s20883_s8 + $0x604] sm:$0xf] }
 0xcbe   : > { %11072 = vmatmul.bf16.vlgmr.msra.gmra.mxu1 %v18792_v63  ;;  %v9044_v63 = vmax.f32 %v9043_v61, %v8728_v52  ;;  %v14279_v61 = vld [vmem:[%s20883_s8 + $0x6d0] sm:$0xf0]  ;;  %v15298_v52 = vld [vmem:[%s20883_s8 + $0x6a4] sm:$0xf] }
 0xcbf   : > { %11116 = vmatpush.bf16.msrb.mxu1 %v14178_v16  ;;  %v10774_v32 = vpop.f32.mrf.mxu2  ;;  %v10815_v2 = vpop.f32.mrf.mxu1  ;;  %v19738_v46 = vpack.c.bf16 %v9180_v47, %v9180_v47  ;;  %v13725_v47 = vld [vmem:[%s20883_s8 + $0x268] sm:$0xf] }
 0xcc0   : > { %v9082_v4 = vmax.f32 %v18402_v5, %v9044_v63  ;;  %v14095_v5 = vld [vmem:[%s20883_s8 + $0x558] sm:$0xf0]  ;;  %v19699_v62 = vadd.f32 %v10774_v32, %v19231_v34  ;;  %8814 = vmatmul.bf16.gmra.mxu3 %v17035_v24  ;;  %v14215_v32 = vld [vmem:[%s20883_s8 + $0x650] sm:$0xf0]  ;;  %v15282_v2 = vld [vmem:[%s20883_s8 + $0x624] sm:$0xf] }
 0xcc1   : > { %v14098_v33 = vor.u32 %v15255_v58, %v14095_v5  ;;  %v15286_v5 = vld [vmem:[%s20883_s8 + $0x644] sm:$0xf] }
 0xcc2   : > { %v9139_v27 = vrot.slane %v9082_v4, 4 }
 0xcc3   : > { %11117 = vmatpush.bf16.msrb.mxu1 %v14162_v1  ;;  %v8775_v24 = vpop.f32.mrf.mxu3  ;;  %v14295_v1 = vld [vmem:[%s20883_s8 + $0x6f0] sm:$0xf0] }
 0xcc4   : > { %v9140_v19 = vmax.f32 %v9082_v4, %v9139_v27  ;;  %v9058_v12 = vmax.f32 %v9057_v25, %v8775_v24  ;;  %v14298_v38 = vor.u32 %v15306_v3, %v14295_v1  ;;  %v14186_v24 = vor.u32 %v15278_v44, %v14183_v59  ;;  %v13741_v1 = vld [vmem:[%s20883_s8 + $0x288] sm:$0xf]  ;;  %v15301_v44 = vld [vmem:[%s20883_s8 + $0x6b4] sm:$0xf0]  ;;  %v14405_v59 = vld [vmem:[%s20883_s8 + $0x7c0] sm:$0xf] }
 0xcc6   : > { %v9141_v48 = vrot.slane %v9140_v19, 2 }
 0xcc7   : > { %11118 = vmatpush.bf16.msrb.mxu1 %v14146_v9  ;;  %v10776_v60 = vpop.f32.mrf.mxu2  ;;  %v10865_v41 = vpop.f32.mrf.mxu1  ;;  %v15302_v9 = vld [vmem:[%s20883_s8 + $0x6c4] sm:$0xf] }
 0xcc8   : > { %v9142_v22 = vmax.f32 %v9140_v19, %v9141_v48  ;;  %v19726_v28 = vadd.f32 %v10865_v41, %v10853_v18  ;;  %v14282_v30 = vor.u32 %v15302_v9, %v14279_v61  ;;  %v14218_v48 = vor.u32 %v15286_v5, %v14215_v32  ;;  %v13757_v60 = vld [vmem:[%s20883_s8 + $0x2a8] sm:$0xf]  ;;  %v15173_v18 = vld [vmem:[%s20883_s8 + $0x2b4] sm:$0xf0] }
 0xcc9   : > { %v13758_v55 = vor.u32 %v15173_v18, %v13757_v60  ;;  %v15169_v41 = vld [vmem:[%s20883_s8 + $0x294] sm:$0xf0]  ;;  %v14237_v60 = vld [vmem:[%s20883_s8 + $0x668] sm:$0xf] }
 0xcca   : > { %v9143_v16 = vrot.slane %v9142_v22, 1  ;;  %v15165_v9 = vld [vmem:[%s20883_s8 + $0x274] sm:$0xf0] }
 0xccb   : > { %11119 = vmatpush.bf16.msrb.mxu1 %v14130_v17  ;;  %v8777_v23 = vpop.f32.mrf.mxu3  ;;  %v14266_v17 = vor.u32 %v15298_v52, %v14263_v35  ;;  %v13726_v52 = vor.u32 %v15165_v9, %v13725_v47  ;;  %v15161_v35 = vld [vmem:[%s20883_s8 + $0x254] sm:$0xf0]  ;;  %v14357_v47 = vld [vmem:[%s20883_s8 + $0x760] sm:$0xf]  ;;  %v15324_v9 = vld [vmem:[%s20883_s8 + $0x76c] sm:$0xf0] }
 0xccc   : > { %v9144_v14 = vmax.f32 %v9142_v22, %v9143_v16  ;;  %v9059_v4 = vmax.f32 %v9058_v12, %v8777_v23  ;;  %v13789_v16 = vld [vmem:[%s20883_s8 + $0x2e8] sm:$0xf]  ;;  %v15177_v12 = vld [vmem:[%s20883_s8 + $0x2d4] sm:$0xf0] }
 0xccd   : > { %v19710_v34 = vpop.f32.mrf.mxu0  ;;  %v15293_v18 = vld [vmem:[%s20883_s8 + $0x674] sm:$0xf0] }
 0xcce   : > { %v9175_v53 = vadd.f32 %v9159_v57, %v9144_v14  ;;  %v15181_v57 = vld [vmem:[%s20883_s8 + $0x2f4] sm:$0xf0]  ;;  %v13773_v14 = vld [vmem:[%s20883_s8 + $0x2c8] sm:$0xf] }
 0xccf   : > { %11120 = vmatpush.bf16.msrb.mxu1 %v14114_v39  ;;  %v10867_v63 = vpop.f32.mrf.mxu1  ;;  %v14231_v39 = vld [vmem:[%s20883_s8 + $0x670] sm:$0xf0]  ;;  %v13774_v11 = vor.u32 %v15177_v12, %v13773_v14  ;;  %v14389_v14 = vld [vmem:[%s20883_s8 + $0x7a0] sm:$0xf]  ;;  %v15332_v12 = vld [vmem:[%s20883_s8 + $0x7ac] sm:$0xf0] }
 0xcd0   : > { %v9183_v49 = vmax.f32 %v9175_v53, 0.0  ;;  %10786 = vmatmul.bf16.vlgmr.msrb.gmra.mxu3 %v19738_v46  ;;  %v14234_v58 = vor.u32 %v15290_v36, %v14231_v39  ;;  %v19802_v53 = vld [vmem:[%s20884_s9] sm:$0xf]  ;;  %v14301_v36 = vld [vmem:[%s20883_s8 + $0x6e8] sm:$0xf] }
 0xcd1   : > { %v10733_v3 = vperm.slane %v19802_v53, 2  ;;  %v15309_v39 = vld [vmem:[%s20883_s8 + $0x6f4] sm:$0xf0] }
 0xcd2   : > { %v19728_v10 = vpack.c.bf16 %v9183_v49, %v9183_v49  ;;  %v13742_v49 = vor.u32 %v15169_v41, %v13741_v1  ;;  %v14302_v32 = vor.u32 %v15309_v39, %v14301_v36  ;;  %v15328_v1 = vld [vmem:[%s20883_s8 + $0x78c] sm:$0xf0]  ;;  %v15281_v36 = vld [vmem:[%s20883_s8 + $0x614] sm:$0xf0]  ;;  %v15179_v39 = vld [vmem:[%s20883_s8 + $0x2ec] sm:$0xf] }
 0xcd3   : > { %11121 = vmatpush.bf16.msrb.mxu1 %v14098_v33  ;;  %v8780_v37 = vpop.f32.mrf.mxu3  ;;  %v14199_v33 = vld [vmem:[%s20883_s8 + $0x630] sm:$0xf0] }
 0xcd4   : > { %10825 = vmatmul.bf16.vlgmr.msrb.gmra.mxu2 %v19728_v10  ;;  %v9060_v31 = vmax.f32 %v9059_v4, %v8780_v37  ;;  %v14202_v0 = vor.u32 %v15282_v2, %v14199_v33  ;;  %v13693_v4 = vld [vmem:[%s20883_s8 + $0x228] sm:$0xf]  ;;  %v14421_v2 = vld [vmem:[%s20883_s8 + $0x7e0] sm:$0xf]  ;;  %v15340_v33 = vld [vmem:[%s20883_s8 + $0x7ec] sm:$0xf0] }
 0xcd5   : > { %v11114_v7 = vpop.f32.mrf.mxu0  ;;  %10921 = vmatpush.bf16.msrb.mxu2 %v14298_v38 }
 0xcd6   : > { %v10957_v7 = vadd.f32 %v19380_v56, %v10733_v3  ;;  %v13709_v56 = vld [vmem:[%s20883_s8 + $0x248] sm:$0xf]  ;;  %v14373_v3 = vld [vmem:[%s20883_s8 + $0x780] sm:$0xf] }
 0xcd7   : > { %11122 = vmatpush.bf16.msrb.mxu1 %v14082_v6  ;;  %v13790_v6 = vor.u32 %v15181_v57, %v13789_v16  ;;  %v13710_v63 = vor.u32 %v15161_v35, %v13709_v56  ;;  %v14205_v56 = vld [vmem:[%s20883_s8 + $0x628] sm:$0xf]  ;;  %v15285_v35 = vld [vmem:[%s20883_s8 + $0x634] sm:$0xf0] }
 0xcd9   : > { %10922 = vmatpush.bf16.msrb.mxu2 %v14282_v30 }
 0xcdb   : > { %11123 = vmatpush.bf16.msrb.mxu1 %v14066_v54  ;;  %v19759_v19 = vpop.f32.mrf.mxu1  ;;  %v8782_v29 = vpop.f32.mrf.mxu3 }
 0xcdc   : > { %v9061_v40 = vmax.f32 %v9060_v31, %v8782_v29  ;;  %v13677_v31 = vld [vmem:[%s20883_s8 + $0x208] sm:$0xf] }
 0xcdd   : > { %10923 = vmatpush.bf16.msrb.mxu2 %v14266_v17  ;;  %v14285_v29 = vld [vmem:[%s20883_s8 + $0x6c8] sm:$0xf] }
 0xcde   : > { %11124 = vmatmul.bf16.vlgmr.msrb.gmra.mxu1 %v19261_v50  ;;  %v15294_v50 = vld [vmem:[%s20883_s8 + $0x684] sm:$0xf] }
 0xcdf   : > { %v14250_v27 = vor.u32 %v15294_v50, %v14247_v15  ;;  %v15157_v50 = vld [vmem:[%s20883_s8 + $0x234] sm:$0xf0] }
 0xce0   : > { %v13694_v37 = vor.u32 %v15157_v50, %v13693_v4  ;;  %v14341_v4 = vld [vmem:[%s20883_s8 + $0x740] sm:$0xf]  ;;  %v15320_v50 = vld [vmem:[%s20883_s8 + $0x74c] sm:$0xf0] }
 0xce1   : > { %10924 = vmatpush.bf16.msrb.mxu2 %v14250_v27  ;;  %v15153_v27 = vld [vmem:[%s20883_s8 + $0x214] sm:$0xf0] }
 0xce3   : > { %v10919_v22 = vpop.f32.mrf.mxu1  ;;  %v8785_v8 = vpop.f32.mrf.mxu3 }
 0xce4   : > { %10877 = vmatmul.bf16.vlgmr.msra.gmra.mxu2 %v19263_v51  ;;  %v9062_v25 = vmax.f32 %v9061_v40, %v8785_v8  ;;  %v14269_v40 = vld [vmem:[%s20883_s8 + $0x6a8] sm:$0xf]  ;;  %v15336_v8 = vld [vmem:[%s20883_s8 + $0x7cc] sm:$0xf0] }
 0xce5   : > { %10925 = vmatpush.bf16.msrb.mxu2 %v14234_v58  ;;  %v13678_v58 = vor.u32 %v15153_v27, %v13677_v31  ;;  %v14270_v57 = vor.u32 %v15301_v44, %v14269_v40  ;;  %v14342_v31 = vor.u32 %v15320_v50, %v14341_v4  ;;  %v14189_v27 = vld [vmem:[%s20883_s8 + $0x608] sm:$0xf]  ;;  %v14309_v40 = vld [vmem:[%s20883_s8 + $0x700] sm:$0xf]  ;;  %v15312_v44 = vld [vmem:[%s20883_s8 + $0x70c] sm:$0xf0] }
 0xce9   : > { %10926 = vmatpush.bf16.msrb.mxu2 %v14218_v48  ;;  %v15305_v48 = vld [vmem:[%s20883_s8 + $0x6d4] sm:$0xf0] }
 0xcea   : > { %v14286_v22 = vor.u32 %v15305_v48, %v14285_v29  ;;  %v15316_v29 = vld [vmem:[%s20883_s8 + $0x72c] sm:$0xf0]  ;;  %v14190_v48 = vor.u32 %v15281_v36, %v14189_v27  ;;  %v15194_v36 = vld [vmem:[%s20883_s8 + $0x364] sm:$0xf] }
 0xceb   : > { %v8787_v45 = vpop.f32.mrf.mxu3 }
 0xcec   : > { %v9063_v54 = vmax.f32 %v9062_v25, %v8787_v45  ;;  %v14406_v25 = vor.u32 %v15336_v8, %v14405_v59  ;;  %v14390_v45 = vor.u32 %v15332_v12, %v14389_v14  ;;  %v14310_v8 = vor.u32 %v15312_v44, %v14309_v40  ;;  %v15171_v14 = vld [vmem:[%s20883_s8 + $0x2ac] sm:$0xf]  ;;  %v13759_v12 = vld [vmem:[%s20883_s8 + $0x2b8] sm:$0xf0] }
 0xced   : > { %10927 = vmatpush.bf16.msrb.mxu2 %v14202_v0  ;;  %v14422_v0 = vor.u32 %v15340_v33, %v14421_v2 }
 0xcef   : > { %10830 = vmatpush.bf16.msra.mxu3 %v14422_v0  ;;  %v13775_v0 = vld [vmem:[%s20883_s8 + $0x2d8] sm:$0xf0] }
 0xcf1   : > { %10928 = vmatpush.bf16.msrb.mxu2 %v14186_v24  ;;  %v14253_v24 = vld [vmem:[%s20883_s8 + $0x688] sm:$0xf] }
 0xcf3   : > { %v8790_v38 = vpop.f32.mrf.mxu3  ;;  %10831 = vmatpush.bf16.msra.mxu3 %v14406_v25  ;;  %v13911_v25 = vld [vmem:[%s20883_s8 + $0x3f0] sm:$0xf0] }
 0xcf4   : > { %10929 = vmatmul.bf16.vlgmr.msrb.gmra.mxu2 %v19728_v10  ;;  %v19818_v61 = vmax.f32 %v9063_v54, %v8790_v38  ;;  %v14238_v54 = vor.u32 %v15293_v18, %v14237_v60  ;;  %v15289_v38 = vld [vmem:[%s20883_s8 + $0x654] sm:$0xf0]  ;;  %v13762_v60 = vor.u32 %v15171_v14, %v13759_v12  ;;  %v13815_v14 = vld [vmem:[%s20883_s8 + $0x330] sm:$0xf0] }
 0xcf5   : > { %10973 = vmatpush.bf16.msra.mxu2 %v13790_v6  ;;  %v15297_v6 = vld [vmem:[%s20883_s8 + $0x694] sm:$0xf0] }
 0xcf7   : > { %10832 = vmatpush.bf16.msra.mxu3 %v14390_v45  ;;  %v13895_v45 = vld [vmem:[%s20883_s8 + $0x3d0] sm:$0xf0] }
 0xcf9   : > { %10974 = vmatpush.bf16.msra.mxu2 %v13774_v11  ;;  %v14254_v11 = vor.u32 %v15297_v6, %v14253_v24 }
 0xcfb   : > { %v10969_v23 = vpop.f32.mrf.mxu1  ;;  %v19828_v17 = vpop.f32.mrf.mxu3 }
 0xcfc   : > { %v19820_v30 = vadd.f32 %v10969_v23, %v10957_v7  ;;  %v14221_v7 = vld [vmem:[%s20883_s8 + $0x648] sm:$0xf] }
 0xcfd   : > { %10975 = vmatpush.bf16.msra.mxu2 %v13758_v55  ;;  %v14222_v23 = vor.u32 %v15289_v38, %v14221_v7  ;;  %v15202_v7 = vld [vmem:[%s20883_s8 + $0x3a4] sm:$0xf]  ;;  %v13879_v38 = vld [vmem:[%s20883_s8 + $0x3b0] sm:$0xf0] }
 0xd01   : > { %10976 = vmatpush.bf16.msra.mxu2 %v13742_v49  ;;  %v14374_v49 = vor.u32 %v15328_v1, %v14373_v3  ;;  %v10734_v3 = vperm.slane %v19802_v53, 3  ;;  %v15167_v1 = vld [vmem:[%s20883_s8 + $0x28c] sm:$0xf] }
 0xd03   : > { %v10971_v15 = vpop.f32.mrf.mxu1  ;;  %v19848_v5 = vpop.f32.mrf.mxu3  ;;  %10833 = vmatpush.bf16.msra.mxu3 %v14374_v49 }
 0xd05   : > { %10977 = vmatpush.bf16.msra.mxu2 %v13726_v52  ;;  %v14358_v52 = vor.u32 %v15324_v9, %v14357_v47  ;;  %v13882_v47 = vor.u32 %v15202_v7, %v13879_v38  ;;  %v11061_v9 = vadd.f32 %v19617_v20, %v10734_v3  ;;  %v13863_v20 = vld [vmem:[%s20883_s8 + $0x390] sm:$0xf0]  ;;  %v14287_v3 = vld [vmem:[%s20883_s8 + $0x6d8] sm:$0xf0] }
 0xd07   : > { %10834 = vmatpush.bf16.msra.mxu3 %v14358_v52  ;;  %v13727_v52 = vld [vmem:[%s20883_s8 + $0x278] sm:$0xf0] }
 0xd09   : > { %10978 = vmatpush.bf16.msra.mxu2 %v13710_v63 }
 0xd0b   : > { %v19875_v16 = vpop.f32.mrf.mxu3  ;;  %10835 = vmatpush.bf16.msra.mxu3 %v14342_v31  ;;  %v13711_v31 = vld [vmem:[%s20883_s8 + $0x258] sm:$0xf0] }
 0xd0d   : > { %10979 = vmatpush.bf16.msra.mxu2 %v13694_v37  ;;  %v14206_v37 = vor.u32 %v15285_v35, %v14205_v56 }
 0xd11   : > { %10980 = vmatpush.bf16.msra.mxu2 %v13678_v58  ;;  %v13791_v58 = vld [vmem:[%s20883_s8 + $0x2f8] sm:$0xf0] }
 0xd12   : > { %v13794_v33 = vor.u32 %v15179_v39, %v13791_v58  ;;  %v13847_v39 = vld [vmem:[%s20883_s8 + $0x370] sm:$0xf0] }
 0xd13   : > { %v19903_v41 = vpop.f32.mrf.mxu3 }
 0xd14   : > { %10981 = vmatmul.bf16.vlgmr.msra.gmra.mxu2 %v19263_v51 }
 0xd15   : > { %11025 = vmatpush.bf16.msrb.mxu2 %v14302_v32  ;;  %v14325_v32 = vld [vmem:[%s20883_s8 + $0x720] sm:$0xf] }
 0xd16   : > { %v14326_v2 = vor.u32 %v15316_v29, %v14325_v32  ;;  %v13850_v32 = vor.u32 %v15194_v36, %v13847_v39  ;;  %v15155_v29 = vld [vmem:[%s20883_s8 + $0x22c] sm:$0xf] }
 0xd17   : > { %v15287_v39 = vld [vmem:[%s20883_s8 + $0x64c] sm:$0xf] }
 0xd18   : > { %10836 = vmatpush.bf16.msra.mxu3 %v14326_v2 }
 0xd19   : > { %11026 = vmatpush.bf16.msrb.mxu2 %v14286_v22  ;;  %v15175_v22 = vld [vmem:[%s20883_s8 + $0x2cc] sm:$0xf] }
 0xd1a   : > { %v13778_v24 = vor.u32 %v15175_v22, %v13775_v0  ;;  %v13831_v22 = vld [vmem:[%s20883_s8 + $0x350] sm:$0xf0]  ;;  %v9065_v0 = vmax.f32 %v19818_v61, %v19828_v17  ;;  %v14303_v61 = vld [vmem:[%s20883_s8 + $0x6f8] sm:$0xf0] }
 0xd1b   : > { %v19895_v55 = vpop.f32.mrf.mxu1  ;;  %v19929_v15 = vpop.f32.mrf.mxu3 }
 0xd1c   : > { %10837 = vmatpush.bf16.msra.mxu3 %v14310_v8  ;;  %v15151_v8 = vld [vmem:[%s20883_s8 + $0x20c] sm:$0xf] }
 0xd1d   : > { %11027 = vmatpush.bf16.msrb.mxu2 %v14270_v57  ;;  %v15210_v57 = vld [vmem:[%s20883_s8 + $0x3e4] sm:$0xf] }
 0xd1e   : > { %v13914_v6 = vor.u32 %v15210_v57, %v13911_v25  ;;  %v13679_v57 = vld [vmem:[%s20883_s8 + $0x218] sm:$0xf0]  ;;  %v9066_v25 = vmax.f32 %v9065_v0, %v19848_v5 }
 0xd1f   : > { %v13682_v12 = vor.u32 %v15151_v8, %v13679_v57 }
 0xd20   : > { %10882 = vmatpush.bf16.msrb.mxu3 %v13914_v6  ;;  %v15186_v6 = vld [vmem:[%s20883_s8 + $0x324] sm:$0xf]  ;;  %v9067_v5 = vmax.f32 %v9066_v25, %v19875_v16  ;;  %v13799_v16 = vld [vmem:[%s20883_s8 + $0x310] sm:$0xf0] }
 0xd21   : > { %11028 = vmatpush.bf16.msrb.mxu2 %v14254_v11  ;;  %v15206_v11 = vld [vmem:[%s20883_s8 + $0x3c4] sm:$0xf] }
 0xd22   : > { %v13898_v18 = vor.u32 %v15206_v11, %v13895_v45  ;;  %v13818_v11 = vor.u32 %v15186_v6, %v13815_v14  ;;  %v15488_v14 = vld [vmem:[%s20882_s7] sm:$0xff] }
 0xd23   : > { %v11023_v63 = vpop.f32.mrf.mxu1  ;;  %v19961_v59 = vpop.f32.mrf.mxu3 }
 0xd24   : > { %10883 = vmatpush.bf16.msrb.mxu3 %v13898_v18  ;;  %v15198_v63 = vld [vmem:[%s20883_s8 + $0x384] sm:$0xf]  ;;  %v15303_v18 = vld [vmem:[%s20883_s8 + $0x6cc] sm:$0xf] }
 0xd25   : > { %11029 = vmatpush.bf16.msrb.mxu2 %v14238_v54  ;;  %v13743_v54 = vld [vmem:[%s20883_s8 + $0x298] sm:$0xf0]  ;;  %v13866_v50 = vor.u32 %v15198_v63, %v13863_v20  ;;  %v14290_v7 = vor.u32 %v15303_v18, %v14287_v3  ;;  %v15338_v18 = vld [vmem:[%s20883_s8 + $0x7e4] sm:$0xf]  ;;  %v14423_v3 = vld [vmem:[%s20883_s8 + $0x7f0] sm:$0xf0] }
 0xd26   : > { %v13746_v53 = vor.u32 %v15167_v1, %v13743_v54  ;;  %v15182_v1 = vld [vmem:[%s20883_s8 + $0x304] sm:$0xf] }
 0xd28   : > { %10884 = vmatpush.bf16.msrb.mxu3 %v13882_v47  ;;  %v14271_v47 = vld [vmem:[%s20883_s8 + $0x6b8] sm:$0xf0] }
 0xd29   : > { %11030 = vmatpush.bf16.msrb.mxu2 %v14222_v23  ;;  %v15163_v23 = vld [vmem:[%s20883_s8 + $0x26c] sm:$0xf] }
 0xd2a   : > { %v13730_v4 = vor.u32 %v15163_v23, %v13727_v52 }
 0xd2b   : > { %v19989_v49 = vpop.f32.mrf.mxu3 }
 0xd2c   : > { %10885 = vmatpush.bf16.msrb.mxu3 %v13866_v50 }
 0xd2d   : > { %11031 = vmatpush.bf16.msrb.mxu2 %v14206_v37  ;;  %v15159_v37 = vld [vmem:[%s20883_s8 + $0x24c] sm:$0xf] }
 0xd2e   : > { %v13714_v58 = vor.u32 %v15159_v37, %v13711_v31 }
 0xd30   : > { %10886 = vmatpush.bf16.msrb.mxu3 %v13850_v32 }
 0xd31   : > { %11032 = vmatpush.bf16.msrb.mxu2 %v14190_v48  ;;  %v13695_v48 = vld [vmem:[%s20883_s8 + $0x238] sm:$0xf0] }
 0xd32   : > { %v13698_v40 = vor.u32 %v15155_v29, %v13695_v48 }
 0xd33   : > { %v8810_v27 = vpop.f32.mrf.mxu3 }
 0xd34   : > { %11033 = vmatmul.bf16.vlgmr.msrb.gmra.mxu2 %v19728_v10 }
 0xd35   : > { %11077 = vmatpush.bf16.msra.mxu2 %v13794_v33  ;;  %v15190_v33 = vld [vmem:[%s20883_s8 + $0x344] sm:$0xf] }
 0xd36   : > { %v13834_v44 = vor.u32 %v15190_v33, %v13831_v22  ;;  %v15283_v33 = vld [vmem:[%s20883_s8 + $0x62c] sm:$0xf] }
 0xd38   : > { %10887 = vmatpush.bf16.msrb.mxu3 %v13834_v44 }
 0xd39   : > { %11078 = vmatpush.bf16.msra.mxu2 %v13778_v24  ;;  %v15307_v24 = vld [vmem:[%s20883_s8 + $0x6ec] sm:$0xf] }
 0xd3a   : > { %v14306_v45 = vor.u32 %v15307_v24, %v14303_v61  ;;  %v15279_v24 = vld [vmem:[%s20883_s8 + $0x60c] sm:$0xf]  ;;  %v14191_v61 = vld [vmem:[%s20883_s8 + $0x618] sm:$0xf0] }
 0xd3b   : > { %v11073_v56 = vpop.f32.mrf.mxu1  ;;  %v8812_v17 = vpop.f32.mrf.mxu3 }
 0xd3c   : > { %v20004_v35 = vadd.f32 %v11073_v56, %v11061_v9  ;;  %10888 = vmatpush.bf16.msrb.mxu3 %v13818_v11  ;;  %v14255_v56 = vld [vmem:[%s20883_s8 + $0x698] sm:$0xf0] }
 0xd3d   : > { %11079 = vmatpush.bf16.msra.mxu2 %v13762_v60  ;;  %v9068_v60 = vmax.f32 %v9067_v5, %v19903_v41  ;;  %v13802_v41 = vor.u32 %v15182_v1, %v13799_v16 }
 0xd3f   : > { %v9069_v54 = vmax.f32 %v9068_v60, %v19929_v15 }
 0xd40   : > { %10889 = vmatpush.bf16.msrb.mxu3 %v13802_v41 }
 0xd41   : > { %11080 = vmatpush.bf16.msra.mxu2 %v13746_v53  ;;  %v9070_v38 = vmax.f32 %v9069_v54, %v19961_v59  ;;  %v15299_v53 = vld [vmem:[%s20883_s8 + $0x6ac] sm:$0xf]  ;;  %v14426_v54 = vor.u32 %v15338_v18, %v14423_v3  ;;  %v13805_v18 = vld [vmem:[%s20883_s8 + $0x308] sm:$0xf]  ;;  %v15185_v3 = vld [vmem:[%s20883_s8 + $0x314] sm:$0xf0] }
 0xd42   : > { %v14274_v23 = vor.u32 %v15299_v53, %v14271_v47  ;;  %v15295_v59 = vld [vmem:[%s20883_s8 + $0x68c] sm:$0xf]  ;;  %v15330_v47 = vld [vmem:[%s20883_s8 + $0x7a4] sm:$0xf] }
 0xd43   : > { %v11075_v2 = vpop.f32.mrf.mxu1  ;;  %v8815_v9 = vpop.f32.mrf.mxu3  ;;  %v9071_v15 = vmax.f32 %v9070_v38, %v19989_v49  ;;  %v14258_v20 = vor.u32 %v15295_v59, %v14255_v56  ;;  %v14239_v49 = vld [vmem:[%s20883_s8 + $0x678] sm:$0xf0]  ;;  %v14407_v38 = vld [vmem:[%s20883_s8 + $0x7d0] sm:$0xf0]  ;;  %v15322_v59 = vld [vmem:[%s20883_s8 + $0x764] sm:$0xf] }
 0xd44   : > { %v14359_v56 = vld [vmem:[%s20883_s8 + $0x770] sm:$0xf0] }
 0xd45   : > { %11081 = vmatpush.bf16.msra.mxu2 %v13730_v4  ;;  %v9072_v52 = vmax.f32 %v9071_v15, %v8810_v27  ;;  %v15326_v15 = vld [vmem:[%s20883_s8 + $0x784] sm:$0xf] }
 0xd47   : > { %v9073_v63 = vmax.f32 %v9072_v52, %v8812_v17 }
 0xd49   : > { %11082 = vmatpush.bf16.msra.mxu2 %v13714_v58  ;;  %v9074_v4 = vmax.f32 %v9073_v63, %v8815_v9  ;;  %v14223_v58 = vld [vmem:[%s20883_s8 + $0x658] sm:$0xf0] }
 0xd4a   : > { %v14226_v48 = vor.u32 %v15287_v39, %v14223_v58  ;;  %v15310_v39 = vld [vmem:[%s20883_s8 + $0x704] sm:$0xf]  ;;  %v14311_v58 = vld [vmem:[%s20883_s8 + $0x710] sm:$0xf0] }
 0xd4b   : > { %v8817_v37 = vpop.f32.mrf.mxu3 }
 0xd4c   : > { %v9075_v31 = vmax.f32 %v9074_v4, %v8817_v37  ;;  %v15318_v4 = vld [vmem:[%s20883_s8 + $0x744] sm:$0xf] }
 0xd4d   : > { %11083 = vmatpush.bf16.msra.mxu2 %v13698_v40  ;;  %v15314_v37 = vld [vmem:[%s20883_s8 + $0x724] sm:$0xf] }
 0xd4e   : > { %v9083_v36 = vmax.f32 %v18577_v26, %v9075_v31  ;;  %v14207_v26 = vld [vmem:[%s20883_s8 + $0x638] sm:$0xf0]  ;;  %v14327_v31 = vld [vmem:[%s20883_s8 + $0x730] sm:$0xf0] }
 0xd4f   : > { %v14210_v8 = vor.u32 %v15283_v33, %v14207_v26  ;;  %v13901_v33 = vld [vmem:[%s20883_s8 + $0x3c8] sm:$0xf]  ;;  %v15209_v26 = vld [vmem:[%s20883_s8 + $0x3d4] sm:$0xf0] }
 0xd50   : > { %v9145_v29 = vrot.slane %v9083_v36, 4 }
 0xd51   : > { %11084 = vmatpush.bf16.msra.mxu2 %v13682_v12  ;;  %v14194_v12 = vor.u32 %v15279_v24, %v14191_v61  ;;  %v13853_v24 = vld [vmem:[%s20883_s8 + $0x368] sm:$0xf]  ;;  %v15197_v61 = vld [vmem:[%s20883_s8 + $0x374] sm:$0xf0] }
 0xd52   : > { %v9146_v2 = vmax.f32 %v9083_v36, %v9145_v29  ;;  %v14330_v36 = vor.u32 %v15314_v37, %v14327_v31  ;;  %v15213_v29 = vld [vmem:[%s20883_s8 + $0x3f4] sm:$0xf0]  ;;  %v14365_v37 = vld [vmem:[%s20883_s8 + $0x768] sm:$0xf] }
 0xd53   : > { %v10787_v0 = vpop.f32.mrf.mxu3  ;;  %v15325_v31 = vld [vmem:[%s20883_s8 + $0x774] sm:$0xf0] }
 0xd54   : > { %11085 = vmatmul.bf16.vlgmr.msra.gmra.mxu2 %v19263_v51  ;;  %v15291_v51 = vld [vmem:[%s20883_s8 + $0x66c] sm:$0xf]  ;;  %v9147_v40 = vrot.slane %v9146_v2, 2  ;;  %v10788_v44 = vadd.f32 %v10787_v0, %v19699_v62  ;;  %v9160_v62 = vperm.slane %v15488_v14, 7  ;;  %v13885_v0 = vld [vmem:[%s20883_s8 + $0x3a8] sm:$0xf] }
 0xd55   : > { %11129 = vmatpush.bf16.msrb.mxu2 %v14306_v45  ;;  %v14242_v27 = vor.u32 %v15291_v51, %v14239_v49  ;;  %v14343_v51 = vld [vmem:[%s20883_s8 + $0x750] sm:$0xf0] }
 0xd56   : > { %v9148_v57 = vmax.f32 %v9146_v2, %v9147_v40  ;;  %v10801_v25 = vadd.f32 %v19233_v13, %v10788_v44  ;;  %v14346_v49 = vor.u32 %v15318_v4, %v14343_v51  ;;  %v15205_v40 = vld [vmem:[%s20883_s8 + $0x3b4] sm:$0xf0]  ;;  %v15355_v4 = vld [vmem:[%s20885_s10 + $0x64] sm:$0xf0] }
 0xd57   : > { %v10826_v32 = vpop.f32.mrf.mxu2  ;;  %v13886_v44 = vor.u32 %v15205_v40, %v13885_v0  ;;  %v14333_v0 = vld [vmem:[%s20883_s8 + $0x728] sm:$0xf]  ;;  %v15317_v40 = vld [vmem:[%s20883_s8 + $0x734] sm:$0xf0] }
 0xd58   : > { %v9149_v6 = vrot.slane %v9148_v57, 1  ;;  %v10814_v5 = vadd.f32 %v19683_v21, %v10801_v25 }
 0xd59   : > { %11130 = vmatpush.bf16.msrb.mxu2 %v14290_v7  ;;  %v15334_v7 = vld [vmem:[%s20883_s8 + $0x7c4] sm:$0xf] }
 0xd5a   : > { %v9150_v13 = vmax.f32 %v9148_v57, %v9149_v6  ;;  %v20120_v11 = vadd.f32 %v10826_v32, %v10814_v5  ;;  %v14410_v53 = vor.u32 %v15334_v7, %v14407_v38  ;;  %v13917_v32 = vld [vmem:[%s20883_s8 + $0x3e8] sm:$0xf]  ;;  %v15201_v57 = vld [vmem:[%s20883_s8 + $0x394] sm:$0xf0]  ;;  %v13854_v6 = vor.u32 %v15197_v61, %v13853_v24 }
 0xd5b   : > { %v20093_v50 = vpop.f32.mrf.mxu1  ;;  %v10789_v45 = vpop.f32.mrf.mxu3  ;;  %v13918_v2 = vor.u32 %v15213_v29, %v13917_v32  ;;  %v15193_v5 = vld [vmem:[%s20883_s8 + $0x354] sm:$0xf0]  ;;  %v14413_v38 = vld [vmem:[%s20883_s8 + $0x7c8] sm:$0xf]  ;;  %v14366_v32 = vor.u32 %v15325_v31, %v14365_v37  ;;  %v14334_v24 = vor.u32 %v15317_v40, %v14333_v0  ;;  %v15191_v0 = vld [vmem:[%s20883_s8 + $0x34c] sm:$0xf] }
 0xd5c   : > { %v9176_v60 = vadd.f32 %v9160_v62, %v9150_v13  ;;  %v13837_v62 = vld [vmem:[%s20883_s8 + $0x348] sm:$0xf]  ;;  %v15189_v45 = vld [vmem:[%s20883_s8 + $0x334] sm:$0xf0]  ;;  %v14541_v40 = vld [vmem:[%s20885_s10 + $0xd0] sm:$0xf] }
 0xd5d   : > { %11131 = vmatpush.bf16.msrb.mxu2 %v14274_v23  ;;  %v14375_v23 = vld [vmem:[%s20883_s8 + $0x790] sm:$0xf0]  ;;  %v13821_v13 = vld [vmem:[%s20883_s8 + $0x328] sm:$0xf] }
 0xd5e   : > { %v9184_v1 = vmax.f32 %v9176_v60, 0.0  ;;  %v14378_v52 = vor.u32 %v15326_v15, %v14375_v23  ;;  %v13822_v60 = vor.u32 %v15189_v45, %v13821_v13  ;;  %v15357_v15 = vld [vmem:[%s20885_s10 + $0x74] sm:$0xf0]  ;;  %v14349_v29 = vld [vmem:[%s20883_s8 + $0x748] sm:$0xf] }
 0xd5f   : > { %v10828_v17 = vpop.f32.mrf.mxu2  ;;  %v14317_v61 = vld [vmem:[%s20883_s8 + $0x708] sm:$0xf] }
 0xd60   : > { %v20128_v21 = vpack.c.bf16 %v9184_v1, %v9184_v1  ;;  %v14429_v1 = vld [vmem:[%s20883_s8 + $0x7e8] sm:$0xf] }
 0xd61   : > { %11132 = vmatpush.bf16.msrb.mxu2 %v14258_v20  ;;  %v14362_v20 = vor.u32 %v15322_v59, %v14359_v56  ;;  %v14381_v59 = vld [vmem:[%s20883_s8 + $0x788] sm:$0xf]  ;;  %v15329_v56 = vld [vmem:[%s20883_s8 + $0x794] sm:$0xf0] }
 0xd62   : > { %10838 = vmatmul.bf16.vlgmr.msra.gmra.mxu3 %v20128_v21 }
 0xd63   : > { %v11127_v22 = vpop.f32.mrf.mxu1  ;;  %10934 = vmatpush.bf16.msra.mxu3 %v14426_v54  ;;  %v13806_v54 = vor.u32 %v15185_v3, %v13805_v18  ;;  %v15345_v18 = vld [vmem:[%s20885_s10 + $0x14] sm:$0xf0]  ;;  %v15207_v3 = vld [vmem:[%s20883_s8 + $0x3cc] sm:$0xf] }
 0xd64   : > { %v13902_v22 = vor.u32 %v15209_v26, %v13901_v33  ;;  %v15351_v33 = vld [vmem:[%s20885_s10 + $0x44] sm:$0xf0] }
 0xd65   : > { %11133 = vmatpush.bf16.msrb.mxu2 %v14242_v27 }
 0xd67   : > { %v10878_v16 = vpop.f32.mrf.mxu2  ;;  %10935 = vmatpush.bf16.msra.mxu3 %v14410_v53  ;;  %v15337_v53 = vld [vmem:[%s20883_s8 + $0x7d4] sm:$0xf0] }
 0xd68   : > { %v20131_v41 = vadd.f32 %v10878_v16, %v19726_v28  ;;  %v14391_v28 = vld [vmem:[%s20883_s8 + $0x7b0] sm:$0xf0]  ;;  %v15341_v16 = vld [vmem:[%s20883_s8 + $0x7f4] sm:$0xf0] }
 0xd69   : > { %11134 = vmatpush.bf16.msrb.mxu2 %v14226_v48  ;;  %v14394_v9 = vor.u32 %v15330_v47, %v14391_v28  ;;  %v14314_v48 = vor.u32 %v15310_v39, %v14311_v58  ;;  %v14430_v7 = vor.u32 %v15341_v16, %v14429_v1  ;;  %v14414_v47 = vor.u32 %v15337_v53, %v14413_v38  ;;  %v14397_v28 = vld [vmem:[%s20883_s8 + $0x7a8] sm:$0xf]  ;;  %v13903_v1 = vld [vmem:[%s20883_s8 + $0x3d8] sm:$0xf0]  ;;  %v14437_v38 = vld [vmem:[%s20885_s10] sm:$0xf] }
 0xd6a   : > { %v15343_v53 = vld [vmem:[%s20885_s10 + $0x4] sm:$0xf0] }
 0xd6b   : > { %10936 = vmatpush.bf16.msra.mxu3 %v14394_v9  ;;  %v14493_v9 = vld [vmem:[%s20885_s10 + $0x70] sm:$0xf] }
 0xd6c   : > { %v14494_v23 = vor.u32 %v15357_v15, %v14493_v9  ;;  %v14495_v9 = vld [vmem:[%s20885_s10 + $0x78] sm:$0xf0] }
 0xd6d   : > { %11135 = vmatpush.bf16.msrb.mxu2 %v14210_v8  ;;  %v13869_v8 = vld [vmem:[%s20883_s8 + $0x388] sm:$0xf] }
 0xd6e   : > { %v13870_v25 = vor.u32 %v15201_v57, %v13869_v8  ;;  %11553 = vmatpush.bf16.msra.mxu0 %v14494_v23  ;;  %v15349_v8 = vld [vmem:[%s20885_s10 + $0x34] sm:$0xf0] }
 0xd6f   : > { %10937 = vmatpush.bf16.msra.mxu3 %v14378_v52 }
 0xd71   : > { %11136 = vmatpush.bf16.msrb.mxu2 %v14194_v12  ;;  %v13838_v12 = vor.u32 %v15193_v5, %v13837_v62  ;;  %v15347_v62 = vld [vmem:[%s20885_s10 + $0x24] sm:$0xf0]  ;;  %v15211_v5 = vld [vmem:[%s20883_s8 + $0x3ec] sm:$0xf] }
 0xd72   : > { %10890 = vmatmul.bf16.vlgmr.msrb.gmra.mxu3 %v19738_v46 }
 0xd73   : > { %10938 = vmatpush.bf16.msra.mxu3 %v14362_v20  ;;  %v14485_v20 = vld [vmem:[%s20885_s10 + $0x60] sm:$0xf] }
 0xd74   : > { %11137 = vmatmul.bf16.vlgmr.msrb.gmra.mxu2 %v19728_v10  ;;  %v10880_v10 = vpop.f32.mrf.mxu2  ;;  %v14486_v51 = vor.u32 %v15355_v4, %v14485_v20  ;;  %v13871_v20 = vld [vmem:[%s20883_s8 + $0x398] sm:$0xf0] }
 0xd75   : > { %v15333_v10 = vld [vmem:[%s20883_s8 + $0x7b4] sm:$0xf0] }
 0xd76   : > { %v14398_v52 = vor.u32 %v15333_v10, %v14397_v28  ;;  %11554 = vmatpush.bf16.msra.mxu0 %v14486_v51  ;;  %v14438_v28 = vor.u32 %v15343_v53, %v14437_v38  ;;  %v15356_v10 = vld [vmem:[%s20885_s10 + $0x74] sm:$0xf]  ;;  %v15354_v51 = vld [vmem:[%s20885_s10 + $0x64] sm:$0xf] }
 0xd77   : > { %10939 = vmatpush.bf16.msra.mxu3 %v14346_v49  ;;  %v14382_v49 = vor.u32 %v15329_v56, %v14381_v59  ;;  %v14498_v15 = vor.u32 %v15356_v10, %v14495_v9  ;;  %v14557_v59 = vld [vmem:[%s20885_s10 + $0xf0] sm:$0xf]  ;;  %v15373_v56 = vld [vmem:[%s20885_s10 + $0xf4] sm:$0xf0]  ;;  %v15346_v53 = vld [vmem:[%s20885_s10 + $0x24] sm:$0xf] }
 0xd78   : > { %v14558_v4 = vor.u32 %v15373_v56, %v14557_v59  ;;  %v14431_v10 = vld [vmem:[%s20883_s8 + $0x7f8] sm:$0xf0] }
 0xd7a   : > { %11566 = vmatpush.bf16.msra.mxu1 %v14558_v4  ;;  %v14447_v4 = vld [vmem:[%s20885_s10 + $0x18] sm:$0xf0] }
 0xd7b   : > { %10940 = vmatpush.bf16.msra.mxu3 %v14330_v36  ;;  %v15353_v36 = vld [vmem:[%s20885_s10 + $0x54] sm:$0xf0] }
 0xd7c   : > { %v20159_v63 = vpop.f32.mrf.mxu2 }
 0xd7f   : > { %10941 = vmatpush.bf16.msra.mxu3 %v14314_v48  ;;  %v15321_v48 = vld [vmem:[%s20883_s8 + $0x754] sm:$0xf0] }
 0xd82   : > { %10942 = vmatmul.bf16.vlgmr.msra.gmra.mxu3 %v20128_v21 }
 0xd83   : > { %10986 = vmatpush.bf16.msrb.mxu3 %v13918_v2  ;;  %v14469_v2 = vld [vmem:[%s20885_s10 + $0x40] sm:$0xf] }
 0xd84   : > { %v10932_v27 = vpop.f32.mrf.mxu2  ;;  %v14470_v26 = vor.u32 %v15351_v33, %v14469_v2  ;;  %v14479_v2 = vld [vmem:[%s20885_s10 + $0x58] sm:$0xf0] }
 0xd85   : > { %v14477_v27 = vld [vmem:[%s20885_s10 + $0x50] sm:$0xf] }
 0xd86   : > { %v14478_v39 = vor.u32 %v15353_v36, %v14477_v27  ;;  %v15195_v27 = vld [vmem:[%s20883_s8 + $0x36c] sm:$0xf]  ;;  %v14549_v36 = vld [vmem:[%s20885_s10 + $0xe0] sm:$0xf] }
 0xd87   : > { %10987 = vmatpush.bf16.msrb.mxu3 %v13902_v22  ;;  %v14350_v22 = vor.u32 %v15321_v48, %v14349_v29  ;;  %v15352_v48 = vld [vmem:[%s20885_s10 + $0x54] sm:$0xf] }
 0xd88   : > { %11555 = vmatpush.bf16.msra.mxu0 %v14478_v39  ;;  %v15371_v39 = vld [vmem:[%s20885_s10 + $0xe4] sm:$0xf0]  ;;  %v14482_v33 = vor.u32 %v15352_v48, %v14479_v2  ;;  %v14439_v48 = vld [vmem:[%s20885_s10 + $0x8] sm:$0xf0]  ;;  %v14399_v2 = vld [vmem:[%s20883_s8 + $0x7b8] sm:$0xf0] }
 0xd89   : > { %v14550_v29 = vor.u32 %v15371_v39, %v14549_v36  ;;  %v15331_v39 = vld [vmem:[%s20883_s8 + $0x7ac] sm:$0xf] }
 0xd8b   : > { %10988 = vmatpush.bf16.msrb.mxu3 %v13886_v44  ;;  %v14461_v44 = vld [vmem:[%s20885_s10 + $0x30] sm:$0xf]  ;;  %11567 = vmatpush.bf16.msra.mxu1 %v14550_v29  ;;  %v15342_v29 = vld [vmem:[%s20885_s10 + $0x4] sm:$0xf] }
 0xd8c   : > { %11556 = vmatpush.bf16.msra.mxu0 %v14470_v26  ;;  %v14462_v57 = vor.u32 %v15349_v8, %v14461_v44  ;;  %v15369_v44 = vld [vmem:[%s20885_s10 + $0xd4] sm:$0xf0] }
 0xd8f   : > { %10989 = vmatpush.bf16.msrb.mxu3 %v13870_v25 }
 0xd90   : > { %11557 = vmatpush.bf16.msra.mxu0 %v14462_v57  ;;  %v13839_v57 = vld [vmem:[%s20883_s8 + $0x358] sm:$0xf0] }
 0xd93   : > { %10990 = vmatpush.bf16.msrb.mxu3 %v13854_v6  ;;  %v14453_v6 = vld [vmem:[%s20885_s10 + $0x20] sm:$0xf] }
 0xd94   : > { %v14454_v13 = vor.u32 %v15347_v62, %v14453_v6  ;;  %v13842_v6 = vor.u32 %v15191_v0, %v13839_v57  ;;  %v14533_v62 = vld [vmem:[%s20885_s10 + $0xc0] sm:$0xf]  ;;  %v14559_v57 = vld [vmem:[%s20885_s10 + $0xf8] sm:$0xf0] }
 0xd96   : > { %11558 = vmatpush.bf16.msra.mxu0 %v14454_v13 }
 0xd97   : > { %v10982_v17 = vpop.f32.mrf.mxu2  ;;  %10991 = vmatpush.bf16.msrb.mxu3 %v13838_v12  ;;  %v13919_v12 = vld [vmem:[%s20883_s8 + $0x3f8] sm:$0xf0] }
 0xd98   : > { %v20212_v14 = vadd.f32 %v10982_v17, %v19820_v30  ;;  %v15313_v17 = vld [vmem:[%s20883_s8 + $0x714] sm:$0xf0] }
 0xd99   : > { %v14318_v45 = vor.u32 %v15313_v17, %v14317_v61  ;;  %v14471_v61 = vld [vmem:[%s20885_s10 + $0x48] sm:$0xf0] }
 0xd9b   : > { %10992 = vmatpush.bf16.msrb.mxu3 %v13822_v60  ;;  %v14445_v60 = vld [vmem:[%s20885_s10 + $0x10] sm:$0xf] }
 0xd9c   : > { %v14446_v16 = vor.u32 %v15345_v18, %v14445_v60 }
 0xd9e   : > { %11559 = vmatpush.bf16.msra.mxu0 %v14446_v16  ;;  %v14525_v16 = vld [vmem:[%s20885_s10 + $0xb0] sm:$0xf] }
 0xd9f   : > { %v10984_v30 = vpop.f32.mrf.mxu2  ;;  %10993 = vmatpush.bf16.msrb.mxu3 %v13806_v54  ;;  %v13906_v54 = vor.u32 %v15207_v3, %v13903_v1  ;;  %v15183_v1 = vld [vmem:[%s20883_s8 + $0x30c] sm:$0xf] }
 0xda0   : > { %v13922_v30 = vor.u32 %v15211_v5, %v13919_v12  ;;  %v15367_v5 = vld [vmem:[%s20885_s10 + $0xc4] sm:$0xf0]  ;;  %v13823_v12 = vld [vmem:[%s20883_s8 + $0x338] sm:$0xf0] }
 0xda1   : > { %v14534_v13 = vor.u32 %v15367_v5, %v14533_v62  ;;  %v15323_v62 = vld [vmem:[%s20883_s8 + $0x76c] sm:$0xf]  ;;  %v14367_v5 = vld [vmem:[%s20883_s8 + $0x778] sm:$0xf0] }
 0xda2   : > { %10994 = vmatmul.bf16.vlgmr.msrb.gmra.mxu3 %v19738_v46  ;;  %11560 = vmatpush.bf16.msra.mxu0 %v14438_v28  ;;  %v15339_v28 = vld [vmem:[%s20883_s8 + $0x7ec] sm:$0xf] }
 0xda3   : > { %11038 = vmatpush.bf16.msra.mxu3 %v14430_v7  ;;  %v15203_v7 = vld [vmem:[%s20883_s8 + $0x3ac] sm:$0xf]  ;;  %v14434_v59 = vor.u32 %v15339_v28, %v14431_v10 }
 0xda6   : > { %11605 = vmatpush.bf16.msrb.mxu0 %v14498_v15 }
 0xda7   : > { %11039 = vmatpush.bf16.msra.mxu3 %v14414_v47  ;;  %v13887_v47 = vld [vmem:[%s20883_s8 + $0x3b8] sm:$0xf0] }
 0xda8   : > { %v13890_v23 = vor.u32 %v15203_v7, %v13887_v47  ;;  %v13807_v7 = vld [vmem:[%s20883_s8 + $0x318] sm:$0xf0]  ;;  %v14455_v47 = vld [vmem:[%s20885_s10 + $0x28] sm:$0xf0] }
 0xda9   : > { %v14458_v9 = vor.u32 %v15346_v53, %v14455_v47  ;;  %v13810_v15 = vor.u32 %v15183_v1, %v13807_v7  ;;  %v15366_v7 = vld [vmem:[%s20885_s10 + $0xc4] sm:$0xf]  ;;  %v15315_v47 = vld [vmem:[%s20883_s8 + $0x72c] sm:$0xf] }
 0xdab   : > { %11040 = vmatpush.bf16.msra.mxu3 %v14398_v52  ;;  %v15199_v52 = vld [vmem:[%s20883_s8 + $0x38c] sm:$0xf] }
 0xdac   : > { %v13874_v31 = vor.u32 %v15199_v52, %v13871_v20  ;;  %v15363_v52 = vld [vmem:[%s20885_s10 + $0xa4] sm:$0xf0]  ;;  %v15344_v20 = vld [vmem:[%s20885_s10 + $0x14] sm:$0xf] }
 0xdaf   : > { %11041 = vmatpush.bf16.msra.mxu3 %v14382_v49  ;;  %v14487_v49 = vld [vmem:[%s20885_s10 + $0x68] sm:$0xf0] }
 0xdb0   : > { %v14490_v37 = vor.u32 %v15354_v51, %v14487_v49  ;;  %v15335_v51 = vld [vmem:[%s20883_s8 + $0x7cc] sm:$0xf]  ;;  %v14415_v49 = vld [vmem:[%s20883_s8 + $0x7d8] sm:$0xf0] }
 0xdb1   : > { %v14418_v36 = vor.u32 %v15335_v51, %v14415_v49  ;;  %v15362_v51 = vld [vmem:[%s20885_s10 + $0xa4] sm:$0xf]  ;;  %v14519_v49 = vld [vmem:[%s20885_s10 + $0xa8] sm:$0xf0] }
 0xdb2   : > { %11606 = vmatpush.bf16.msrb.mxu0 %v14490_v37  ;;  %v14450_v37 = vor.u32 %v15344_v20, %v14447_v4 }
 0xdb3   : > { %11042 = vmatpush.bf16.msra.mxu3 %v14366_v32  ;;  %v13855_v32 = vld [vmem:[%s20883_s8 + $0x378] sm:$0xf0] }
 0xdb6   : > { %11607 = vmatpush.bf16.msrb.mxu0 %v14482_v33  ;;  %v14442_v33 = vor.u32 %v15342_v29, %v14439_v48 }
 0xdb7   : > { %v20281_v58 = vpop.f32.mrf.mxu2  ;;  %11043 = vmatpush.bf16.msra.mxu3 %v14350_v22  ;;  %v13858_v22 = vor.u32 %v15195_v27, %v13855_v32  ;;  %v15361_v27 = vld [vmem:[%s20885_s10 + $0x94] sm:$0xf0] }
 0xdbb   : > { %11044 = vmatpush.bf16.msra.mxu3 %v14334_v24  ;;  %v15350_v24 = vld [vmem:[%s20885_s10 + $0x44] sm:$0xf] }
 0xdbc   : > { %v14474_v17 = vor.u32 %v15350_v24, %v14471_v61  ;;  %v15370_v61 = vld [vmem:[%s20885_s10 + $0xe4] sm:$0xf] }
 0xdbe   : > { %11608 = vmatpush.bf16.msrb.mxu0 %v14474_v17  ;;  %v14551_v17 = vld [vmem:[%s20885_s10 + $0xe8] sm:$0xf0] }
 0xdbf   : > { %v11036_v25 = vpop.f32.mrf.mxu2  ;;  %11045 = vmatpush.bf16.msra.mxu3 %v14318_v45  ;;  %v15348_v45 = vld [vmem:[%s20885_s10 + $0x34] sm:$0xf] }
 0xdc0   : > { %v14542_v25 = vor.u32 %v15369_v44, %v14541_v40  ;;  %v14402_v40 = vor.u32 %v15331_v39, %v14399_v2  ;;  %v15372_v44 = vld [vmem:[%s20885_s10 + $0xf4] sm:$0xf]  ;;  %v15358_v2 = vld [vmem:[%s20885_s10 + $0x84] sm:$0xf] }
 0xdc1   : > { %v14562_v24 = vor.u32 %v15372_v44, %v14559_v57  ;;  %v15360_v39 = vld [vmem:[%s20885_s10 + $0x94] sm:$0xf]  ;;  %v15387_v44 = vld [vmem:[%s20885_s10 + $0x164] sm:$0xf0] }
 0xdc2   : > { %11046 = vmatmul.bf16.vlgmr.msra.gmra.mxu3 %v20128_v21  ;;  %11568 = vmatpush.bf16.msra.mxu1 %v14542_v25  ;;  %v15327_v25 = vld [vmem:[%s20883_s8 + $0x78c] sm:$0xf] }
 0xdc3   : > { %11090 = vmatpush.bf16.msrb.mxu3 %v13922_v30  ;;  %v14463_v30 = vld [vmem:[%s20885_s10 + $0x38] sm:$0xf0] }
 0xdc4   : > { %v14466_v60 = vor.u32 %v15348_v45, %v14463_v30  ;;  %v15368_v45 = vld [vmem:[%s20885_s10 + $0xd4] sm:$0xf]  ;;  %v14543_v30 = vld [vmem:[%s20885_s10 + $0xd8] sm:$0xf0] }
 0xdc6   : > { %11569 = vmatpush.bf16.msra.mxu1 %v14534_v13  ;;  %11609 = vmatpush.bf16.msrb.mxu0 %v14466_v60  ;;  %v14370_v13 = vor.u32 %v15323_v62, %v14367_v5  ;;  %v15319_v60 = vld [vmem:[%s20883_s8 + $0x74c] sm:$0xf] }
 0xdc7   : > { %11091 = vmatpush.bf16.msrb.mxu3 %v13906_v54  ;;  %v15365_v54 = vld [vmem:[%s20885_s10 + $0xb4] sm:$0xf0] }
 0xdc8   : > { %v14526_v38 = vor.u32 %v15365_v54, %v14525_v16 }
 0xdca   : > { %11570 = vmatpush.bf16.msra.mxu1 %v14526_v38  ;;  %11610 = vmatpush.bf16.msrb.mxu0 %v14458_v9  ;;  %v14535_v38 = vld [vmem:[%s20885_s10 + $0xc8] sm:$0xf0] }
 0xdcb   : > { %11092 = vmatpush.bf16.msrb.mxu3 %v13890_v23  ;;  %v14517_v23 = vld [vmem:[%s20885_s10 + $0xa0] sm:$0xf]  ;;  %v14538_v28 = vor.u32 %v15366_v7, %v14535_v38 }
 0xdcc   : > { %v14518_v56 = vor.u32 %v15363_v52, %v14517_v23  ;;  %v15364_v23 = vld [vmem:[%s20885_s10 + $0xb4] sm:$0xf]  ;;  %v14527_v52 = vld [vmem:[%s20885_s10 + $0xb8] sm:$0xf0]  ;;  %v14565_v38 = vld [vmem:[%s20885_s10 + $0x100] sm:$0xf] }
 0xdcd   : > { %v14530_v20 = vor.u32 %v15364_v23, %v14527_v52  ;;  %v15384_v52 = vld [vmem:[%s20885_s10 + $0x154] sm:$0xf] }
 0xdce   : > { %11571 = vmatpush.bf16.msra.mxu1 %v14518_v56  ;;  %11611 = vmatpush.bf16.msrb.mxu0 %v14450_v37  ;;  %v14319_v56 = vld [vmem:[%s20883_s8 + $0x718] sm:$0xf0]  ;;  %v14522_v37 = vor.u32 %v15362_v51, %v14519_v49 }
 0xdcf   : > { %11093 = vmatpush.bf16.msrb.mxu3 %v13874_v31  ;;  %v14509_v31 = vld [vmem:[%s20885_s10 + $0x90] sm:$0xf] }
 0xdd0   : > { %v14510_v32 = vor.u32 %v15361_v27, %v14509_v31  ;;  %v14621_v31 = vld [vmem:[%s20885_s10 + $0x170] sm:$0xf]  ;;  %v15389_v27 = vld [vmem:[%s20885_s10 + $0x174] sm:$0xf0] }
 0xdd1   : > { %v14622_v29 = vor.u32 %v15389_v27, %v14621_v31  ;;  %v14591_v31 = vld [vmem:[%s20885_s10 + $0x138] sm:$0xf0] }
 0xdd2   : > { %11572 = vmatpush.bf16.msra.mxu1 %v14510_v32  ;;  %11612 = vmatpush.bf16.msrb.mxu0 %v14442_v33  ;;  %v14511_v32 = vld [vmem:[%s20885_s10 + $0x98] sm:$0xf0]  ;;  %v14503_v33 = vld [vmem:[%s20885_s10 + $0x88] sm:$0xf0] }
 0xdd3   : > { %11094 = vmatpush.bf16.msrb.mxu3 %v13858_v22  ;;  %v15359_v22 = vld [vmem:[%s20885_s10 + $0x84] sm:$0xf0]  ;;  %11579 = vmatpush.bf16.msra.mxu2 %v14622_v29  ;;  %v14514_v48 = vor.u32 %v15360_v39, %v14511_v32  ;;  %v14583_v39 = vld [vmem:[%s20885_s10 + $0x128] sm:$0xf0]  ;;  %v15376_v29 = vld [vmem:[%s20885_s10 + $0x114] sm:$0xf] }
 0xdd7   : > { %v11086_v26 = vpop.f32.mrf.mxu2  ;;  %11095 = vmatpush.bf16.msrb.mxu3 %v13842_v6  ;;  %v14554_v6 = vor.u32 %v15370_v61, %v14551_v17  ;;  %v15383_v17 = vld [vmem:[%s20885_s10 + $0x144] sm:$0xf0] }
 0xdd8   : > { %v20402_v8 = vadd.f32 %v11086_v26, %v20004_v35  ;;  %v15187_v35 = vld [vmem:[%s20883_s8 + $0x32c] sm:$0xf]  ;;  %v14501_v26 = vld [vmem:[%s20885_s10 + $0x80] sm:$0xf] }
 0xdd9   : > { %v13826_v3 = vor.u32 %v15187_v35, %v13823_v12  ;;  %v14502_v0 = vor.u32 %v15359_v22, %v14501_v26  ;;  %v14506_v22 = vor.u32 %v15358_v2, %v14503_v33  ;;  %v14685_v2 = vld [vmem:[%s20885_s10 + $0x1f0] sm:$0xf]  ;;  %v15405_v33 = vld [vmem:[%s20885_s10 + $0x1f4] sm:$0xf0] }
 0xddb   : > { %11096 = vmatpush.bf16.msrb.mxu3 %v13826_v3  ;;  %11573 = vmatpush.bf16.msra.mxu1 %v14502_v0  ;;  %v14546_v3 = vor.u32 %v15368_v45, %v14543_v30 }
 0xddf   : > { %v11088_v18 = vpop.f32.mrf.mxu2  ;;  %11097 = vmatpush.bf16.msrb.mxu3 %v13810_v15  ;;  %11618 = vmatpush.bf16.msrb.mxu1 %v14562_v24 }
 0xde0   : > { %v14351_v18 = vld [vmem:[%s20883_s8 + $0x758] sm:$0xf0] }
 0xde1   : > { %v14354_v54 = vor.u32 %v15319_v60, %v14351_v18  ;;  %v15379_v18 = vld [vmem:[%s20885_s10 + $0x124] sm:$0xf0] }
 0xde2   : > { %11098 = vmatmul.bf16.vlgmr.msrb.gmra.mxu3 %v19738_v46  ;;  %v14383_v46 = vld [vmem:[%s20883_s8 + $0x798] sm:$0xf0] }
 0xde3   : > { %11142 = vmatpush.bf16.msra.mxu3 %v14434_v59  ;;  %v14386_v35 = vor.u32 %v15327_v25, %v14383_v46  ;;  %11619 = vmatpush.bf16.msrb.mxu1 %v14554_v6  ;;  %v15311_v59 = vld [vmem:[%s20883_s8 + $0x70c] sm:$0xf] }
 0xde5   : > { %v10839_v1 = vpop.f32.mrf.mxu3 }
 0xde6   : > { %v10840_v16 = vadd.f32 %v10839_v1, %v20120_v11  ;;  %v14335_v11 = vld [vmem:[%s20883_s8 + $0x738] sm:$0xf0]  ;;  %v14573_v1 = vld [vmem:[%s20885_s10 + $0x110] sm:$0xf] }
 0xde7   : > { %11143 = vmatpush.bf16.msra.mxu3 %v14418_v36  ;;  %11620 = vmatpush.bf16.msrb.mxu1 %v14546_v3  ;;  %v14338_v15 = vor.u32 %v15315_v47, %v14335_v11  ;;  %v14322_v36 = vor.u32 %v15311_v59, %v14319_v56  ;;  %v15388_v47 = vld [vmem:[%s20885_s10 + $0x174] sm:$0xf]  ;;  %v14623_v11 = vld [vmem:[%s20885_s10 + $0x178] sm:$0xf0] }
 0xde8   : > { %v11155_v53 = vmax.f32 %v10840_v16, 0.0  ;;  %v15377_v16 = vld [vmem:[%s20885_s10 + $0x114] sm:$0xf0]  ;;  %v14607_v59 = vld [vmem:[%s20885_s10 + $0x158] sm:$0xf0] }
 0xde9   : > { %v14574_v7 = vor.u32 %v15377_v16, %v14573_v1  ;;  %v14610_v56 = vor.u32 %v15384_v52, %v14607_v59  ;;  %v14637_v1 = vld [vmem:[%s20885_s10 + $0x190] sm:$0xf]  ;;  %v15393_v16 = vld [vmem:[%s20885_s10 + $0x194] sm:$0xf0]  ;;  %v14671_v52 = vld [vmem:[%s20885_s10 + $0x1d8] sm:$0xf0] }
 0xdea   : > { %v11159_v10 = vpack.c.bf16 %v11155_v53, %v11155_v53  ;;  %v15375_v53 = vld [vmem:[%s20885_s10 + $0x104] sm:$0xf0] }
 0xdeb   : > { %11144 = vmatpush.bf16.msra.mxu3 %v14402_v40  ;;  %11621 = vmatpush.bf16.msrb.mxu1 %v14538_v28  ;;  %v14613_v40 = vld [vmem:[%s20885_s10 + $0x160] sm:$0xf]  ;;  %v14566_v28 = vor.u32 %v15375_v53, %v14565_v38  ;;  %v15391_v38 = vld [vmem:[%s20885_s10 + $0x184] sm:$0xf0]  ;;  %v15404_v53 = vld [vmem:[%s20885_s10 + $0x1f4] sm:$0xf] }
 0xdec   : > { %11561 = vmatmul.bf16.vlgmr.msra.gmra.mxu0 %v11159_v10  ;;  %v14614_v25 = vor.u32 %v15387_v44, %v14613_v40  ;;  %v15374_v40 = vld [vmem:[%s20885_s10 + $0x104] sm:$0xf]  ;;  %v14567_v44 = vld [vmem:[%s20885_s10 + $0x108] sm:$0xf0] }
 0xded   : > { %v10841_v4 = vpop.f32.mrf.mxu3 }
 0xdee   : > { %11580 = vmatpush.bf16.msra.mxu2 %v14614_v25  ;;  %v14599_v4 = vld [vmem:[%s20885_s10 + $0x148] sm:$0xf0] }
 0xdef   : > { %11145 = vmatpush.bf16.msra.mxu3 %v14386_v35  ;;  %11622 = vmatpush.bf16.msrb.mxu1 %v14530_v20  ;;  %v15382_v20 = vld [vmem:[%s20885_s10 + $0x144] sm:$0xf] }
 0xdf0   : > { %v14602_v51 = vor.u32 %v15382_v20, %v14599_v4  ;;  %v14663_v20 = vld [vmem:[%s20885_s10 + $0x1c8] sm:$0xf0] }
 0xdf3   : > { %11146 = vmatpush.bf16.msra.mxu3 %v14370_v13  ;;  %11623 = vmatpush.bf16.msrb.mxu1 %v14522_v37  ;;  %v15381_v13 = vld [vmem:[%s20885_s10 + $0x134] sm:$0xf0]  ;;  %v15380_v37 = vld [vmem:[%s20885_s10 + $0x134] sm:$0xf] }
 0xdf4   : > { %v14594_v27 = vor.u32 %v15380_v37, %v14591_v31  ;;  %v14655_v37 = vld [vmem:[%s20885_s10 + $0x1b8] sm:$0xf0] }
 0xdf5   : > { %v10891_v26 = vpop.f32.mrf.mxu3 }
 0xdf6   : > { %v10892_v0 = vadd.f32 %v10891_v26, %v20131_v41  ;;  %v15385_v41 = vld [vmem:[%s20885_s10 + $0x154] sm:$0xf0] }
 0xdf7   : > { %v20522_v12 = vpop.f32.mrf.mxu2  ;;  %11147 = vmatpush.bf16.msra.mxu3 %v14354_v54  ;;  %11624 = vmatpush.bf16.msrb.mxu1 %v14514_v48  ;;  %v14575_v48 = vld [vmem:[%s20885_s10 + $0x118] sm:$0xf0] }
 0xdf8   : > { %v10905_v57 = vadd.f32 %v19314_v43, %v10892_v0  ;;  %v14597_v43 = vld [vmem:[%s20885_s10 + $0x140] sm:$0xf]  ;;  %v14578_v0 = vor.u32 %v15376_v29, %v14575_v48  ;;  %v14639_v29 = vld [vmem:[%s20885_s10 + $0x198] sm:$0xf0] }
 0xdf9   : > { %v14598_v35 = vor.u32 %v15383_v17, %v14597_v43 }
 0xdfa   : > { %v10918_v24 = vadd.f32 %v19759_v19, %v10905_v57  ;;  %v14589_v19 = vld [vmem:[%s20885_s10 + $0x130] sm:$0xf]  ;;  %v14570_v57 = vor.u32 %v15374_v40, %v14567_v44 }
 0xdfb   : > { %11148 = vmatpush.bf16.msra.mxu3 %v14338_v15  ;;  %11625 = vmatpush.bf16.msrb.mxu1 %v14506_v22  ;;  %v14590_v30 = vor.u32 %v15381_v13, %v14589_v19  ;;  %v14615_v15 = vld [vmem:[%s20885_s10 + $0x168] sm:$0xf0]  ;;  %v14686_v22 = vor.u32 %v15405_v33, %v14685_v2  ;;  %v15397_v13 = vld [vmem:[%s20885_s10 + $0x1b4] sm:$0xf0] }
 0xdfc   : > { %11613 = vmatmul.bf16.vlgmr.msrb.gmra.mxu0 %v11159_v10  ;;  %v10931_v6 = vadd.f32 %v20159_v63, %v10918_v24  ;;  %v14581_v63 = vld [vmem:[%s20885_s10 + $0x120] sm:$0xf]  ;;  %v14626_v10 = vor.u32 %v15388_v47, %v14623_v11  ;;  %v14687_v47 = vld [vmem:[%s20885_s10 + $0x1f8] sm:$0xf0] }
 0xdfd   : > { %v10893_v46 = vpop.f32.mrf.mxu3  ;;  %v14582_v3 = vor.u32 %v15379_v18, %v14581_v63  ;;  %v15395_v63 = vld [vmem:[%s20885_s10 + $0x1a4] sm:$0xf0] }
 0xdfe   : > { %v14677_v46 = vld [vmem:[%s20885_s10 + $0x1e0] sm:$0xf] }
 0xdff   : > { %v11140_v9 = vpop.f32.mrf.mxu2  ;;  %11149 = vmatpush.bf16.msra.mxu3 %v14322_v36  ;;  %v15378_v36 = vld [vmem:[%s20885_s10 + $0x124] sm:$0xf] }
 0xe00   : > { %v15386_v9 = vld [vmem:[%s20885_s10 + $0x164] sm:$0xf]  ;;  %v14586_v32 = vor.u32 %v15378_v36, %v14583_v39  ;;  %v14647_v36 = vld [vmem:[%s20885_s10 + $0x1a8] sm:$0xf0] }
 0xe01   : > { %v14618_v23 = vor.u32 %v15386_v9, %v14615_v15  ;;  %v14679_v9 = vld [vmem:[%s20885_s10 + $0x1e8] sm:$0xf0] }
 0xe02   : > { %11150 = vmatmul.bf16.vlgmr.msra.gmra.mxu3 %v20128_v21  ;;  %v14605_v21 = vld [vmem:[%s20885_s10 + $0x150] sm:$0xf] }
 0xe03   : > { %v14606_v61 = vor.u32 %v15385_v41, %v14605_v21  ;;  %11592 = vmatpush.bf16.msrb.mxu3 %v14686_v22  ;;  %v15403_v21 = vld [vmem:[%s20885_s10 + $0x1e4] sm:$0xf0]  ;;  %v14631_v22 = vld [vmem:[%s20885_s10 + $0x188] sm:$0xf0] }
 0xe04   : > { %v14678_v24 = vor.u32 %v15403_v21, %v14677_v46 }
 0xe05   : > { %11581 = vmatpush.bf16.msra.mxu2 %v14606_v61  ;;  %v10943_v62 = vpop.f32.mrf.mxu3  ;;  %v14669_v61 = vld [vmem:[%s20885_s10 + $0x1d0] sm:$0xf] }
 0xe06   : > { %v10944_v5 = vadd.f32 %v10943_v62, %v10931_v6  ;;  %v14661_v6 = vld [vmem:[%s20885_s10 + $0x1c0] sm:$0xf] }
 0xe07   : > { %11593 = vmatpush.bf16.msrb.mxu3 %v14678_v24 }
 0xe08   : > { %v11156_v45 = vmax.f32 %v10944_v5, 0.0 }
 0xe09   : > { %11582 = vmatpush.bf16.msra.mxu2 %v14598_v35 }
 0xe0a   : > { %v11160_v60 = vpack.c.bf16 %v11156_v45, %v11156_v45 }
 0xe0c   : > { %11574 = vmatmul.bf16.vlgmr.msra.gmra.mxu1 %v11160_v60 }
 0xe0d   : > { %11583 = vmatpush.bf16.msra.mxu2 %v14590_v30  ;;  %v10945_v54 = vpop.f32.mrf.mxu3 }
 0xe0e   : > { %v14638_v54 = vor.u32 %v15393_v16, %v14637_v1  ;;  %v15408_v16 = vld [vmem:[%s20887_s12 + $0x10] sm:$0xff] }
 0xe11   : > { %11584 = vmatpush.bf16.msra.mxu2 %v14582_v3 }
 0xe15   : > { %11585 = vmatpush.bf16.msra.mxu2 %v14574_v7  ;;  %v14629_v7 = vld [vmem:[%s20885_s10 + $0x180] sm:$0xf] }
 0xe16   : > { %v14630_v11 = vor.u32 %v15391_v38, %v14629_v7  ;;  %v15407_v38 = vld [vmem:[%s20887_s12 + $0x8] sm:$0xff] }
 0xe19   : > { %11586 = vmatpush.bf16.msra.mxu2 %v14566_v28  ;;  %v14690_v28 = vor.u32 %v15404_v53, %v14687_v47  ;;  %v15419_v53 = vld [vmem:[%s20887_s12 + $0x68] sm:$0xff]  ;;  %v15406_v47 = vld [vmem:[%s20887_s12] sm:$0xff] }
 0xe1c   : > { %11626 = vmatmul.bf16.vlgmr.msrb.gmra.mxu1 %v11160_v60 }
 0xe1d   : > { %11631 = vmatpush.bf16.msrb.mxu2 %v14626_v10  ;;  %v15402_v10 = vld [vmem:[%s20885_s10 + $0x1e4] sm:$0xf] }
 0xe1e   : > { %v14682_v15 = vor.u32 %v15402_v10, %v14679_v9  ;;  %v15416_v10 = vld [vmem:[%s20887_s12 + $0x50] sm:$0xff]  ;;  %v15415_v9 = vld [vmem:[%s20887_s12 + $0x48] sm:$0xff] }
 0xe21   : > { %11632 = vmatpush.bf16.msrb.mxu2 %v14618_v23  ;;  %v15400_v23 = vld [vmem:[%s20885_s10 + $0x1d4] sm:$0xf] }
 0xe22   : > { %v14674_v59 = vor.u32 %v15400_v23, %v14671_v52 }
 0xe25   : > { %11633 = vmatpush.bf16.msrb.mxu2 %v14610_v56  ;;  %v10995_v49 = vpop.f32.mrf.mxu3  ;;  %v15398_v56 = vld [vmem:[%s20885_s10 + $0x1c4] sm:$0xf] }
 0xe26   : > { %v10996_v25 = vadd.f32 %v10995_v49, %v20212_v14  ;;  %v15401_v14 = vld [vmem:[%s20885_s10 + $0x1d4] sm:$0xf0]  ;;  %v14666_v4 = vor.u32 %v15398_v56, %v14663_v20  ;;  %v15396_v49 = vld [vmem:[%s20885_s10 + $0x1b4] sm:$0xf] }
 0xe27   : > { %v14670_v17 = vor.u32 %v15401_v14, %v14669_v61  ;;  %v14658_v31 = vor.u32 %v15396_v49, %v14655_v37 }
 0xe28   : > { %v11009_v41 = vadd.f32 %v19483_v42, %v10996_v25  ;;  %v15399_v42 = vld [vmem:[%s20885_s10 + $0x1c4] sm:$0xf0] }
 0xe29   : > { %11634 = vmatpush.bf16.msrb.mxu2 %v14602_v51  ;;  %11594 = vmatpush.bf16.msrb.mxu3 %v14670_v17  ;;  %v14662_v62 = vor.u32 %v15399_v42, %v14661_v6 }
 0xe2a   : > { %v11022_v43 = vadd.f32 %v19895_v55, %v11009_v41  ;;  %v14653_v55 = vld [vmem:[%s20885_s10 + $0x1b0] sm:$0xf] }
 0xe2b   : > { %v14654_v30 = vor.u32 %v15397_v13, %v14653_v55  ;;  %v15413_v13 = vld [vmem:[%s20887_s12 + $0x38] sm:$0xff] }
 0xe2c   : > { %v11035_v35 = vadd.f32 %v20281_v58, %v11022_v43  ;;  %v14645_v58 = vld [vmem:[%s20885_s10 + $0x1a0] sm:$0xf]  ;;  %11790 = vmatpush.bf16.msra.mxu0 %v15413_v13 }
 0xe2d   : > { %11635 = vmatpush.bf16.msrb.mxu2 %v14594_v27  ;;  %v10997_v26 = vpop.f32.mrf.mxu3  ;;  %11595 = vmatpush.bf16.msrb.mxu3 %v14662_v62  ;;  %v14646_v18 = vor.u32 %v15395_v63, %v14645_v58  ;;  %v15394_v27 = vld [vmem:[%s20885_s10 + $0x1a4] sm:$0xf]  ;;  %v11227_v43 = vld [vmem:[%s20886_s11] sm:$0x3]  ;;  %v15411_v58 = vld [vmem:[%s20887_s12 + $0x28] sm:$0xff] }
 0xe2e   : > { %v14650_v39 = vor.u32 %v15394_v27, %v14647_v36  ;;  %v15390_v26 = vld [vmem:[%s20885_s10 + $0x184] sm:$0xf]  ;;  %v11549_v6 = vperm.slane %v11227_v43, 0  ;;  %v11550_v62 = vperm.slane %v11227_v43, 1 }
 0xe31   : > { %11636 = vmatpush.bf16.msrb.mxu2 %v14586_v32  ;;  %11596 = vmatpush.bf16.msrb.mxu3 %v14654_v30  ;;  %v15392_v32 = vld [vmem:[%s20885_s10 + $0x194] sm:$0xf] }
 0xe32   : > { %v14642_v2 = vor.u32 %v15392_v32, %v14639_v29  ;;  %v15412_v30 = vld [vmem:[%s20887_s12 + $0x30] sm:$0xff]  ;;  %v11693_v29 = vld [vmem:[%s20888_s13] sm:$0x1] }
 0xe33   : > { %11791 = vmatpush.bf16.msra.mxu0 %v15412_v30 }
 0xe35   : > { %11637 = vmatpush.bf16.msrb.mxu2 %v14578_v0  ;;  %11597 = vmatpush.bf16.msrb.mxu3 %v14646_v18  ;;  %v14634_v0 = vor.u32 %v15390_v26, %v14631_v22  ;;  %v15410_v18 = vld [vmem:[%s20887_s12 + $0x20] sm:$0xff] }
 0xe37   : > { %11792 = vmatpush.bf16.msra.mxu0 %v15411_v58 }
 0xe39   : > { %11638 = vmatpush.bf16.msrb.mxu2 %v14570_v57  ;;  %11598 = vmatpush.bf16.msrb.mxu3 %v14638_v54 }
 0xe3b   : > { %11793 = vmatpush.bf16.msra.mxu0 %v15410_v18 }
 0xe3d   : > { %11599 = vmatpush.bf16.msrb.mxu3 %v14630_v11  ;;  %v15418_v11 = vld [vmem:[%s20887_s12 + $0x60] sm:$0xff] }
 0xe41   : > { %11644 = vmatpush.bf16.msra.mxu3 %v14690_v28  ;;  %v15417_v28 = vld [vmem:[%s20887_s12 + $0x58] sm:$0xff] }
 0xe45   : > { %v11047_v5 = vpop.f32.mrf.mxu3  ;;  %11645 = vmatpush.bf16.msra.mxu3 %v14682_v15  ;;  %v15414_v15 = vld [vmem:[%s20887_s12 + $0x40] sm:$0xff] }
 0xe46   : > { %v11048_v19 = vadd.f32 %v11047_v5, %v11035_v35 }
 0xe48   : > { %v11157_v45 = vmax.f32 %v11048_v19, 0.0 }
 0xe49   : > { %11646 = vmatpush.bf16.msra.mxu3 %v14674_v59 }
 0xe4a   : > { %v11161_v60 = vpack.c.bf16 %v11157_v45, %v11157_v45  ;;  %v15421_v45 = vld [vmem:[%s20887_s12 + $0x78] sm:$0xff] }
 0xe4b   : > { %11803 = vmatpush.bf16.msra.mxu1 %v15421_v45 }
 0xe4c   : > { %11587 = vmatmul.bf16.vlgmr.msra.gmra.mxu2 %v11161_v60 }
 0xe4d   : > { %v11049_v3 = vpop.f32.mrf.mxu3  ;;  %11647 = vmatpush.bf16.msra.mxu3 %v14666_v4 }
 0xe4e   : > { %v15409_v3 = vld [vmem:[%s20887_s12 + $0x18] sm:$0xff] }
 0xe4f   : > { %11794 = vmatpush.bf16.msra.mxu0 %v15409_v3 }
 0xe51   : > { %11648 = vmatpush.bf16.msra.mxu3 %v14658_v31 }
 0xe53   : > { %11795 = vmatpush.bf16.msra.mxu0 %v15408_v16 }
 0xe55   : > { %11649 = vmatpush.bf16.msra.mxu3 %v14650_v39 }
 0xe57   : > { %11796 = vmatpush.bf16.msra.mxu0 %v15407_v38 }
 0xe59   : > { %11650 = vmatpush.bf16.msra.mxu3 %v14642_v2 }
 0xe5b   : > { %11797 = vmatpush.bf16.msra.mxu0 %v15406_v47 }
 0xe5c   : > { %11639 = vmatmul.bf16.vlgmr.msrb.gmra.mxu2 %v11161_v60  ;;  %v15420_v60 = vld [vmem:[%s20887_s12 + $0x70] sm:$0xff] }
 0xe5d   : > { %11651 = vmatpush.bf16.msra.mxu3 %v14634_v0  ;;  %11804 = vmatpush.bf16.msra.mxu1 %v15420_v60 }
 0xe61   : > { %11805 = vmatpush.bf16.msra.mxu1 %v15419_v53 }
 0xe65   : > { %v11099_v51 = vpop.f32.mrf.mxu3  ;;  %11806 = vmatpush.bf16.msra.mxu1 %v15418_v11 }
 0xe66   : > { %v11100_v40 = vadd.f32 %v11099_v51, %v20402_v8 }
 0xe68   : > { %v11113_v44 = vadd.f32 %v19710_v34, %v11100_v40 }
 0xe69   : > { %v11562_v33 = vpop.f32.mrf.mxu0  ;;  %11807 = vmatpush.bf16.msra.mxu1 %v15417_v28 }
 0xe6a   : > { %v11126_v25 = vadd.f32 %v20093_v50, %v11113_v44  ;;  %v11563_v42 = vadd.f32 %v11562_v33, %v11549_v6 }
 0xe6c   : > { %v11139_v46 = vadd.f32 %v20522_v12, %v11126_v25 }
 0xe6d   : > { %v11101_v48 = vpop.f32.mrf.mxu3  ;;  %11808 = vmatpush.bf16.msra.mxu1 %v15416_v10 }
 0xe71   : > { %v11564_v57 = vpop.f32.mrf.mxu0  ;;  %11809 = vmatpush.bf16.msra.mxu1 %v15415_v9 }
 0xe75   : > { %11810 = vmatpush.bf16.msra.mxu1 %v15414_v15 }
 0xe79   : > { %v11614_v41 = vpop.f32.mrf.mxu0 }
 0xe7a   : > { %v11615_v12 = vadd.f32 %v11614_v41, %v11550_v62 }
 0xe81   : > { %v11616_v8 = vpop.f32.mrf.mxu0 }
 0xe85   : > { %v11151_v21 = vpop.f32.mrf.mxu3 }
 0xe86   : > { %v11152_v24 = vadd.f32 %v11151_v21, %v11139_v46 }
 0xe88   : > { %v11158_v61 = vmax.f32 %v11152_v24, 0.0 }
 0xe89   : > { %v11575_v34 = vpop.f32.mrf.mxu1 }
 0xe8a   : > { %v11162_v14 = vpack.c.bf16 %v11158_v61, %v11158_v61  ;;  %v11576_v35 = vadd.f32 %v11575_v34, %v11563_v42 }
 0xe8c   : > { %11600 = vmatmul.bf16.vlgmr.msrb.gmra.mxu3 %v11162_v14 }
 0xe8d   : > { %v11153_v17 = vpop.f32.mrf.mxu3 }
 0xe91   : > { %v11577_v50 = vpop.f32.mrf.mxu1 }
 0xe99   : > { %v11627_v5 = vpop.f32.mrf.mxu1 }
 0xe9a   : > { %v11628_v19 = vadd.f32 %v11627_v5, %v11615_v12 }
 0xe9c   : > { %11652 = vmatmul.bf16.vlgmr.msra.gmra.mxu3 %v11162_v14 }
 0xea1   : > { %v11629_v55 = vpop.f32.mrf.mxu1 }
 0xecf   : > { %v11588_v63 = vpop.f32.mrf.mxu2 }
 0xed0   : > { %v11589_v23 = vadd.f32 %v11588_v63, %v11576_v35 }
 0xed7   : > { %v11590_v1 = vpop.f32.mrf.mxu2 }
 0xedf   : > { %v11640_v54 = vpop.f32.mrf.mxu2 }
 0xee0   : > { %v11641_v51 = vadd.f32 %v11640_v54, %v11628_v19 }
 0xee7   : > { %v11642_v7 = vpop.f32.mrf.mxu2 }
 0xf0f   : > { %v11601_v52 = vpop.f32.mrf.mxu3 }
 0xf10   : > { %v11602_v59 = vadd.f32 %v11601_v52, %v11589_v23 }
 0xf12   : > { %v11657_v56 = vmax.f32 %v11602_v59, 0.0 }
 0xf14   : > { %v11659_v20 = vpack.c.bf16 %v11657_v56, %v11657_v56 }
 0xf16   : > { %11798 = vmatmul.bf16.vlgmr.msra.gmra.mxu0 %v11659_v20 }
 0xf17   : > { %v11603_v4 = vpop.f32.mrf.mxu3 }
 0xf1f   : > { %v11653_v49 = vpop.f32.mrf.mxu3 }
 0xf20   : > { %v11654_v37 = vadd.f32 %v11653_v49, %v11641_v51 }
 0xf22   : > { %v11658_v31 = vmax.f32 %v11654_v37, 0.0 }
 0xf24   : > { %v11660_v27 = vpack.c.bf16 %v11658_v31, %v11658_v31 }
 0xf26   : > { %11811 = vmatmul.bf16.vlgmr.msra.gmra.mxu1 %v11660_v27 }
 0xf27   : > { %v11655_v36 = vpop.f32.mrf.mxu3 }
 0xf93   : > { %v11799_v39 = vpop.f32.mrf.mxu0 }
 0xf94   : > { %v11800_v48 = vadd.f32 %v11799_v39, %v11693_v29 }
 0xf9b   : > { %v11801_v32 = vpop.f32.mrf.mxu0 }
 0xfa3   : > { %v11812_v2 = vpop.f32.mrf.mxu1 }
 0xfa4   : > { %v11813_v33 = vadd.f32 %v11812_v2, %v11800_v48 }
 0xfa6   : > { %11817 = vst.msk [vmem:[%s482_s2] sm:$0x1] %vm11816_vm3, %v11813_v33 }
 0xfa7   : > { %15516 = shalt.err (!%p15513_p5)
}
 0xfa8   : > { %15422 = dma.vmem_to_hbm [thread:$0]  (%p15684_p4), %s11830_s0, 16, %s11832_s21, %s11819_s22  }
 0xfab   : > { %v11814_v26 = vpop.f32.mrf.mxu1 }
 0xfac PF: > { %p15428_p6 = scmp.ge.s32.totalorder %s15567_s18, 2  ;;  %s11843_s17 = sand.u32 1, %s15547_s29  }
 0xfad   : > { %s11844_s2 = scalar_lea.sflag [#allocation4], %s11843_s17 }
 0xfae   : > { %p15425_p7 = pnand %p15428_p6, %p15691_p8 }
 0xfb0   : > { %p15426_p9 = pneg %p15425_p7 }
 0xfb2   : > { %15542 = dma.done.wait (%p15426_p9), %s11844_s2, 16  }
 0xfb3   : > { %15544 = vsyncadd (%p15426_p9), %s11844_s2, 4294967280  ;;  %s27_s18 = sadd.s32 1, %s15567_s18   ;;  %s20995_s16 = sld [smem:[#allocation6_spill]] }
 0xfb4   : > { %p24_p10 = scmp.ge.s32.totalorder %s27_s18, 4   ;;  %s20996_s17 = sld [smem:[#allocation7_spill]] }
 0xfb5   : > { %s20997_s29 = smov %s15551_s30  ;;  %s20998_s30 = smov %s15555_s15 }
 0xfb6   : > { %s20999_s15 = smov %s15697_s26  ;;  %26 = sbr.rel (!%p24_p10) target bundleno = 8 (0x8), region = 119 }
 0xfbb   :  { %11849 = vsyncpa [#allocation4], 1 }
 0xfbc   :  { %11851 = vsyncpa [#allocation4 + $0x1], 1 }

</bundles_post_ra>
